<compile_context>
chip_gen: v7x
topology: tpu7x:2x2x1
jax: 0.10.0
libtpu: 0.0.40
codegen_flags: <defaults>
</compile_context>

<pallas_src>
import functools

import numpy as np
import jax
import jax.numpy as jnp
from jax.experimental import pallas as pl
from jax.experimental.pallas import tpu as pltpu  # noqa: F401  (TPU backend)

# ------------------------- configuration (small) -------------------------
B_OUTER = 1          # batch
D_SIZE = 2           # depth / number of slices
HW = 12              # input spatial size == image_size
IMG_SIZE = 16        # image_encoder.img_size (input padded up to this)
PATCH = 8            # patch size -> 2x2 image embedding
EMBED = 32           # ViT embedding dim
VIT_HEADS = 2
PDIM = 16            # prompt / mask-decoder transformer dim
EMB_HW = IMG_SIZE // PATCH      # 2
DEC_HEADS = 2
DEC_LAYERS = 2
NUM_MASK_TOKENS = 4
LOW_HW = 4 * EMB_HW             # 8, low-res mask size

PIXEL_MEAN = jnp.array([123.675, 116.28, 103.53], dtype=jnp.float32)
PIXEL_STD = jnp.array([58.395, 57.12, 57.375], dtype=jnp.float32)


# --------------------------- in-kernel helpers --------------------------------
def _layer_norm(x, g, b, eps):
    mean = jnp.mean(x, axis=-1, keepdims=True)
    var = jnp.mean((x - mean) ** 2, axis=-1, keepdims=True)
    return (x - mean) * jax.lax.rsqrt(var + eps) * g + b


def _group_layer_norm(x, gmat, g_t, b_t, eps):
    # Grouped LayerNorm over channel groups packed along the lane axis.
    # gmat = kron(eye(G), ones((Cg, Cg)) / Cg);  g_t / b_t are gamma/beta tiled per group.
    mean = jnp.dot(x, gmat, preferred_element_type=jnp.float32)
    var = jnp.dot((x - mean) ** 2, gmat, preferred_element_type=jnp.float32)
    return (x - mean) * jax.lax.rsqrt(var + eps) * g_t + b_t


def _gelu(x):
    # TODO(synk): PyTorch nn.GELU() is erf-exact; tanh approximation used here for safe
    # Mosaic lowering (EUP tanh).
    return jax.nn.gelu(x, approximate=True)


def _mha(q_in, k_in, v_in, get_w, get_b, get_wo, bo, bias, heads):
    """Multi-head attention on 2D (rows, feat) operands.

    Weights are pre-split per head on the host (get_w(s, h) -> (C, dh)); head outputs are
    accumulated through per-head row blocks of w_out, so there are no lane-axis slices or
    concatenates inside the kernel.  Batching is an additive block mask `bias`
    (0 inside a batch, -1e9 across batches).
    """
    acc = None
    for h in range(heads):
        q = jnp.dot(q_in, get_w(0, h), preferred_element_type=jnp.float32) + get_b(0, h)
        k = jnp.dot(k_in, get_w(1, h), preferred_element_type=jnp.float32) + get_b(1, h)
        v = jnp.dot(v_in, get_w(2, h), preferred_element_type=jnp.float32) + get_b(2, h)
        scale = 1.0 / float(q.shape[-1]) ** 0.5
        s = jax.lax.dot_general(q, k, (((1,), (1,)), ((), ())),
                                preferred_element_type=jnp.float32) * scale + bias
        s = s - jnp.max(s, axis=-1, keepdims=True)
        p = jnp.exp(s)
        p = p / jnp.sum(p, axis=-1, keepdims=True)
        o_h = jnp.dot(p, v, preferred_element_type=jnp.float32)
        c = jnp.dot(o_h, get_wo(h), preferred_element_type=jnp.float32)
        acc = c if acc is None else acc + c
    return acc + bo


# ------------------------------ Pallas kernels ---------------------------------
def _sam_fused_kernel(
    # image encoder (patch embed + 1 global ViT block + neck)
    patches_ref, pw_ref, posb_ref,
    vw_ref, vb_ref, vwo_ref, vbo_ref,
    encln_ref, vm1w_ref, vm1b_ref, vm2w_ref, vm2b_ref,
    neckw_ref, neckln_ref, vbias_ref,
    # prompt encoder (uncertainty branch + no-mask dense embedding)
    unc_ref, umats_ref, uvecs_ref,
    # two-way transformer decoder
    tok0_ref, kpe_ref,
    dw_ref, db_ref, dwo_ref, dbo_ref,
    dlng_ref, dlnb_ref,
    dmw1_ref, dmb1_ref, dmw2_ref, dmb2_ref,
    bself_ref, bt2i_ref, bi2t_ref,
    # mask head (upscaling + hypernetworks + IoU MLP)
    up1w_ref, up1b_ref, upgm_ref, upg_ref, upb_ref, up2w_ref, up2b_ref,
    p0_ref, p1_ref, e0_ref, e1_ref,
    hw1_ref, hb1_ref, hw2_ref, hb2_ref, hw3_ref, hb3_ref,
    hmask_ref, rsel_ref,
    iw1_ref, ib1_ref, iw2_ref, ib2_ref, iw3_ref, ib3_ref,
    # outputs
    masks_ref, iou_ref,
    *, vit_heads, dec_heads, dec_layers, n_batch, num_tokens,
):
    f32 = jnp.float32

    # ---------------- ViT image encoder (pixel norm folded into patch-embed) ------
    # TODO(synk): MA-SAM's 3D (d_size) adapters and the neck's 3x3 conv / second
    # LayerNorm2d are not reproduced (single global-attention block approximation).
    tok = jnp.dot(patches_ref[...], pw_ref[...], preferred_element_type=f32) + posb_ref[...]
    vbias = vbias_ref[...]

    h = _layer_norm(tok, encln_ref[0:1, :], encln_ref[1:2, :], 1e-5)
    tok = tok + _mha(h, h, h,
                     lambda s, hh: vw_ref[s * vit_heads + hh],
                     lambda s, hh: vb_ref[s * vit_heads + hh],
                     lambda hh: vwo_ref[hh],
                     vbo_ref[...], vbias, vit_heads)
    h = _layer_norm(tok, encln_ref[2:3, :], encln_ref[3:4, :], 1e-5)
    h = _gelu(jnp.dot(h, vm1w_ref[...], preferred_element_type=f32) + vm1b_ref[...])
    h = jnp.dot(h, vm2w_ref[...], preferred_element_type=f32) + vm2b_ref[...]
    tok = tok + h
    emb = jnp.dot(tok, neckw_ref[...], preferred_element_type=f32)
    emb = _layer_norm(emb, neckln_ref[0:1, :], neckln_ref[1:2, :], 1e-6)

    # ---------------- prompt encoder: uncertainty branch ---------------------------
    # TODO(synk): PromptEncoder_Un's exact uncertainty branch is not public; SAM-style
    # mask-downscaling stack (conv s2 -> LN2d -> GELU -> conv s2 -> LN2d -> GELU -> 1x1).
    u = jnp.dot(unc_ref[...], umats_ref[0], preferred_element_type=f32) + uvecs_ref[0:1, :]
    u = _group_layer_norm(u, umats_ref[1], uvecs_ref[1:2, :], uvecs_ref[2:3, :], 1e-6)
    u = _gelu(u)
    u = jnp.dot(u, umats_ref[2], preferred_element_type=f32) + uvecs_ref[3:4, :]
    u = _layer_norm(u, uvecs_ref[4:5, :], uvecs_ref[5:6, :], 1e-6)
    u = _gelu(u)
    u = jnp.dot(u, umats_ref[3], preferred_element_type=f32) + uvecs_ref[6:7, :]

    # TODO(synk): MaskDecoder_Un's exact fusion of uncertainty embeddings is not public;
    # they are added to the dense (no-mask) prompt embedding.
    keys = emb + u + uvecs_ref[7:8, :]          # decoder "src" (image side)

    # ---------------- two-way transformer decoder ----------------------------------
    qpe = tok0_ref[...]                         # token-major (t, n) rows
    kpe = kpe_ref[...]                          # batch-major (n, pos) rows
    queries = qpe
    b_self = bself_ref[...]
    b_t2i = bt2i_ref[...]
    b_i2t = bi2t_ref[...]

    def dln(i, x):
        return _layer_norm(x, dlng_ref[i:i + 1, :], dlnb_ref[i:i + 1, :], 1e-5)

    def d_attn(a, q_in, k_in, v_in, bias):
        # per-module / per-head weights read from refs only when used
        return _mha(q_in, k_in, v_in,
                    lambda s, hh: dw_ref[(a * 3 + s) * dec_heads + hh],
                    lambda s, hh: db_ref[(a * 3 + s) * dec_heads + hh],
                    lambda hh: dwo_ref[a * dec_heads + hh],
                    dbo_ref[a], bias, dec_heads)

    for l in range(dec_layers):
        a0 = 3 * l
        if l == 0:
            queries = d_attn(a0, queries, queries, queries, b_self)
        else:
            q = queries + qpe
            queries = queries + d_attn(a0, q, q, queries, b_self)
        queries = dln(4 * l + 0, queries)

        q = queries + qpe
        k = keys + kpe
        queries = queries + d_attn(a0 + 1, q, k, keys, b_t2i)
        queries = dln(4 * l + 1, queries)

        h = jnp.maximum(jnp.dot(queries, dmw1_ref[l], preferred_element_type=f32)
                        + dmb1_ref[l], 0.0)
        h = jnp.dot(h, dmw2_ref[l], preferred_element_type=f32) + dmb2_ref[l]
        queries = dln(4 * l + 2, queries + h)

        q = queries + qpe
        k = keys + kpe
        keys = keys + d_attn(a0 + 2, k, q, queries, b_i2t)
        keys = dln(4 * l + 3, keys)

    q = queries + qpe
    k = keys + kpe
    queries = queries + d_attn(3 * dec_layers, q, k, keys, b_t2i)
    queries = dln(4 * dec_layers, queries)

    # ---------------- mask head -----------------------------------------------------
    # Output upscaling: two stride-2 transposed convs kept in a per-source-pixel layout.
    y = jnp.dot(keys, up1w_ref[...], preferred_element_type=f32) + up1b_ref[...]
    y = _group_layer_norm(y, upgm_ref[...], upg_ref[...], upb_ref[...], 1e-6)
    y = _gelu(y)
    y = jnp.dot(y, up2w_ref[...], preferred_element_type=f32) + up2b_ref[...]
    y = _gelu(y)                                              # (N*4, 32)

    # Hypernetwork MLPs for all mask tokens in one block-diagonal matmul chain.
    qm = queries[n_batch:(1 + num_tokens) * n_batch, :]       # (T*N, C) mask-token rows
    hh = jnp.maximum(jnp.dot(qm, hw1_ref[...], preferred_element_type=f32)
                     + hb1_ref[...], 0.0)
    hh = jnp.maximum(jnp.dot(hh, hw2_ref[...], preferred_element_type=f32)
                     + hb2_ref[...], 0.0)
    hh = jnp.dot(hh, hw3_ref[...], preferred_element_type=f32) + hb3_ref[...]   # (T*N, 2T)
    hh = hh * hmask_ref[...]                                   # keep each token's own block
    hrows = jnp.dot(rsel_ref[...], hh, preferred_element_type=f32)              # (N*4, 2T)

    # masks[(n,I,J), (t,pix)] = sum_c hyper[n,t,c] * upscaled[(n,I,J), pix, c]
    # expressed with constant expansion matmuls (no lane-axis slicing / concatenation).
    yt0 = jnp.dot(y, p0_ref[...], preferred_element_type=f32)        # (N*4, T*16)
    yt1 = jnp.dot(y, p1_ref[...], preferred_element_type=f32)
    hx0 = jnp.dot(hrows, e0_ref[...], preferred_element_type=f32)
    hx1 = jnp.dot(hrows, e1_ref[...], preferred_element_type=f32)
    masks_ref[...] = yt0 * hx0 + yt1 * hx1

    # IoU prediction head (IoU-token rows).
    xi = queries[0:n_batch, :]
    h = jnp.maximum(jnp.dot(xi, iw1_ref[...], preferred_element_type=f32) + ib1_ref[...], 0.0)
    h = jnp.maximum(jnp.dot(h, iw2_ref[...], preferred_element_type=f32) + ib2_ref[...], 0.0)
    iou_ref[...] = jnp.dot(h, iw3_ref[...], preferred_element_type=f32) + ib3_ref[...]


def _resize_kernel(lblk_ref, x_ref, rt_ref, o_ref):
    # postprocess_masks: (bilinear-up -> crop -> bilinear) composed into L @ X @ R^T,
    # applied to all images at once (block-diagonal L along rows, shared R).
    y = jnp.dot(x_ref[...], rt_ref[...], preferred_element_type=jnp.float32)
    o_ref[...] = jnp.dot(lblk_ref[...], y, preferred_element_type=jnp.float32)


# ------------------------------- host helpers ----------------------------------
def patchify(x, k):
    # non-overlapping k x k patches, NCHW input, per-patch flatten order (C, kh, kw)
    n, c, h, w = x.shape
    x = x.reshape(n, c, h // k, k, w // k, k)
    x = jnp.transpose(x, (0, 2, 4, 1, 3, 5))
    return x.reshape(n * (h // k) * (w // k), c * k * k)


def _attn_bias(batch_q, batch_k):
    same = np.asarray(batch_q)[:, None] == np.asarray(batch_k)[None, :]
    return jnp.asarray(np.where(same, 0.0, -1e9).astype(np.float32))


def _bilinear_matrix(out_size, in_size):
    # PyTorch F.interpolate(mode='bilinear', align_corners=False) weights.
    i = np.arange(out_size, dtype=np.float64)
    src = np.clip((i + 0.5) * (in_size / out_size) - 0.5, 0.0, in_size - 1)
    i0 = np.floor(src).astype(np.int64)
    i1 = np.minimum(i0 + 1, in_size - 1)
    w1 = src - i0
    w0 = 1.0 - w1
    mmat = np.zeros((out_size, in_size), np.float64)
    mmat[np.arange(out_size), i0] += w0
    mmat[np.arange(out_size), i1] += w1
    return mmat.astype(np.float32)


def _block_diag(mats):
    rows = sum(w.shape[0] for w in mats)
    cols = sum(w.shape[1] for w in mats)
    out = jnp.zeros((rows, cols), jnp.float32)
    r = c = 0
    for w in mats:
        out = out.at[r:r + w.shape[0], c:c + w.shape[1]].set(w)
        r += w.shape[0]
        c += w.shape[1]
    return out


# ----------------------- host constants (built once, outside jit) ---------------
def prepare_constants(params, m, multimask_output, image_size):
    p_enc, p_pr, p_dec = params["enc"], params["prompt"], params["dec"]
    C, H, T = PDIM, DEC_HEADS, NUM_MASK_TOKENS
    dh = C // H
    Hv, dhv = VIT_HEADS, EMBED // VIT_HEADS
    n_tok_img = EMB_HW * EMB_HW
    t_tot = 1 + T

    def rv(x):
        return x.reshape(1, -1)

    # ---- image encoder: fold (x - mean) / std into the patch embedding ----
    scale = jnp.repeat(1.0 / PIXEL_STD, PATCH * PATCH)
    offset = jnp.repeat(-PIXEL_MEAN / PIXEL_STD, PATCH * PATCH)
    pw_f = p_enc["patch_w"] * scale[:, None]
    pb_f = rv(p_enc["patch_b"]) + rv(offset) @ p_enc["patch_w"]
    posb = jnp.tile(p_enc["pos_embed"].reshape(n_tok_img, EMBED), (m, 1)) + pb_f

    qkv_w, qkv_b = p_enc["qkv_w"], rv(p_enc["qkv_b"])
    vw = jnp.stack([qkv_w[:, s * EMBED + h * dhv:s * EMBED + (h + 1) * dhv]
                    for s in range(3) for h in range(Hv)])
    vb = jnp.stack([qkv_b[:, s * EMBED + h * dhv:s * EMBED + (h + 1) * dhv]
                    for s in range(3) for h in range(Hv)])
    vwo = jnp.stack([p_enc["proj_w"][h * dhv:(h + 1) * dhv, :] for h in range(Hv)])
    vbo = rv(p_enc["proj_b"])
    encln = jnp.stack([p_enc["ln1_g"], p_enc["ln1_b"], p_enc["ln2_g"], p_enc["ln2_b"]])
    neckln = jnp.stack([p_enc["neck_ln_g"], p_enc["neck_ln_b"]])
    vbias = _attn_bias(np.arange(m * n_tok_img) // n_tok_img,
                       np.arange(m * n_tok_img) // n_tok_img)

    enc_args = (pw_f, posb, vw, vb, vwo, vbo, encln,
                p_enc["mlp_w1"], rv(p_enc["mlp_b1"]),
                p_enc["mlp_w2"], rv(p_enc["mlp_b2"]),
                p_enc["neck_w"], neckln, vbias)

    # ---- prompt encoder: uncertainty stack in blocked per-output-pixel form ----
    umats = jnp.stack([
        jnp.kron(jnp.eye(4, dtype=jnp.float32), p_pr["unc_w1"]),
        jnp.kron(jnp.eye(4, dtype=jnp.float32), jnp.full((4, 4), 0.25, jnp.float32)),
        p_pr["unc_w2"], p_pr["unc_w3"],
    ])
    uvecs = jnp.stack([
        jnp.tile(p_pr["unc_b1"], 4), jnp.tile(p_pr["unc_ln1_g"], 4),
        jnp.tile(p_pr["unc_ln1_b"], 4),
        p_pr["unc_b2"], p_pr["unc_ln2_g"], p_pr["unc_ln2_b"],
        p_pr["unc_b3"], p_pr["no_mask_embed"].reshape(-1),
    ])

    # ---- decoder: dense PE, token init, per-head split attention weights ----
    gridv = (jnp.arange(EMB_HW, dtype=jnp.float32) + 0.5) / EMB_HW
    yy, xx = jnp.meshgrid(gridv, gridv, indexing="ij")
    coords = jnp.stack([xx, yy], axis=-1).reshape(-1, 2) * 2.0 - 1.0
    proj = coords @ p_pr["pe_gauss"] * (2.0 * jnp.pi)
    pe = jnp.concatenate([jnp.sin(proj), jnp.cos(proj)], axis=-1)      # (4, PDIM)
    kpe = jnp.tile(pe, (m, 1))
    tok0 = jnp.repeat(jnp.concatenate([p_dec["iou_token"], p_dec["mask_tokens"]], axis=0),
                      m, axis=0)                                        # token-major rows

    q_batch = np.arange(t_tot * m) % m
    k_batch = np.arange(m * n_tok_img) // n_tok_img
    b_self = _attn_bias(q_batch, q_batch)
    b_t2i = _attn_bias(q_batch, k_batch)
    b_i2t = _attn_bias(k_batch, q_batch)

    def split_in(w, b):
        ws = [w[:, s * C + h * dh:s * C + (h + 1) * dh] for s in range(3) for h in range(H)]
        bs = [b[:, s * C + h * dh:s * C + (h + 1) * dh] for s in range(3) for h in range(H)]
        return ws, bs

    wl, bl, wol, bol = [], [], [], []
    for l in range(DEC_LAYERS):
        for name in ("sa", "t2i", "i2t"):
            ws, bs = split_in(p_dec[name + "_w"][l], p_dec[name + "_b"][l])
            wl += ws
            bl += bs
            wol += [p_dec[name + "_wo"][l][h * dh:(h + 1) * dh, :] for h in range(H)]
            bol.append(p_dec[name + "_bo"][l])
    ws, bs = split_in(p_dec["fa_w"], p_dec["fa_b"])
    wl += ws
    bl += bs
    wol += [p_dec["fa_wo"][h * dh:(h + 1) * dh, :] for h in range(H)]
    bol.append(p_dec["fa_bo"])
    dw, db = jnp.stack(wl), jnp.stack(bl)           # (42, C, dh), (42, 1, dh)
    dwo, dbo = jnp.stack(wol), jnp.stack(bol)       # (14, dh, C), (7, 1, C)
    dlng = jnp.concatenate([p_dec["ln_g"].reshape(-1, C), rv(p_dec["fln_g"])], axis=0)
    dlnb = jnp.concatenate([p_dec["ln_b"].reshape(-1, C), rv(p_dec["fln_b"])], axis=0)

    # ---- mask head: upscaling / hypernetwork / IoU constants ----
    c_half, c_out = C // 2, C // 8
    up1w = p_dec["up1_w"].transpose(0, 2, 3, 1).reshape(C, 4 * c_half)   # (16, 32) (kh,kw,c)
    up1b = rv(jnp.tile(p_dec["up1_b"], 4))
    upgm = jnp.kron(jnp.eye(4, dtype=jnp.float32),
                    jnp.full((c_half, c_half), 1.0 / c_half, jnp.float32))
    upg = rv(jnp.tile(p_dec["up_ln_g"], 4))
    upb = rv(jnp.tile(p_dec["up_ln_b"], 4))
    up2w = jnp.kron(jnp.eye(4, dtype=jnp.float32),
                    p_dec["up2_w"].reshape(c_half, 4 * c_out))           # (32, 32)
    up2b = rv(jnp.tile(jnp.repeat(p_dec["up2_b"], 4), 4))

    # P0/P1 tile plane-c pixels per mask token; E0/E1 broadcast hyper channel c of token t
    # across that token's 16 pixel columns.  Column order = (t, kh1, kw1, kh2, kw2).
    p0 = np.zeros((4 * c_out * 4, T * 16), np.float32)
    p1 = np.zeros((4 * c_out * 4, T * 16), np.float32)
    for g in range(4):              # (kh1, kw1)
        for j in range(4):          # (kh2, kw2)
            for t in range(T):
                col = t * 16 + g * 4 + j
                p0[g * 8 + j, col] = 1.0
                p1[g * 8 + 4 + j, col] = 1.0
    e0 = np.zeros((2 * T, T * 16), np.float32)
    e1 = np.zeros((2 * T, T * 16), np.float32)
    for t in range(T):
        e0[2 * t, t * 16:(t + 1) * 16] = 1.0
        e1[2 * t + 1, t * 16:(t + 1) * 16] = 1.0

    hw1 = jnp.concatenate([p_dec["hyper_w1"][t] for t in range(T)], axis=1)   # (C, T*C)
    hb1 = jnp.concatenate([p_dec["hyper_b1"][t] for t in range(T)], axis=1)
    hw2 = _block_diag([p_dec["hyper_w2"][t] for t in range(T)])               # (T*C, T*C)
    hb2 = jnp.concatenate([p_dec["hyper_b2"][t] for t in range(T)], axis=1)
    hw3 = _block_diag([p_dec["hyper_w3"][t] for t in range(T)])               # (T*C, 2T)
    hb3 = jnp.concatenate([p_dec["hyper_b3"][t] for t in range(T)], axis=1)

    hmask = np.zeros((T * m, 2 * T), np.float32)
    for t in range(T):
        hmask[t * m:(t + 1) * m, 2 * t:2 * t + 2] = 1.0
    rsel = np.zeros((m * n_tok_img, T * m), np.float32)
    for n in range(m):
        for p in range(n_tok_img):
            for t in range(T):
                rsel[n * n_tok_img + p, t * m + n] = 1.0

    dec_args = (umats, uvecs, tok0, kpe, dw, db, dwo, dbo, dlng, dlnb,
                p_dec["mlp_w1"], p_dec["mlp_b1"], p_dec["mlp_w2"], p_dec["mlp_b2"],
                b_self, b_t2i, b_i2t,
                up1w, up1b, upgm, upg, upb, up2w, up2b,
                jnp.asarray(p0), jnp.asarray(p1), jnp.asarray(e0), jnp.asarray(e1),
                hw1, hb1, hw2, hb2, hw3, hb3,
                jnp.asarray(hmask), jnp.asarray(rsel),
                p_dec["iou_w1"], p_dec["iou_b1"], p_dec["iou_w2"], p_dec["iou_b2"],
                p_dec["iou_w3"], p_dec["iou_b3"])

    # ---- postprocess_masks: composed bilinear matrices, block-diagonal over images ----
    n_ch = (T - 1) if multimask_output else 1
    n_imgs = m * n_ch
    l1 = _bilinear_matrix(IMG_SIZE, LOW_HW)
    r1 = _bilinear_matrix(IMG_SIZE, LOW_HW)
    l2 = _bilinear_matrix(image_size, image_size)
    r2 = _bilinear_matrix(image_size, image_size)
    l_comb = l2 @ l1[:image_size, :]                   # (image_size, LOW_HW)
    rt_comb = r1[:image_size, :].T @ r2.T              # (LOW_HW, image_size)
    lblk = np.kron(np.eye(n_imgs, dtype=np.float32), l_comb)

    return {"enc_args": enc_args, "dec_args": dec_args,
            "lblk": jnp.asarray(lblk), "rt": jnp.asarray(rt_comb)}


# --------------------------------- forward --------------------------------------
def sam_un_forward(prep, batched_input, multimask_output, image_size, uncertainty):
    # batched_input: (B, D, 3, H, W); d_size (3D adapters) unused here, see TODO above.
    hw = batched_input.shape[-2]
    x = batched_input.reshape(-1, 3, hw, hw)
    m = x.shape[0]
    T = NUM_MASK_TOKENS

    # -- preprocess: pad to img_size; padding value = per-channel mean so that the
    #    normalization folded into the patch embedding maps padding to exactly 0.
    padh = IMG_SIZE - hw
    padw = IMG_SIZE - hw
    xp = jnp.pad(x, ((0, 0), (0, 0), (0, padh), (0, padw)))
    valid = jnp.pad(jnp.ones((1, 1, hw, hw), jnp.float32),
                    ((0, 0), (0, 0), (0, padh), (0, padw)))
    xp = xp * valid + (1.0 - valid) * PIXEL_MEAN.reshape(1, 3, 1, 1)
    patches = patchify(xp, PATCH)                               # (m*4, 3*PATCH*PATCH)

    # -- uncertainty map -> nested 2x2-of-2x2 per-output-pixel patches
    u = uncertainty.reshape(m, 1, 2, 2, 2, 2, 2, 2)             # (m, C, I, a, rin, J, b, cin)
    u = jnp.transpose(u, (0, 2, 5, 3, 6, 4, 7, 1))              # (m, I, J, a, b, rin, cin, C)
    unc_patches = u.reshape(m * 4, 16)

    # -- one fused kernel: image encoder + prompt encoder + two-way decoder + mask head.
    #    (Output slabs are tiny; lane-dense packing is unnecessary at this size.)
    masks_rows, iou_pred = pl.pallas_call(
        functools.partial(_sam_fused_kernel, vit_heads=VIT_HEADS, dec_heads=DEC_HEADS,
                          dec_layers=DEC_LAYERS, n_batch=m, num_tokens=T),
        out_shape=(jax.ShapeDtypeStruct((m * 4, T * 16), jnp.float32),
                   jax.ShapeDtypeStruct((m, T), jnp.float32)),
    )(patches, *prep["enc_args"], unc_patches, *prep["dec_args"])

    # unscramble per-source-pixel layout -> (m, T, 8, 8) low-res masks (tiny XLA permute)
    masks = masks_rows.reshape(m, EMB_HW, EMB_HW, T, 2, 2, 2, 2)
    masks = masks.transpose(0, 3, 1, 4, 6, 2, 5, 7).reshape(m, T, LOW_HW, LOW_HW)

    if multimask_output:
        low_res = masks[:, 1:, :, :]
        iou_out = iou_pred[:, 1:]
    else:
        low_res = masks[:, 0:1, :, :]
        iou_out = iou_pred[:, 0:1]

    # -- postprocess_masks as one kernel: block-diag left resize, shared right resize
    n_ch = low_res.shape[1]
    x_rs = low_res.reshape(m * n_ch * LOW_HW, LOW_HW)
    slab = pl.pallas_call(
        _resize_kernel,
        out_shape=jax.ShapeDtypeStruct((m * n_ch * image_size, image_size), jnp.float32),
    )(prep["lblk"], x_rs, prep["rt"])
    masks_out = slab.reshape(m, n_ch, image_size, image_size)

    return {
        "masks": masks_out,
        "iou_predictions": iou_out,
        "low_res_logits": low_res,
    }


# ------------------------------ parameter init -----------------------------------
def init_params(key):
    cnt = [0]

    def nrm(shape, scale=0.05):
        cnt[0] += 1
        return scale * jax.random.normal(jax.random.fold_in(key, cnt[0]), shape,
                                         dtype=jnp.float32)

    def zeros(shape):
        return jnp.zeros(shape, jnp.float32)

    def ones(shape):
        return jnp.ones(shape, jnp.float32)

    enc = dict(
        patch_w=nrm((3 * PATCH * PATCH, EMBED)), patch_b=zeros((EMBED,)),
        pos_embed=nrm((1, EMB_HW * EMB_HW, EMBED)),
        ln1_g=ones((EMBED,)), ln1_b=zeros((EMBED,)),
        qkv_w=nrm((EMBED, 3 * EMBED)), qkv_b=zeros((3 * EMBED,)),
        proj_w=nrm((EMBED, EMBED)), proj_b=zeros((EMBED,)),
        ln2_g=ones((EMBED,)), ln2_b=zeros((EMBED,)),
        mlp_w1=nrm((EMBED, 2 * EMBED)), mlp_b1=zeros((2 * EMBED,)),
        mlp_w2=nrm((2 * EMBED, EMBED)), mlp_b2=zeros((EMBED,)),
        neck_w=nrm((EMBED, PDIM)),
        neck_ln_g=ones((PDIM,)), neck_ln_b=zeros((PDIM,)),
    )
    prompt = dict(
        pe_gauss=nrm((2, PDIM // 2), scale=1.0),
        no_mask_embed=nrm((1, PDIM)),
        unc_w1=nrm((4, 4)), unc_b1=zeros((4,)),
        unc_ln1_g=ones((4,)), unc_ln1_b=zeros((4,)),
        unc_w2=nrm((16, PDIM)), unc_b2=zeros((PDIM,)),
        unc_ln2_g=ones((PDIM,)), unc_ln2_b=zeros((PDIM,)),
        unc_w3=nrm((PDIM, PDIM)), unc_b3=zeros((PDIM,)),
    )
    L, C, T = DEC_LAYERS, PDIM, NUM_MASK_TOKENS
    dec = dict(
        iou_token=nrm((1, C)), mask_tokens=nrm((T, C)),
        sa_w=nrm((L, C, 3 * C)), sa_b=zeros((L, 1, 3 * C)),
        sa_wo=nrm((L, C, C)), sa_bo=zeros((L, 1, C)),
        t2i_w=nrm((L, C, 3 * C)), t2i_b=zeros((L, 1, 3 * C)),
        t2i_wo=nrm((L, C, C)), t2i_bo=zeros((L, 1, C)),
        i2t_w=nrm((L, C, 3 * C)), i2t_b=zeros((L, 1, 3 * C)),
        i2t_wo=nrm((L, C, C)), i2t_bo=zeros((L, 1, C)),
        ln_g=ones((L, 4, C)), ln_b=zeros((L, 4, C)),
        mlp_w1=nrm((L, C, 2 * C)), mlp_b1=zeros((L, 1, 2 * C)),
        mlp_w2=nrm((L, 2 * C, C)), mlp_b2=zeros((L, 1, C)),
        fa_w=nrm((C, 3 * C)), fa_b=zeros((1, 3 * C)),
        fa_wo=nrm((C, C)), fa_bo=zeros((1, C)),
        fln_g=ones((C,)), fln_b=zeros((C,)),
        up1_w=nrm((C, C // 2, 2, 2)), up1_b=zeros((C // 2,)),
        up_ln_g=ones((C // 2,)), up_ln_b=zeros((C // 2,)),
        up2_w=nrm((C // 2, C // 8, 2, 2)), up2_b=zeros((C // 8,)),
        hyper_w1=nrm((T, C, C)), hyper_b1=zeros((T, 1, C)),
        hyper_w2=nrm((T, C, C)), hyper_b2=zeros((T, 1, C)),
        hyper_w3=nrm((T, C, C // 8)), hyper_b3=zeros((T, 1, C // 8)),
        iou_w1=nrm((C, C)), iou_b1=zeros((1, C)),
        iou_w2=nrm((C, C)), iou_b2=zeros((1, C)),
        iou_w3=nrm((C, T)), iou_b3=zeros((1, T)),
    )
    return dict(enc=enc, prompt=prompt, dec=dec)


# ----------------------------------- main -----------------------------------------
if __name__ == "__main__":
    key = jax.random.PRNGKey(0)
    k_img, k_unc, k_par = jax.random.split(key, 3)

    batched_input = jax.random.uniform(
        k_img, (B_OUTER, D_SIZE, 3, HW, HW), dtype=jnp.float32) * 255.0
    # uncertainty map at 4x the image-embedding resolution (one per slice)
    uncertainty = jax.random.uniform(
        k_unc, (B_OUTER * D_SIZE, 1, LOW_HW, LOW_HW), dtype=jnp.float32)
    params = init_params(k_par)

    m = B_OUTER * D_SIZE
    multimask = True
    # all param-/shape-derived constants built once, outside the jitted forward
    prep = prepare_constants(params, m, multimask, HW)

    fwd = jax.jit(sam_un_forward, static_argnums=(2, 3))
    out = fwd(prep, batched_input, multimask, HW, uncertainty)
    out = jax.block_until_ready(out)

    assert out["masks"].shape == (m, NUM_MASK_TOKENS - 1, HW, HW)
    assert out["low_res_logits"].shape == (m, NUM_MASK_TOKENS - 1, LOW_HW, LOW_HW)
    assert out["iou_predictions"].shape == (m, NUM_MASK_TOKENS - 1)
    print("KERNEL_OK")
</pallas_src>

<mosaic_0001>
module attributes {stable_mosaic.version = 11 : i64} {
  func.func @_sam_fused_kernel(%arg0: memref<8x192xf32, #tpu.memory_space<vmem>>, %arg1: memref<192x32xf32, #tpu.memory_space<vmem>>, %arg2: memref<8x32xf32, #tpu.memory_space<vmem>>, %arg3: memref<6x32x16xf32, #tpu.memory_space<vmem>>, %arg4: memref<6x1x16xf32, #tpu.memory_space<vmem>>, %arg5: memref<2x16x32xf32, #tpu.memory_space<vmem>>, %arg6: memref<1x32xf32, #tpu.memory_space<vmem>>, %arg7: memref<4x32xf32, #tpu.memory_space<vmem>>, %arg8: memref<32x64xf32, #tpu.memory_space<vmem>>, %arg9: memref<1x64xf32, #tpu.memory_space<vmem>>, %arg10: memref<64x32xf32, #tpu.memory_space<vmem>>, %arg11: memref<1x32xf32, #tpu.memory_space<vmem>>, %arg12: memref<32x16xf32, #tpu.memory_space<vmem>>, %arg13: memref<2x16xf32, #tpu.memory_space<vmem>>, %arg14: memref<8x8xf32, #tpu.memory_space<vmem>>, %arg15: memref<8x16xf32, #tpu.memory_space<vmem>>, %arg16: memref<4x16x16xf32, #tpu.memory_space<vmem>>, %arg17: memref<8x16xf32, #tpu.memory_space<vmem>>, %arg18: memref<10x16xf32, #tpu.memory_space<vmem>>, %arg19: memref<8x16xf32, #tpu.memory_space<vmem>>, %arg20: memref<42x16x8xf32, #tpu.memory_space<vmem>>, %arg21: memref<42x1x8xf32, #tpu.memory_space<vmem>>, %arg22: memref<14x8x16xf32, #tpu.memory_space<vmem>>, %arg23: memref<7x1x16xf32, #tpu.memory_space<vmem>>, %arg24: memref<9x16xf32, #tpu.memory_space<vmem>>, %arg25: memref<9x16xf32, #tpu.memory_space<vmem>>, %arg26: memref<2x16x32xf32, #tpu.memory_space<vmem>>, %arg27: memref<2x1x32xf32, #tpu.memory_space<vmem>>, %arg28: memref<2x32x16xf32, #tpu.memory_space<vmem>>, %arg29: memref<2x1x16xf32, #tpu.memory_space<vmem>>, %arg30: memref<10x10xf32, #tpu.memory_space<vmem>>, %arg31: memref<10x8xf32, #tpu.memory_space<vmem>>, %arg32: memref<8x10xf32, #tpu.memory_space<vmem>>, %arg33: memref<16x32xf32, #tpu.memory_space<vmem>>, %arg34: memref<1x32xf32, #tpu.memory_space<vmem>>, %arg35: memref<32x32xf32, #tpu.memory_space<vmem>>, %arg36: memref<1x32xf32, #tpu.memory_space<vmem>>, %arg37: memref<1x32xf32, #tpu.memory_space<vmem>>, %arg38: memref<32x32xf32, #tpu.memory_space<vmem>>, %arg39: memref<1x32xf32, #tpu.memory_space<vmem>>, %arg40: memref<32x64xf32, #tpu.memory_space<vmem>>, %arg41: memref<32x64xf32, #tpu.memory_space<vmem>>, %arg42: memref<8x64xf32, #tpu.memory_space<vmem>>, %arg43: memref<8x64xf32, #tpu.memory_space<vmem>>, %arg44: memref<16x64xf32, #tpu.memory_space<vmem>>, %arg45: memref<1x64xf32, #tpu.memory_space<vmem>>, %arg46: memref<64x64xf32, #tpu.memory_space<vmem>>, %arg47: memref<1x64xf32, #tpu.memory_space<vmem>>, %arg48: memref<64x8xf32, #tpu.memory_space<vmem>>, %arg49: memref<1x8xf32, #tpu.memory_space<vmem>>, %arg50: memref<8x8xf32, #tpu.memory_space<vmem>>, %arg51: memref<8x8xf32, #tpu.memory_space<vmem>>, %arg52: memref<16x16xf32, #tpu.memory_space<vmem>>, %arg53: memref<1x16xf32, #tpu.memory_space<vmem>>, %arg54: memref<16x16xf32, #tpu.memory_space<vmem>>, %arg55: memref<1x16xf32, #tpu.memory_space<vmem>>, %arg56: memref<16x4xf32, #tpu.memory_space<vmem>>, %arg57: memref<1x4xf32, #tpu.memory_space<vmem>>, %arg58: memref<8x64xf32, #tpu.memory_space<vmem>>, %arg59: memref<2x4xf32, #tpu.memory_space<vmem>>) attributes {dimension_semantics = [], scalar_prefetch = 0 : i64, scratch_operands = 0 : i64, tpu.core_type = #tpu.core_type<tc>} {
    %c0 = arith.constant 0 : index
    %c0_0 = arith.constant 0 : index
    %0 = vector.load %arg0[%c0, %c0_0] : memref<8x192xf32, #tpu.memory_space<vmem>>, vector<8x192xf32>
    %c0_1 = arith.constant 0 : index
    %c0_2 = arith.constant 0 : index
    %1 = vector.load %arg1[%c0_1, %c0_2] : memref<192x32xf32, #tpu.memory_space<vmem>>, vector<192x32xf32>
    %cst = arith.constant dense<0.000000e+00> : vector<8x32xf32>
    %2 = tpu.matmul %0, %1, %cst {dimension_numbers = #tpu.dot_dimension_numbers<[1], [0], [0], [1], [0, 0, 1, 1], [], []>} : vector<8x192xf32>, vector<192x32xf32>, vector<8x32xf32> -> vector<8x32xf32>
    %c0_3 = arith.constant 0 : index
    %c0_4 = arith.constant 0 : index
    %3 = vector.load %arg2[%c0_3, %c0_4] : memref<8x32xf32, #tpu.memory_space<vmem>>, vector<8x32xf32>
    %4 = arith.addf %2, %3 : vector<8x32xf32>
    %c0_5 = arith.constant 0 : index
    %c0_6 = arith.constant 0 : index
    %5 = vector.load %arg14[%c0_5, %c0_6] : memref<8x8xf32, #tpu.memory_space<vmem>>, vector<8x8xf32>
    %c0_7 = arith.constant 0 : index
    %c0_8 = arith.constant 0 : index
    %6 = vector.load %arg7[%c0_7, %c0_8] : memref<4x32xf32, #tpu.memory_space<vmem>>, vector<1x32xf32>
    %c1 = arith.constant 1 : index
    %c0_9 = arith.constant 0 : index
    %7 = vector.load %arg7[%c1, %c0_9] : memref<4x32xf32, #tpu.memory_space<vmem>>, vector<1x32xf32>
    %cst_10 = arith.constant dense<0.000000e+00> : vector<8xf32>
    %8 = vector.multi_reduction <add>, %4, %cst_10 [1] : vector<8x32xf32> to vector<8xf32>
    %9 = vector.shape_cast %8 : vector<8xf32> to vector<8x1xf32>
    %cst_11 = arith.constant 3.200000e+01 : f32
    %10 = vector.broadcast %cst_11 : f32 to vector<8x1xf32>
    %11 = arith.divf %9, %10 : vector<8x1xf32>
    %12 = vector.broadcast %11 : vector<8x1xf32> to vector<8x32xf32>
    %13 = arith.subf %4, %12 : vector<8x32xf32>
    %14 = arith.mulf %13, %13 : vector<8x32xf32>
    %cst_12 = arith.constant dense<0.000000e+00> : vector<8xf32>
    %15 = vector.multi_reduction <add>, %14, %cst_12 [1] : vector<8x32xf32> to vector<8xf32>
    %16 = vector.shape_cast %15 : vector<8xf32> to vector<8x1xf32>
    %cst_13 = arith.constant 3.200000e+01 : f32
    %17 = vector.broadcast %cst_13 : f32 to vector<8x1xf32>
    %18 = arith.divf %16, %17 : vector<8x1xf32>
    %19 = vector.broadcast %11 : vector<8x1xf32> to vector<8x32xf32>
    %20 = arith.subf %4, %19 : vector<8x32xf32>
    %cst_14 = arith.constant 9.99999974E-6 : f32
    %21 = vector.broadcast %cst_14 : f32 to vector<8x1xf32>
    %22 = arith.addf %18, %21 : vector<8x1xf32>
    %23 = math.rsqrt %22 : vector<8x1xf32>
    %24 = vector.broadcast %23 : vector<8x1xf32> to vector<8x32xf32>
    %25 = arith.mulf %20, %24 : vector<8x32xf32>
    %26 = vector.broadcast %6 : vector<1x32xf32> to vector<8x32xf32>
    %27 = arith.mulf %25, %26 : vector<8x32xf32>
    %28 = vector.broadcast %7 : vector<1x32xf32> to vector<8x32xf32>
    %29 = arith.addf %27, %28 : vector<8x32xf32>
    %c0_15 = arith.constant 0 : index
    %c0_16 = arith.constant 0 : index
    %30 = vector.load %arg6[%c0_15, %c0_16] : memref<1x32xf32, #tpu.memory_space<vmem>>, vector<1x32xf32>
    %c0_17 = arith.constant 0 : index
    %c0_18 = arith.constant 0 : index
    %c0_19 = arith.constant 0 : index
    %31 = vector.load %arg3[%c0_17, %c0_18, %c0_19] : memref<6x32x16xf32, #tpu.memory_space<vmem>>, vector<1x32x16xf32>
    %32 = vector.shape_cast %31 : vector<1x32x16xf32> to vector<32x16xf32>
    %cst_20 = arith.constant dense<0.000000e+00> : vector<8x16xf32>
    %33 = tpu.matmul %29, %32, %cst_20 {dimension_numbers = #tpu.dot_dimension_numbers<[1], [0], [0], [1], [0, 0, 1, 1], [], []>} : vector<8x32xf32>, vector<32x16xf32>, vector<8x16xf32> -> vector<8x16xf32>
    %c0_21 = arith.constant 0 : index
    %c0_22 = arith.constant 0 : index
    %c0_23 = arith.constant 0 : index
    %34 = vector.load %arg4[%c0_21, %c0_22, %c0_23] : memref<6x1x16xf32, #tpu.memory_space<vmem>>, vector<1x1x16xf32>
    %35 = vector.shape_cast %34 : vector<1x1x16xf32> to vector<1x16xf32>
    %36 = vector.broadcast %35 : vector<1x16xf32> to vector<8x16xf32>
    %37 = arith.addf %33, %36 : vector<8x16xf32>
    %c2 = arith.constant 2 : index
    %c0_24 = arith.constant 0 : index
    %c0_25 = arith.constant 0 : index
    %38 = vector.load %arg3[%c2, %c0_24, %c0_25] : memref<6x32x16xf32, #tpu.memory_space<vmem>>, vector<1x32x16xf32>
    %39 = vector.shape_cast %38 : vector<1x32x16xf32> to vector<32x16xf32>
    %cst_26 = arith.constant dense<0.000000e+00> : vector<8x16xf32>
    %40 = tpu.matmul %29, %39, %cst_26 {dimension_numbers = #tpu.dot_dimension_numbers<[1], [0], [0], [1], [0, 0, 1, 1], [], []>} : vector<8x32xf32>, vector<32x16xf32>, vector<8x16xf32> -> vector<8x16xf32>
    %c2_27 = arith.constant 2 : index
    %c0_28 = arith.constant 0 : index
    %c0_29 = arith.constant 0 : index
    %41 = vector.load %arg4[%c2_27, %c0_28, %c0_29] : memref<6x1x16xf32, #tpu.memory_space<vmem>>, vector<1x1x16xf32>
    %42 = vector.shape_cast %41 : vector<1x1x16xf32> to vector<1x16xf32>
    %43 = vector.broadcast %42 : vector<1x16xf32> to vector<8x16xf32>
    %44 = arith.addf %40, %43 : vector<8x16xf32>
    %c4 = arith.constant 4 : index
    %c0_30 = arith.constant 0 : index
    %c0_31 = arith.constant 0 : index
    %45 = vector.load %arg3[%c4, %c0_30, %c0_31] : memref<6x32x16xf32, #tpu.memory_space<vmem>>, vector<1x32x16xf32>
    %46 = vector.shape_cast %45 : vector<1x32x16xf32> to vector<32x16xf32>
    %cst_32 = arith.constant dense<0.000000e+00> : vector<8x16xf32>
    %47 = tpu.matmul %29, %46, %cst_32 {dimension_numbers = #tpu.dot_dimension_numbers<[1], [0], [0], [1], [0, 0, 1, 1], [], []>} : vector<8x32xf32>, vector<32x16xf32>, vector<8x16xf32> -> vector<8x16xf32>
    %c4_33 = arith.constant 4 : index
    %c0_34 = arith.constant 0 : index
    %c0_35 = arith.constant 0 : index
    %48 = vector.load %arg4[%c4_33, %c0_34, %c0_35] : memref<6x1x16xf32, #tpu.memory_space<vmem>>, vector<1x1x16xf32>
    %49 = vector.shape_cast %48 : vector<1x1x16xf32> to vector<1x16xf32>
    %50 = vector.broadcast %49 : vector<1x16xf32> to vector<8x16xf32>
    %51 = arith.addf %47, %50 : vector<8x16xf32>
    %cst_36 = arith.constant dense<0.000000e+00> : vector<8x8xf32>
    %52 = tpu.matmul %37, %44, %cst_36 {dimension_numbers = #tpu.dot_dimension_numbers<[1], [1], [0], [0], [0, 0, 1, 0], [], []>} : vector<8x16xf32>, vector<8x16xf32>, vector<8x8xf32> -> vector<8x8xf32>
    %cst_37 = arith.constant 2.500000e-01 : f32
    %53 = vector.broadcast %cst_37 : f32 to vector<8x8xf32>
    %54 = arith.mulf %52, %53 : vector<8x8xf32>
    %55 = arith.addf %54, %5 : vector<8x8xf32>
    %cst_38 = arith.constant dense<0xFF800000> : vector<8xf32>
    %56 = vector.multi_reduction <maximumf>, %55, %cst_38 [1] : vector<8x8xf32> to vector<8xf32>
    %57 = vector.shape_cast %56 : vector<8xf32> to vector<8x1xf32>
    %58 = vector.broadcast %57 : vector<8x1xf32> to vector<8x8xf32>
    %59 = arith.subf %55, %58 : vector<8x8xf32>
    %60 = math.exp %59 : vector<8x8xf32>
    %cst_39 = arith.constant dense<0.000000e+00> : vector<8xf32>
    %61 = vector.multi_reduction <add>, %60, %cst_39 [1] : vector<8x8xf32> to vector<8xf32>
    %62 = vector.shape_cast %61 : vector<8xf32> to vector<8x1xf32>
    %63 = vector.broadcast %62 : vector<8x1xf32> to vector<8x8xf32>
    %64 = arith.divf %60, %63 : vector<8x8xf32>
    %cst_40 = arith.constant dense<0.000000e+00> : vector<8x16xf32>
    %65 = tpu.matmul %64, %51, %cst_40 {dimension_numbers = #tpu.dot_dimension_numbers<[1], [0], [0], [1], [0, 0, 1, 1], [], []>} : vector<8x8xf32>, vector<8x16xf32>, vector<8x16xf32> -> vector<8x16xf32>
    %c0_41 = arith.constant 0 : index
    %c0_42 = arith.constant 0 : index
    %c0_43 = arith.constant 0 : index
    %66 = vector.load %arg5[%c0_41, %c0_42, %c0_43] : memref<2x16x32xf32, #tpu.memory_space<vmem>>, vector<1x16x32xf32>
    %67 = vector.shape_cast %66 : vector<1x16x32xf32> to vector<16x32xf32>
    %cst_44 = arith.constant dense<0.000000e+00> : vector<8x32xf32>
    %68 = tpu.matmul %65, %67, %cst_44 {dimension_numbers = #tpu.dot_dimension_numbers<[1], [0], [0], [1], [0, 0, 1, 1], [], []>} : vector<8x16xf32>, vector<16x32xf32>, vector<8x32xf32> -> vector<8x32xf32>
    %c1_45 = arith.constant 1 : index
    %c0_46 = arith.constant 0 : index
    %c0_47 = arith.constant 0 : index
    %69 = vector.load %arg3[%c1_45, %c0_46, %c0_47] : memref<6x32x16xf32, #tpu.memory_space<vmem>>, vector<1x32x16xf32>
    %70 = vector.shape_cast %69 : vector<1x32x16xf32> to vector<32x16xf32>
    %cst_48 = arith.constant dense<0.000000e+00> : vector<8x16xf32>
    %71 = tpu.matmul %29, %70, %cst_48 {dimension_numbers = #tpu.dot_dimension_numbers<[1], [0], [0], [1], [0, 0, 1, 1], [], []>} : vector<8x32xf32>, vector<32x16xf32>, vector<8x16xf32> -> vector<8x16xf32>
    %c1_49 = arith.constant 1 : index
    %c0_50 = arith.constant 0 : index
    %c0_51 = arith.constant 0 : index
    %72 = vector.load %arg4[%c1_49, %c0_50, %c0_51] : memref<6x1x16xf32, #tpu.memory_space<vmem>>, vector<1x1x16xf32>
    %73 = vector.shape_cast %72 : vector<1x1x16xf32> to vector<1x16xf32>
    %74 = vector.broadcast %73 : vector<1x16xf32> to vector<8x16xf32>
    %75 = arith.addf %71, %74 : vector<8x16xf32>
    %c3 = arith.constant 3 : index
    %c0_52 = arith.constant 0 : index
    %c0_53 = arith.constant 0 : index
    %76 = vector.load %arg3[%c3, %c0_52, %c0_53] : memref<6x32x16xf32, #tpu.memory_space<vmem>>, vector<1x32x16xf32>
    %77 = vector.shape_cast %76 : vector<1x32x16xf32> to vector<32x16xf32>
    %cst_54 = arith.constant dense<0.000000e+00> : vector<8x16xf32>
    %78 = tpu.matmul %29, %77, %cst_54 {dimension_numbers = #tpu.dot_dimension_numbers<[1], [0], [0], [1], [0, 0, 1, 1], [], []>} : vector<8x32xf32>, vector<32x16xf32>, vector<8x16xf32> -> vector<8x16xf32>
    %c3_55 = arith.constant 3 : index
    %c0_56 = arith.constant 0 : index
    %c0_57 = arith.constant 0 : index
    %79 = vector.load %arg4[%c3_55, %c0_56, %c0_57] : memref<6x1x16xf32, #tpu.memory_space<vmem>>, vector<1x1x16xf32>
    %80 = vector.shape_cast %79 : vector<1x1x16xf32> to vector<1x16xf32>
    %81 = vector.broadcast %80 : vector<1x16xf32> to vector<8x16xf32>
    %82 = arith.addf %78, %81 : vector<8x16xf32>
    %c5 = arith.constant 5 : index
    %c0_58 = arith.constant 0 : index
    %c0_59 = arith.constant 0 : index
    %83 = vector.load %arg3[%c5, %c0_58, %c0_59] : memref<6x32x16xf32, #tpu.memory_space<vmem>>, vector<1x32x16xf32>
    %84 = vector.shape_cast %83 : vector<1x32x16xf32> to vector<32x16xf32>
    %cst_60 = arith.constant dense<0.000000e+00> : vector<8x16xf32>
    %85 = tpu.matmul %29, %84, %cst_60 {dimension_numbers = #tpu.dot_dimension_numbers<[1], [0], [0], [1], [0, 0, 1, 1], [], []>} : vector<8x32xf32>, vector<32x16xf32>, vector<8x16xf32> -> vector<8x16xf32>
    %c5_61 = arith.constant 5 : index
    %c0_62 = arith.constant 0 : index
    %c0_63 = arith.constant 0 : index
    %86 = vector.load %arg4[%c5_61, %c0_62, %c0_63] : memref<6x1x16xf32, #tpu.memory_space<vmem>>, vector<1x1x16xf32>
    %87 = vector.shape_cast %86 : vector<1x1x16xf32> to vector<1x16xf32>
    %88 = vector.broadcast %87 : vector<1x16xf32> to vector<8x16xf32>
    %89 = arith.addf %85, %88 : vector<8x16xf32>
    %cst_64 = arith.constant dense<0.000000e+00> : vector<8x8xf32>
    %90 = tpu.matmul %75, %82, %cst_64 {dimension_numbers = #tpu.dot_dimension_numbers<[1], [1], [0], [0], [0, 0, 1, 0], [], []>} : vector<8x16xf32>, vector<8x16xf32>, vector<8x8xf32> -> vector<8x8xf32>
    %cst_65 = arith.constant 2.500000e-01 : f32
    %91 = vector.broadcast %cst_65 : f32 to vector<8x8xf32>
    %92 = arith.mulf %90, %91 : vector<8x8xf32>
    %93 = arith.addf %92, %5 : vector<8x8xf32>
    %cst_66 = arith.constant dense<0xFF800000> : vector<8xf32>
    %94 = vector.multi_reduction <maximumf>, %93, %cst_66 [1] : vector<8x8xf32> to vector<8xf32>
    %95 = vector.shape_cast %94 : vector<8xf32> to vector<8x1xf32>
    %96 = vector.broadcast %95 : vector<8x1xf32> to vector<8x8xf32>
    %97 = arith.subf %93, %96 : vector<8x8xf32>
    %98 = math.exp %97 : vector<8x8xf32>
    %cst_67 = arith.constant dense<0.000000e+00> : vector<8xf32>
    %99 = vector.multi_reduction <add>, %98, %cst_67 [1] : vector<8x8xf32> to vector<8xf32>
    %100 = vector.shape_cast %99 : vector<8xf32> to vector<8x1xf32>
    %101 = vector.broadcast %100 : vector<8x1xf32> to vector<8x8xf32>
    %102 = arith.divf %98, %101 : vector<8x8xf32>
    %cst_68 = arith.constant dense<0.000000e+00> : vector<8x16xf32>
    %103 = tpu.matmul %102, %89, %cst_68 {dimension_numbers = #tpu.dot_dimension_numbers<[1], [0], [0], [1], [0, 0, 1, 1], [], []>} : vector<8x8xf32>, vector<8x16xf32>, vector<8x16xf32> -> vector<8x16xf32>
    %c1_69 = arith.constant 1 : index
    %c0_70 = arith.constant 0 : index
    %c0_71 = arith.constant 0 : index
    %104 = vector.load %arg5[%c1_69, %c0_70, %c0_71] : memref<2x16x32xf32, #tpu.memory_space<vmem>>, vector<1x16x32xf32>
    %105 = vector.shape_cast %104 : vector<1x16x32xf32> to vector<16x32xf32>
    %cst_72 = arith.constant dense<0.000000e+00> : vector<8x32xf32>
    %106 = tpu.matmul %103, %105, %cst_72 {dimension_numbers = #tpu.dot_dimension_numbers<[1], [0], [0], [1], [0, 0, 1, 1], [], []>} : vector<8x16xf32>, vector<16x32xf32>, vector<8x32xf32> -> vector<8x32xf32>
    %107 = arith.addf %68, %106 : vector<8x32xf32>
    %108 = vector.broadcast %30 : vector<1x32xf32> to vector<8x32xf32>
    %109 = arith.addf %107, %108 : vector<8x32xf32>
    %110 = arith.addf %4, %109 : vector<8x32xf32>
    %c2_73 = arith.constant 2 : index
    %c0_74 = arith.constant 0 : index
    %111 = vector.load %arg7[%c2_73, %c0_74] : memref<4x32xf32, #tpu.memory_space<vmem>>, vector<1x32xf32>
    %c3_75 = arith.constant 3 : index
    %c0_76 = arith.constant 0 : index
    %112 = vector.load %arg7[%c3_75, %c0_76] : memref<4x32xf32, #tpu.memory_space<vmem>>, vector<1x32xf32>
    %cst_77 = arith.constant dense<0.000000e+00> : vector<8xf32>
    %113 = vector.multi_reduction <add>, %110, %cst_77 [1] : vector<8x32xf32> to vector<8xf32>
    %114 = vector.shape_cast %113 : vector<8xf32> to vector<8x1xf32>
    %cst_78 = arith.constant 3.200000e+01 : f32
    %115 = vector.broadcast %cst_78 : f32 to vector<8x1xf32>
    %116 = arith.divf %114, %115 : vector<8x1xf32>
    %117 = vector.broadcast %116 : vector<8x1xf32> to vector<8x32xf32>
    %118 = arith.subf %110, %117 : vector<8x32xf32>
    %119 = arith.mulf %118, %118 : vector<8x32xf32>
    %cst_79 = arith.constant dense<0.000000e+00> : vector<8xf32>
    %120 = vector.multi_reduction <add>, %119, %cst_79 [1] : vector<8x32xf32> to vector<8xf32>
    %121 = vector.shape_cast %120 : vector<8xf32> to vector<8x1xf32>
    %cst_80 = arith.constant 3.200000e+01 : f32
    %122 = vector.broadcast %cst_80 : f32 to vector<8x1xf32>
    %123 = arith.divf %121, %122 : vector<8x1xf32>
    %124 = vector.broadcast %116 : vector<8x1xf32> to vector<8x32xf32>
    %125 = arith.subf %110, %124 : vector<8x32xf32>
    %cst_81 = arith.constant 9.99999974E-6 : f32
    %126 = vector.broadcast %cst_81 : f32 to vector<8x1xf32>
    %127 = arith.addf %123, %126 : vector<8x1xf32>
    %128 = math.rsqrt %127 : vector<8x1xf32>
    %129 = vector.broadcast %128 : vector<8x1xf32> to vector<8x32xf32>
    %130 = arith.mulf %125, %129 : vector<8x32xf32>
    %131 = vector.broadcast %111 : vector<1x32xf32> to vector<8x32xf32>
    %132 = arith.mulf %130, %131 : vector<8x32xf32>
    %133 = vector.broadcast %112 : vector<1x32xf32> to vector<8x32xf32>
    %134 = arith.addf %132, %133 : vector<8x32xf32>
    %c0_82 = arith.constant 0 : index
    %c0_83 = arith.constant 0 : index
    %135 = vector.load %arg8[%c0_82, %c0_83] : memref<32x64xf32, #tpu.memory_space<vmem>>, vector<32x64xf32>
    %cst_84 = arith.constant dense<0.000000e+00> : vector<8x64xf32>
    %136 = tpu.matmul %134, %135, %cst_84 {dimension_numbers = #tpu.dot_dimension_numbers<[1], [0], [0], [1], [0, 0, 1, 1], [], []>} : vector<8x32xf32>, vector<32x64xf32>, vector<8x64xf32> -> vector<8x64xf32>
    %c0_85 = arith.constant 0 : index
    %c0_86 = arith.constant 0 : index
    %137 = vector.load %arg9[%c0_85, %c0_86] : memref<1x64xf32, #tpu.memory_space<vmem>>, vector<1x64xf32>
    %138 = vector.broadcast %137 : vector<1x64xf32> to vector<8x64xf32>
    %139 = arith.addf %136, %138 : vector<8x64xf32>
    %140 = arith.mulf %139, %139 : vector<8x64xf32>
    %141 = arith.mulf %139, %140 : vector<8x64xf32>
    %cst_87 = arith.constant 4.471500e-02 : f32
    %142 = vector.broadcast %cst_87 : f32 to vector<8x64xf32>
    %143 = arith.mulf %142, %141 : vector<8x64xf32>
    %144 = arith.addf %139, %143 : vector<8x64xf32>
    %cst_88 = arith.constant 0.797884583 : f32
    %145 = vector.broadcast %cst_88 : f32 to vector<8x64xf32>
    %146 = arith.mulf %145, %144 : vector<8x64xf32>
    %147 = math.tanh %146 : vector<8x64xf32>
    %cst_89 = arith.constant 1.000000e+00 : f32
    %148 = vector.broadcast %cst_89 : f32 to vector<8x64xf32>
    %149 = arith.addf %148, %147 : vector<8x64xf32>
    %cst_90 = arith.constant 5.000000e-01 : f32
    %150 = vector.broadcast %cst_90 : f32 to vector<8x64xf32>
    %151 = arith.mulf %150, %149 : vector<8x64xf32>
    %152 = arith.mulf %139, %151 : vector<8x64xf32>
    %c0_91 = arith.constant 0 : index
    %c0_92 = arith.constant 0 : index
    %153 = vector.load %arg10[%c0_91, %c0_92] : memref<64x32xf32, #tpu.memory_space<vmem>>, vector<64x32xf32>
    %cst_93 = arith.constant dense<0.000000e+00> : vector<8x32xf32>
    %154 = tpu.matmul %152, %153, %cst_93 {dimension_numbers = #tpu.dot_dimension_numbers<[1], [0], [0], [1], [0, 0, 1, 1], [], []>} : vector<8x64xf32>, vector<64x32xf32>, vector<8x32xf32> -> vector<8x32xf32>
    %c0_94 = arith.constant 0 : index
    %c0_95 = arith.constant 0 : index
    %155 = vector.load %arg11[%c0_94, %c0_95] : memref<1x32xf32, #tpu.memory_space<vmem>>, vector<1x32xf32>
    %156 = vector.broadcast %155 : vector<1x32xf32> to vector<8x32xf32>
    %157 = arith.addf %154, %156 : vector<8x32xf32>
    %158 = arith.addf %110, %157 : vector<8x32xf32>
    %c0_96 = arith.constant 0 : index
    %c0_97 = arith.constant 0 : index
    %159 = vector.load %arg12[%c0_96, %c0_97] : memref<32x16xf32, #tpu.memory_space<vmem>>, vector<32x16xf32>
    %cst_98 = arith.constant dense<0.000000e+00> : vector<8x16xf32>
    %160 = tpu.matmul %158, %159, %cst_98 {dimension_numbers = #tpu.dot_dimension_numbers<[1], [0], [0], [1], [0, 0, 1, 1], [], []>} : vector<8x32xf32>, vector<32x16xf32>, vector<8x16xf32> -> vector<8x16xf32>
    %c0_99 = arith.constant 0 : index
    %c0_100 = arith.constant 0 : index
    %161 = vector.load %arg13[%c0_99, %c0_100] : memref<2x16xf32, #tpu.memory_space<vmem>>, vector<1x16xf32>
    %c1_101 = arith.constant 1 : index
    %c0_102 = arith.constant 0 : index
    %162 = vector.load %arg13[%c1_101, %c0_102] : memref<2x16xf32, #tpu.memory_space<vmem>>, vector<1x16xf32>
    %cst_103 = arith.constant dense<0.000000e+00> : vector<8xf32>
    %163 = vector.multi_reduction <add>, %160, %cst_103 [1] : vector<8x16xf32> to vector<8xf32>
    %164 = vector.shape_cast %163 : vector<8xf32> to vector<8x1xf32>
    %cst_104 = arith.constant 1.600000e+01 : f32
    %165 = vector.broadcast %cst_104 : f32 to vector<8x1xf32>
    %166 = arith.divf %164, %165 : vector<8x1xf32>
    %167 = vector.broadcast %166 : vector<8x1xf32> to vector<8x16xf32>
    %168 = arith.subf %160, %167 : vector<8x16xf32>
    %169 = arith.mulf %168, %168 : vector<8x16xf32>
    %cst_105 = arith.constant dense<0.000000e+00> : vector<8xf32>
    %170 = vector.multi_reduction <add>, %169, %cst_105 [1] : vector<8x16xf32> to vector<8xf32>
    %171 = vector.shape_cast %170 : vector<8xf32> to vector<8x1xf32>
    %cst_106 = arith.constant 1.600000e+01 : f32
    %172 = vector.broadcast %cst_106 : f32 to vector<8x1xf32>
    %173 = arith.divf %171, %172 : vector<8x1xf32>
    %174 = vector.broadcast %166 : vector<8x1xf32> to vector<8x16xf32>
    %175 = arith.subf %160, %174 : vector<8x16xf32>
    %cst_107 = arith.constant 9.99999997E-7 : f32
    %176 = vector.broadcast %cst_107 : f32 to vector<8x1xf32>
    %177 = arith.addf %173, %176 : vector<8x1xf32>
    %178 = math.rsqrt %177 : vector<8x1xf32>
    %179 = vector.broadcast %178 : vector<8x1xf32> to vector<8x16xf32>
    %180 = arith.mulf %175, %179 : vector<8x16xf32>
    %181 = vector.broadcast %161 : vector<1x16xf32> to vector<8x16xf32>
    %182 = arith.mulf %180, %181 : vector<8x16xf32>
    %183 = vector.broadcast %162 : vector<1x16xf32> to vector<8x16xf32>
    %184 = arith.addf %182, %183 : vector<8x16xf32>
    %c0_108 = arith.constant 0 : index
    %c0_109 = arith.constant 0 : index
    %185 = vector.load %arg15[%c0_108, %c0_109] : memref<8x16xf32, #tpu.memory_space<vmem>>, vector<8x16xf32>
    %c0_110 = arith.constant 0 : index
    %c0_111 = arith.constant 0 : index
    %c0_112 = arith.constant 0 : index
    %186 = vector.load %arg16[%c0_110, %c0_111, %c0_112] : memref<4x16x16xf32, #tpu.memory_space<vmem>>, vector<1x16x16xf32>
    %187 = vector.shape_cast %186 : vector<1x16x16xf32> to vector<16x16xf32>
    %cst_113 = arith.constant dense<0.000000e+00> : vector<8x16xf32>
    %188 = tpu.matmul %185, %187, %cst_113 {dimension_numbers = #tpu.dot_dimension_numbers<[1], [0], [0], [1], [0, 0, 1, 1], [], []>} : vector<8x16xf32>, vector<16x16xf32>, vector<8x16xf32> -> vector<8x16xf32>
    %c0_114 = arith.constant 0 : index
    %c0_115 = arith.constant 0 : index
    %189 = vector.load %arg17[%c0_114, %c0_115] : memref<8x16xf32, #tpu.memory_space<vmem>>, vector<1x16xf32>
    %190 = vector.broadcast %189 : vector<1x16xf32> to vector<8x16xf32>
    %191 = arith.addf %188, %190 : vector<8x16xf32>
    %c1_116 = arith.constant 1 : index
    %c0_117 = arith.constant 0 : index
    %c0_118 = arith.constant 0 : index
    %192 = vector.load %arg16[%c1_116, %c0_117, %c0_118] : memref<4x16x16xf32, #tpu.memory_space<vmem>>, vector<1x16x16xf32>
    %193 = vector.shape_cast %192 : vector<1x16x16xf32> to vector<16x16xf32>
    %c1_119 = arith.constant 1 : index
    %c0_120 = arith.constant 0 : index
    %194 = vector.load %arg17[%c1_119, %c0_120] : memref<8x16xf32, #tpu.memory_space<vmem>>, vector<1x16xf32>
    %c2_121 = arith.constant 2 : index
    %c0_122 = arith.constant 0 : index
    %195 = vector.load %arg17[%c2_121, %c0_122] : memref<8x16xf32, #tpu.memory_space<vmem>>, vector<1x16xf32>
    %cst_123 = arith.constant dense<0.000000e+00> : vector<8x16xf32>
    %196 = tpu.matmul %191, %193, %cst_123 {dimension_numbers = #tpu.dot_dimension_numbers<[1], [0], [0], [1], [0, 0, 1, 1], [], []>} : vector<8x16xf32>, vector<16x16xf32>, vector<8x16xf32> -> vector<8x16xf32>
    %197 = arith.subf %191, %196 : vector<8x16xf32>
    %198 = arith.mulf %197, %197 : vector<8x16xf32>
    %cst_124 = arith.constant dense<0.000000e+00> : vector<8x16xf32>
    %199 = tpu.matmul %198, %193, %cst_124 {dimension_numbers = #tpu.dot_dimension_numbers<[1], [0], [0], [1], [0, 0, 1, 1], [], []>} : vector<8x16xf32>, vector<16x16xf32>, vector<8x16xf32> -> vector<8x16xf32>
    %200 = arith.subf %191, %196 : vector<8x16xf32>
    %cst_125 = arith.constant 9.99999997E-7 : f32
    %201 = vector.broadcast %cst_125 : f32 to vector<8x16xf32>
    %202 = arith.addf %199, %201 : vector<8x16xf32>
    %203 = math.rsqrt %202 : vector<8x16xf32>
    %204 = arith.mulf %200, %203 : vector<8x16xf32>
    %205 = vector.broadcast %194 : vector<1x16xf32> to vector<8x16xf32>
    %206 = arith.mulf %204, %205 : vector<8x16xf32>
    %207 = vector.broadcast %195 : vector<1x16xf32> to vector<8x16xf32>
    %208 = arith.addf %206, %207 : vector<8x16xf32>
    %209 = arith.mulf %208, %208 : vector<8x16xf32>
    %210 = arith.mulf %208, %209 : vector<8x16xf32>
    %cst_126 = arith.constant 4.471500e-02 : f32
    %211 = vector.broadcast %cst_126 : f32 to vector<8x16xf32>
    %212 = arith.mulf %211, %210 : vector<8x16xf32>
    %213 = arith.addf %208, %212 : vector<8x16xf32>
    %cst_127 = arith.constant 0.797884583 : f32
    %214 = vector.broadcast %cst_127 : f32 to vector<8x16xf32>
    %215 = arith.mulf %214, %213 : vector<8x16xf32>
    %216 = math.tanh %215 : vector<8x16xf32>
    %cst_128 = arith.constant 1.000000e+00 : f32
    %217 = vector.broadcast %cst_128 : f32 to vector<8x16xf32>
    %218 = arith.addf %217, %216 : vector<8x16xf32>
    %cst_129 = arith.constant 5.000000e-01 : f32
    %219 = vector.broadcast %cst_129 : f32 to vector<8x16xf32>
    %220 = arith.mulf %219, %218 : vector<8x16xf32>
    %221 = arith.mulf %208, %220 : vector<8x16xf32>
    %c2_130 = arith.constant 2 : index
    %c0_131 = arith.constant 0 : index
    %c0_132 = arith.constant 0 : index
    %222 = vector.load %arg16[%c2_130, %c0_131, %c0_132] : memref<4x16x16xf32, #tpu.memory_space<vmem>>, vector<1x16x16xf32>
    %223 = vector.shape_cast %222 : vector<1x16x16xf32> to vector<16x16xf32>
    %cst_133 = arith.constant dense<0.000000e+00> : vector<8x16xf32>
    %224 = tpu.matmul %221, %223, %cst_133 {dimension_numbers = #tpu.dot_dimension_numbers<[1], [0], [0], [1], [0, 0, 1, 1], [], []>} : vector<8x16xf32>, vector<16x16xf32>, vector<8x16xf32> -> vector<8x16xf32>
    %c3_134 = arith.constant 3 : index
    %c0_135 = arith.constant 0 : index
    %225 = vector.load %arg17[%c3_134, %c0_135] : memref<8x16xf32, #tpu.memory_space<vmem>>, vector<1x16xf32>
    %226 = vector.broadcast %225 : vector<1x16xf32> to vector<8x16xf32>
    %227 = arith.addf %224, %226 : vector<8x16xf32>
    %c4_136 = arith.constant 4 : index
    %c0_137 = arith.constant 0 : index
    %228 = vector.load %arg17[%c4_136, %c0_137] : memref<8x16xf32, #tpu.memory_space<vmem>>, vector<1x16xf32>
    %c5_138 = arith.constant 5 : index
    %c0_139 = arith.constant 0 : index
    %229 = vector.load %arg17[%c5_138, %c0_139] : memref<8x16xf32, #tpu.memory_space<vmem>>, vector<1x16xf32>
    %cst_140 = arith.constant dense<0.000000e+00> : vector<8xf32>
    %230 = vector.multi_reduction <add>, %227, %cst_140 [1] : vector<8x16xf32> to vector<8xf32>
    %231 = vector.shape_cast %230 : vector<8xf32> to vector<8x1xf32>
    %cst_141 = arith.constant 1.600000e+01 : f32
    %232 = vector.broadcast %cst_141 : f32 to vector<8x1xf32>
    %233 = arith.divf %231, %232 : vector<8x1xf32>
    %234 = vector.broadcast %233 : vector<8x1xf32> to vector<8x16xf32>
    %235 = arith.subf %227, %234 : vector<8x16xf32>
    %236 = arith.mulf %235, %235 : vector<8x16xf32>
    %cst_142 = arith.constant dense<0.000000e+00> : vector<8xf32>
    %237 = vector.multi_reduction <add>, %236, %cst_142 [1] : vector<8x16xf32> to vector<8xf32>
    %238 = vector.shape_cast %237 : vector<8xf32> to vector<8x1xf32>
    %cst_143 = arith.constant 1.600000e+01 : f32
    %239 = vector.broadcast %cst_143 : f32 to vector<8x1xf32>
    %240 = arith.divf %238, %239 : vector<8x1xf32>
    %241 = vector.broadcast %233 : vector<8x1xf32> to vector<8x16xf32>
    %242 = arith.subf %227, %241 : vector<8x16xf32>
    %cst_144 = arith.constant 9.99999997E-7 : f32
    %243 = vector.broadcast %cst_144 : f32 to vector<8x1xf32>
    %244 = arith.addf %240, %243 : vector<8x1xf32>
    %245 = math.rsqrt %244 : vector<8x1xf32>
    %246 = vector.broadcast %245 : vector<8x1xf32> to vector<8x16xf32>
    %247 = arith.mulf %242, %246 : vector<8x16xf32>
    %248 = vector.broadcast %228 : vector<1x16xf32> to vector<8x16xf32>
    %249 = arith.mulf %247, %248 : vector<8x16xf32>
    %250 = vector.broadcast %229 : vector<1x16xf32> to vector<8x16xf32>
    %251 = arith.addf %249, %250 : vector<8x16xf32>
    %252 = arith.mulf %251, %251 : vector<8x16xf32>
    %253 = arith.mulf %251, %252 : vector<8x16xf32>
    %cst_145 = arith.constant 4.471500e-02 : f32
    %254 = vector.broadcast %cst_145 : f32 to vector<8x16xf32>
    %255 = arith.mulf %254, %253 : vector<8x16xf32>
    %256 = arith.addf %251, %255 : vector<8x16xf32>
    %cst_146 = arith.constant 0.797884583 : f32
    %257 = vector.broadcast %cst_146 : f32 to vector<8x16xf32>
    %258 = arith.mulf %257, %256 : vector<8x16xf32>
    %259 = math.tanh %258 : vector<8x16xf32>
    %cst_147 = arith.constant 1.000000e+00 : f32
    %260 = vector.broadcast %cst_147 : f32 to vector<8x16xf32>
    %261 = arith.addf %260, %259 : vector<8x16xf32>
    %cst_148 = arith.constant 5.000000e-01 : f32
    %262 = vector.broadcast %cst_148 : f32 to vector<8x16xf32>
    %263 = arith.mulf %262, %261 : vector<8x16xf32>
    %264 = arith.mulf %251, %263 : vector<8x16xf32>
    %c3_149 = arith.constant 3 : index
    %c0_150 = arith.constant 0 : index
    %c0_151 = arith.constant 0 : index
    %265 = vector.load %arg16[%c3_149, %c0_150, %c0_151] : memref<4x16x16xf32, #tpu.memory_space<vmem>>, vector<1x16x16xf32>
    %266 = vector.shape_cast %265 : vector<1x16x16xf32> to vector<16x16xf32>
    %cst_152 = arith.constant dense<0.000000e+00> : vector<8x16xf32>
    %267 = tpu.matmul %264, %266, %cst_152 {dimension_numbers = #tpu.dot_dimension_numbers<[1], [0], [0], [1], [0, 0, 1, 1], [], []>} : vector<8x16xf32>, vector<16x16xf32>, vector<8x16xf32> -> vector<8x16xf32>
    %c6 = arith.constant 6 : index
    %c0_153 = arith.constant 0 : index
    %268 = vector.load %arg17[%c6, %c0_153] : memref<8x16xf32, #tpu.memory_space<vmem>>, vector<1x16xf32>
    %269 = vector.broadcast %268 : vector<1x16xf32> to vector<8x16xf32>
    %270 = arith.addf %267, %269 : vector<8x16xf32>
    %271 = arith.addf %184, %270 : vector<8x16xf32>
    %c7 = arith.constant 7 : index
    %c0_154 = arith.constant 0 : index
    %272 = vector.load %arg17[%c7, %c0_154] : memref<8x16xf32, #tpu.memory_space<vmem>>, vector<1x16xf32>
    %273 = vector.broadcast %272 : vector<1x16xf32> to vector<8x16xf32>
    %274 = arith.addf %271, %273 : vector<8x16xf32>
    %c0_155 = arith.constant 0 : index
    %c0_156 = arith.constant 0 : index
    %275 = vector.load %arg18[%c0_155, %c0_156] : memref<10x16xf32, #tpu.memory_space<vmem>>, vector<10x16xf32>
    %c0_157 = arith.constant 0 : index
    %c0_158 = arith.constant 0 : index
    %276 = vector.load %arg19[%c0_157, %c0_158] : memref<8x16xf32, #tpu.memory_space<vmem>>, vector<8x16xf32>
    %c0_159 = arith.constant 0 : index
    %c0_160 = arith.constant 0 : index
    %277 = vector.load %arg30[%c0_159, %c0_160] : memref<10x10xf32, #tpu.memory_space<vmem>>, vector<10x10xf32>
    %c0_161 = arith.constant 0 : index
    %c0_162 = arith.constant 0 : index
    %278 = vector.load %arg31[%c0_161, %c0_162] : memref<10x8xf32, #tpu.memory_space<vmem>>, vector<10x8xf32>
    %c0_163 = arith.constant 0 : index
    %c0_164 = arith.constant 0 : index
    %279 = vector.load %arg32[%c0_163, %c0_164] : memref<8x10xf32, #tpu.memory_space<vmem>>, vector<8x10xf32>
    %c0_165 = arith.constant 0 : index
    %c0_166 = arith.constant 0 : index
    %c0_167 = arith.constant 0 : index
    %280 = vector.load %arg23[%c0_165, %c0_166, %c0_167] : memref<7x1x16xf32, #tpu.memory_space<vmem>>, vector<1x1x16xf32>
    %281 = vector.shape_cast %280 : vector<1x1x16xf32> to vector<1x16xf32>
    %c0_168 = arith.constant 0 : index
    %c0_169 = arith.constant 0 : index
    %c0_170 = arith.constant 0 : index
    %282 = vector.load %arg20[%c0_168, %c0_169, %c0_170] : memref<42x16x8xf32, #tpu.memory_space<vmem>>, vector<1x16x8xf32>
    %283 = vector.shape_cast %282 : vector<1x16x8xf32> to vector<16x8xf32>
    %cst_171 = arith.constant dense<0.000000e+00> : vector<10x8xf32>
    %284 = tpu.matmul %275, %283, %cst_171 {dimension_numbers = #tpu.dot_dimension_numbers<[1], [0], [0], [1], [0, 0, 1, 1], [], []>} : vector<10x16xf32>, vector<16x8xf32>, vector<10x8xf32> -> vector<10x8xf32>
    %c0_172 = arith.constant 0 : index
    %c0_173 = arith.constant 0 : index
    %c0_174 = arith.constant 0 : index
    %285 = vector.load %arg21[%c0_172, %c0_173, %c0_174] : memref<42x1x8xf32, #tpu.memory_space<vmem>>, vector<1x1x8xf32>
    %286 = vector.shape_cast %285 : vector<1x1x8xf32> to vector<1x8xf32>
    %287 = vector.broadcast %286 : vector<1x8xf32> to vector<10x8xf32>
    %288 = arith.addf %284, %287 : vector<10x8xf32>
    %c2_175 = arith.constant 2 : index
    %c0_176 = arith.constant 0 : index
    %c0_177 = arith.constant 0 : index
    %289 = vector.load %arg20[%c2_175, %c0_176, %c0_177] : memref<42x16x8xf32, #tpu.memory_space<vmem>>, vector<1x16x8xf32>
    %290 = vector.shape_cast %289 : vector<1x16x8xf32> to vector<16x8xf32>
    %cst_178 = arith.constant dense<0.000000e+00> : vector<10x8xf32>
    %291 = tpu.matmul %275, %290, %cst_178 {dimension_numbers = #tpu.dot_dimension_numbers<[1], [0], [0], [1], [0, 0, 1, 1], [], []>} : vector<10x16xf32>, vector<16x8xf32>, vector<10x8xf32> -> vector<10x8xf32>
    %c2_179 = arith.constant 2 : index
    %c0_180 = arith.constant 0 : index
    %c0_181 = arith.constant 0 : index
    %292 = vector.load %arg21[%c2_179, %c0_180, %c0_181] : memref<42x1x8xf32, #tpu.memory_space<vmem>>, vector<1x1x8xf32>
    %293 = vector.shape_cast %292 : vector<1x1x8xf32> to vector<1x8xf32>
    %294 = vector.broadcast %293 : vector<1x8xf32> to vector<10x8xf32>
    %295 = arith.addf %291, %294 : vector<10x8xf32>
    %c4_182 = arith.constant 4 : index
    %c0_183 = arith.constant 0 : index
    %c0_184 = arith.constant 0 : index
    %296 = vector.load %arg20[%c4_182, %c0_183, %c0_184] : memref<42x16x8xf32, #tpu.memory_space<vmem>>, vector<1x16x8xf32>
    %297 = vector.shape_cast %296 : vector<1x16x8xf32> to vector<16x8xf32>
    %cst_185 = arith.constant dense<0.000000e+00> : vector<10x8xf32>
    %298 = tpu.matmul %275, %297, %cst_185 {dimension_numbers = #tpu.dot_dimension_numbers<[1], [0], [0], [1], [0, 0, 1, 1], [], []>} : vector<10x16xf32>, vector<16x8xf32>, vector<10x8xf32> -> vector<10x8xf32>
    %c4_186 = arith.constant 4 : index
    %c0_187 = arith.constant 0 : index
    %c0_188 = arith.constant 0 : index
    %299 = vector.load %arg21[%c4_186, %c0_187, %c0_188] : memref<42x1x8xf32, #tpu.memory_space<vmem>>, vector<1x1x8xf32>
    %300 = vector.shape_cast %299 : vector<1x1x8xf32> to vector<1x8xf32>
    %301 = vector.broadcast %300 : vector<1x8xf32> to vector<10x8xf32>
    %302 = arith.addf %298, %301 : vector<10x8xf32>
    %cst_189 = arith.constant dense<0.000000e+00> : vector<10x10xf32>
    %303 = tpu.matmul %288, %295, %cst_189 {dimension_numbers = #tpu.dot_dimension_numbers<[1], [1], [0], [0], [0, 0, 1, 0], [], []>} : vector<10x8xf32>, vector<10x8xf32>, vector<10x10xf32> -> vector<10x10xf32>
    %cst_190 = arith.constant 0.353553385 : f32
    %304 = vector.broadcast %cst_190 : f32 to vector<10x10xf32>
    %305 = arith.mulf %303, %304 : vector<10x10xf32>
    %306 = arith.addf %305, %277 : vector<10x10xf32>
    %cst_191 = arith.constant dense<0xFF800000> : vector<10xf32>
    %307 = vector.multi_reduction <maximumf>, %306, %cst_191 [1] : vector<10x10xf32> to vector<10xf32>
    %308 = vector.shape_cast %307 : vector<10xf32> to vector<10x1xf32>
    %309 = vector.broadcast %308 : vector<10x1xf32> to vector<10x10xf32>
    %310 = arith.subf %306, %309 : vector<10x10xf32>
    %311 = math.exp %310 : vector<10x10xf32>
    %cst_192 = arith.constant dense<0.000000e+00> : vector<10xf32>
    %312 = vector.multi_reduction <add>, %311, %cst_192 [1] : vector<10x10xf32> to vector<10xf32>
    %313 = vector.shape_cast %312 : vector<10xf32> to vector<10x1xf32>
    %314 = vector.broadcast %313 : vector<10x1xf32> to vector<10x10xf32>
    %315 = arith.divf %311, %314 : vector<10x10xf32>
    %cst_193 = arith.constant dense<0.000000e+00> : vector<10x8xf32>
    %316 = tpu.matmul %315, %302, %cst_193 {dimension_numbers = #tpu.dot_dimension_numbers<[1], [0], [0], [1], [0, 0, 1, 1], [], []>} : vector<10x10xf32>, vector<10x8xf32>, vector<10x8xf32> -> vector<10x8xf32>
    %c0_194 = arith.constant 0 : index
    %c0_195 = arith.constant 0 : index
    %c0_196 = arith.constant 0 : index
    %317 = vector.load %arg22[%c0_194, %c0_195, %c0_196] : memref<14x8x16xf32, #tpu.memory_space<vmem>>, vector<1x8x16xf32>
    %318 = vector.shape_cast %317 : vector<1x8x16xf32> to vector<8x16xf32>
    %cst_197 = arith.constant dense<0.000000e+00> : vector<10x16xf32>
    %319 = tpu.matmul %316, %318, %cst_197 {dimension_numbers = #tpu.dot_dimension_numbers<[1], [0], [0], [1], [0, 0, 1, 1], [], []>} : vector<10x8xf32>, vector<8x16xf32>, vector<10x16xf32> -> vector<10x16xf32>
    %c1_198 = arith.constant 1 : index
    %c0_199 = arith.constant 0 : index
    %c0_200 = arith.constant 0 : index
    %320 = vector.load %arg20[%c1_198, %c0_199, %c0_200] : memref<42x16x8xf32, #tpu.memory_space<vmem>>, vector<1x16x8xf32>
    %321 = vector.shape_cast %320 : vector<1x16x8xf32> to vector<16x8xf32>
    %cst_201 = arith.constant dense<0.000000e+00> : vector<10x8xf32>
    %322 = tpu.matmul %275, %321, %cst_201 {dimension_numbers = #tpu.dot_dimension_numbers<[1], [0], [0], [1], [0, 0, 1, 1], [], []>} : vector<10x16xf32>, vector<16x8xf32>, vector<10x8xf32> -> vector<10x8xf32>
    %c1_202 = arith.constant 1 : index
    %c0_203 = arith.constant 0 : index
    %c0_204 = arith.constant 0 : index
    %323 = vector.load %arg21[%c1_202, %c0_203, %c0_204] : memref<42x1x8xf32, #tpu.memory_space<vmem>>, vector<1x1x8xf32>
    %324 = vector.shape_cast %323 : vector<1x1x8xf32> to vector<1x8xf32>
    %325 = vector.broadcast %324 : vector<1x8xf32> to vector<10x8xf32>
    %326 = arith.addf %322, %325 : vector<10x8xf32>
    %c3_205 = arith.constant 3 : index
    %c0_206 = arith.constant 0 : index
    %c0_207 = arith.constant 0 : index
    %327 = vector.load %arg20[%c3_205, %c0_206, %c0_207] : memref<42x16x8xf32, #tpu.memory_space<vmem>>, vector<1x16x8xf32>
    %328 = vector.shape_cast %327 : vector<1x16x8xf32> to vector<16x8xf32>
    %cst_208 = arith.constant dense<0.000000e+00> : vector<10x8xf32>
    %329 = tpu.matmul %275, %328, %cst_208 {dimension_numbers = #tpu.dot_dimension_numbers<[1], [0], [0], [1], [0, 0, 1, 1], [], []>} : vector<10x16xf32>, vector<16x8xf32>, vector<10x8xf32> -> vector<10x8xf32>
    %c3_209 = arith.constant 3 : index
    %c0_210 = arith.constant 0 : index
    %c0_211 = arith.constant 0 : index
    %330 = vector.load %arg21[%c3_209, %c0_210, %c0_211] : memref<42x1x8xf32, #tpu.memory_space<vmem>>, vector<1x1x8xf32>
    %331 = vector.shape_cast %330 : vector<1x1x8xf32> to vector<1x8xf32>
    %332 = vector.broadcast %331 : vector<1x8xf32> to vector<10x8xf32>
    %333 = arith.addf %329, %332 : vector<10x8xf32>
    %c5_212 = arith.constant 5 : index
    %c0_213 = arith.constant 0 : index
    %c0_214 = arith.constant 0 : index
    %334 = vector.load %arg20[%c5_212, %c0_213, %c0_214] : memref<42x16x8xf32, #tpu.memory_space<vmem>>, vector<1x16x8xf32>
    %335 = vector.shape_cast %334 : vector<1x16x8xf32> to vector<16x8xf32>
    %cst_215 = arith.constant dense<0.000000e+00> : vector<10x8xf32>
    %336 = tpu.matmul %275, %335, %cst_215 {dimension_numbers = #tpu.dot_dimension_numbers<[1], [0], [0], [1], [0, 0, 1, 1], [], []>} : vector<10x16xf32>, vector<16x8xf32>, vector<10x8xf32> -> vector<10x8xf32>
    %c5_216 = arith.constant 5 : index
    %c0_217 = arith.constant 0 : index
    %c0_218 = arith.constant 0 : index
    %337 = vector.load %arg21[%c5_216, %c0_217, %c0_218] : memref<42x1x8xf32, #tpu.memory_space<vmem>>, vector<1x1x8xf32>
    %338 = vector.shape_cast %337 : vector<1x1x8xf32> to vector<1x8xf32>
    %339 = vector.broadcast %338 : vector<1x8xf32> to vector<10x8xf32>
    %340 = arith.addf %336, %339 : vector<10x8xf32>
    %cst_219 = arith.constant dense<0.000000e+00> : vector<10x10xf32>
    %341 = tpu.matmul %326, %333, %cst_219 {dimension_numbers = #tpu.dot_dimension_numbers<[1], [1], [0], [0], [0, 0, 1, 0], [], []>} : vector<10x8xf32>, vector<10x8xf32>, vector<10x10xf32> -> vector<10x10xf32>
    %cst_220 = arith.constant 0.353553385 : f32
    %342 = vector.broadcast %cst_220 : f32 to vector<10x10xf32>
    %343 = arith.mulf %341, %342 : vector<10x10xf32>
    %344 = arith.addf %343, %277 : vector<10x10xf32>
    %cst_221 = arith.constant dense<0xFF800000> : vector<10xf32>
    %345 = vector.multi_reduction <maximumf>, %344, %cst_221 [1] : vector<10x10xf32> to vector<10xf32>
    %346 = vector.shape_cast %345 : vector<10xf32> to vector<10x1xf32>
    %347 = vector.broadcast %346 : vector<10x1xf32> to vector<10x10xf32>
    %348 = arith.subf %344, %347 : vector<10x10xf32>
    %349 = math.exp %348 : vector<10x10xf32>
    %cst_222 = arith.constant dense<0.000000e+00> : vector<10xf32>
    %350 = vector.multi_reduction <add>, %349, %cst_222 [1] : vector<10x10xf32> to vector<10xf32>
    %351 = vector.shape_cast %350 : vector<10xf32> to vector<10x1xf32>
    %352 = vector.broadcast %351 : vector<10x1xf32> to vector<10x10xf32>
    %353 = arith.divf %349, %352 : vector<10x10xf32>
    %cst_223 = arith.constant dense<0.000000e+00> : vector<10x8xf32>
    %354 = tpu.matmul %353, %340, %cst_223 {dimension_numbers = #tpu.dot_dimension_numbers<[1], [0], [0], [1], [0, 0, 1, 1], [], []>} : vector<10x10xf32>, vector<10x8xf32>, vector<10x8xf32> -> vector<10x8xf32>
    %c1_224 = arith.constant 1 : index
    %c0_225 = arith.constant 0 : index
    %c0_226 = arith.constant 0 : index
    %355 = vector.load %arg22[%c1_224, %c0_225, %c0_226] : memref<14x8x16xf32, #tpu.memory_space<vmem>>, vector<1x8x16xf32>
    %356 = vector.shape_cast %355 : vector<1x8x16xf32> to vector<8x16xf32>
    %cst_227 = arith.constant dense<0.000000e+00> : vector<10x16xf32>
    %357 = tpu.matmul %354, %356, %cst_227 {dimension_numbers = #tpu.dot_dimension_numbers<[1], [0], [0], [1], [0, 0, 1, 1], [], []>} : vector<10x8xf32>, vector<8x16xf32>, vector<10x16xf32> -> vector<10x16xf32>
    %358 = arith.addf %319, %357 : vector<10x16xf32>
    %359 = vector.broadcast %281 : vector<1x16xf32> to vector<10x16xf32>
    %360 = arith.addf %358, %359 : vector<10x16xf32>
    %c0_228 = arith.constant 0 : index
    %c0_229 = arith.constant 0 : index
    %361 = vector.load %arg24[%c0_228, %c0_229] : memref<9x16xf32, #tpu.memory_space<vmem>>, vector<1x16xf32>
    %c0_230 = arith.constant 0 : index
    %c0_231 = arith.constant 0 : index
    %362 = vector.load %arg25[%c0_230, %c0_231] : memref<9x16xf32, #tpu.memory_space<vmem>>, vector<1x16xf32>
    %cst_232 = arith.constant dense<0.000000e+00> : vector<10xf32>
    %363 = vector.multi_reduction <add>, %360, %cst_232 [1] : vector<10x16xf32> to vector<10xf32>
    %364 = vector.shape_cast %363 : vector<10xf32> to vector<10x1xf32>
    %cst_233 = arith.constant 1.600000e+01 : f32
    %365 = vector.broadcast %cst_233 : f32 to vector<10x1xf32>
    %366 = arith.divf %364, %365 : vector<10x1xf32>
    %367 = vector.broadcast %366 : vector<10x1xf32> to vector<10x16xf32>
    %368 = arith.subf %360, %367 : vector<10x16xf32>
    %369 = arith.mulf %368, %368 : vector<10x16xf32>
    %cst_234 = arith.constant dense<0.000000e+00> : vector<10xf32>
    %370 = vector.multi_reduction <add>, %369, %cst_234 [1] : vector<10x16xf32> to vector<10xf32>
    %371 = vector.shape_cast %370 : vector<10xf32> to vector<10x1xf32>
    %cst_235 = arith.constant 1.600000e+01 : f32
    %372 = vector.broadcast %cst_235 : f32 to vector<10x1xf32>
    %373 = arith.divf %371, %372 : vector<10x1xf32>
    %374 = vector.broadcast %366 : vector<10x1xf32> to vector<10x16xf32>
    %375 = arith.subf %360, %374 : vector<10x16xf32>
    %cst_236 = arith.constant 9.99999974E-6 : f32
    %376 = vector.broadcast %cst_236 : f32 to vector<10x1xf32>
    %377 = arith.addf %373, %376 : vector<10x1xf32>
    %378 = math.rsqrt %377 : vector<10x1xf32>
    %379 = vector.broadcast %378 : vector<10x1xf32> to vector<10x16xf32>
    %380 = arith.mulf %375, %379 : vector<10x16xf32>
    %381 = vector.broadcast %361 : vector<1x16xf32> to vector<10x16xf32>
    %382 = arith.mulf %380, %381 : vector<10x16xf32>
    %383 = vector.broadcast %362 : vector<1x16xf32> to vector<10x16xf32>
    %384 = arith.addf %382, %383 : vector<10x16xf32>
    %385 = arith.addf %384, %275 : vector<10x16xf32>
    %386 = arith.addf %274, %276 : vector<8x16xf32>
    %c1_237 = arith.constant 1 : index
    %c0_238 = arith.constant 0 : index
    %c0_239 = arith.constant 0 : index
    %387 = vector.load %arg23[%c1_237, %c0_238, %c0_239] : memref<7x1x16xf32, #tpu.memory_space<vmem>>, vector<1x1x16xf32>
    %388 = vector.shape_cast %387 : vector<1x1x16xf32> to vector<1x16xf32>
    %c6_240 = arith.constant 6 : index
    %c0_241 = arith.constant 0 : index
    %c0_242 = arith.constant 0 : index
    %389 = vector.load %arg20[%c6_240, %c0_241, %c0_242] : memref<42x16x8xf32, #tpu.memory_space<vmem>>, vector<1x16x8xf32>
    %390 = vector.shape_cast %389 : vector<1x16x8xf32> to vector<16x8xf32>
    %cst_243 = arith.constant dense<0.000000e+00> : vector<10x8xf32>
    %391 = tpu.matmul %385, %390, %cst_243 {dimension_numbers = #tpu.dot_dimension_numbers<[1], [0], [0], [1], [0, 0, 1, 1], [], []>} : vector<10x16xf32>, vector<16x8xf32>, vector<10x8xf32> -> vector<10x8xf32>
    %c6_244 = arith.constant 6 : index
    %c0_245 = arith.constant 0 : index
    %c0_246 = arith.constant 0 : index
    %392 = vector.load %arg21[%c6_244, %c0_245, %c0_246] : memref<42x1x8xf32, #tpu.memory_space<vmem>>, vector<1x1x8xf32>
    %393 = vector.shape_cast %392 : vector<1x1x8xf32> to vector<1x8xf32>
    %394 = vector.broadcast %393 : vector<1x8xf32> to vector<10x8xf32>
    %395 = arith.addf %391, %394 : vector<10x8xf32>
    %c8 = arith.constant 8 : index
    %c0_247 = arith.constant 0 : index
    %c0_248 = arith.constant 0 : index
    %396 = vector.load %arg20[%c8, %c0_247, %c0_248] : memref<42x16x8xf32, #tpu.memory_space<vmem>>, vector<1x16x8xf32>
    %397 = vector.shape_cast %396 : vector<1x16x8xf32> to vector<16x8xf32>
    %cst_249 = arith.constant dense<0.000000e+00> : vector<8x8xf32>
    %398 = tpu.matmul %386, %397, %cst_249 {dimension_numbers = #tpu.dot_dimension_numbers<[1], [0], [0], [1], [0, 0, 1, 1], [], []>} : vector<8x16xf32>, vector<16x8xf32>, vector<8x8xf32> -> vector<8x8xf32>
    %c8_250 = arith.constant 8 : index
    %c0_251 = arith.constant 0 : index
    %c0_252 = arith.constant 0 : index
    %399 = vector.load %arg21[%c8_250, %c0_251, %c0_252] : memref<42x1x8xf32, #tpu.memory_space<vmem>>, vector<1x1x8xf32>
    %400 = vector.shape_cast %399 : vector<1x1x8xf32> to vector<1x8xf32>
    %401 = vector.broadcast %400 : vector<1x8xf32> to vector<8x8xf32>
    %402 = arith.addf %398, %401 : vector<8x8xf32>
    %c10 = arith.constant 10 : index
    %c0_253 = arith.constant 0 : index
    %c0_254 = arith.constant 0 : index
    %403 = vector.load %arg20[%c10, %c0_253, %c0_254] : memref<42x16x8xf32, #tpu.memory_space<vmem>>, vector<1x16x8xf32>
    %404 = vector.shape_cast %403 : vector<1x16x8xf32> to vector<16x8xf32>
    %cst_255 = arith.constant dense<0.000000e+00> : vector<8x8xf32>
    %405 = tpu.matmul %274, %404, %cst_255 {dimension_numbers = #tpu.dot_dimension_numbers<[1], [0], [0], [1], [0, 0, 1, 1], [], []>} : vector<8x16xf32>, vector<16x8xf32>, vector<8x8xf32> -> vector<8x8xf32>
    %c10_256 = arith.constant 10 : index
    %c0_257 = arith.constant 0 : index
    %c0_258 = arith.constant 0 : index
    %406 = vector.load %arg21[%c10_256, %c0_257, %c0_258] : memref<42x1x8xf32, #tpu.memory_space<vmem>>, vector<1x1x8xf32>
    %407 = vector.shape_cast %406 : vector<1x1x8xf32> to vector<1x8xf32>
    %408 = vector.broadcast %407 : vector<1x8xf32> to vector<8x8xf32>
    %409 = arith.addf %405, %408 : vector<8x8xf32>
    %cst_259 = arith.constant dense<0.000000e+00> : vector<10x8xf32>
    %410 = tpu.matmul %395, %402, %cst_259 {dimension_numbers = #tpu.dot_dimension_numbers<[1], [1], [0], [0], [0, 0, 1, 0], [], []>} : vector<10x8xf32>, vector<8x8xf32>, vector<10x8xf32> -> vector<10x8xf32>
    %cst_260 = arith.constant 0.353553385 : f32
    %411 = vector.broadcast %cst_260 : f32 to vector<10x8xf32>
    %412 = arith.mulf %410, %411 : vector<10x8xf32>
    %413 = arith.addf %412, %278 : vector<10x8xf32>
    %cst_261 = arith.constant dense<0xFF800000> : vector<10xf32>
    %414 = vector.multi_reduction <maximumf>, %413, %cst_261 [1] : vector<10x8xf32> to vector<10xf32>
    %415 = vector.shape_cast %414 : vector<10xf32> to vector<10x1xf32>
    %416 = vector.broadcast %415 : vector<10x1xf32> to vector<10x8xf32>
    %417 = arith.subf %413, %416 : vector<10x8xf32>
    %418 = math.exp %417 : vector<10x8xf32>
    %cst_262 = arith.constant dense<0.000000e+00> : vector<10xf32>
    %419 = vector.multi_reduction <add>, %418, %cst_262 [1] : vector<10x8xf32> to vector<10xf32>
    %420 = vector.shape_cast %419 : vector<10xf32> to vector<10x1xf32>
    %421 = vector.broadcast %420 : vector<10x1xf32> to vector<10x8xf32>
    %422 = arith.divf %418, %421 : vector<10x8xf32>
    %cst_263 = arith.constant dense<0.000000e+00> : vector<10x8xf32>
    %423 = tpu.matmul %422, %409, %cst_263 {dimension_numbers = #tpu.dot_dimension_numbers<[1], [0], [0], [1], [0, 0, 1, 1], [], []>} : vector<10x8xf32>, vector<8x8xf32>, vector<10x8xf32> -> vector<10x8xf32>
    %c2_264 = arith.constant 2 : index
    %c0_265 = arith.constant 0 : index
    %c0_266 = arith.constant 0 : index
    %424 = vector.load %arg22[%c2_264, %c0_265, %c0_266] : memref<14x8x16xf32, #tpu.memory_space<vmem>>, vector<1x8x16xf32>
    %425 = vector.shape_cast %424 : vector<1x8x16xf32> to vector<8x16xf32>
    %cst_267 = arith.constant dense<0.000000e+00> : vector<10x16xf32>
    %426 = tpu.matmul %423, %425, %cst_267 {dimension_numbers = #tpu.dot_dimension_numbers<[1], [0], [0], [1], [0, 0, 1, 1], [], []>} : vector<10x8xf32>, vector<8x16xf32>, vector<10x16xf32> -> vector<10x16xf32>
    %c7_268 = arith.constant 7 : index
    %c0_269 = arith.constant 0 : index
    %c0_270 = arith.constant 0 : index
    %427 = vector.load %arg20[%c7_268, %c0_269, %c0_270] : memref<42x16x8xf32, #tpu.memory_space<vmem>>, vector<1x16x8xf32>
    %428 = vector.shape_cast %427 : vector<1x16x8xf32> to vector<16x8xf32>
    %cst_271 = arith.constant dense<0.000000e+00> : vector<10x8xf32>
    %429 = tpu.matmul %385, %428, %cst_271 {dimension_numbers = #tpu.dot_dimension_numbers<[1], [0], [0], [1], [0, 0, 1, 1], [], []>} : vector<10x16xf32>, vector<16x8xf32>, vector<10x8xf32> -> vector<10x8xf32>
    %c7_272 = arith.constant 7 : index
    %c0_273 = arith.constant 0 : index
    %c0_274 = arith.constant 0 : index
    %430 = vector.load %arg21[%c7_272, %c0_273, %c0_274] : memref<42x1x8xf32, #tpu.memory_space<vmem>>, vector<1x1x8xf32>
    %431 = vector.shape_cast %430 : vector<1x1x8xf32> to vector<1x8xf32>
    %432 = vector.broadcast %431 : vector<1x8xf32> to vector<10x8xf32>
    %433 = arith.addf %429, %432 : vector<10x8xf32>
    %c9 = arith.constant 9 : index
    %c0_275 = arith.constant 0 : index
    %c0_276 = arith.constant 0 : index
    %434 = vector.load %arg20[%c9, %c0_275, %c0_276] : memref<42x16x8xf32, #tpu.memory_space<vmem>>, vector<1x16x8xf32>
    %435 = vector.shape_cast %434 : vector<1x16x8xf32> to vector<16x8xf32>
    %cst_277 = arith.constant dense<0.000000e+00> : vector<8x8xf32>
    %436 = tpu.matmul %386, %435, %cst_277 {dimension_numbers = #tpu.dot_dimension_numbers<[1], [0], [0], [1], [0, 0, 1, 1], [], []>} : vector<8x16xf32>, vector<16x8xf32>, vector<8x8xf32> -> vector<8x8xf32>
    %c9_278 = arith.constant 9 : index
    %c0_279 = arith.constant 0 : index
    %c0_280 = arith.constant 0 : index
    %437 = vector.load %arg21[%c9_278, %c0_279, %c0_280] : memref<42x1x8xf32, #tpu.memory_space<vmem>>, vector<1x1x8xf32>
    %438 = vector.shape_cast %437 : vector<1x1x8xf32> to vector<1x8xf32>
    %439 = vector.broadcast %438 : vector<1x8xf32> to vector<8x8xf32>
    %440 = arith.addf %436, %439 : vector<8x8xf32>
    %c11 = arith.constant 11 : index
    %c0_281 = arith.constant 0 : index
    %c0_282 = arith.constant 0 : index
    %441 = vector.load %arg20[%c11, %c0_281, %c0_282] : memref<42x16x8xf32, #tpu.memory_space<vmem>>, vector<1x16x8xf32>
    %442 = vector.shape_cast %441 : vector<1x16x8xf32> to vector<16x8xf32>
    %cst_283 = arith.constant dense<0.000000e+00> : vector<8x8xf32>
    %443 = tpu.matmul %274, %442, %cst_283 {dimension_numbers = #tpu.dot_dimension_numbers<[1], [0], [0], [1], [0, 0, 1, 1], [], []>} : vector<8x16xf32>, vector<16x8xf32>, vector<8x8xf32> -> vector<8x8xf32>
    %c11_284 = arith.constant 11 : index
    %c0_285 = arith.constant 0 : index
    %c0_286 = arith.constant 0 : index
    %444 = vector.load %arg21[%c11_284, %c0_285, %c0_286] : memref<42x1x8xf32, #tpu.memory_space<vmem>>, vector<1x1x8xf32>
    %445 = vector.shape_cast %444 : vector<1x1x8xf32> to vector<1x8xf32>
    %446 = vector.broadcast %445 : vector<1x8xf32> to vector<8x8xf32>
    %447 = arith.addf %443, %446 : vector<8x8xf32>
    %cst_287 = arith.constant dense<0.000000e+00> : vector<10x8xf32>
    %448 = tpu.matmul %433, %440, %cst_287 {dimension_numbers = #tpu.dot_dimension_numbers<[1], [1], [0], [0], [0, 0, 1, 0], [], []>} : vector<10x8xf32>, vector<8x8xf32>, vector<10x8xf32> -> vector<10x8xf32>
    %cst_288 = arith.constant 0.353553385 : f32
    %449 = vector.broadcast %cst_288 : f32 to vector<10x8xf32>
    %450 = arith.mulf %448, %449 : vector<10x8xf32>
    %451 = arith.addf %450, %278 : vector<10x8xf32>
    %cst_289 = arith.constant dense<0xFF800000> : vector<10xf32>
    %452 = vector.multi_reduction <maximumf>, %451, %cst_289 [1] : vector<10x8xf32> to vector<10xf32>
    %453 = vector.shape_cast %452 : vector<10xf32> to vector<10x1xf32>
    %454 = vector.broadcast %453 : vector<10x1xf32> to vector<10x8xf32>
    %455 = arith.subf %451, %454 : vector<10x8xf32>
    %456 = math.exp %455 : vector<10x8xf32>
    %cst_290 = arith.constant dense<0.000000e+00> : vector<10xf32>
    %457 = vector.multi_reduction <add>, %456, %cst_290 [1] : vector<10x8xf32> to vector<10xf32>
    %458 = vector.shape_cast %457 : vector<10xf32> to vector<10x1xf32>
    %459 = vector.broadcast %458 : vector<10x1xf32> to vector<10x8xf32>
    %460 = arith.divf %456, %459 : vector<10x8xf32>
    %cst_291 = arith.constant dense<0.000000e+00> : vector<10x8xf32>
    %461 = tpu.matmul %460, %447, %cst_291 {dimension_numbers = #tpu.dot_dimension_numbers<[1], [0], [0], [1], [0, 0, 1, 1], [], []>} : vector<10x8xf32>, vector<8x8xf32>, vector<10x8xf32> -> vector<10x8xf32>
    %c3_292 = arith.constant 3 : index
    %c0_293 = arith.constant 0 : index
    %c0_294 = arith.constant 0 : index
    %462 = vector.load %arg22[%c3_292, %c0_293, %c0_294] : memref<14x8x16xf32, #tpu.memory_space<vmem>>, vector<1x8x16xf32>
    %463 = vector.shape_cast %462 : vector<1x8x16xf32> to vector<8x16xf32>
    %cst_295 = arith.constant dense<0.000000e+00> : vector<10x16xf32>
    %464 = tpu.matmul %461, %463, %cst_295 {dimension_numbers = #tpu.dot_dimension_numbers<[1], [0], [0], [1], [0, 0, 1, 1], [], []>} : vector<10x8xf32>, vector<8x16xf32>, vector<10x16xf32> -> vector<10x16xf32>
    %465 = arith.addf %426, %464 : vector<10x16xf32>
    %466 = vector.broadcast %388 : vector<1x16xf32> to vector<10x16xf32>
    %467 = arith.addf %465, %466 : vector<10x16xf32>
    %468 = arith.addf %384, %467 : vector<10x16xf32>
    %c1_296 = arith.constant 1 : index
    %c0_297 = arith.constant 0 : index
    %469 = vector.load %arg24[%c1_296, %c0_297] : memref<9x16xf32, #tpu.memory_space<vmem>>, vector<1x16xf32>
    %c1_298 = arith.constant 1 : index
    %c0_299 = arith.constant 0 : index
    %470 = vector.load %arg25[%c1_298, %c0_299] : memref<9x16xf32, #tpu.memory_space<vmem>>, vector<1x16xf32>
    %cst_300 = arith.constant dense<0.000000e+00> : vector<10xf32>
    %471 = vector.multi_reduction <add>, %468, %cst_300 [1] : vector<10x16xf32> to vector<10xf32>
    %472 = vector.shape_cast %471 : vector<10xf32> to vector<10x1xf32>
    %cst_301 = arith.constant 1.600000e+01 : f32
    %473 = vector.broadcast %cst_301 : f32 to vector<10x1xf32>
    %474 = arith.divf %472, %473 : vector<10x1xf32>
    %475 = vector.broadcast %474 : vector<10x1xf32> to vector<10x16xf32>
    %476 = arith.subf %468, %475 : vector<10x16xf32>
    %477 = arith.mulf %476, %476 : vector<10x16xf32>
    %cst_302 = arith.constant dense<0.000000e+00> : vector<10xf32>
    %478 = vector.multi_reduction <add>, %477, %cst_302 [1] : vector<10x16xf32> to vector<10xf32>
    %479 = vector.shape_cast %478 : vector<10xf32> to vector<10x1xf32>
    %cst_303 = arith.constant 1.600000e+01 : f32
    %480 = vector.broadcast %cst_303 : f32 to vector<10x1xf32>
    %481 = arith.divf %479, %480 : vector<10x1xf32>
    %482 = vector.broadcast %474 : vector<10x1xf32> to vector<10x16xf32>
    %483 = arith.subf %468, %482 : vector<10x16xf32>
    %cst_304 = arith.constant 9.99999974E-6 : f32
    %484 = vector.broadcast %cst_304 : f32 to vector<10x1xf32>
    %485 = arith.addf %481, %484 : vector<10x1xf32>
    %486 = math.rsqrt %485 : vector<10x1xf32>
    %487 = vector.broadcast %486 : vector<10x1xf32> to vector<10x16xf32>
    %488 = arith.mulf %483, %487 : vector<10x16xf32>
    %489 = vector.broadcast %469 : vector<1x16xf32> to vector<10x16xf32>
    %490 = arith.mulf %488, %489 : vector<10x16xf32>
    %491 = vector.broadcast %470 : vector<1x16xf32> to vector<10x16xf32>
    %492 = arith.addf %490, %491 : vector<10x16xf32>
    %c0_305 = arith.constant 0 : index
    %c0_306 = arith.constant 0 : index
    %c0_307 = arith.constant 0 : index
    %493 = vector.load %arg26[%c0_305, %c0_306, %c0_307] : memref<2x16x32xf32, #tpu.memory_space<vmem>>, vector<1x16x32xf32>
    %494 = vector.shape_cast %493 : vector<1x16x32xf32> to vector<16x32xf32>
    %cst_308 = arith.constant dense<0.000000e+00> : vector<10x32xf32>
    %495 = tpu.matmul %492, %494, %cst_308 {dimension_numbers = #tpu.dot_dimension_numbers<[1], [0], [0], [1], [0, 0, 1, 1], [], []>} : vector<10x16xf32>, vector<16x32xf32>, vector<10x32xf32> -> vector<10x32xf32>
    %c0_309 = arith.constant 0 : index
    %c0_310 = arith.constant 0 : index
    %c0_311 = arith.constant 0 : index
    %496 = vector.load %arg27[%c0_309, %c0_310, %c0_311] : memref<2x1x32xf32, #tpu.memory_space<vmem>>, vector<1x1x32xf32>
    %497 = vector.shape_cast %496 : vector<1x1x32xf32> to vector<1x32xf32>
    %498 = vector.broadcast %497 : vector<1x32xf32> to vector<10x32xf32>
    %499 = arith.addf %495, %498 : vector<10x32xf32>
    %cst_312 = arith.constant 0.000000e+00 : f32
    %500 = vector.broadcast %cst_312 : f32 to vector<10x32xf32>
    %501 = arith.maximumf %499, %500 : vector<10x32xf32>
    %c0_313 = arith.constant 0 : index
    %c0_314 = arith.constant 0 : index
    %c0_315 = arith.constant 0 : index
    %502 = vector.load %arg28[%c0_313, %c0_314, %c0_315] : memref<2x32x16xf32, #tpu.memory_space<vmem>>, vector<1x32x16xf32>
    %503 = vector.shape_cast %502 : vector<1x32x16xf32> to vector<32x16xf32>
    %cst_316 = arith.constant dense<0.000000e+00> : vector<10x16xf32>
    %504 = tpu.matmul %501, %503, %cst_316 {dimension_numbers = #tpu.dot_dimension_numbers<[1], [0], [0], [1], [0, 0, 1, 1], [], []>} : vector<10x32xf32>, vector<32x16xf32>, vector<10x16xf32> -> vector<10x16xf32>
    %c0_317 = arith.constant 0 : index
    %c0_318 = arith.constant 0 : index
    %c0_319 = arith.constant 0 : index
    %505 = vector.load %arg29[%c0_317, %c0_318, %c0_319] : memref<2x1x16xf32, #tpu.memory_space<vmem>>, vector<1x1x16xf32>
    %506 = vector.shape_cast %505 : vector<1x1x16xf32> to vector<1x16xf32>
    %507 = vector.broadcast %506 : vector<1x16xf32> to vector<10x16xf32>
    %508 = arith.addf %504, %507 : vector<10x16xf32>
    %509 = arith.addf %492, %508 : vector<10x16xf32>
    %c2_320 = arith.constant 2 : index
    %c0_321 = arith.constant 0 : index
    %510 = vector.load %arg24[%c2_320, %c0_321] : memref<9x16xf32, #tpu.memory_space<vmem>>, vector<1x16xf32>
    %c2_322 = arith.constant 2 : index
    %c0_323 = arith.constant 0 : index
    %511 = vector.load %arg25[%c2_322, %c0_323] : memref<9x16xf32, #tpu.memory_space<vmem>>, vector<1x16xf32>
    %cst_324 = arith.constant dense<0.000000e+00> : vector<10xf32>
    %512 = vector.multi_reduction <add>, %509, %cst_324 [1] : vector<10x16xf32> to vector<10xf32>
    %513 = vector.shape_cast %512 : vector<10xf32> to vector<10x1xf32>
    %cst_325 = arith.constant 1.600000e+01 : f32
    %514 = vector.broadcast %cst_325 : f32 to vector<10x1xf32>
    %515 = arith.divf %513, %514 : vector<10x1xf32>
    %516 = vector.broadcast %515 : vector<10x1xf32> to vector<10x16xf32>
    %517 = arith.subf %509, %516 : vector<10x16xf32>
    %518 = arith.mulf %517, %517 : vector<10x16xf32>
    %cst_326 = arith.constant dense<0.000000e+00> : vector<10xf32>
    %519 = vector.multi_reduction <add>, %518, %cst_326 [1] : vector<10x16xf32> to vector<10xf32>
    %520 = vector.shape_cast %519 : vector<10xf32> to vector<10x1xf32>
    %cst_327 = arith.constant 1.600000e+01 : f32
    %521 = vector.broadcast %cst_327 : f32 to vector<10x1xf32>
    %522 = arith.divf %520, %521 : vector<10x1xf32>
    %523 = vector.broadcast %515 : vector<10x1xf32> to vector<10x16xf32>
    %524 = arith.subf %509, %523 : vector<10x16xf32>
    %cst_328 = arith.constant 9.99999974E-6 : f32
    %525 = vector.broadcast %cst_328 : f32 to vector<10x1xf32>
    %526 = arith.addf %522, %525 : vector<10x1xf32>
    %527 = math.rsqrt %526 : vector<10x1xf32>
    %528 = vector.broadcast %527 : vector<10x1xf32> to vector<10x16xf32>
    %529 = arith.mulf %524, %528 : vector<10x16xf32>
    %530 = vector.broadcast %510 : vector<1x16xf32> to vector<10x16xf32>
    %531 = arith.mulf %529, %530 : vector<10x16xf32>
    %532 = vector.broadcast %511 : vector<1x16xf32> to vector<10x16xf32>
    %533 = arith.addf %531, %532 : vector<10x16xf32>
    %534 = arith.addf %533, %275 : vector<10x16xf32>
    %535 = arith.addf %274, %276 : vector<8x16xf32>
    %c2_329 = arith.constant 2 : index
    %c0_330 = arith.constant 0 : index
    %c0_331 = arith.constant 0 : index
    %536 = vector.load %arg23[%c2_329, %c0_330, %c0_331] : memref<7x1x16xf32, #tpu.memory_space<vmem>>, vector<1x1x16xf32>
    %537 = vector.shape_cast %536 : vector<1x1x16xf32> to vector<1x16xf32>
    %c12 = arith.constant 12 : index
    %c0_332 = arith.constant 0 : index
    %c0_333 = arith.constant 0 : index
    %538 = vector.load %arg20[%c12, %c0_332, %c0_333] : memref<42x16x8xf32, #tpu.memory_space<vmem>>, vector<1x16x8xf32>
    %539 = vector.shape_cast %538 : vector<1x16x8xf32> to vector<16x8xf32>
    %cst_334 = arith.constant dense<0.000000e+00> : vector<8x8xf32>
    %540 = tpu.matmul %535, %539, %cst_334 {dimension_numbers = #tpu.dot_dimension_numbers<[1], [0], [0], [1], [0, 0, 1, 1], [], []>} : vector<8x16xf32>, vector<16x8xf32>, vector<8x8xf32> -> vector<8x8xf32>
    %c12_335 = arith.constant 12 : index
    %c0_336 = arith.constant 0 : index
    %c0_337 = arith.constant 0 : index
    %541 = vector.load %arg21[%c12_335, %c0_336, %c0_337] : memref<42x1x8xf32, #tpu.memory_space<vmem>>, vector<1x1x8xf32>
    %542 = vector.shape_cast %541 : vector<1x1x8xf32> to vector<1x8xf32>
    %543 = vector.broadcast %542 : vector<1x8xf32> to vector<8x8xf32>
    %544 = arith.addf %540, %543 : vector<8x8xf32>
    %c14 = arith.constant 14 : index
    %c0_338 = arith.constant 0 : index
    %c0_339 = arith.constant 0 : index
    %545 = vector.load %arg20[%c14, %c0_338, %c0_339] : memref<42x16x8xf32, #tpu.memory_space<vmem>>, vector<1x16x8xf32>
    %546 = vector.shape_cast %545 : vector<1x16x8xf32> to vector<16x8xf32>
    %cst_340 = arith.constant dense<0.000000e+00> : vector<10x8xf32>
    %547 = tpu.matmul %534, %546, %cst_340 {dimension_numbers = #tpu.dot_dimension_numbers<[1], [0], [0], [1], [0, 0, 1, 1], [], []>} : vector<10x16xf32>, vector<16x8xf32>, vector<10x8xf32> -> vector<10x8xf32>
    %c14_341 = arith.constant 14 : index
    %c0_342 = arith.constant 0 : index
    %c0_343 = arith.constant 0 : index
    %548 = vector.load %arg21[%c14_341, %c0_342, %c0_343] : memref<42x1x8xf32, #tpu.memory_space<vmem>>, vector<1x1x8xf32>
    %549 = vector.shape_cast %548 : vector<1x1x8xf32> to vector<1x8xf32>
    %550 = vector.broadcast %549 : vector<1x8xf32> to vector<10x8xf32>
    %551 = arith.addf %547, %550 : vector<10x8xf32>
    %c16 = arith.constant 16 : index
    %c0_344 = arith.constant 0 : index
    %c0_345 = arith.constant 0 : index
    %552 = vector.load %arg20[%c16, %c0_344, %c0_345] : memref<42x16x8xf32, #tpu.memory_space<vmem>>, vector<1x16x8xf32>
    %553 = vector.shape_cast %552 : vector<1x16x8xf32> to vector<16x8xf32>
    %cst_346 = arith.constant dense<0.000000e+00> : vector<10x8xf32>
    %554 = tpu.matmul %533, %553, %cst_346 {dimension_numbers = #tpu.dot_dimension_numbers<[1], [0], [0], [1], [0, 0, 1, 1], [], []>} : vector<10x16xf32>, vector<16x8xf32>, vector<10x8xf32> -> vector<10x8xf32>
    %c16_347 = arith.constant 16 : index
    %c0_348 = arith.constant 0 : index
    %c0_349 = arith.constant 0 : index
    %555 = vector.load %arg21[%c16_347, %c0_348, %c0_349] : memref<42x1x8xf32, #tpu.memory_space<vmem>>, vector<1x1x8xf32>
    %556 = vector.shape_cast %555 : vector<1x1x8xf32> to vector<1x8xf32>
    %557 = vector.broadcast %556 : vector<1x8xf32> to vector<10x8xf32>
    %558 = arith.addf %554, %557 : vector<10x8xf32>
    %cst_350 = arith.constant dense<0.000000e+00> : vector<8x10xf32>
    %559 = tpu.matmul %544, %551, %cst_350 {dimension_numbers = #tpu.dot_dimension_numbers<[1], [1], [0], [0], [0, 0, 1, 0], [], []>} : vector<8x8xf32>, vector<10x8xf32>, vector<8x10xf32> -> vector<8x10xf32>
    %cst_351 = arith.constant 0.353553385 : f32
    %560 = vector.broadcast %cst_351 : f32 to vector<8x10xf32>
    %561 = arith.mulf %559, %560 : vector<8x10xf32>
    %562 = arith.addf %561, %279 : vector<8x10xf32>
    %cst_352 = arith.constant dense<0xFF800000> : vector<8xf32>
    %563 = vector.multi_reduction <maximumf>, %562, %cst_352 [1] : vector<8x10xf32> to vector<8xf32>
    %564 = vector.shape_cast %563 : vector<8xf32> to vector<8x1xf32>
    %565 = vector.broadcast %564 : vector<8x1xf32> to vector<8x10xf32>
    %566 = arith.subf %562, %565 : vector<8x10xf32>
    %567 = math.exp %566 : vector<8x10xf32>
    %cst_353 = arith.constant dense<0.000000e+00> : vector<8xf32>
    %568 = vector.multi_reduction <add>, %567, %cst_353 [1] : vector<8x10xf32> to vector<8xf32>
    %569 = vector.shape_cast %568 : vector<8xf32> to vector<8x1xf32>
    %570 = vector.broadcast %569 : vector<8x1xf32> to vector<8x10xf32>
    %571 = arith.divf %567, %570 : vector<8x10xf32>
    %cst_354 = arith.constant dense<0.000000e+00> : vector<8x8xf32>
    %572 = tpu.matmul %571, %558, %cst_354 {dimension_numbers = #tpu.dot_dimension_numbers<[1], [0], [0], [1], [0, 0, 1, 1], [], []>} : vector<8x10xf32>, vector<10x8xf32>, vector<8x8xf32> -> vector<8x8xf32>
    %c4_355 = arith.constant 4 : index
    %c0_356 = arith.constant 0 : index
    %c0_357 = arith.constant 0 : index
    %573 = vector.load %arg22[%c4_355, %c0_356, %c0_357] : memref<14x8x16xf32, #tpu.memory_space<vmem>>, vector<1x8x16xf32>
    %574 = vector.shape_cast %573 : vector<1x8x16xf32> to vector<8x16xf32>
    %cst_358 = arith.constant dense<0.000000e+00> : vector<8x16xf32>
    %575 = tpu.matmul %572, %574, %cst_358 {dimension_numbers = #tpu.dot_dimension_numbers<[1], [0], [0], [1], [0, 0, 1, 1], [], []>} : vector<8x8xf32>, vector<8x16xf32>, vector<8x16xf32> -> vector<8x16xf32>
    %c13 = arith.constant 13 : index
    %c0_359 = arith.constant 0 : index
    %c0_360 = arith.constant 0 : index
    %576 = vector.load %arg20[%c13, %c0_359, %c0_360] : memref<42x16x8xf32, #tpu.memory_space<vmem>>, vector<1x16x8xf32>
    %577 = vector.shape_cast %576 : vector<1x16x8xf32> to vector<16x8xf32>
    %cst_361 = arith.constant dense<0.000000e+00> : vector<8x8xf32>
    %578 = tpu.matmul %535, %577, %cst_361 {dimension_numbers = #tpu.dot_dimension_numbers<[1], [0], [0], [1], [0, 0, 1, 1], [], []>} : vector<8x16xf32>, vector<16x8xf32>, vector<8x8xf32> -> vector<8x8xf32>
    %c13_362 = arith.constant 13 : index
    %c0_363 = arith.constant 0 : index
    %c0_364 = arith.constant 0 : index
    %579 = vector.load %arg21[%c13_362, %c0_363, %c0_364] : memref<42x1x8xf32, #tpu.memory_space<vmem>>, vector<1x1x8xf32>
    %580 = vector.shape_cast %579 : vector<1x1x8xf32> to vector<1x8xf32>
    %581 = vector.broadcast %580 : vector<1x8xf32> to vector<8x8xf32>
    %582 = arith.addf %578, %581 : vector<8x8xf32>
    %c15 = arith.constant 15 : index
    %c0_365 = arith.constant 0 : index
    %c0_366 = arith.constant 0 : index
    %583 = vector.load %arg20[%c15, %c0_365, %c0_366] : memref<42x16x8xf32, #tpu.memory_space<vmem>>, vector<1x16x8xf32>
    %584 = vector.shape_cast %583 : vector<1x16x8xf32> to vector<16x8xf32>
    %cst_367 = arith.constant dense<0.000000e+00> : vector<10x8xf32>
    %585 = tpu.matmul %534, %584, %cst_367 {dimension_numbers = #tpu.dot_dimension_numbers<[1], [0], [0], [1], [0, 0, 1, 1], [], []>} : vector<10x16xf32>, vector<16x8xf32>, vector<10x8xf32> -> vector<10x8xf32>
    %c15_368 = arith.constant 15 : index
    %c0_369 = arith.constant 0 : index
    %c0_370 = arith.constant 0 : index
    %586 = vector.load %arg21[%c15_368, %c0_369, %c0_370] : memref<42x1x8xf32, #tpu.memory_space<vmem>>, vector<1x1x8xf32>
    %587 = vector.shape_cast %586 : vector<1x1x8xf32> to vector<1x8xf32>
    %588 = vector.broadcast %587 : vector<1x8xf32> to vector<10x8xf32>
    %589 = arith.addf %585, %588 : vector<10x8xf32>
    %c17 = arith.constant 17 : index
    %c0_371 = arith.constant 0 : index
    %c0_372 = arith.constant 0 : index
    %590 = vector.load %arg20[%c17, %c0_371, %c0_372] : memref<42x16x8xf32, #tpu.memory_space<vmem>>, vector<1x16x8xf32>
    %591 = vector.shape_cast %590 : vector<1x16x8xf32> to vector<16x8xf32>
    %cst_373 = arith.constant dense<0.000000e+00> : vector<10x8xf32>
    %592 = tpu.matmul %533, %591, %cst_373 {dimension_numbers = #tpu.dot_dimension_numbers<[1], [0], [0], [1], [0, 0, 1, 1], [], []>} : vector<10x16xf32>, vector<16x8xf32>, vector<10x8xf32> -> vector<10x8xf32>
    %c17_374 = arith.constant 17 : index
    %c0_375 = arith.constant 0 : index
    %c0_376 = arith.constant 0 : index
    %593 = vector.load %arg21[%c17_374, %c0_375, %c0_376] : memref<42x1x8xf32, #tpu.memory_space<vmem>>, vector<1x1x8xf32>
    %594 = vector.shape_cast %593 : vector<1x1x8xf32> to vector<1x8xf32>
    %595 = vector.broadcast %594 : vector<1x8xf32> to vector<10x8xf32>
    %596 = arith.addf %592, %595 : vector<10x8xf32>
    %cst_377 = arith.constant dense<0.000000e+00> : vector<8x10xf32>
    %597 = tpu.matmul %582, %589, %cst_377 {dimension_numbers = #tpu.dot_dimension_numbers<[1], [1], [0], [0], [0, 0, 1, 0], [], []>} : vector<8x8xf32>, vector<10x8xf32>, vector<8x10xf32> -> vector<8x10xf32>
    %cst_378 = arith.constant 0.353553385 : f32
    %598 = vector.broadcast %cst_378 : f32 to vector<8x10xf32>
    %599 = arith.mulf %597, %598 : vector<8x10xf32>
    %600 = arith.addf %599, %279 : vector<8x10xf32>
    %cst_379 = arith.constant dense<0xFF800000> : vector<8xf32>
    %601 = vector.multi_reduction <maximumf>, %600, %cst_379 [1] : vector<8x10xf32> to vector<8xf32>
    %602 = vector.shape_cast %601 : vector<8xf32> to vector<8x1xf32>
    %603 = vector.broadcast %602 : vector<8x1xf32> to vector<8x10xf32>
    %604 = arith.subf %600, %603 : vector<8x10xf32>
    %605 = math.exp %604 : vector<8x10xf32>
    %cst_380 = arith.constant dense<0.000000e+00> : vector<8xf32>
    %606 = vector.multi_reduction <add>, %605, %cst_380 [1] : vector<8x10xf32> to vector<8xf32>
    %607 = vector.shape_cast %606 : vector<8xf32> to vector<8x1xf32>
    %608 = vector.broadcast %607 : vector<8x1xf32> to vector<8x10xf32>
    %609 = arith.divf %605, %608 : vector<8x10xf32>
    %cst_381 = arith.constant dense<0.000000e+00> : vector<8x8xf32>
    %610 = tpu.matmul %609, %596, %cst_381 {dimension_numbers = #tpu.dot_dimension_numbers<[1], [0], [0], [1], [0, 0, 1, 1], [], []>} : vector<8x10xf32>, vector<10x8xf32>, vector<8x8xf32> -> vector<8x8xf32>
    %c5_382 = arith.constant 5 : index
    %c0_383 = arith.constant 0 : index
    %c0_384 = arith.constant 0 : index
    %611 = vector.load %arg22[%c5_382, %c0_383, %c0_384] : memref<14x8x16xf32, #tpu.memory_space<vmem>>, vector<1x8x16xf32>
    %612 = vector.shape_cast %611 : vector<1x8x16xf32> to vector<8x16xf32>
    %cst_385 = arith.constant dense<0.000000e+00> : vector<8x16xf32>
    %613 = tpu.matmul %610, %612, %cst_385 {dimension_numbers = #tpu.dot_dimension_numbers<[1], [0], [0], [1], [0, 0, 1, 1], [], []>} : vector<8x8xf32>, vector<8x16xf32>, vector<8x16xf32> -> vector<8x16xf32>
    %614 = arith.addf %575, %613 : vector<8x16xf32>
    %615 = vector.broadcast %537 : vector<1x16xf32> to vector<8x16xf32>
    %616 = arith.addf %614, %615 : vector<8x16xf32>
    %617 = arith.addf %274, %616 : vector<8x16xf32>
    %c3_386 = arith.constant 3 : index
    %c0_387 = arith.constant 0 : index
    %618 = vector.load %arg24[%c3_386, %c0_387] : memref<9x16xf32, #tpu.memory_space<vmem>>, vector<1x16xf32>
    %c3_388 = arith.constant 3 : index
    %c0_389 = arith.constant 0 : index
    %619 = vector.load %arg25[%c3_388, %c0_389] : memref<9x16xf32, #tpu.memory_space<vmem>>, vector<1x16xf32>
    %cst_390 = arith.constant dense<0.000000e+00> : vector<8xf32>
    %620 = vector.multi_reduction <add>, %617, %cst_390 [1] : vector<8x16xf32> to vector<8xf32>
    %621 = vector.shape_cast %620 : vector<8xf32> to vector<8x1xf32>
    %cst_391 = arith.constant 1.600000e+01 : f32
    %622 = vector.broadcast %cst_391 : f32 to vector<8x1xf32>
    %623 = arith.divf %621, %622 : vector<8x1xf32>
    %624 = vector.broadcast %623 : vector<8x1xf32> to vector<8x16xf32>
    %625 = arith.subf %617, %624 : vector<8x16xf32>
    %626 = arith.mulf %625, %625 : vector<8x16xf32>
    %cst_392 = arith.constant dense<0.000000e+00> : vector<8xf32>
    %627 = vector.multi_reduction <add>, %626, %cst_392 [1] : vector<8x16xf32> to vector<8xf32>
    %628 = vector.shape_cast %627 : vector<8xf32> to vector<8x1xf32>
    %cst_393 = arith.constant 1.600000e+01 : f32
    %629 = vector.broadcast %cst_393 : f32 to vector<8x1xf32>
    %630 = arith.divf %628, %629 : vector<8x1xf32>
    %631 = vector.broadcast %623 : vector<8x1xf32> to vector<8x16xf32>
    %632 = arith.subf %617, %631 : vector<8x16xf32>
    %cst_394 = arith.constant 9.99999974E-6 : f32
    %633 = vector.broadcast %cst_394 : f32 to vector<8x1xf32>
    %634 = arith.addf %630, %633 : vector<8x1xf32>
    %635 = math.rsqrt %634 : vector<8x1xf32>
    %636 = vector.broadcast %635 : vector<8x1xf32> to vector<8x16xf32>
    %637 = arith.mulf %632, %636 : vector<8x16xf32>
    %638 = vector.broadcast %618 : vector<1x16xf32> to vector<8x16xf32>
    %639 = arith.mulf %637, %638 : vector<8x16xf32>
    %640 = vector.broadcast %619 : vector<1x16xf32> to vector<8x16xf32>
    %641 = arith.addf %639, %640 : vector<8x16xf32>
    %642 = arith.addf %533, %275 : vector<10x16xf32>
    %c3_395 = arith.constant 3 : index
    %c0_396 = arith.constant 0 : index
    %c0_397 = arith.constant 0 : index
    %643 = vector.load %arg23[%c3_395, %c0_396, %c0_397] : memref<7x1x16xf32, #tpu.memory_space<vmem>>, vector<1x1x16xf32>
    %644 = vector.shape_cast %643 : vector<1x1x16xf32> to vector<1x16xf32>
    %c18 = arith.constant 18 : index
    %c0_398 = arith.constant 0 : index
    %c0_399 = arith.constant 0 : index
    %645 = vector.load %arg20[%c18, %c0_398, %c0_399] : memref<42x16x8xf32, #tpu.memory_space<vmem>>, vector<1x16x8xf32>
    %646 = vector.shape_cast %645 : vector<1x16x8xf32> to vector<16x8xf32>
    %cst_400 = arith.constant dense<0.000000e+00> : vector<10x8xf32>
    %647 = tpu.matmul %642, %646, %cst_400 {dimension_numbers = #tpu.dot_dimension_numbers<[1], [0], [0], [1], [0, 0, 1, 1], [], []>} : vector<10x16xf32>, vector<16x8xf32>, vector<10x8xf32> -> vector<10x8xf32>
    %c18_401 = arith.constant 18 : index
    %c0_402 = arith.constant 0 : index
    %c0_403 = arith.constant 0 : index
    %648 = vector.load %arg21[%c18_401, %c0_402, %c0_403] : memref<42x1x8xf32, #tpu.memory_space<vmem>>, vector<1x1x8xf32>
    %649 = vector.shape_cast %648 : vector<1x1x8xf32> to vector<1x8xf32>
    %650 = vector.broadcast %649 : vector<1x8xf32> to vector<10x8xf32>
    %651 = arith.addf %647, %650 : vector<10x8xf32>
    %c20 = arith.constant 20 : index
    %c0_404 = arith.constant 0 : index
    %c0_405 = arith.constant 0 : index
    %652 = vector.load %arg20[%c20, %c0_404, %c0_405] : memref<42x16x8xf32, #tpu.memory_space<vmem>>, vector<1x16x8xf32>
    %653 = vector.shape_cast %652 : vector<1x16x8xf32> to vector<16x8xf32>
    %cst_406 = arith.constant dense<0.000000e+00> : vector<10x8xf32>
    %654 = tpu.matmul %642, %653, %cst_406 {dimension_numbers = #tpu.dot_dimension_numbers<[1], [0], [0], [1], [0, 0, 1, 1], [], []>} : vector<10x16xf32>, vector<16x8xf32>, vector<10x8xf32> -> vector<10x8xf32>
    %c20_407 = arith.constant 20 : index
    %c0_408 = arith.constant 0 : index
    %c0_409 = arith.constant 0 : index
    %655 = vector.load %arg21[%c20_407, %c0_408, %c0_409] : memref<42x1x8xf32, #tpu.memory_space<vmem>>, vector<1x1x8xf32>
    %656 = vector.shape_cast %655 : vector<1x1x8xf32> to vector<1x8xf32>
    %657 = vector.broadcast %656 : vector<1x8xf32> to vector<10x8xf32>
    %658 = arith.addf %654, %657 : vector<10x8xf32>
    %c22 = arith.constant 22 : index
    %c0_410 = arith.constant 0 : index
    %c0_411 = arith.constant 0 : index
    %659 = vector.load %arg20[%c22, %c0_410, %c0_411] : memref<42x16x8xf32, #tpu.memory_space<vmem>>, vector<1x16x8xf32>
    %660 = vector.shape_cast %659 : vector<1x16x8xf32> to vector<16x8xf32>
    %cst_412 = arith.constant dense<0.000000e+00> : vector<10x8xf32>
    %661 = tpu.matmul %533, %660, %cst_412 {dimension_numbers = #tpu.dot_dimension_numbers<[1], [0], [0], [1], [0, 0, 1, 1], [], []>} : vector<10x16xf32>, vector<16x8xf32>, vector<10x8xf32> -> vector<10x8xf32>
    %c22_413 = arith.constant 22 : index
    %c0_414 = arith.constant 0 : index
    %c0_415 = arith.constant 0 : index
    %662 = vector.load %arg21[%c22_413, %c0_414, %c0_415] : memref<42x1x8xf32, #tpu.memory_space<vmem>>, vector<1x1x8xf32>
    %663 = vector.shape_cast %662 : vector<1x1x8xf32> to vector<1x8xf32>
    %664 = vector.broadcast %663 : vector<1x8xf32> to vector<10x8xf32>
    %665 = arith.addf %661, %664 : vector<10x8xf32>
    %cst_416 = arith.constant dense<0.000000e+00> : vector<10x10xf32>
    %666 = tpu.matmul %651, %658, %cst_416 {dimension_numbers = #tpu.dot_dimension_numbers<[1], [1], [0], [0], [0, 0, 1, 0], [], []>} : vector<10x8xf32>, vector<10x8xf32>, vector<10x10xf32> -> vector<10x10xf32>
    %cst_417 = arith.constant 0.353553385 : f32
    %667 = vector.broadcast %cst_417 : f32 to vector<10x10xf32>
    %668 = arith.mulf %666, %667 : vector<10x10xf32>
    %669 = arith.addf %668, %277 : vector<10x10xf32>
    %cst_418 = arith.constant dense<0xFF800000> : vector<10xf32>
    %670 = vector.multi_reduction <maximumf>, %669, %cst_418 [1] : vector<10x10xf32> to vector<10xf32>
    %671 = vector.shape_cast %670 : vector<10xf32> to vector<10x1xf32>
    %672 = vector.broadcast %671 : vector<10x1xf32> to vector<10x10xf32>
    %673 = arith.subf %669, %672 : vector<10x10xf32>
    %674 = math.exp %673 : vector<10x10xf32>
    %cst_419 = arith.constant dense<0.000000e+00> : vector<10xf32>
    %675 = vector.multi_reduction <add>, %674, %cst_419 [1] : vector<10x10xf32> to vector<10xf32>
    %676 = vector.shape_cast %675 : vector<10xf32> to vector<10x1xf32>
    %677 = vector.broadcast %676 : vector<10x1xf32> to vector<10x10xf32>
    %678 = arith.divf %674, %677 : vector<10x10xf32>
    %cst_420 = arith.constant dense<0.000000e+00> : vector<10x8xf32>
    %679 = tpu.matmul %678, %665, %cst_420 {dimension_numbers = #tpu.dot_dimension_numbers<[1], [0], [0], [1], [0, 0, 1, 1], [], []>} : vector<10x10xf32>, vector<10x8xf32>, vector<10x8xf32> -> vector<10x8xf32>
    %c6_421 = arith.constant 6 : index
    %c0_422 = arith.constant 0 : index
    %c0_423 = arith.constant 0 : index
    %680 = vector.load %arg22[%c6_421, %c0_422, %c0_423] : memref<14x8x16xf32, #tpu.memory_space<vmem>>, vector<1x8x16xf32>
    %681 = vector.shape_cast %680 : vector<1x8x16xf32> to vector<8x16xf32>
    %cst_424 = arith.constant dense<0.000000e+00> : vector<10x16xf32>
    %682 = tpu.matmul %679, %681, %cst_424 {dimension_numbers = #tpu.dot_dimension_numbers<[1], [0], [0], [1], [0, 0, 1, 1], [], []>} : vector<10x8xf32>, vector<8x16xf32>, vector<10x16xf32> -> vector<10x16xf32>
    %c19 = arith.constant 19 : index
    %c0_425 = arith.constant 0 : index
    %c0_426 = arith.constant 0 : index
    %683 = vector.load %arg20[%c19, %c0_425, %c0_426] : memref<42x16x8xf32, #tpu.memory_space<vmem>>, vector<1x16x8xf32>
    %684 = vector.shape_cast %683 : vector<1x16x8xf32> to vector<16x8xf32>
    %cst_427 = arith.constant dense<0.000000e+00> : vector<10x8xf32>
    %685 = tpu.matmul %642, %684, %cst_427 {dimension_numbers = #tpu.dot_dimension_numbers<[1], [0], [0], [1], [0, 0, 1, 1], [], []>} : vector<10x16xf32>, vector<16x8xf32>, vector<10x8xf32> -> vector<10x8xf32>
    %c19_428 = arith.constant 19 : index
    %c0_429 = arith.constant 0 : index
    %c0_430 = arith.constant 0 : index
    %686 = vector.load %arg21[%c19_428, %c0_429, %c0_430] : memref<42x1x8xf32, #tpu.memory_space<vmem>>, vector<1x1x8xf32>
    %687 = vector.shape_cast %686 : vector<1x1x8xf32> to vector<1x8xf32>
    %688 = vector.broadcast %687 : vector<1x8xf32> to vector<10x8xf32>
    %689 = arith.addf %685, %688 : vector<10x8xf32>
    %c21 = arith.constant 21 : index
    %c0_431 = arith.constant 0 : index
    %c0_432 = arith.constant 0 : index
    %690 = vector.load %arg20[%c21, %c0_431, %c0_432] : memref<42x16x8xf32, #tpu.memory_space<vmem>>, vector<1x16x8xf32>
    %691 = vector.shape_cast %690 : vector<1x16x8xf32> to vector<16x8xf32>
    %cst_433 = arith.constant dense<0.000000e+00> : vector<10x8xf32>
    %692 = tpu.matmul %642, %691, %cst_433 {dimension_numbers = #tpu.dot_dimension_numbers<[1], [0], [0], [1], [0, 0, 1, 1], [], []>} : vector<10x16xf32>, vector<16x8xf32>, vector<10x8xf32> -> vector<10x8xf32>
    %c21_434 = arith.constant 21 : index
    %c0_435 = arith.constant 0 : index
    %c0_436 = arith.constant 0 : index
    %693 = vector.load %arg21[%c21_434, %c0_435, %c0_436] : memref<42x1x8xf32, #tpu.memory_space<vmem>>, vector<1x1x8xf32>
    %694 = vector.shape_cast %693 : vector<1x1x8xf32> to vector<1x8xf32>
    %695 = vector.broadcast %694 : vector<1x8xf32> to vector<10x8xf32>
    %696 = arith.addf %692, %695 : vector<10x8xf32>
    %c23 = arith.constant 23 : index
    %c0_437 = arith.constant 0 : index
    %c0_438 = arith.constant 0 : index
    %697 = vector.load %arg20[%c23, %c0_437, %c0_438] : memref<42x16x8xf32, #tpu.memory_space<vmem>>, vector<1x16x8xf32>
    %698 = vector.shape_cast %697 : vector<1x16x8xf32> to vector<16x8xf32>
    %cst_439 = arith.constant dense<0.000000e+00> : vector<10x8xf32>
    %699 = tpu.matmul %533, %698, %cst_439 {dimension_numbers = #tpu.dot_dimension_numbers<[1], [0], [0], [1], [0, 0, 1, 1], [], []>} : vector<10x16xf32>, vector<16x8xf32>, vector<10x8xf32> -> vector<10x8xf32>
    %c23_440 = arith.constant 23 : index
    %c0_441 = arith.constant 0 : index
    %c0_442 = arith.constant 0 : index
    %700 = vector.load %arg21[%c23_440, %c0_441, %c0_442] : memref<42x1x8xf32, #tpu.memory_space<vmem>>, vector<1x1x8xf32>
    %701 = vector.shape_cast %700 : vector<1x1x8xf32> to vector<1x8xf32>
    %702 = vector.broadcast %701 : vector<1x8xf32> to vector<10x8xf32>
    %703 = arith.addf %699, %702 : vector<10x8xf32>
    %cst_443 = arith.constant dense<0.000000e+00> : vector<10x10xf32>
    %704 = tpu.matmul %689, %696, %cst_443 {dimension_numbers = #tpu.dot_dimension_numbers<[1], [1], [0], [0], [0, 0, 1, 0], [], []>} : vector<10x8xf32>, vector<10x8xf32>, vector<10x10xf32> -> vector<10x10xf32>
    %cst_444 = arith.constant 0.353553385 : f32
    %705 = vector.broadcast %cst_444 : f32 to vector<10x10xf32>
    %706 = arith.mulf %704, %705 : vector<10x10xf32>
    %707 = arith.addf %706, %277 : vector<10x10xf32>
    %cst_445 = arith.constant dense<0xFF800000> : vector<10xf32>
    %708 = vector.multi_reduction <maximumf>, %707, %cst_445 [1] : vector<10x10xf32> to vector<10xf32>
    %709 = vector.shape_cast %708 : vector<10xf32> to vector<10x1xf32>
    %710 = vector.broadcast %709 : vector<10x1xf32> to vector<10x10xf32>
    %711 = arith.subf %707, %710 : vector<10x10xf32>
    %712 = math.exp %711 : vector<10x10xf32>
    %cst_446 = arith.constant dense<0.000000e+00> : vector<10xf32>
    %713 = vector.multi_reduction <add>, %712, %cst_446 [1] : vector<10x10xf32> to vector<10xf32>
    %714 = vector.shape_cast %713 : vector<10xf32> to vector<10x1xf32>
    %715 = vector.broadcast %714 : vector<10x1xf32> to vector<10x10xf32>
    %716 = arith.divf %712, %715 : vector<10x10xf32>
    %cst_447 = arith.constant dense<0.000000e+00> : vector<10x8xf32>
    %717 = tpu.matmul %716, %703, %cst_447 {dimension_numbers = #tpu.dot_dimension_numbers<[1], [0], [0], [1], [0, 0, 1, 1], [], []>} : vector<10x10xf32>, vector<10x8xf32>, vector<10x8xf32> -> vector<10x8xf32>
    %c7_448 = arith.constant 7 : index
    %c0_449 = arith.constant 0 : index
    %c0_450 = arith.constant 0 : index
    %718 = vector.load %arg22[%c7_448, %c0_449, %c0_450] : memref<14x8x16xf32, #tpu.memory_space<vmem>>, vector<1x8x16xf32>
    %719 = vector.shape_cast %718 : vector<1x8x16xf32> to vector<8x16xf32>
    %cst_451 = arith.constant dense<0.000000e+00> : vector<10x16xf32>
    %720 = tpu.matmul %717, %719, %cst_451 {dimension_numbers = #tpu.dot_dimension_numbers<[1], [0], [0], [1], [0, 0, 1, 1], [], []>} : vector<10x8xf32>, vector<8x16xf32>, vector<10x16xf32> -> vector<10x16xf32>
    %721 = arith.addf %682, %720 : vector<10x16xf32>
    %722 = vector.broadcast %644 : vector<1x16xf32> to vector<10x16xf32>
    %723 = arith.addf %721, %722 : vector<10x16xf32>
    %724 = arith.addf %533, %723 : vector<10x16xf32>
    %c4_452 = arith.constant 4 : index
    %c0_453 = arith.constant 0 : index
    %725 = vector.load %arg24[%c4_452, %c0_453] : memref<9x16xf32, #tpu.memory_space<vmem>>, vector<1x16xf32>
    %c4_454 = arith.constant 4 : index
    %c0_455 = arith.constant 0 : index
    %726 = vector.load %arg25[%c4_454, %c0_455] : memref<9x16xf32, #tpu.memory_space<vmem>>, vector<1x16xf32>
    %cst_456 = arith.constant dense<0.000000e+00> : vector<10xf32>
    %727 = vector.multi_reduction <add>, %724, %cst_456 [1] : vector<10x16xf32> to vector<10xf32>
    %728 = vector.shape_cast %727 : vector<10xf32> to vector<10x1xf32>
    %cst_457 = arith.constant 1.600000e+01 : f32
    %729 = vector.broadcast %cst_457 : f32 to vector<10x1xf32>
    %730 = arith.divf %728, %729 : vector<10x1xf32>
    %731 = vector.broadcast %730 : vector<10x1xf32> to vector<10x16xf32>
    %732 = arith.subf %724, %731 : vector<10x16xf32>
    %733 = arith.mulf %732, %732 : vector<10x16xf32>
    %cst_458 = arith.constant dense<0.000000e+00> : vector<10xf32>
    %734 = vector.multi_reduction <add>, %733, %cst_458 [1] : vector<10x16xf32> to vector<10xf32>
    %735 = vector.shape_cast %734 : vector<10xf32> to vector<10x1xf32>
    %cst_459 = arith.constant 1.600000e+01 : f32
    %736 = vector.broadcast %cst_459 : f32 to vector<10x1xf32>
    %737 = arith.divf %735, %736 : vector<10x1xf32>
    %738 = vector.broadcast %730 : vector<10x1xf32> to vector<10x16xf32>
    %739 = arith.subf %724, %738 : vector<10x16xf32>
    %cst_460 = arith.constant 9.99999974E-6 : f32
    %740 = vector.broadcast %cst_460 : f32 to vector<10x1xf32>
    %741 = arith.addf %737, %740 : vector<10x1xf32>
    %742 = math.rsqrt %741 : vector<10x1xf32>
    %743 = vector.broadcast %742 : vector<10x1xf32> to vector<10x16xf32>
    %744 = arith.mulf %739, %743 : vector<10x16xf32>
    %745 = vector.broadcast %725 : vector<1x16xf32> to vector<10x16xf32>
    %746 = arith.mulf %744, %745 : vector<10x16xf32>
    %747 = vector.broadcast %726 : vector<1x16xf32> to vector<10x16xf32>
    %748 = arith.addf %746, %747 : vector<10x16xf32>
    %749 = arith.addf %748, %275 : vector<10x16xf32>
    %750 = arith.addf %641, %276 : vector<8x16xf32>
    %c4_461 = arith.constant 4 : index
    %c0_462 = arith.constant 0 : index
    %c0_463 = arith.constant 0 : index
    %751 = vector.load %arg23[%c4_461, %c0_462, %c0_463] : memref<7x1x16xf32, #tpu.memory_space<vmem>>, vector<1x1x16xf32>
    %752 = vector.shape_cast %751 : vector<1x1x16xf32> to vector<1x16xf32>
    %c24 = arith.constant 24 : index
    %c0_464 = arith.constant 0 : index
    %c0_465 = arith.constant 0 : index
    %753 = vector.load %arg20[%c24, %c0_464, %c0_465] : memref<42x16x8xf32, #tpu.memory_space<vmem>>, vector<1x16x8xf32>
    %754 = vector.shape_cast %753 : vector<1x16x8xf32> to vector<16x8xf32>
    %cst_466 = arith.constant dense<0.000000e+00> : vector<10x8xf32>
    %755 = tpu.matmul %749, %754, %cst_466 {dimension_numbers = #tpu.dot_dimension_numbers<[1], [0], [0], [1], [0, 0, 1, 1], [], []>} : vector<10x16xf32>, vector<16x8xf32>, vector<10x8xf32> -> vector<10x8xf32>
    %c24_467 = arith.constant 24 : index
    %c0_468 = arith.constant 0 : index
    %c0_469 = arith.constant 0 : index
    %756 = vector.load %arg21[%c24_467, %c0_468, %c0_469] : memref<42x1x8xf32, #tpu.memory_space<vmem>>, vector<1x1x8xf32>
    %757 = vector.shape_cast %756 : vector<1x1x8xf32> to vector<1x8xf32>
    %758 = vector.broadcast %757 : vector<1x8xf32> to vector<10x8xf32>
    %759 = arith.addf %755, %758 : vector<10x8xf32>
    %c26 = arith.constant 26 : index
    %c0_470 = arith.constant 0 : index
    %c0_471 = arith.constant 0 : index
    %760 = vector.load %arg20[%c26, %c0_470, %c0_471] : memref<42x16x8xf32, #tpu.memory_space<vmem>>, vector<1x16x8xf32>
    %761 = vector.shape_cast %760 : vector<1x16x8xf32> to vector<16x8xf32>
    %cst_472 = arith.constant dense<0.000000e+00> : vector<8x8xf32>
    %762 = tpu.matmul %750, %761, %cst_472 {dimension_numbers = #tpu.dot_dimension_numbers<[1], [0], [0], [1], [0, 0, 1, 1], [], []>} : vector<8x16xf32>, vector<16x8xf32>, vector<8x8xf32> -> vector<8x8xf32>
    %c26_473 = arith.constant 26 : index
    %c0_474 = arith.constant 0 : index
    %c0_475 = arith.constant 0 : index
    %763 = vector.load %arg21[%c26_473, %c0_474, %c0_475] : memref<42x1x8xf32, #tpu.memory_space<vmem>>, vector<1x1x8xf32>
    %764 = vector.shape_cast %763 : vector<1x1x8xf32> to vector<1x8xf32>
    %765 = vector.broadcast %764 : vector<1x8xf32> to vector<8x8xf32>
    %766 = arith.addf %762, %765 : vector<8x8xf32>
    %c28 = arith.constant 28 : index
    %c0_476 = arith.constant 0 : index
    %c0_477 = arith.constant 0 : index
    %767 = vector.load %arg20[%c28, %c0_476, %c0_477] : memref<42x16x8xf32, #tpu.memory_space<vmem>>, vector<1x16x8xf32>
    %768 = vector.shape_cast %767 : vector<1x16x8xf32> to vector<16x8xf32>
    %cst_478 = arith.constant dense<0.000000e+00> : vector<8x8xf32>
    %769 = tpu.matmul %641, %768, %cst_478 {dimension_numbers = #tpu.dot_dimension_numbers<[1], [0], [0], [1], [0, 0, 1, 1], [], []>} : vector<8x16xf32>, vector<16x8xf32>, vector<8x8xf32> -> vector<8x8xf32>
    %c28_479 = arith.constant 28 : index
    %c0_480 = arith.constant 0 : index
    %c0_481 = arith.constant 0 : index
    %770 = vector.load %arg21[%c28_479, %c0_480, %c0_481] : memref<42x1x8xf32, #tpu.memory_space<vmem>>, vector<1x1x8xf32>
    %771 = vector.shape_cast %770 : vector<1x1x8xf32> to vector<1x8xf32>
    %772 = vector.broadcast %771 : vector<1x8xf32> to vector<8x8xf32>
    %773 = arith.addf %769, %772 : vector<8x8xf32>
    %cst_482 = arith.constant dense<0.000000e+00> : vector<10x8xf32>
    %774 = tpu.matmul %759, %766, %cst_482 {dimension_numbers = #tpu.dot_dimension_numbers<[1], [1], [0], [0], [0, 0, 1, 0], [], []>} : vector<10x8xf32>, vector<8x8xf32>, vector<10x8xf32> -> vector<10x8xf32>
    %cst_483 = arith.constant 0.353553385 : f32
    %775 = vector.broadcast %cst_483 : f32 to vector<10x8xf32>
    %776 = arith.mulf %774, %775 : vector<10x8xf32>
    %777 = arith.addf %776, %278 : vector<10x8xf32>
    %cst_484 = arith.constant dense<0xFF800000> : vector<10xf32>
    %778 = vector.multi_reduction <maximumf>, %777, %cst_484 [1] : vector<10x8xf32> to vector<10xf32>
    %779 = vector.shape_cast %778 : vector<10xf32> to vector<10x1xf32>
    %780 = vector.broadcast %779 : vector<10x1xf32> to vector<10x8xf32>
    %781 = arith.subf %777, %780 : vector<10x8xf32>
    %782 = math.exp %781 : vector<10x8xf32>
    %cst_485 = arith.constant dense<0.000000e+00> : vector<10xf32>
    %783 = vector.multi_reduction <add>, %782, %cst_485 [1] : vector<10x8xf32> to vector<10xf32>
    %784 = vector.shape_cast %783 : vector<10xf32> to vector<10x1xf32>
    %785 = vector.broadcast %784 : vector<10x1xf32> to vector<10x8xf32>
    %786 = arith.divf %782, %785 : vector<10x8xf32>
    %cst_486 = arith.constant dense<0.000000e+00> : vector<10x8xf32>
    %787 = tpu.matmul %786, %773, %cst_486 {dimension_numbers = #tpu.dot_dimension_numbers<[1], [0], [0], [1], [0, 0, 1, 1], [], []>} : vector<10x8xf32>, vector<8x8xf32>, vector<10x8xf32> -> vector<10x8xf32>
    %c8_487 = arith.constant 8 : index
    %c0_488 = arith.constant 0 : index
    %c0_489 = arith.constant 0 : index
    %788 = vector.load %arg22[%c8_487, %c0_488, %c0_489] : memref<14x8x16xf32, #tpu.memory_space<vmem>>, vector<1x8x16xf32>
    %789 = vector.shape_cast %788 : vector<1x8x16xf32> to vector<8x16xf32>
    %cst_490 = arith.constant dense<0.000000e+00> : vector<10x16xf32>
    %790 = tpu.matmul %787, %789, %cst_490 {dimension_numbers = #tpu.dot_dimension_numbers<[1], [0], [0], [1], [0, 0, 1, 1], [], []>} : vector<10x8xf32>, vector<8x16xf32>, vector<10x16xf32> -> vector<10x16xf32>
    %c25 = arith.constant 25 : index
    %c0_491 = arith.constant 0 : index
    %c0_492 = arith.constant 0 : index
    %791 = vector.load %arg20[%c25, %c0_491, %c0_492] : memref<42x16x8xf32, #tpu.memory_space<vmem>>, vector<1x16x8xf32>
    %792 = vector.shape_cast %791 : vector<1x16x8xf32> to vector<16x8xf32>
    %cst_493 = arith.constant dense<0.000000e+00> : vector<10x8xf32>
    %793 = tpu.matmul %749, %792, %cst_493 {dimension_numbers = #tpu.dot_dimension_numbers<[1], [0], [0], [1], [0, 0, 1, 1], [], []>} : vector<10x16xf32>, vector<16x8xf32>, vector<10x8xf32> -> vector<10x8xf32>
    %c25_494 = arith.constant 25 : index
    %c0_495 = arith.constant 0 : index
    %c0_496 = arith.constant 0 : index
    %794 = vector.load %arg21[%c25_494, %c0_495, %c0_496] : memref<42x1x8xf32, #tpu.memory_space<vmem>>, vector<1x1x8xf32>
    %795 = vector.shape_cast %794 : vector<1x1x8xf32> to vector<1x8xf32>
    %796 = vector.broadcast %795 : vector<1x8xf32> to vector<10x8xf32>
    %797 = arith.addf %793, %796 : vector<10x8xf32>
    %c27 = arith.constant 27 : index
    %c0_497 = arith.constant 0 : index
    %c0_498 = arith.constant 0 : index
    %798 = vector.load %arg20[%c27, %c0_497, %c0_498] : memref<42x16x8xf32, #tpu.memory_space<vmem>>, vector<1x16x8xf32>
    %799 = vector.shape_cast %798 : vector<1x16x8xf32> to vector<16x8xf32>
    %cst_499 = arith.constant dense<0.000000e+00> : vector<8x8xf32>
    %800 = tpu.matmul %750, %799, %cst_499 {dimension_numbers = #tpu.dot_dimension_numbers<[1], [0], [0], [1], [0, 0, 1, 1], [], []>} : vector<8x16xf32>, vector<16x8xf32>, vector<8x8xf32> -> vector<8x8xf32>
    %c27_500 = arith.constant 27 : index
    %c0_501 = arith.constant 0 : index
    %c0_502 = arith.constant 0 : index
    %801 = vector.load %arg21[%c27_500, %c0_501, %c0_502] : memref<42x1x8xf32, #tpu.memory_space<vmem>>, vector<1x1x8xf32>
    %802 = vector.shape_cast %801 : vector<1x1x8xf32> to vector<1x8xf32>
    %803 = vector.broadcast %802 : vector<1x8xf32> to vector<8x8xf32>
    %804 = arith.addf %800, %803 : vector<8x8xf32>
    %c29 = arith.constant 29 : index
    %c0_503 = arith.constant 0 : index
    %c0_504 = arith.constant 0 : index
    %805 = vector.load %arg20[%c29, %c0_503, %c0_504] : memref<42x16x8xf32, #tpu.memory_space<vmem>>, vector<1x16x8xf32>
    %806 = vector.shape_cast %805 : vector<1x16x8xf32> to vector<16x8xf32>
    %cst_505 = arith.constant dense<0.000000e+00> : vector<8x8xf32>
    %807 = tpu.matmul %641, %806, %cst_505 {dimension_numbers = #tpu.dot_dimension_numbers<[1], [0], [0], [1], [0, 0, 1, 1], [], []>} : vector<8x16xf32>, vector<16x8xf32>, vector<8x8xf32> -> vector<8x8xf32>
    %c29_506 = arith.constant 29 : index
    %c0_507 = arith.constant 0 : index
    %c0_508 = arith.constant 0 : index
    %808 = vector.load %arg21[%c29_506, %c0_507, %c0_508] : memref<42x1x8xf32, #tpu.memory_space<vmem>>, vector<1x1x8xf32>
    %809 = vector.shape_cast %808 : vector<1x1x8xf32> to vector<1x8xf32>
    %810 = vector.broadcast %809 : vector<1x8xf32> to vector<8x8xf32>
    %811 = arith.addf %807, %810 : vector<8x8xf32>
    %cst_509 = arith.constant dense<0.000000e+00> : vector<10x8xf32>
    %812 = tpu.matmul %797, %804, %cst_509 {dimension_numbers = #tpu.dot_dimension_numbers<[1], [1], [0], [0], [0, 0, 1, 0], [], []>} : vector<10x8xf32>, vector<8x8xf32>, vector<10x8xf32> -> vector<10x8xf32>
    %cst_510 = arith.constant 0.353553385 : f32
    %813 = vector.broadcast %cst_510 : f32 to vector<10x8xf32>
    %814 = arith.mulf %812, %813 : vector<10x8xf32>
    %815 = arith.addf %814, %278 : vector<10x8xf32>
    %cst_511 = arith.constant dense<0xFF800000> : vector<10xf32>
    %816 = vector.multi_reduction <maximumf>, %815, %cst_511 [1] : vector<10x8xf32> to vector<10xf32>
    %817 = vector.shape_cast %816 : vector<10xf32> to vector<10x1xf32>
    %818 = vector.broadcast %817 : vector<10x1xf32> to vector<10x8xf32>
    %819 = arith.subf %815, %818 : vector<10x8xf32>
    %820 = math.exp %819 : vector<10x8xf32>
    %cst_512 = arith.constant dense<0.000000e+00> : vector<10xf32>
    %821 = vector.multi_reduction <add>, %820, %cst_512 [1] : vector<10x8xf32> to vector<10xf32>
    %822 = vector.shape_cast %821 : vector<10xf32> to vector<10x1xf32>
    %823 = vector.broadcast %822 : vector<10x1xf32> to vector<10x8xf32>
    %824 = arith.divf %820, %823 : vector<10x8xf32>
    %cst_513 = arith.constant dense<0.000000e+00> : vector<10x8xf32>
    %825 = tpu.matmul %824, %811, %cst_513 {dimension_numbers = #tpu.dot_dimension_numbers<[1], [0], [0], [1], [0, 0, 1, 1], [], []>} : vector<10x8xf32>, vector<8x8xf32>, vector<10x8xf32> -> vector<10x8xf32>
    %c9_514 = arith.constant 9 : index
    %c0_515 = arith.constant 0 : index
    %c0_516 = arith.constant 0 : index
    %826 = vector.load %arg22[%c9_514, %c0_515, %c0_516] : memref<14x8x16xf32, #tpu.memory_space<vmem>>, vector<1x8x16xf32>
    %827 = vector.shape_cast %826 : vector<1x8x16xf32> to vector<8x16xf32>
    %cst_517 = arith.constant dense<0.000000e+00> : vector<10x16xf32>
    %828 = tpu.matmul %825, %827, %cst_517 {dimension_numbers = #tpu.dot_dimension_numbers<[1], [0], [0], [1], [0, 0, 1, 1], [], []>} : vector<10x8xf32>, vector<8x16xf32>, vector<10x16xf32> -> vector<10x16xf32>
    %829 = arith.addf %790, %828 : vector<10x16xf32>
    %830 = vector.broadcast %752 : vector<1x16xf32> to vector<10x16xf32>
    %831 = arith.addf %829, %830 : vector<10x16xf32>
    %832 = arith.addf %748, %831 : vector<10x16xf32>
    %c5_518 = arith.constant 5 : index
    %c0_519 = arith.constant 0 : index
    %833 = vector.load %arg24[%c5_518, %c0_519] : memref<9x16xf32, #tpu.memory_space<vmem>>, vector<1x16xf32>
    %c5_520 = arith.constant 5 : index
    %c0_521 = arith.constant 0 : index
    %834 = vector.load %arg25[%c5_520, %c0_521] : memref<9x16xf32, #tpu.memory_space<vmem>>, vector<1x16xf32>
    %cst_522 = arith.constant dense<0.000000e+00> : vector<10xf32>
    %835 = vector.multi_reduction <add>, %832, %cst_522 [1] : vector<10x16xf32> to vector<10xf32>
    %836 = vector.shape_cast %835 : vector<10xf32> to vector<10x1xf32>
    %cst_523 = arith.constant 1.600000e+01 : f32
    %837 = vector.broadcast %cst_523 : f32 to vector<10x1xf32>
    %838 = arith.divf %836, %837 : vector<10x1xf32>
    %839 = vector.broadcast %838 : vector<10x1xf32> to vector<10x16xf32>
    %840 = arith.subf %832, %839 : vector<10x16xf32>
    %841 = arith.mulf %840, %840 : vector<10x16xf32>
    %cst_524 = arith.constant dense<0.000000e+00> : vector<10xf32>
    %842 = vector.multi_reduction <add>, %841, %cst_524 [1] : vector<10x16xf32> to vector<10xf32>
    %843 = vector.shape_cast %842 : vector<10xf32> to vector<10x1xf32>
    %cst_525 = arith.constant 1.600000e+01 : f32
    %844 = vector.broadcast %cst_525 : f32 to vector<10x1xf32>
    %845 = arith.divf %843, %844 : vector<10x1xf32>
    %846 = vector.broadcast %838 : vector<10x1xf32> to vector<10x16xf32>
    %847 = arith.subf %832, %846 : vector<10x16xf32>
    %cst_526 = arith.constant 9.99999974E-6 : f32
    %848 = vector.broadcast %cst_526 : f32 to vector<10x1xf32>
    %849 = arith.addf %845, %848 : vector<10x1xf32>
    %850 = math.rsqrt %849 : vector<10x1xf32>
    %851 = vector.broadcast %850 : vector<10x1xf32> to vector<10x16xf32>
    %852 = arith.mulf %847, %851 : vector<10x16xf32>
    %853 = vector.broadcast %833 : vector<1x16xf32> to vector<10x16xf32>
    %854 = arith.mulf %852, %853 : vector<10x16xf32>
    %855 = vector.broadcast %834 : vector<1x16xf32> to vector<10x16xf32>
    %856 = arith.addf %854, %855 : vector<10x16xf32>
    %c1_527 = arith.constant 1 : index
    %c0_528 = arith.constant 0 : index
    %c0_529 = arith.constant 0 : index
    %857 = vector.load %arg26[%c1_527, %c0_528, %c0_529] : memref<2x16x32xf32, #tpu.memory_space<vmem>>, vector<1x16x32xf32>
    %858 = vector.shape_cast %857 : vector<1x16x32xf32> to vector<16x32xf32>
    %cst_530 = arith.constant dense<0.000000e+00> : vector<10x32xf32>
    %859 = tpu.matmul %856, %858, %cst_530 {dimension_numbers = #tpu.dot_dimension_numbers<[1], [0], [0], [1], [0, 0, 1, 1], [], []>} : vector<10x16xf32>, vector<16x32xf32>, vector<10x32xf32> -> vector<10x32xf32>
    %c1_531 = arith.constant 1 : index
    %c0_532 = arith.constant 0 : index
    %c0_533 = arith.constant 0 : index
    %860 = vector.load %arg27[%c1_531, %c0_532, %c0_533] : memref<2x1x32xf32, #tpu.memory_space<vmem>>, vector<1x1x32xf32>
    %861 = vector.shape_cast %860 : vector<1x1x32xf32> to vector<1x32xf32>
    %862 = vector.broadcast %861 : vector<1x32xf32> to vector<10x32xf32>
    %863 = arith.addf %859, %862 : vector<10x32xf32>
    %cst_534 = arith.constant 0.000000e+00 : f32
    %864 = vector.broadcast %cst_534 : f32 to vector<10x32xf32>
    %865 = arith.maximumf %863, %864 : vector<10x32xf32>
    %c1_535 = arith.constant 1 : index
    %c0_536 = arith.constant 0 : index
    %c0_537 = arith.constant 0 : index
    %866 = vector.load %arg28[%c1_535, %c0_536, %c0_537] : memref<2x32x16xf32, #tpu.memory_space<vmem>>, vector<1x32x16xf32>
    %867 = vector.shape_cast %866 : vector<1x32x16xf32> to vector<32x16xf32>
    %cst_538 = arith.constant dense<0.000000e+00> : vector<10x16xf32>
    %868 = tpu.matmul %865, %867, %cst_538 {dimension_numbers = #tpu.dot_dimension_numbers<[1], [0], [0], [1], [0, 0, 1, 1], [], []>} : vector<10x32xf32>, vector<32x16xf32>, vector<10x16xf32> -> vector<10x16xf32>
    %c1_539 = arith.constant 1 : index
    %c0_540 = arith.constant 0 : index
    %c0_541 = arith.constant 0 : index
    %869 = vector.load %arg29[%c1_539, %c0_540, %c0_541] : memref<2x1x16xf32, #tpu.memory_space<vmem>>, vector<1x1x16xf32>
    %870 = vector.shape_cast %869 : vector<1x1x16xf32> to vector<1x16xf32>
    %871 = vector.broadcast %870 : vector<1x16xf32> to vector<10x16xf32>
    %872 = arith.addf %868, %871 : vector<10x16xf32>
    %873 = arith.addf %856, %872 : vector<10x16xf32>
    %c6_542 = arith.constant 6 : index
    %c0_543 = arith.constant 0 : index
    %874 = vector.load %arg24[%c6_542, %c0_543] : memref<9x16xf32, #tpu.memory_space<vmem>>, vector<1x16xf32>
    %c6_544 = arith.constant 6 : index
    %c0_545 = arith.constant 0 : index
    %875 = vector.load %arg25[%c6_544, %c0_545] : memref<9x16xf32, #tpu.memory_space<vmem>>, vector<1x16xf32>
    %cst_546 = arith.constant dense<0.000000e+00> : vector<10xf32>
    %876 = vector.multi_reduction <add>, %873, %cst_546 [1] : vector<10x16xf32> to vector<10xf32>
    %877 = vector.shape_cast %876 : vector<10xf32> to vector<10x1xf32>
    %cst_547 = arith.constant 1.600000e+01 : f32
    %878 = vector.broadcast %cst_547 : f32 to vector<10x1xf32>
    %879 = arith.divf %877, %878 : vector<10x1xf32>
    %880 = vector.broadcast %879 : vector<10x1xf32> to vector<10x16xf32>
    %881 = arith.subf %873, %880 : vector<10x16xf32>
    %882 = arith.mulf %881, %881 : vector<10x16xf32>
    %cst_548 = arith.constant dense<0.000000e+00> : vector<10xf32>
    %883 = vector.multi_reduction <add>, %882, %cst_548 [1] : vector<10x16xf32> to vector<10xf32>
    %884 = vector.shape_cast %883 : vector<10xf32> to vector<10x1xf32>
    %cst_549 = arith.constant 1.600000e+01 : f32
    %885 = vector.broadcast %cst_549 : f32 to vector<10x1xf32>
    %886 = arith.divf %884, %885 : vector<10x1xf32>
    %887 = vector.broadcast %879 : vector<10x1xf32> to vector<10x16xf32>
    %888 = arith.subf %873, %887 : vector<10x16xf32>
    %cst_550 = arith.constant 9.99999974E-6 : f32
    %889 = vector.broadcast %cst_550 : f32 to vector<10x1xf32>
    %890 = arith.addf %886, %889 : vector<10x1xf32>
    %891 = math.rsqrt %890 : vector<10x1xf32>
    %892 = vector.broadcast %891 : vector<10x1xf32> to vector<10x16xf32>
    %893 = arith.mulf %888, %892 : vector<10x16xf32>
    %894 = vector.broadcast %874 : vector<1x16xf32> to vector<10x16xf32>
    %895 = arith.mulf %893, %894 : vector<10x16xf32>
    %896 = vector.broadcast %875 : vector<1x16xf32> to vector<10x16xf32>
    %897 = arith.addf %895, %896 : vector<10x16xf32>
    %898 = arith.addf %897, %275 : vector<10x16xf32>
    %899 = arith.addf %641, %276 : vector<8x16xf32>
    %c5_551 = arith.constant 5 : index
    %c0_552 = arith.constant 0 : index
    %c0_553 = arith.constant 0 : index
    %900 = vector.load %arg23[%c5_551, %c0_552, %c0_553] : memref<7x1x16xf32, #tpu.memory_space<vmem>>, vector<1x1x16xf32>
    %901 = vector.shape_cast %900 : vector<1x1x16xf32> to vector<1x16xf32>
    %c30 = arith.constant 30 : index
    %c0_554 = arith.constant 0 : index
    %c0_555 = arith.constant 0 : index
    %902 = vector.load %arg20[%c30, %c0_554, %c0_555] : memref<42x16x8xf32, #tpu.memory_space<vmem>>, vector<1x16x8xf32>
    %903 = vector.shape_cast %902 : vector<1x16x8xf32> to vector<16x8xf32>
    %cst_556 = arith.constant dense<0.000000e+00> : vector<8x8xf32>
    %904 = tpu.matmul %899, %903, %cst_556 {dimension_numbers = #tpu.dot_dimension_numbers<[1], [0], [0], [1], [0, 0, 1, 1], [], []>} : vector<8x16xf32>, vector<16x8xf32>, vector<8x8xf32> -> vector<8x8xf32>
    %c30_557 = arith.constant 30 : index
    %c0_558 = arith.constant 0 : index
    %c0_559 = arith.constant 0 : index
    %905 = vector.load %arg21[%c30_557, %c0_558, %c0_559] : memref<42x1x8xf32, #tpu.memory_space<vmem>>, vector<1x1x8xf32>
    %906 = vector.shape_cast %905 : vector<1x1x8xf32> to vector<1x8xf32>
    %907 = vector.broadcast %906 : vector<1x8xf32> to vector<8x8xf32>
    %908 = arith.addf %904, %907 : vector<8x8xf32>
    %c32 = arith.constant 32 : index
    %c0_560 = arith.constant 0 : index
    %c0_561 = arith.constant 0 : index
    %909 = vector.load %arg20[%c32, %c0_560, %c0_561] : memref<42x16x8xf32, #tpu.memory_space<vmem>>, vector<1x16x8xf32>
    %910 = vector.shape_cast %909 : vector<1x16x8xf32> to vector<16x8xf32>
    %cst_562 = arith.constant dense<0.000000e+00> : vector<10x8xf32>
    %911 = tpu.matmul %898, %910, %cst_562 {dimension_numbers = #tpu.dot_dimension_numbers<[1], [0], [0], [1], [0, 0, 1, 1], [], []>} : vector<10x16xf32>, vector<16x8xf32>, vector<10x8xf32> -> vector<10x8xf32>
    %c32_563 = arith.constant 32 : index
    %c0_564 = arith.constant 0 : index
    %c0_565 = arith.constant 0 : index
    %912 = vector.load %arg21[%c32_563, %c0_564, %c0_565] : memref<42x1x8xf32, #tpu.memory_space<vmem>>, vector<1x1x8xf32>
    %913 = vector.shape_cast %912 : vector<1x1x8xf32> to vector<1x8xf32>
    %914 = vector.broadcast %913 : vector<1x8xf32> to vector<10x8xf32>
    %915 = arith.addf %911, %914 : vector<10x8xf32>
    %c34 = arith.constant 34 : index
    %c0_566 = arith.constant 0 : index
    %c0_567 = arith.constant 0 : index
    %916 = vector.load %arg20[%c34, %c0_566, %c0_567] : memref<42x16x8xf32, #tpu.memory_space<vmem>>, vector<1x16x8xf32>
    %917 = vector.shape_cast %916 : vector<1x16x8xf32> to vector<16x8xf32>
    %cst_568 = arith.constant dense<0.000000e+00> : vector<10x8xf32>
    %918 = tpu.matmul %897, %917, %cst_568 {dimension_numbers = #tpu.dot_dimension_numbers<[1], [0], [0], [1], [0, 0, 1, 1], [], []>} : vector<10x16xf32>, vector<16x8xf32>, vector<10x8xf32> -> vector<10x8xf32>
    %c34_569 = arith.constant 34 : index
    %c0_570 = arith.constant 0 : index
    %c0_571 = arith.constant 0 : index
    %919 = vector.load %arg21[%c34_569, %c0_570, %c0_571] : memref<42x1x8xf32, #tpu.memory_space<vmem>>, vector<1x1x8xf32>
    %920 = vector.shape_cast %919 : vector<1x1x8xf32> to vector<1x8xf32>
    %921 = vector.broadcast %920 : vector<1x8xf32> to vector<10x8xf32>
    %922 = arith.addf %918, %921 : vector<10x8xf32>
    %cst_572 = arith.constant dense<0.000000e+00> : vector<8x10xf32>
    %923 = tpu.matmul %908, %915, %cst_572 {dimension_numbers = #tpu.dot_dimension_numbers<[1], [1], [0], [0], [0, 0, 1, 0], [], []>} : vector<8x8xf32>, vector<10x8xf32>, vector<8x10xf32> -> vector<8x10xf32>
    %cst_573 = arith.constant 0.353553385 : f32
    %924 = vector.broadcast %cst_573 : f32 to vector<8x10xf32>
    %925 = arith.mulf %923, %924 : vector<8x10xf32>
    %926 = arith.addf %925, %279 : vector<8x10xf32>
    %cst_574 = arith.constant dense<0xFF800000> : vector<8xf32>
    %927 = vector.multi_reduction <maximumf>, %926, %cst_574 [1] : vector<8x10xf32> to vector<8xf32>
    %928 = vector.shape_cast %927 : vector<8xf32> to vector<8x1xf32>
    %929 = vector.broadcast %928 : vector<8x1xf32> to vector<8x10xf32>
    %930 = arith.subf %926, %929 : vector<8x10xf32>
    %931 = math.exp %930 : vector<8x10xf32>
    %cst_575 = arith.constant dense<0.000000e+00> : vector<8xf32>
    %932 = vector.multi_reduction <add>, %931, %cst_575 [1] : vector<8x10xf32> to vector<8xf32>
    %933 = vector.shape_cast %932 : vector<8xf32> to vector<8x1xf32>
    %934 = vector.broadcast %933 : vector<8x1xf32> to vector<8x10xf32>
    %935 = arith.divf %931, %934 : vector<8x10xf32>
    %cst_576 = arith.constant dense<0.000000e+00> : vector<8x8xf32>
    %936 = tpu.matmul %935, %922, %cst_576 {dimension_numbers = #tpu.dot_dimension_numbers<[1], [0], [0], [1], [0, 0, 1, 1], [], []>} : vector<8x10xf32>, vector<10x8xf32>, vector<8x8xf32> -> vector<8x8xf32>
    %c10_577 = arith.constant 10 : index
    %c0_578 = arith.constant 0 : index
    %c0_579 = arith.constant 0 : index
    %937 = vector.load %arg22[%c10_577, %c0_578, %c0_579] : memref<14x8x16xf32, #tpu.memory_space<vmem>>, vector<1x8x16xf32>
    %938 = vector.shape_cast %937 : vector<1x8x16xf32> to vector<8x16xf32>
    %cst_580 = arith.constant dense<0.000000e+00> : vector<8x16xf32>
    %939 = tpu.matmul %936, %938, %cst_580 {dimension_numbers = #tpu.dot_dimension_numbers<[1], [0], [0], [1], [0, 0, 1, 1], [], []>} : vector<8x8xf32>, vector<8x16xf32>, vector<8x16xf32> -> vector<8x16xf32>
    %c31 = arith.constant 31 : index
    %c0_581 = arith.constant 0 : index
    %c0_582 = arith.constant 0 : index
    %940 = vector.load %arg20[%c31, %c0_581, %c0_582] : memref<42x16x8xf32, #tpu.memory_space<vmem>>, vector<1x16x8xf32>
    %941 = vector.shape_cast %940 : vector<1x16x8xf32> to vector<16x8xf32>
    %cst_583 = arith.constant dense<0.000000e+00> : vector<8x8xf32>
    %942 = tpu.matmul %899, %941, %cst_583 {dimension_numbers = #tpu.dot_dimension_numbers<[1], [0], [0], [1], [0, 0, 1, 1], [], []>} : vector<8x16xf32>, vector<16x8xf32>, vector<8x8xf32> -> vector<8x8xf32>
    %c31_584 = arith.constant 31 : index
    %c0_585 = arith.constant 0 : index
    %c0_586 = arith.constant 0 : index
    %943 = vector.load %arg21[%c31_584, %c0_585, %c0_586] : memref<42x1x8xf32, #tpu.memory_space<vmem>>, vector<1x1x8xf32>
    %944 = vector.shape_cast %943 : vector<1x1x8xf32> to vector<1x8xf32>
    %945 = vector.broadcast %944 : vector<1x8xf32> to vector<8x8xf32>
    %946 = arith.addf %942, %945 : vector<8x8xf32>
    %c33 = arith.constant 33 : index
    %c0_587 = arith.constant 0 : index
    %c0_588 = arith.constant 0 : index
    %947 = vector.load %arg20[%c33, %c0_587, %c0_588] : memref<42x16x8xf32, #tpu.memory_space<vmem>>, vector<1x16x8xf32>
    %948 = vector.shape_cast %947 : vector<1x16x8xf32> to vector<16x8xf32>
    %cst_589 = arith.constant dense<0.000000e+00> : vector<10x8xf32>
    %949 = tpu.matmul %898, %948, %cst_589 {dimension_numbers = #tpu.dot_dimension_numbers<[1], [0], [0], [1], [0, 0, 1, 1], [], []>} : vector<10x16xf32>, vector<16x8xf32>, vector<10x8xf32> -> vector<10x8xf32>
    %c33_590 = arith.constant 33 : index
    %c0_591 = arith.constant 0 : index
    %c0_592 = arith.constant 0 : index
    %950 = vector.load %arg21[%c33_590, %c0_591, %c0_592] : memref<42x1x8xf32, #tpu.memory_space<vmem>>, vector<1x1x8xf32>
    %951 = vector.shape_cast %950 : vector<1x1x8xf32> to vector<1x8xf32>
    %952 = vector.broadcast %951 : vector<1x8xf32> to vector<10x8xf32>
    %953 = arith.addf %949, %952 : vector<10x8xf32>
    %c35 = arith.constant 35 : index
    %c0_593 = arith.constant 0 : index
    %c0_594 = arith.constant 0 : index
    %954 = vector.load %arg20[%c35, %c0_593, %c0_594] : memref<42x16x8xf32, #tpu.memory_space<vmem>>, vector<1x16x8xf32>
    %955 = vector.shape_cast %954 : vector<1x16x8xf32> to vector<16x8xf32>
    %cst_595 = arith.constant dense<0.000000e+00> : vector<10x8xf32>
    %956 = tpu.matmul %897, %955, %cst_595 {dimension_numbers = #tpu.dot_dimension_numbers<[1], [0], [0], [1], [0, 0, 1, 1], [], []>} : vector<10x16xf32>, vector<16x8xf32>, vector<10x8xf32> -> vector<10x8xf32>
    %c35_596 = arith.constant 35 : index
    %c0_597 = arith.constant 0 : index
    %c0_598 = arith.constant 0 : index
    %957 = vector.load %arg21[%c35_596, %c0_597, %c0_598] : memref<42x1x8xf32, #tpu.memory_space<vmem>>, vector<1x1x8xf32>
    %958 = vector.shape_cast %957 : vector<1x1x8xf32> to vector<1x8xf32>
    %959 = vector.broadcast %958 : vector<1x8xf32> to vector<10x8xf32>
    %960 = arith.addf %956, %959 : vector<10x8xf32>
    %cst_599 = arith.constant dense<0.000000e+00> : vector<8x10xf32>
    %961 = tpu.matmul %946, %953, %cst_599 {dimension_numbers = #tpu.dot_dimension_numbers<[1], [1], [0], [0], [0, 0, 1, 0], [], []>} : vector<8x8xf32>, vector<10x8xf32>, vector<8x10xf32> -> vector<8x10xf32>
    %cst_600 = arith.constant 0.353553385 : f32
    %962 = vector.broadcast %cst_600 : f32 to vector<8x10xf32>
    %963 = arith.mulf %961, %962 : vector<8x10xf32>
    %964 = arith.addf %963, %279 : vector<8x10xf32>
    %cst_601 = arith.constant dense<0xFF800000> : vector<8xf32>
    %965 = vector.multi_reduction <maximumf>, %964, %cst_601 [1] : vector<8x10xf32> to vector<8xf32>
    %966 = vector.shape_cast %965 : vector<8xf32> to vector<8x1xf32>
    %967 = vector.broadcast %966 : vector<8x1xf32> to vector<8x10xf32>
    %968 = arith.subf %964, %967 : vector<8x10xf32>
    %969 = math.exp %968 : vector<8x10xf32>
    %cst_602 = arith.constant dense<0.000000e+00> : vector<8xf32>
    %970 = vector.multi_reduction <add>, %969, %cst_602 [1] : vector<8x10xf32> to vector<8xf32>
    %971 = vector.shape_cast %970 : vector<8xf32> to vector<8x1xf32>
    %972 = vector.broadcast %971 : vector<8x1xf32> to vector<8x10xf32>
    %973 = arith.divf %969, %972 : vector<8x10xf32>
    %cst_603 = arith.constant dense<0.000000e+00> : vector<8x8xf32>
    %974 = tpu.matmul %973, %960, %cst_603 {dimension_numbers = #tpu.dot_dimension_numbers<[1], [0], [0], [1], [0, 0, 1, 1], [], []>} : vector<8x10xf32>, vector<10x8xf32>, vector<8x8xf32> -> vector<8x8xf32>
    %c11_604 = arith.constant 11 : index
    %c0_605 = arith.constant 0 : index
    %c0_606 = arith.constant 0 : index
    %975 = vector.load %arg22[%c11_604, %c0_605, %c0_606] : memref<14x8x16xf32, #tpu.memory_space<vmem>>, vector<1x8x16xf32>
    %976 = vector.shape_cast %975 : vector<1x8x16xf32> to vector<8x16xf32>
    %cst_607 = arith.constant dense<0.000000e+00> : vector<8x16xf32>
    %977 = tpu.matmul %974, %976, %cst_607 {dimension_numbers = #tpu.dot_dimension_numbers<[1], [0], [0], [1], [0, 0, 1, 1], [], []>} : vector<8x8xf32>, vector<8x16xf32>, vector<8x16xf32> -> vector<8x16xf32>
    %978 = arith.addf %939, %977 : vector<8x16xf32>
    %979 = vector.broadcast %901 : vector<1x16xf32> to vector<8x16xf32>
    %980 = arith.addf %978, %979 : vector<8x16xf32>
    %981 = arith.addf %641, %980 : vector<8x16xf32>
    %c7_608 = arith.constant 7 : index
    %c0_609 = arith.constant 0 : index
    %982 = vector.load %arg24[%c7_608, %c0_609] : memref<9x16xf32, #tpu.memory_space<vmem>>, vector<1x16xf32>
    %c7_610 = arith.constant 7 : index
    %c0_611 = arith.constant 0 : index
    %983 = vector.load %arg25[%c7_610, %c0_611] : memref<9x16xf32, #tpu.memory_space<vmem>>, vector<1x16xf32>
    %cst_612 = arith.constant dense<0.000000e+00> : vector<8xf32>
    %984 = vector.multi_reduction <add>, %981, %cst_612 [1] : vector<8x16xf32> to vector<8xf32>
    %985 = vector.shape_cast %984 : vector<8xf32> to vector<8x1xf32>
    %cst_613 = arith.constant 1.600000e+01 : f32
    %986 = vector.broadcast %cst_613 : f32 to vector<8x1xf32>
    %987 = arith.divf %985, %986 : vector<8x1xf32>
    %988 = vector.broadcast %987 : vector<8x1xf32> to vector<8x16xf32>
    %989 = arith.subf %981, %988 : vector<8x16xf32>
    %990 = arith.mulf %989, %989 : vector<8x16xf32>
    %cst_614 = arith.constant dense<0.000000e+00> : vector<8xf32>
    %991 = vector.multi_reduction <add>, %990, %cst_614 [1] : vector<8x16xf32> to vector<8xf32>
    %992 = vector.shape_cast %991 : vector<8xf32> to vector<8x1xf32>
    %cst_615 = arith.constant 1.600000e+01 : f32
    %993 = vector.broadcast %cst_615 : f32 to vector<8x1xf32>
    %994 = arith.divf %992, %993 : vector<8x1xf32>
    %995 = vector.broadcast %987 : vector<8x1xf32> to vector<8x16xf32>
    %996 = arith.subf %981, %995 : vector<8x16xf32>
    %cst_616 = arith.constant 9.99999974E-6 : f32
    %997 = vector.broadcast %cst_616 : f32 to vector<8x1xf32>
    %998 = arith.addf %994, %997 : vector<8x1xf32>
    %999 = math.rsqrt %998 : vector<8x1xf32>
    %1000 = vector.broadcast %999 : vector<8x1xf32> to vector<8x16xf32>
    %1001 = arith.mulf %996, %1000 : vector<8x16xf32>
    %1002 = vector.broadcast %982 : vector<1x16xf32> to vector<8x16xf32>
    %1003 = arith.mulf %1001, %1002 : vector<8x16xf32>
    %1004 = vector.broadcast %983 : vector<1x16xf32> to vector<8x16xf32>
    %1005 = arith.addf %1003, %1004 : vector<8x16xf32>
    %1006 = arith.addf %897, %275 : vector<10x16xf32>
    %1007 = arith.addf %1005, %276 : vector<8x16xf32>
    %c6_617 = arith.constant 6 : index
    %c0_618 = arith.constant 0 : index
    %c0_619 = arith.constant 0 : index
    %1008 = vector.load %arg23[%c6_617, %c0_618, %c0_619] : memref<7x1x16xf32, #tpu.memory_space<vmem>>, vector<1x1x16xf32>
    %1009 = vector.shape_cast %1008 : vector<1x1x16xf32> to vector<1x16xf32>
    %c36 = arith.constant 36 : index
    %c0_620 = arith.constant 0 : index
    %c0_621 = arith.constant 0 : index
    %1010 = vector.load %arg20[%c36, %c0_620, %c0_621] : memref<42x16x8xf32, #tpu.memory_space<vmem>>, vector<1x16x8xf32>
    %1011 = vector.shape_cast %1010 : vector<1x16x8xf32> to vector<16x8xf32>
    %cst_622 = arith.constant dense<0.000000e+00> : vector<10x8xf32>
    %1012 = tpu.matmul %1006, %1011, %cst_622 {dimension_numbers = #tpu.dot_dimension_numbers<[1], [0], [0], [1], [0, 0, 1, 1], [], []>} : vector<10x16xf32>, vector<16x8xf32>, vector<10x8xf32> -> vector<10x8xf32>
    %c36_623 = arith.constant 36 : index
    %c0_624 = arith.constant 0 : index
    %c0_625 = arith.constant 0 : index
    %1013 = vector.load %arg21[%c36_623, %c0_624, %c0_625] : memref<42x1x8xf32, #tpu.memory_space<vmem>>, vector<1x1x8xf32>
    %1014 = vector.shape_cast %1013 : vector<1x1x8xf32> to vector<1x8xf32>
    %1015 = vector.broadcast %1014 : vector<1x8xf32> to vector<10x8xf32>
    %1016 = arith.addf %1012, %1015 : vector<10x8xf32>
    %c38 = arith.constant 38 : index
    %c0_626 = arith.constant 0 : index
    %c0_627 = arith.constant 0 : index
    %1017 = vector.load %arg20[%c38, %c0_626, %c0_627] : memref<42x16x8xf32, #tpu.memory_space<vmem>>, vector<1x16x8xf32>
    %1018 = vector.shape_cast %1017 : vector<1x16x8xf32> to vector<16x8xf32>
    %cst_628 = arith.constant dense<0.000000e+00> : vector<8x8xf32>
    %1019 = tpu.matmul %1007, %1018, %cst_628 {dimension_numbers = #tpu.dot_dimension_numbers<[1], [0], [0], [1], [0, 0, 1, 1], [], []>} : vector<8x16xf32>, vector<16x8xf32>, vector<8x8xf32> -> vector<8x8xf32>
    %c38_629 = arith.constant 38 : index
    %c0_630 = arith.constant 0 : index
    %c0_631 = arith.constant 0 : index
    %1020 = vector.load %arg21[%c38_629, %c0_630, %c0_631] : memref<42x1x8xf32, #tpu.memory_space<vmem>>, vector<1x1x8xf32>
    %1021 = vector.shape_cast %1020 : vector<1x1x8xf32> to vector<1x8xf32>
    %1022 = vector.broadcast %1021 : vector<1x8xf32> to vector<8x8xf32>
    %1023 = arith.addf %1019, %1022 : vector<8x8xf32>
    %c40 = arith.constant 40 : index
    %c0_632 = arith.constant 0 : index
    %c0_633 = arith.constant 0 : index
    %1024 = vector.load %arg20[%c40, %c0_632, %c0_633] : memref<42x16x8xf32, #tpu.memory_space<vmem>>, vector<1x16x8xf32>
    %1025 = vector.shape_cast %1024 : vector<1x16x8xf32> to vector<16x8xf32>
    %cst_634 = arith.constant dense<0.000000e+00> : vector<8x8xf32>
    %1026 = tpu.matmul %1005, %1025, %cst_634 {dimension_numbers = #tpu.dot_dimension_numbers<[1], [0], [0], [1], [0, 0, 1, 1], [], []>} : vector<8x16xf32>, vector<16x8xf32>, vector<8x8xf32> -> vector<8x8xf32>
    %c40_635 = arith.constant 40 : index
    %c0_636 = arith.constant 0 : index
    %c0_637 = arith.constant 0 : index
    %1027 = vector.load %arg21[%c40_635, %c0_636, %c0_637] : memref<42x1x8xf32, #tpu.memory_space<vmem>>, vector<1x1x8xf32>
    %1028 = vector.shape_cast %1027 : vector<1x1x8xf32> to vector<1x8xf32>
    %1029 = vector.broadcast %1028 : vector<1x8xf32> to vector<8x8xf32>
    %1030 = arith.addf %1026, %1029 : vector<8x8xf32>
    %cst_638 = arith.constant dense<0.000000e+00> : vector<10x8xf32>
    %1031 = tpu.matmul %1016, %1023, %cst_638 {dimension_numbers = #tpu.dot_dimension_numbers<[1], [1], [0], [0], [0, 0, 1, 0], [], []>} : vector<10x8xf32>, vector<8x8xf32>, vector<10x8xf32> -> vector<10x8xf32>
    %cst_639 = arith.constant 0.353553385 : f32
    %1032 = vector.broadcast %cst_639 : f32 to vector<10x8xf32>
    %1033 = arith.mulf %1031, %1032 : vector<10x8xf32>
    %1034 = arith.addf %1033, %278 : vector<10x8xf32>
    %cst_640 = arith.constant dense<0xFF800000> : vector<10xf32>
    %1035 = vector.multi_reduction <maximumf>, %1034, %cst_640 [1] : vector<10x8xf32> to vector<10xf32>
    %1036 = vector.shape_cast %1035 : vector<10xf32> to vector<10x1xf32>
    %1037 = vector.broadcast %1036 : vector<10x1xf32> to vector<10x8xf32>
    %1038 = arith.subf %1034, %1037 : vector<10x8xf32>
    %1039 = math.exp %1038 : vector<10x8xf32>
    %cst_641 = arith.constant dense<0.000000e+00> : vector<10xf32>
    %1040 = vector.multi_reduction <add>, %1039, %cst_641 [1] : vector<10x8xf32> to vector<10xf32>
    %1041 = vector.shape_cast %1040 : vector<10xf32> to vector<10x1xf32>
    %1042 = vector.broadcast %1041 : vector<10x1xf32> to vector<10x8xf32>
    %1043 = arith.divf %1039, %1042 : vector<10x8xf32>
    %cst_642 = arith.constant dense<0.000000e+00> : vector<10x8xf32>
    %1044 = tpu.matmul %1043, %1030, %cst_642 {dimension_numbers = #tpu.dot_dimension_numbers<[1], [0], [0], [1], [0, 0, 1, 1], [], []>} : vector<10x8xf32>, vector<8x8xf32>, vector<10x8xf32> -> vector<10x8xf32>
    %c12_643 = arith.constant 12 : index
    %c0_644 = arith.constant 0 : index
    %c0_645 = arith.constant 0 : index
    %1045 = vector.load %arg22[%c12_643, %c0_644, %c0_645] : memref<14x8x16xf32, #tpu.memory_space<vmem>>, vector<1x8x16xf32>
    %1046 = vector.shape_cast %1045 : vector<1x8x16xf32> to vector<8x16xf32>
    %cst_646 = arith.constant dense<0.000000e+00> : vector<10x16xf32>
    %1047 = tpu.matmul %1044, %1046, %cst_646 {dimension_numbers = #tpu.dot_dimension_numbers<[1], [0], [0], [1], [0, 0, 1, 1], [], []>} : vector<10x8xf32>, vector<8x16xf32>, vector<10x16xf32> -> vector<10x16xf32>
    %c37 = arith.constant 37 : index
    %c0_647 = arith.constant 0 : index
    %c0_648 = arith.constant 0 : index
    %1048 = vector.load %arg20[%c37, %c0_647, %c0_648] : memref<42x16x8xf32, #tpu.memory_space<vmem>>, vector<1x16x8xf32>
    %1049 = vector.shape_cast %1048 : vector<1x16x8xf32> to vector<16x8xf32>
    %cst_649 = arith.constant dense<0.000000e+00> : vector<10x8xf32>
    %1050 = tpu.matmul %1006, %1049, %cst_649 {dimension_numbers = #tpu.dot_dimension_numbers<[1], [0], [0], [1], [0, 0, 1, 1], [], []>} : vector<10x16xf32>, vector<16x8xf32>, vector<10x8xf32> -> vector<10x8xf32>
    %c37_650 = arith.constant 37 : index
    %c0_651 = arith.constant 0 : index
    %c0_652 = arith.constant 0 : index
    %1051 = vector.load %arg21[%c37_650, %c0_651, %c0_652] : memref<42x1x8xf32, #tpu.memory_space<vmem>>, vector<1x1x8xf32>
    %1052 = vector.shape_cast %1051 : vector<1x1x8xf32> to vector<1x8xf32>
    %1053 = vector.broadcast %1052 : vector<1x8xf32> to vector<10x8xf32>
    %1054 = arith.addf %1050, %1053 : vector<10x8xf32>
    %c39 = arith.constant 39 : index
    %c0_653 = arith.constant 0 : index
    %c0_654 = arith.constant 0 : index
    %1055 = vector.load %arg20[%c39, %c0_653, %c0_654] : memref<42x16x8xf32, #tpu.memory_space<vmem>>, vector<1x16x8xf32>
    %1056 = vector.shape_cast %1055 : vector<1x16x8xf32> to vector<16x8xf32>
    %cst_655 = arith.constant dense<0.000000e+00> : vector<8x8xf32>
    %1057 = tpu.matmul %1007, %1056, %cst_655 {dimension_numbers = #tpu.dot_dimension_numbers<[1], [0], [0], [1], [0, 0, 1, 1], [], []>} : vector<8x16xf32>, vector<16x8xf32>, vector<8x8xf32> -> vector<8x8xf32>
    %c39_656 = arith.constant 39 : index
    %c0_657 = arith.constant 0 : index
    %c0_658 = arith.constant 0 : index
    %1058 = vector.load %arg21[%c39_656, %c0_657, %c0_658] : memref<42x1x8xf32, #tpu.memory_space<vmem>>, vector<1x1x8xf32>
    %1059 = vector.shape_cast %1058 : vector<1x1x8xf32> to vector<1x8xf32>
    %1060 = vector.broadcast %1059 : vector<1x8xf32> to vector<8x8xf32>
    %1061 = arith.addf %1057, %1060 : vector<8x8xf32>
    %c41 = arith.constant 41 : index
    %c0_659 = arith.constant 0 : index
    %c0_660 = arith.constant 0 : index
    %1062 = vector.load %arg20[%c41, %c0_659, %c0_660] : memref<42x16x8xf32, #tpu.memory_space<vmem>>, vector<1x16x8xf32>
    %1063 = vector.shape_cast %1062 : vector<1x16x8xf32> to vector<16x8xf32>
    %cst_661 = arith.constant dense<0.000000e+00> : vector<8x8xf32>
    %1064 = tpu.matmul %1005, %1063, %cst_661 {dimension_numbers = #tpu.dot_dimension_numbers<[1], [0], [0], [1], [0, 0, 1, 1], [], []>} : vector<8x16xf32>, vector<16x8xf32>, vector<8x8xf32> -> vector<8x8xf32>
    %c41_662 = arith.constant 41 : index
    %c0_663 = arith.constant 0 : index
    %c0_664 = arith.constant 0 : index
    %1065 = vector.load %arg21[%c41_662, %c0_663, %c0_664] : memref<42x1x8xf32, #tpu.memory_space<vmem>>, vector<1x1x8xf32>
    %1066 = vector.shape_cast %1065 : vector<1x1x8xf32> to vector<1x8xf32>
    %1067 = vector.broadcast %1066 : vector<1x8xf32> to vector<8x8xf32>
    %1068 = arith.addf %1064, %1067 : vector<8x8xf32>
    %cst_665 = arith.constant dense<0.000000e+00> : vector<10x8xf32>
    %1069 = tpu.matmul %1054, %1061, %cst_665 {dimension_numbers = #tpu.dot_dimension_numbers<[1], [1], [0], [0], [0, 0, 1, 0], [], []>} : vector<10x8xf32>, vector<8x8xf32>, vector<10x8xf32> -> vector<10x8xf32>
    %cst_666 = arith.constant 0.353553385 : f32
    %1070 = vector.broadcast %cst_666 : f32 to vector<10x8xf32>
    %1071 = arith.mulf %1069, %1070 : vector<10x8xf32>
    %1072 = arith.addf %1071, %278 : vector<10x8xf32>
    %cst_667 = arith.constant dense<0xFF800000> : vector<10xf32>
    %1073 = vector.multi_reduction <maximumf>, %1072, %cst_667 [1] : vector<10x8xf32> to vector<10xf32>
    %1074 = vector.shape_cast %1073 : vector<10xf32> to vector<10x1xf32>
    %1075 = vector.broadcast %1074 : vector<10x1xf32> to vector<10x8xf32>
    %1076 = arith.subf %1072, %1075 : vector<10x8xf32>
    %1077 = math.exp %1076 : vector<10x8xf32>
    %cst_668 = arith.constant dense<0.000000e+00> : vector<10xf32>
    %1078 = vector.multi_reduction <add>, %1077, %cst_668 [1] : vector<10x8xf32> to vector<10xf32>
    %1079 = vector.shape_cast %1078 : vector<10xf32> to vector<10x1xf32>
    %1080 = vector.broadcast %1079 : vector<10x1xf32> to vector<10x8xf32>
    %1081 = arith.divf %1077, %1080 : vector<10x8xf32>
    %cst_669 = arith.constant dense<0.000000e+00> : vector<10x8xf32>
    %1082 = tpu.matmul %1081, %1068, %cst_669 {dimension_numbers = #tpu.dot_dimension_numbers<[1], [0], [0], [1], [0, 0, 1, 1], [], []>} : vector<10x8xf32>, vector<8x8xf32>, vector<10x8xf32> -> vector<10x8xf32>
    %c13_670 = arith.constant 13 : index
    %c0_671 = arith.constant 0 : index
    %c0_672 = arith.constant 0 : index
    %1083 = vector.load %arg22[%c13_670, %c0_671, %c0_672] : memref<14x8x16xf32, #tpu.memory_space<vmem>>, vector<1x8x16xf32>
    %1084 = vector.shape_cast %1083 : vector<1x8x16xf32> to vector<8x16xf32>
    %cst_673 = arith.constant dense<0.000000e+00> : vector<10x16xf32>
    %1085 = tpu.matmul %1082, %1084, %cst_673 {dimension_numbers = #tpu.dot_dimension_numbers<[1], [0], [0], [1], [0, 0, 1, 1], [], []>} : vector<10x8xf32>, vector<8x16xf32>, vector<10x16xf32> -> vector<10x16xf32>
    %1086 = arith.addf %1047, %1085 : vector<10x16xf32>
    %1087 = vector.broadcast %1009 : vector<1x16xf32> to vector<10x16xf32>
    %1088 = arith.addf %1086, %1087 : vector<10x16xf32>
    %1089 = arith.addf %897, %1088 : vector<10x16xf32>
    %c8_674 = arith.constant 8 : index
    %c0_675 = arith.constant 0 : index
    %1090 = vector.load %arg24[%c8_674, %c0_675] : memref<9x16xf32, #tpu.memory_space<vmem>>, vector<1x16xf32>
    %c8_676 = arith.constant 8 : index
    %c0_677 = arith.constant 0 : index
    %1091 = vector.load %arg25[%c8_676, %c0_677] : memref<9x16xf32, #tpu.memory_space<vmem>>, vector<1x16xf32>
    %cst_678 = arith.constant dense<0.000000e+00> : vector<10xf32>
    %1092 = vector.multi_reduction <add>, %1089, %cst_678 [1] : vector<10x16xf32> to vector<10xf32>
    %1093 = vector.shape_cast %1092 : vector<10xf32> to vector<10x1xf32>
    %cst_679 = arith.constant 1.600000e+01 : f32
    %1094 = vector.broadcast %cst_679 : f32 to vector<10x1xf32>
    %1095 = arith.divf %1093, %1094 : vector<10x1xf32>
    %1096 = vector.broadcast %1095 : vector<10x1xf32> to vector<10x16xf32>
    %1097 = arith.subf %1089, %1096 : vector<10x16xf32>
    %1098 = arith.mulf %1097, %1097 : vector<10x16xf32>
    %cst_680 = arith.constant dense<0.000000e+00> : vector<10xf32>
    %1099 = vector.multi_reduction <add>, %1098, %cst_680 [1] : vector<10x16xf32> to vector<10xf32>
    %1100 = vector.shape_cast %1099 : vector<10xf32> to vector<10x1xf32>
    %cst_681 = arith.constant 1.600000e+01 : f32
    %1101 = vector.broadcast %cst_681 : f32 to vector<10x1xf32>
    %1102 = arith.divf %1100, %1101 : vector<10x1xf32>
    %1103 = vector.broadcast %1095 : vector<10x1xf32> to vector<10x16xf32>
    %1104 = arith.subf %1089, %1103 : vector<10x16xf32>
    %cst_682 = arith.constant 9.99999974E-6 : f32
    %1105 = vector.broadcast %cst_682 : f32 to vector<10x1xf32>
    %1106 = arith.addf %1102, %1105 : vector<10x1xf32>
    %1107 = math.rsqrt %1106 : vector<10x1xf32>
    %1108 = vector.broadcast %1107 : vector<10x1xf32> to vector<10x16xf32>
    %1109 = arith.mulf %1104, %1108 : vector<10x16xf32>
    %1110 = vector.broadcast %1090 : vector<1x16xf32> to vector<10x16xf32>
    %1111 = arith.mulf %1109, %1110 : vector<10x16xf32>
    %1112 = vector.broadcast %1091 : vector<1x16xf32> to vector<10x16xf32>
    %1113 = arith.addf %1111, %1112 : vector<10x16xf32>
    %c0_683 = arith.constant 0 : index
    %c0_684 = arith.constant 0 : index
    %1114 = vector.load %arg33[%c0_683, %c0_684] : memref<16x32xf32, #tpu.memory_space<vmem>>, vector<16x32xf32>
    %cst_685 = arith.constant dense<0.000000e+00> : vector<8x32xf32>
    %1115 = tpu.matmul %1005, %1114, %cst_685 {dimension_numbers = #tpu.dot_dimension_numbers<[1], [0], [0], [1], [0, 0, 1, 1], [], []>} : vector<8x16xf32>, vector<16x32xf32>, vector<8x32xf32> -> vector<8x32xf32>
    %c0_686 = arith.constant 0 : index
    %c0_687 = arith.constant 0 : index
    %1116 = vector.load %arg34[%c0_686, %c0_687] : memref<1x32xf32, #tpu.memory_space<vmem>>, vector<1x32xf32>
    %1117 = vector.broadcast %1116 : vector<1x32xf32> to vector<8x32xf32>
    %1118 = arith.addf %1115, %1117 : vector<8x32xf32>
    %c0_688 = arith.constant 0 : index
    %c0_689 = arith.constant 0 : index
    %1119 = vector.load %arg35[%c0_688, %c0_689] : memref<32x32xf32, #tpu.memory_space<vmem>>, vector<32x32xf32>
    %c0_690 = arith.constant 0 : index
    %c0_691 = arith.constant 0 : index
    %1120 = vector.load %arg36[%c0_690, %c0_691] : memref<1x32xf32, #tpu.memory_space<vmem>>, vector<1x32xf32>
    %c0_692 = arith.constant 0 : index
    %c0_693 = arith.constant 0 : index
    %1121 = vector.load %arg37[%c0_692, %c0_693] : memref<1x32xf32, #tpu.memory_space<vmem>>, vector<1x32xf32>
    %cst_694 = arith.constant dense<0.000000e+00> : vector<8x32xf32>
    %1122 = tpu.matmul %1118, %1119, %cst_694 {dimension_numbers = #tpu.dot_dimension_numbers<[1], [0], [0], [1], [0, 0, 1, 1], [], []>} : vector<8x32xf32>, vector<32x32xf32>, vector<8x32xf32> -> vector<8x32xf32>
    %1123 = arith.subf %1118, %1122 : vector<8x32xf32>
    %1124 = arith.mulf %1123, %1123 : vector<8x32xf32>
    %cst_695 = arith.constant dense<0.000000e+00> : vector<8x32xf32>
    %1125 = tpu.matmul %1124, %1119, %cst_695 {dimension_numbers = #tpu.dot_dimension_numbers<[1], [0], [0], [1], [0, 0, 1, 1], [], []>} : vector<8x32xf32>, vector<32x32xf32>, vector<8x32xf32> -> vector<8x32xf32>
    %1126 = arith.subf %1118, %1122 : vector<8x32xf32>
    %cst_696 = arith.constant 9.99999997E-7 : f32
    %1127 = vector.broadcast %cst_696 : f32 to vector<8x32xf32>
    %1128 = arith.addf %1125, %1127 : vector<8x32xf32>
    %1129 = math.rsqrt %1128 : vector<8x32xf32>
    %1130 = arith.mulf %1126, %1129 : vector<8x32xf32>
    %1131 = vector.broadcast %1120 : vector<1x32xf32> to vector<8x32xf32>
    %1132 = arith.mulf %1130, %1131 : vector<8x32xf32>
    %1133 = vector.broadcast %1121 : vector<1x32xf32> to vector<8x32xf32>
    %1134 = arith.addf %1132, %1133 : vector<8x32xf32>
    %1135 = arith.mulf %1134, %1134 : vector<8x32xf32>
    %1136 = arith.mulf %1134, %1135 : vector<8x32xf32>
    %cst_697 = arith.constant 4.471500e-02 : f32
    %1137 = vector.broadcast %cst_697 : f32 to vector<8x32xf32>
    %1138 = arith.mulf %1137, %1136 : vector<8x32xf32>
    %1139 = arith.addf %1134, %1138 : vector<8x32xf32>
    %cst_698 = arith.constant 0.797884583 : f32
    %1140 = vector.broadcast %cst_698 : f32 to vector<8x32xf32>
    %1141 = arith.mulf %1140, %1139 : vector<8x32xf32>
    %1142 = math.tanh %1141 : vector<8x32xf32>
    %cst_699 = arith.constant 1.000000e+00 : f32
    %1143 = vector.broadcast %cst_699 : f32 to vector<8x32xf32>
    %1144 = arith.addf %1143, %1142 : vector<8x32xf32>
    %cst_700 = arith.constant 5.000000e-01 : f32
    %1145 = vector.broadcast %cst_700 : f32 to vector<8x32xf32>
    %1146 = arith.mulf %1145, %1144 : vector<8x32xf32>
    %1147 = arith.mulf %1134, %1146 : vector<8x32xf32>
    %c0_701 = arith.constant 0 : index
    %c0_702 = arith.constant 0 : index
    %1148 = vector.load %arg38[%c0_701, %c0_702] : memref<32x32xf32, #tpu.memory_space<vmem>>, vector<32x32xf32>
    %cst_703 = arith.constant dense<0.000000e+00> : vector<8x32xf32>
    %1149 = tpu.matmul %1147, %1148, %cst_703 {dimension_numbers = #tpu.dot_dimension_numbers<[1], [0], [0], [1], [0, 0, 1, 1], [], []>} : vector<8x32xf32>, vector<32x32xf32>, vector<8x32xf32> -> vector<8x32xf32>
    %c0_704 = arith.constant 0 : index
    %c0_705 = arith.constant 0 : index
    %1150 = vector.load %arg39[%c0_704, %c0_705] : memref<1x32xf32, #tpu.memory_space<vmem>>, vector<1x32xf32>
    %1151 = vector.broadcast %1150 : vector<1x32xf32> to vector<8x32xf32>
    %1152 = arith.addf %1149, %1151 : vector<8x32xf32>
    %1153 = arith.mulf %1152, %1152 : vector<8x32xf32>
    %1154 = arith.mulf %1152, %1153 : vector<8x32xf32>
    %cst_706 = arith.constant 4.471500e-02 : f32
    %1155 = vector.broadcast %cst_706 : f32 to vector<8x32xf32>
    %1156 = arith.mulf %1155, %1154 : vector<8x32xf32>
    %1157 = arith.addf %1152, %1156 : vector<8x32xf32>
    %cst_707 = arith.constant 0.797884583 : f32
    %1158 = vector.broadcast %cst_707 : f32 to vector<8x32xf32>
    %1159 = arith.mulf %1158, %1157 : vector<8x32xf32>
    %1160 = math.tanh %1159 : vector<8x32xf32>
    %cst_708 = arith.constant 1.000000e+00 : f32
    %1161 = vector.broadcast %cst_708 : f32 to vector<8x32xf32>
    %1162 = arith.addf %1161, %1160 : vector<8x32xf32>
    %cst_709 = arith.constant 5.000000e-01 : f32
    %1163 = vector.broadcast %cst_709 : f32 to vector<8x32xf32>
    %1164 = arith.mulf %1163, %1162 : vector<8x32xf32>
    %1165 = arith.mulf %1152, %1164 : vector<8x32xf32>
    %1166 = vector.extract_strided_slice %1113 {offsets = [2, 0], sizes = [8, 16], strides = [1, 1]} : vector<10x16xf32> to vector<8x16xf32>
    %c0_710 = arith.constant 0 : index
    %c0_711 = arith.constant 0 : index
    %1167 = vector.load %arg44[%c0_710, %c0_711] : memref<16x64xf32, #tpu.memory_space<vmem>>, vector<16x64xf32>
    %cst_712 = arith.constant dense<0.000000e+00> : vector<8x64xf32>
    %1168 = tpu.matmul %1166, %1167, %cst_712 {dimension_numbers = #tpu.dot_dimension_numbers<[1], [0], [0], [1], [0, 0, 1, 1], [], []>} : vector<8x16xf32>, vector<16x64xf32>, vector<8x64xf32> -> vector<8x64xf32>
    %c0_713 = arith.constant 0 : index
    %c0_714 = arith.constant 0 : index
    %1169 = vector.load %arg45[%c0_713, %c0_714] : memref<1x64xf32, #tpu.memory_space<vmem>>, vector<1x64xf32>
    %1170 = vector.broadcast %1169 : vector<1x64xf32> to vector<8x64xf32>
    %1171 = arith.addf %1168, %1170 : vector<8x64xf32>
    %cst_715 = arith.constant 0.000000e+00 : f32
    %1172 = vector.broadcast %cst_715 : f32 to vector<8x64xf32>
    %1173 = arith.maximumf %1171, %1172 : vector<8x64xf32>
    %c0_716 = arith.constant 0 : index
    %c0_717 = arith.constant 0 : index
    %1174 = vector.load %arg46[%c0_716, %c0_717] : memref<64x64xf32, #tpu.memory_space<vmem>>, vector<64x64xf32>
    %cst_718 = arith.constant dense<0.000000e+00> : vector<8x64xf32>
    %1175 = tpu.matmul %1173, %1174, %cst_718 {dimension_numbers = #tpu.dot_dimension_numbers<[1], [0], [0], [1], [0, 0, 1, 1], [], []>} : vector<8x64xf32>, vector<64x64xf32>, vector<8x64xf32> -> vector<8x64xf32>
    %c0_719 = arith.constant 0 : index
    %c0_720 = arith.constant 0 : index
    %1176 = vector.load %arg47[%c0_719, %c0_720] : memref<1x64xf32, #tpu.memory_space<vmem>>, vector<1x64xf32>
    %1177 = vector.broadcast %1176 : vector<1x64xf32> to vector<8x64xf32>
    %1178 = arith.addf %1175, %1177 : vector<8x64xf32>
    %cst_721 = arith.constant 0.000000e+00 : f32
    %1179 = vector.broadcast %cst_721 : f32 to vector<8x64xf32>
    %1180 = arith.maximumf %1178, %1179 : vector<8x64xf32>
    %c0_722 = arith.constant 0 : index
    %c0_723 = arith.constant 0 : index
    %1181 = vector.load %arg48[%c0_722, %c0_723] : memref<64x8xf32, #tpu.memory_space<vmem>>, vector<64x8xf32>
    %cst_724 = arith.constant dense<0.000000e+00> : vector<8x8xf32>
    %1182 = tpu.matmul %1180, %1181, %cst_724 {dimension_numbers = #tpu.dot_dimension_numbers<[1], [0], [0], [1], [0, 0, 1, 1], [], []>} : vector<8x64xf32>, vector<64x8xf32>, vector<8x8xf32> -> vector<8x8xf32>
    %c0_725 = arith.constant 0 : index
    %c0_726 = arith.constant 0 : index
    %1183 = vector.load %arg49[%c0_725, %c0_726] : memref<1x8xf32, #tpu.memory_space<vmem>>, vector<1x8xf32>
    %1184 = vector.broadcast %1183 : vector<1x8xf32> to vector<8x8xf32>
    %1185 = arith.addf %1182, %1184 : vector<8x8xf32>
    %c0_727 = arith.constant 0 : index
    %c0_728 = arith.constant 0 : index
    %1186 = vector.load %arg50[%c0_727, %c0_728] : memref<8x8xf32, #tpu.memory_space<vmem>>, vector<8x8xf32>
    %1187 = arith.mulf %1185, %1186 : vector<8x8xf32>
    %c0_729 = arith.constant 0 : index
    %c0_730 = arith.constant 0 : index
    %1188 = vector.load %arg51[%c0_729, %c0_730] : memref<8x8xf32, #tpu.memory_space<vmem>>, vector<8x8xf32>
    %cst_731 = arith.constant dense<0.000000e+00> : vector<8x8xf32>
    %1189 = tpu.matmul %1188, %1187, %cst_731 {dimension_numbers = #tpu.dot_dimension_numbers<[1], [0], [0], [1], [0, 0, 1, 1], [], []>} : vector<8x8xf32>, vector<8x8xf32>, vector<8x8xf32> -> vector<8x8xf32>
    %c0_732 = arith.constant 0 : index
    %c0_733 = arith.constant 0 : index
    %1190 = vector.load %arg40[%c0_732, %c0_733] : memref<32x64xf32, #tpu.memory_space<vmem>>, vector<32x64xf32>
    %cst_734 = arith.constant dense<0.000000e+00> : vector<8x64xf32>
    %1191 = tpu.matmul %1165, %1190, %cst_734 {dimension_numbers = #tpu.dot_dimension_numbers<[1], [0], [0], [1], [0, 0, 1, 1], [], []>} : vector<8x32xf32>, vector<32x64xf32>, vector<8x64xf32> -> vector<8x64xf32>
    %c0_735 = arith.constant 0 : index
    %c0_736 = arith.constant 0 : index
    %1192 = vector.load %arg41[%c0_735, %c0_736] : memref<32x64xf32, #tpu.memory_space<vmem>>, vector<32x64xf32>
    %cst_737 = arith.constant dense<0.000000e+00> : vector<8x64xf32>
    %1193 = tpu.matmul %1165, %1192, %cst_737 {dimension_numbers = #tpu.dot_dimension_numbers<[1], [0], [0], [1], [0, 0, 1, 1], [], []>} : vector<8x32xf32>, vector<32x64xf32>, vector<8x64xf32> -> vector<8x64xf32>
    %c0_738 = arith.constant 0 : index
    %c0_739 = arith.constant 0 : index
    %1194 = vector.load %arg42[%c0_738, %c0_739] : memref<8x64xf32, #tpu.memory_space<vmem>>, vector<8x64xf32>
    %cst_740 = arith.constant dense<0.000000e+00> : vector<8x64xf32>
    %1195 = tpu.matmul %1189, %1194, %cst_740 {dimension_numbers = #tpu.dot_dimension_numbers<[1], [0], [0], [1], [0, 0, 1, 1], [], []>} : vector<8x8xf32>, vector<8x64xf32>, vector<8x64xf32> -> vector<8x64xf32>
    %c0_741 = arith.constant 0 : index
    %c0_742 = arith.constant 0 : index
    %1196 = vector.load %arg43[%c0_741, %c0_742] : memref<8x64xf32, #tpu.memory_space<vmem>>, vector<8x64xf32>
    %cst_743 = arith.constant dense<0.000000e+00> : vector<8x64xf32>
    %1197 = tpu.matmul %1189, %1196, %cst_743 {dimension_numbers = #tpu.dot_dimension_numbers<[1], [0], [0], [1], [0, 0, 1, 1], [], []>} : vector<8x8xf32>, vector<8x64xf32>, vector<8x64xf32> -> vector<8x64xf32>
    %1198 = arith.mulf %1191, %1195 : vector<8x64xf32>
    %1199 = arith.mulf %1193, %1197 : vector<8x64xf32>
    %1200 = arith.addf %1198, %1199 : vector<8x64xf32>
    %c0_744 = arith.constant 0 : index
    %c0_745 = arith.constant 0 : index
    %1201 = vector.load %arg58[%c0_744, %c0_745] : memref<8x64xf32, #tpu.memory_space<vmem>>, vector<8x64xf32>
    tpu.vector_store %arg58[%c0_744, %c0_745], %1200 {strides = array<i32>} : memref<8x64xf32, #tpu.memory_space<vmem>>, vector<8x64xf32>,
    %1202 = vector.extract_strided_slice %1113 {offsets = [0, 0], sizes = [2, 16], strides = [1, 1]} : vector<10x16xf32> to vector<2x16xf32>
    %c0_746 = arith.constant 0 : index
    %c0_747 = arith.constant 0 : index
    %1203 = vector.load %arg52[%c0_746, %c0_747] : memref<16x16xf32, #tpu.memory_space<vmem>>, vector<16x16xf32>
    %cst_748 = arith.constant dense<0.000000e+00> : vector<2x16xf32>
    %1204 = tpu.matmul %1202, %1203, %cst_748 {dimension_numbers = #tpu.dot_dimension_numbers<[1], [0], [0], [1], [0, 0, 1, 1], [], []>} : vector<2x16xf32>, vector<16x16xf32>, vector<2x16xf32> -> vector<2x16xf32>
    %c0_749 = arith.constant 0 : index
    %c0_750 = arith.constant 0 : index
    %1205 = vector.load %arg53[%c0_749, %c0_750] : memref<1x16xf32, #tpu.memory_space<vmem>>, vector<1x16xf32>
    %1206 = vector.broadcast %1205 : vector<1x16xf32> to vector<2x16xf32>
    %1207 = arith.addf %1204, %1206 : vector<2x16xf32>
    %cst_751 = arith.constant 0.000000e+00 : f32
    %1208 = vector.broadcast %cst_751 : f32 to vector<2x16xf32>
    %1209 = arith.maximumf %1207, %1208 : vector<2x16xf32>
    %c0_752 = arith.constant 0 : index
    %c0_753 = arith.constant 0 : index
    %1210 = vector.load %arg54[%c0_752, %c0_753] : memref<16x16xf32, #tpu.memory_space<vmem>>, vector<16x16xf32>
    %cst_754 = arith.constant dense<0.000000e+00> : vector<2x16xf32>
    %1211 = tpu.matmul %1209, %1210, %cst_754 {dimension_numbers = #tpu.dot_dimension_numbers<[1], [0], [0], [1], [0, 0, 1, 1], [], []>} : vector<2x16xf32>, vector<16x16xf32>, vector<2x16xf32> -> vector<2x16xf32>
    %c0_755 = arith.constant 0 : index
    %c0_756 = arith.constant 0 : index
    %1212 = vector.load %arg55[%c0_755, %c0_756] : memref<1x16xf32, #tpu.memory_space<vmem>>, vector<1x16xf32>
    %1213 = vector.broadcast %1212 : vector<1x16xf32> to vector<2x16xf32>
    %1214 = arith.addf %1211, %1213 : vector<2x16xf32>
    %cst_757 = arith.constant 0.000000e+00 : f32
    %1215 = vector.broadcast %cst_757 : f32 to vector<2x16xf32>
    %1216 = arith.maximumf %1214, %1215 : vector<2x16xf32>
    %c0_758 = arith.constant 0 : index
    %c0_759 = arith.constant 0 : index
    %1217 = vector.load %arg56[%c0_758, %c0_759] : memref<16x4xf32, #tpu.memory_space<vmem>>, vector<16x4xf32>
    %cst_760 = arith.constant dense<0.000000e+00> : vector<2x4xf32>
    %1218 = tpu.matmul %1216, %1217, %cst_760 {dimension_numbers = #tpu.dot_dimension_numbers<[1], [0], [0], [1], [0, 0, 1, 1], [], []>} : vector<2x16xf32>, vector<16x4xf32>, vector<2x4xf32> -> vector<2x4xf32>
    %c0_761 = arith.constant 0 : index
    %c0_762 = arith.constant 0 : index
    %1219 = vector.load %arg57[%c0_761, %c0_762] : memref<1x4xf32, #tpu.memory_space<vmem>>, vector<1x4xf32>
    %1220 = vector.broadcast %1219 : vector<1x4xf32> to vector<2x4xf32>
    %1221 = arith.addf %1218, %1220 : vector<2x4xf32>
    %c0_763 = arith.constant 0 : index
    %c0_764 = arith.constant 0 : index
    %1222 = vector.load %arg59[%c0_763, %c0_764] : memref<2x4xf32, #tpu.memory_space<vmem>>, vector<2x4xf32>
    tpu.vector_store %arg59[%c0_763, %c0_764], %1221 {strides = array<i32>} : memref<2x4xf32, #tpu.memory_space<vmem>>, vector<2x4xf32>,
    return
  }
}

module attributes {stable_mosaic.version = 11 : i64} {
  func.func @_resize_kernel(%arg0: memref<72x48xf32, #tpu.memory_space<vmem>>, %arg1: memref<48x8xf32, #tpu.memory_space<vmem>>, %arg2: memref<8x12xf32, #tpu.memory_space<vmem>>, %arg3: memref<72x12xf32, #tpu.memory_space<vmem>>) attributes {dimension_semantics = [], scalar_prefetch = 0 : i64, scratch_operands = 0 : i64, tpu.core_type = #tpu.core_type<tc>} {
    %c0 = arith.constant 0 : index
    %c0_0 = arith.constant 0 : index
    %0 = vector.load %arg1[%c0, %c0_0] : memref<48x8xf32, #tpu.memory_space<vmem>>, vector<48x8xf32>
    %c0_1 = arith.constant 0 : index
    %c0_2 = arith.constant 0 : index
    %1 = vector.load %arg2[%c0_1, %c0_2] : memref<8x12xf32, #tpu.memory_space<vmem>>, vector<8x12xf32>
    %cst = arith.constant dense<0.000000e+00> : vector<48x12xf32>
    %2 = tpu.matmul %0, %1, %cst {dimension_numbers = #tpu.dot_dimension_numbers<[1], [0], [0], [1], [0, 0, 1, 1], [], []>} : vector<48x8xf32>, vector<8x12xf32>, vector<48x12xf32> -> vector<48x12xf32>
    %c0_3 = arith.constant 0 : index
    %c0_4 = arith.constant 0 : index
    %3 = vector.load %arg0[%c0_3, %c0_4] : memref<72x48xf32, #tpu.memory_space<vmem>>, vector<72x48xf32>
    %cst_5 = arith.constant dense<0.000000e+00> : vector<72x12xf32>
    %4 = tpu.matmul %3, %2, %cst_5 {dimension_numbers = #tpu.dot_dimension_numbers<[1], [0], [0], [1], [0, 0, 1, 1], [], []>} : vector<72x48xf32>, vector<48x12xf32>, vector<72x12xf32> -> vector<72x12xf32>
    %c0_6 = arith.constant 0 : index
    %c0_7 = arith.constant 0 : index
    %5 = vector.load %arg3[%c0_6, %c0_7] : memref<72x12xf32, #tpu.memory_space<vmem>>, vector<72x12xf32>
    tpu.vector_store %arg3[%c0_6, %c0_7], %4 {strides = array<i32>} : memref<72x12xf32, #tpu.memory_space<vmem>>, vector<72x12xf32>,
    return
  }
}

</mosaic_0001>

<bundles_post_ra>
// kernel: sam_un_forward.3
= control target key start
LH: loop header
LB: loop body
LE: loop exit
PB: predicated region body
PF: predicated region fallthrough
CT: control target
= control target key end

     0   :  { %vm21_vm0 = vcmask 64512   ;;  %v401_v7 = vmov 0.0|0.0   ;;  %vm402_vm1 = vmmov 0   ;;  %v403_v8 = vmov 0.0   ;;  %s526_s2 = inlined_call_operand.vmem [shape: f32[8,12], index: 2, kind: input, shape index: {}]   ;;  %s527_s1 = inlined_call_operand.vmem [shape: f32[48,8], index: 1, kind: input, shape index: {}]   ;;  %s528_s0 = inlined_call_operand.vmem [shape: f32[72,48], index: 0, kind: input, shape index: {}]   ;;  %s529_s3 = inlined_call_operand.vmem [shape: f32[72,12], index: 3, kind: output, shape index: {}]  }
   0x1   :  { %v20_v0 = vld [vmem:[%s526_s2] sm:$0xff]  ;;  %v15_v2 = vld [vmem:[%s527_s1 + $0x8] sm:$0xff]  ;;  %v16_v3 = vld [vmem:[%s527_s1 + $0x10] sm:$0xff]  ;;  %392 = vmatprep.subr.bf16.mxu1 %v401_v7  ;;  %368 = vmatprep.mubr.msk.f32.mxu1 %vm402_vm1, %v403_v8  ;;  %vm144_vm2 = vcmask 392192   ;;  %vm282_vm3 = vcmask 97280  }
   0x2   :  { %v14_v1 = vld [vmem:[%s527_s1] sm:$0xff]  ;;  %333 = vmatprep.subr.mxu0 %v20_v0  ;;  %v17_v4 = vld [vmem:[%s527_s1 + $0x18] sm:$0xff]  ;;  %v19_v6 = vld [vmem:[%s527_s1 + $0x28] sm:$0xff] }
   0x3   :  { %335 = vmatprep.mubr.msk.f32.mxu0 %vm21_vm0, %v14_v1  ;;  %334 = vmatpush3.msra.mxu0 %v20_v0  ;;  %v18_v5 = vld [vmem:[%s527_s1 + $0x20] sm:$0xff]  ;;  %v140_v20 = vld [vmem:[%s528_s0 + $0x28] sm:$0xff]  ;;  %v141_v22 = vld [vmem:[%s528_s0 + $0x30] sm:$0xff] }
   0x4   :  { %336 = vmatmul.mubr.msk.f32.vlgmr.msra.gmra.mrb[0].mxu0 %vm21_vm0, %v15_v2  ;;  %383 = vmatprep.subr.bf16.mxu0 %v401_v7  ;;  %v139_v18 = vld [vmem:[%s528_s0 + $0x20] sm:$0xff]  ;;  %v136_v21 = vld [vmem:[%s528_s0 + $0x8] sm:$0xff]  ;;  %v137_v23 = vld [vmem:[%s528_s0 + $0x10] sm:$0xff] }
   0x5   :  { %338 = vmatprep.mubr.msk.f32.mxu0 %vm21_vm0, %v16_v3  ;;  %v135_v19 = vld [vmem:[%s528_s0] sm:$0xff]  ;;  %v142_v24 = vld [vmem:[%s528_s0 + $0x38] sm:$0xff] }
   0x6   :  { %v138_v25 = vld [vmem:[%s528_s0 + $0x18] sm:$0xff]  ;;  %v143_v26 = vld [vmem:[%s528_s0 + $0x40] sm:$0xff] }
   0x8   :  { %339 = vmatmul.mubr.msk.f32.gmra.mrb[2].mxu0 %vm21_vm0, %v17_v4 }
   0x9   :  { %341 = vmatprep.mubr.msk.f32.mxu0 %vm21_vm0, %v18_v5 }
   0xc   :  { %342 = vmatmul.mubr.msk.f32.gmra.mrb[4].mxu0 %vm21_vm0, %v19_v6 }
   0xd   :  { %356 = vmatprep.mubr.msk.f32.mxu0 %vm402_vm1, %v403_v8 }
  0xd7   :  { %v337_v9 = vpop.f32.mrb[0].mxu0 }
  0xd8   :  { %v106_v10 = vpop.f32.mrb[1].mxu0 }
  0xd9   :  { %v384_v11 = vpack.c.bf16 %v337_v9, %v106_v10 }
  0xdb   :  { %v340_v12 = vpop.f32.mrb[2].mxu0  ;;  %385 = vmatpush3.bf16.msra.mxu0 %v384_v11  ;;  %395 = vmatpush3.bf16.msra.mxu1 %v384_v11 }
  0xdc   :  { %v116_v13 = vpop.f32.mrb[3].mxu0  ;;  %386 = vmatprep.subr.bf16.mxu0 %v401_v7  ;;  %393 = vmatprep.subr.bf16.mxu1 %v401_v7 }
  0xdd   :  { %v387_v14 = vpack.c.bf16 %v340_v12, %v116_v13 }
  0xdf   :  { %v343_v15 = vpop.f32.mrb[4].mxu0  ;;  %388 = vmatpush3.bf16.msra.mxu0 %v387_v14  ;;  %396 = vmatpush3.bf16.msra.mxu1 %v387_v14 }
  0xe0   :  { %v126_v16 = vpop.f32.mrb[5].mxu0  ;;  %389 = vmatprep.subr.bf16.mxu0 %v401_v7  ;;  %394 = vmatprep.subr.bf16.mxu1 %v401_v7 }
  0xe1   :  { %v390_v17 = vpack.c.bf16 %v343_v15, %v126_v16 }
  0xe3   :  { %391 = vmatpush3.bf16.msra.mxu0 %v390_v17  ;;  %397 = vmatpush3.bf16.msra.mxu1 %v390_v17 }
  0xe6   :  { %369 = vmatmul.mubr.msk.f32.vlgmr.msra.gmra.mrb[0].mxu1 %vm144_vm2, %v139_v18  ;;  %357 = vmatmul.mubr.msk.f32.vlgmr.msra.gmra.mrb[6].mxu0 %vm144_vm2, %v135_v19 }
  0xe7   :  { %371 = vmatprep.mubr.msk.f32.mxu1 %vm402_vm1, %v403_v8  ;;  %359 = vmatprep.mubr.msk.f32.mxu0 %vm402_vm1, %v403_v8 }
  0xea   :  { %372 = vmatmul.mubr.msk.f32.gmra.mrb[2].mxu1 %vm144_vm2, %v140_v20  ;;  %360 = vmatmul.mubr.msk.f32.gmra.mrb[8].mxu0 %vm144_vm2, %v136_v21 }
  0xeb   :  { %374 = vmatprep.mubr.msk.f32.mxu1 %vm402_vm1, %v403_v8  ;;  %362 = vmatprep.mubr.msk.f32.mxu0 %vm402_vm1, %v403_v8 }
  0xee   :  { %375 = vmatmul.mubr.msk.f32.gmra.mrb[4].mxu1 %vm144_vm2, %v141_v22  ;;  %363 = vmatmul.mubr.msk.f32.gmra.mrb[10].mxu0 %vm144_vm2, %v137_v23 }
  0xef   :  { %377 = vmatprep.mubr.msk.f32.mxu1 %vm402_vm1, %v403_v8  ;;  %365 = vmatprep.mubr.msk.f32.mxu0 %vm402_vm1, %v403_v8 }
  0xf2   :  { %378 = vmatmul.mubr.msk.f32.gmra.mrb[6].mxu1 %vm144_vm2, %v142_v24  ;;  %366 = vmatmul.mubr.msk.f32.gmra.mrb[12].mxu0 %vm144_vm2, %v138_v25 }
  0xf3   :  { %380 = vmatprep.mubr.msk.f32.mxu1 %vm402_vm1, %v403_v8 }
  0xf6   :  { %381 = vmatmul.mubr.msk.f32.gmra.mrb[8].mxu1 %vm144_vm2, %v143_v26 }
 0x1b9   :  { %v258_v27 = vpop.f32.mrb[0].mxu1  ;;  %v238_v28 = vpop.f32.mrb[6].mxu0 }
 0x1ba   :  { %287 = vst.msk [vmem:[%s529_s3 + $0x20] sm:$0xff] %vm282_vm3, %v258_v27  ;;  %v370_v29 = vpop.f32.mrb[1].mxu1  ;;  %283 = vst.msk [vmem:[%s529_s3] sm:$0xff] %vm282_vm3, %v238_v28  ;;  %v358_v30 = vpop.f32.mrb[7].mxu0 }
 0x1bd   :  { %v263_v31 = vpop.f32.mrb[2].mxu1  ;;  %v243_v32 = vpop.f32.mrb[8].mxu0 }
 0x1be   :  { %288 = vst.msk [vmem:[%s529_s3 + $0x28] sm:$0xff] %vm282_vm3, %v263_v31  ;;  %v373_v33 = vpop.f32.mrb[3].mxu1  ;;  %284 = vst.msk [vmem:[%s529_s3 + $0x8] sm:$0xff] %vm282_vm3, %v243_v32  ;;  %v361_v34 = vpop.f32.mrb[9].mxu0 }
 0x1c1   :  { %v268_v35 = vpop.f32.mrb[4].mxu1  ;;  %v248_v36 = vpop.f32.mrb[10].mxu0 }
 0x1c2   :  { %289 = vst.msk [vmem:[%s529_s3 + $0x30] sm:$0xff] %vm282_vm3, %v268_v35  ;;  %v376_v37 = vpop.f32.mrb[5].mxu1  ;;  %285 = vst.msk [vmem:[%s529_s3 + $0x10] sm:$0xff] %vm282_vm3, %v248_v36  ;;  %v364_v38 = vpop.f32.mrb[11].mxu0 }
 0x1c5   :  { %v273_v39 = vpop.f32.mrb[6].mxu1  ;;  %v253_v40 = vpop.f32.mrb[12].mxu0 }
 0x1c6   :  { %290 = vst.msk [vmem:[%s529_s3 + $0x38] sm:$0xff] %vm282_vm3, %v273_v39  ;;  %v379_v41 = vpop.f32.mrb[7].mxu1  ;;  %286 = vst.msk [vmem:[%s529_s3 + $0x18] sm:$0xff] %vm282_vm3, %v253_v40  ;;  %v367_v42 = vpop.f32.mrb[13].mxu0 }
 0x1c9   :  { %v278_v43 = vpop.f32.mrb[8].mxu1 }
 0x1ca   :  { %291 = vst.msk [vmem:[%s529_s3 + $0x40] sm:$0xff] %vm282_vm3, %v278_v43  ;;  %v382_v44 = vpop.f32.mrb[9].mxu1 }

// kernel: sam_un_forward.2
= control target key start
LH: loop header
LB: loop body
LE: loop exit
PB: predicated region body
PF: predicated region fallthrough
CT: control target
= control target key end

     0   :  { %s14630_s6 = smov 1   ;;  %s14631_s10 = smov 2   ;;  %s16246_s0 = inlined_call_operand.smem [shape: u32[60], index: -1, kind: input, shape index: {}] }
   0x1   :  { %s14718_s5 = sld [smem:[%s16246_s0]]   ;;  %s14632_s14 = smov 3  }
   0x2   :  { %s14723_s9 = sld [smem:[%s16246_s0 + %s14630_s6]]   ;;  %s14633_s18 = smov 4  }
   0x3   :  { %s14728_s13 = sld [smem:[%s16246_s0 + %s14631_s10]]   ;;  %s14634_s22 = smov 5  }
   0x4   :  { %s14733_s17 = sld [smem:[%s16246_s0 + %s14632_s14]]   ;;  %s14635_s26 = smov 6  }
   0x5   :  { %s14738_s21 = sld [smem:[%s16246_s0 + %s14633_s18]]   ;;  %s14636_s30 = smov 7  }
   0x6   :  { %s14743_s25 = sld [smem:[%s16246_s0 + %s14634_s22]]   ;;  %s14637_s4 = smov 8  }
   0x7   :  { %16281 = sst [smem:[#allocation33_spill]] %s14718_s5  ;;  %s14638_s10 = smov 9  }
   0x8   :  { %16282 = sst [smem:[#allocation34_spill]] %s14723_s9  ;;  %s14639_s15 = smov 10  }
   0x9   :  { %16283 = sst [smem:[#allocation35_spill]] %s14728_s13  ;;  %s14640_s20 = smov 11  }
   0xa   :  { %16284 = sst [smem:[#allocation36_spill]] %s14733_s17  ;;  %s14642_s1 = smov 13  }
   0xb   :  { %16285 = sst [smem:[#allocation37_spill]] %s14738_s21  ;;  %s14643_s7 = smov 14  }
   0xc   :  { %16286 = sst [smem:[#allocation38_spill]] %s14743_s25  ;;  %s14645_s22 = smov 16  }
   0xd   :  { %s14748_s29 = sld [smem:[%s16246_s0 + %s14635_s26]]   ;;  %s14641_s26 = smov 12  }
   0xe   :  { %s14753_s3 = sld [smem:[%s16246_s0 + %s14636_s30]]   ;;  %s14646_s28 = smov 17  }
   0xf   :  { %s14758_s8 = sld [smem:[%s16246_s0 + %s14637_s4]]  }
  0x10   :  { %s14763_s14 = sld [smem:[%s16246_s0 + %s14638_s10]]  }
  0x11   :  { %s14768_s19 = sld [smem:[%s16246_s0 + %s14639_s15]]   ;;  %s14644_s15 = smov 15  }
  0x12   :  { %s14773_s24 = sld [smem:[%s16246_s0 + %s14640_s20]]  }
  0x13   :  { %16287 = sst [smem:[#allocation39_spill]] %s14748_s29 }
  0x14   :  { %16288 = sst [smem:[#allocation40_spill]] %s14753_s3 }
  0x15   :  { %16289 = sst [smem:[#allocation41_spill]] %s14758_s8 }
  0x16   :  { %s14778_s30 = sld [smem:[%s16246_s0 + %s14641_s26]]  }
  0x17   :  { %16290 = sst [smem:[#allocation42_spill]] %s14768_s19 }
  0x18   :  { %s14783_s6 = sld [smem:[%s16246_s0 + %s14642_s1]]  }
  0x19   :  { %s14788_s12 = sld [smem:[%s16246_s0 + %s14643_s7]]   ;;  %s14647_s7 = smov 18  }
  0x1a   :  { %s14793_s20 = sld [smem:[%s16246_s0 + %s14644_s15]]   ;;  %s14648_s15 = smov 19  }
  0x1b   :  { %s14798_s27 = sld [smem:[%s16246_s0 + %s14645_s22]]   ;;  %s14649_s22 = smov 20  }
  0x1c   :  { %16291 = sst [smem:[#allocation43_spill]] %s14778_s30 }
  0x1d   :  { %s14803_s4 = sld [smem:[%s16246_s0 + %s14646_s28]]   ;;  %s14650_s28 = smov 21  }
  0x1e   :  { %s14808_s30 = sld [smem:[%s16246_s0 + %s14647_s7]]   ;;  %s14651_s7 = smov 22  }
  0x1f   :  { %16292 = sst [smem:[#allocation44_spill]] %s14788_s12 }
  0x20   :  { %16293 = sst [smem:[#allocation45_spill]] %s14793_s20 }
  0x21   :  { %16294 = sst [smem:[#allocation46_spill]] %s14798_s27 }
  0x22   :  { %s14813_s20 = sld [smem:[%s16246_s0 + %s14648_s15]]   ;;  %s14652_s15 = smov 23  }
  0x23   :  { %16295 = sst [smem:[#allocation47_spill]] %s14803_s4 }
  0x24   :  { %16296 = sst [smem:[#allocation48_spill]] %s14808_s30 }
  0x25   :  { %s14818_s27 = sld [smem:[%s16246_s0 + %s14649_s22]]   ;;  %s14653_s22 = smov 24  }
  0x26   :  { %s14823_s4 = sld [smem:[%s16246_s0 + %s14650_s28]]   ;;  %s14654_s28 = smov 25  }
  0x27   :  { %s14828_s30 = sld [smem:[%s16246_s0 + %s14651_s7]]   ;;  %s14655_s7 = smov 26  }
  0x28   :  { %16297 = sst [smem:[#allocation49_spill]] %s14813_s20 }
  0x29   :  { %s14833_s20 = sld [smem:[%s16246_s0 + %s14652_s15]]   ;;  %s14656_s15 = smov 27  }
  0x2b   :  { %16298 = sst [smem:[#allocation50_spill]] %s14818_s27 }
  0x2c   :  { %16299 = sst [smem:[#allocation51_spill]] %s14823_s4 }
  0x2d   :  { %16300 = sst [smem:[#allocation52_spill]] %s14828_s30 }
  0x2e   :  { %s14838_s27 = sld [smem:[%s16246_s0 + %s14653_s22]]   ;;  %s14657_s22 = smov 28  }
  0x2f   :  { %16301 = sst [smem:[#allocation53_spill]] %s14833_s20 }
  0x30   :  { %s14843_s4 = sld [smem:[%s16246_s0 + %s14654_s28]]   ;;  %s14658_s28 = smov 29  }
  0x31   :  { %s14848_s30 = sld [smem:[%s16246_s0 + %s14655_s7]]   ;;  %s14659_s7 = smov 30  }
  0x32   :  { %s14853_s20 = sld [smem:[%s16246_s0 + %s14656_s15]]   ;;  %s14660_s15 = smov 31  }
  0x33   :  { %s14873_s19 = sld [smem:[%s16246_s0 + %s14660_s15]]   ;;  %s14664_s15 = smov 35  }
  0x34   :  { %16302 = sst [smem:[#allocation54_spill]] %s14838_s27 }
  0x35   :  { %s14858_s27 = sld [smem:[%s16246_s0 + %s14657_s22]]   ;;  %s14661_s22 = smov 32  }
  0x36   :  { %16303 = sst [smem:[#allocation55_spill]] %s14843_s4 }
  0x37   :  { %16304 = sst [smem:[#allocation56_spill]] %s14848_s30 }
  0x38   :  { %s14863_s4 = sld [smem:[%s16246_s0 + %s14658_s28]]   ;;  %s14662_s28 = smov 33  }
  0x39   :  { %s14868_s30 = sld [smem:[%s16246_s0 + %s14659_s7]]   ;;  %s14663_s7 = smov 34  }
  0x3a   :  { %16307 = sst [smem:[#allocation59_spill]] %s14873_s19 }
  0x3b   :  { %16305 = sst [smem:[#allocation57_spill]] %s14858_s27 }
  0x3c   :  { %s14878_s27 = sld [smem:[%s16246_s0 + %s14661_s22]]   ;;  %s14665_s22 = smov 36  }
  0x3d   :  { %s14883_s8 = sld [smem:[%s16246_s0 + %s14662_s28]]   ;;  %s14666_s28 = smov 37  }
  0x3e   :  { %s14893_s19 = sld [smem:[%s16246_s0 + %s14664_s15]]   ;;  %s14668_s15 = smov 39  }
  0x3f   :  { %16306 = sst [smem:[#allocation58_spill]] %s14868_s30 }
  0x40   :  { %s14888_s30 = sld [smem:[%s16246_s0 + %s14663_s7]]   ;;  %s14667_s7 = smov 38  }
  0x41   :  { %s14908_s29 = sld [smem:[%s16246_s0 + %s14667_s7]]   ;;  %s14671_s7 = smov 42  }
  0x42   :  { %16308 = sst [smem:[#allocation60_spill]] %s14878_s27 }
  0x43   :  { %16309 = sst [smem:[#allocation61_spill]] %s14883_s8 }
  0x44   :  { %16310 = sst [smem:[#allocation62_spill]] %s14893_s19 }
  0x45   :  { %s14898_s27 = sld [smem:[%s16246_s0 + %s14665_s22]]   ;;  %s14669_s22 = smov 40  }
  0x46   :  { %s14903_s8 = sld [smem:[%s16246_s0 + %s14666_s28]]   ;;  %s14670_s28 = smov 41  }
  0x47   :  { %16311 = sst [smem:[#allocation63_spill]] %s14908_s29 }
  0x48   :  { %s14913_s19 = sld [smem:[%s16246_s0 + %s14668_s15]]   ;;  %s14672_s15 = smov 43  }
  0x49   :  { %s14918_s25 = sld [smem:[%s16246_s0 + %s14669_s22]]   ;;  %s14673_s22 = smov 44  }
  0x4a   :  { %s14923_s12 = sld [smem:[%s16246_s0 + %s14670_s28]]   ;;  %s14674_s28 = smov 45  }
  0x4b   :  { %s14928_s29 = sld [smem:[%s16246_s0 + %s14671_s7]]   ;;  %s14675_s7 = smov 46  }
  0x4c   :  { %s14933_s21 = sld [smem:[%s16246_s0 + %s14672_s15]]   ;;  %s14676_s15 = smov 47  }
  0x4f   :  { %16312 = sst [smem:[#allocation64_spill]] %s14918_s25 }
  0x50   :  { %16313 = sst [smem:[#allocation65_spill]] %s14923_s12 }
  0x51   :  { %16314 = sst [smem:[#allocation66_spill]] %s14928_s29 }
  0x52   :  { %16315 = sst [smem:[#allocation67_spill]] %s14933_s21 }
  0x53   :  { %s14938_s25 = sld [smem:[%s16246_s0 + %s14673_s22]]   ;;  %s14677_s22 = smov 48  }
  0x54   :  { %s14943_s12 = sld [smem:[%s16246_s0 + %s14674_s28]]   ;;  %s14678_s28 = smov 49  }
  0x55   :  { %s14948_s29 = sld [smem:[%s16246_s0 + %s14675_s7]]   ;;  %s14679_s7 = smov 50  }
  0x56   :  { %s14953_s21 = sld [smem:[%s16246_s0 + %s14676_s15]]   ;;  %s14680_s15 = smov 51  }
  0x57   :  { %s14963_s3 = sld [smem:[%s16246_s0 + %s14678_s28]]   ;;  %s14682_s28 = smov 53  }
  0x58   :  { %s14973_s17 = sld [smem:[%s16246_s0 + %s14680_s15]]   ;;  %s14684_s15 = smov 55  }
  0x59   :  { %16316 = sst [smem:[#allocation68_spill]] %s14938_s25 }
  0x5a   :  { %s14958_s25 = sld [smem:[%s16246_s0 + %s14677_s22]]   ;;  %s14681_s22 = smov 52  }
  0x5b   :  { %16317 = sst [smem:[#allocation69_spill]] %s14948_s29 }
  0x5c   :  { %s14968_s29 = sld [smem:[%s16246_s0 + %s14679_s7]]   ;;  %s14683_s7 = smov 54  }
  0x5d   :  { %s14983_s13 = sld [smem:[%s16246_s0 + %s14682_s28]]   ;;  %s14686_s28 = smov 57  }
  0x5e   :  { %16320 = sst [smem:[#allocation72_spill]] %s14973_s17 }
  0x5f   :  { %s14993_s17 = sld [smem:[%s16246_s0 + %s14684_s15]]   ;;  %s14688_s15 = smov 59  }
  0x60   :  { %16318 = sst [smem:[#allocation70_spill]] %s14958_s25 }
  0x61   :  { %s14978_s25 = sld [smem:[%s16246_s0 + %s14681_s22]]   ;;  %s14685_s22 = smov 56  }
  0x62   :  { %16319 = sst [smem:[#allocation71_spill]] %s14968_s29 }
  0x63   :  { %s14988_s29 = sld [smem:[%s16246_s0 + %s14683_s7]]   ;;  %s14687_s7 = smov 58  }
  0x64   :  { %s15003_s5 = sld [smem:[%s16246_s0 + %s14686_s28]]  }
  0x65   :  { %s15013_s9 = sld [smem:[%s16246_s0 + %s14688_s15]]  }
  0x67   :  { %16321 = sst [smem:[#allocation73_spill]] %s14978_s25 }
  0x68   :  { %s14998_s25 = sld [smem:[%s16246_s0 + %s14685_s22]]  }
  0x69   :  { %16322 = sst [smem:[#allocation74_spill]] %s14988_s29 }
  0x6a   :  { %s15008_s29 = sld [smem:[%s16246_s0 + %s14687_s7]]  }
  0x6b   :  { %125 = vsyncpa [#allocation3], 0 }
  0x6c   :  { %126 = vsyncpa [#allocation5], 0 }
  0x6d   :  { %127 = vsyncpa [#allocation8], 0 }
  0x6e   :  { %128 = vsyncpa [#allocation11], 0 }
  0x6f   :  { %129 = vsyncpa [#allocation14], 0 }
  0x70   :  { %130 = vsyncpa [#allocation17], 0 }
  0x71   :  { %131 = vsyncpa [#allocation20], 0 }
  0x72   :  { %132 = vsyncpa [#allocation23], 0  ;;  %s14689_s22 = smov [#allocation4]   ;;  %s14690_s26 = smov [#allocation7]  }
  0x73   :  { %s169_s23 = sshll.u32 %s14689_s22, 4  ;;  %s216_s28 = sshll.u32 %s14690_s26, 4  ;;  %s170_s23 = int_to_ptr.vmem [resolvable:$true] %s169_s23  ;;  %s15015_s28 = int_to_ptr.vmem [resolvable:$true] %s216_s28 }
  0x74   :  { %s14284_s0 = scalar_lea.hbm %s14773_s24, 16 }
  0x75   :  { %p14285_p0 = scmp.ne.s32.totalorder %s14773_s24, %s14284_s0  ;;  %p14288_p1 = scmp.lt.u32.totalorder %s14284_s0, %s14773_s24 }
  0x77   :  { %p14290_p2 = pnand %p14288_p1, %p14285_p0 }
  0x79   :  { %14293 = shalt.err (!%p14290_p2)
}
  0x7a   :  { %s14294_s1 = scalar_lea.vmem %s170_s23, 16  ;;  %s14298_s2 = scalar_lea.vmem %s170_s23, 32 }
  0x7b   :  { %p14295_p3 = scmp.ne.s32.totalorder %s170_s23, %s14294_s1  ;;  %p14299_p4 = scmp.lt.s32.totalorder %s170_s23, %s170_s23 }
  0x7c   :  { %p14300_p5 = scmp.lt.s32.totalorder %s14298_s2, %s14294_s1 }
  0x7e   :  { %p14301_p6 = por %p14300_p5, %p14299_p4 }
  0x80   :  { %p14302_p7 = pnand %p14301_p6, %p14295_p3 }
  0x82   :  { %14305 = shalt.err (!%p14302_p7)
}
  0x83   :  { %172 = dma.hbm_to_vmem [thread:$0]  %s14773_s24, 16, %s170_s23, [#allocation5]  }
  0x84   :  { %s14306_s7 = scalar_lea.hbm %s14853_s20, 32 }
  0x85   :  { %p14307_p8 = scmp.ne.s32.totalorder %s14853_s20, %s14306_s7  ;;  %p14310_p9 = scmp.lt.u32.totalorder %s14306_s7, %s14853_s20 }
  0x87   :  { %p14312_p10 = pnand %p14310_p9, %p14307_p8 }
  0x89   :  { %14315 = shalt.err (!%p14312_p10)
}
  0x8a   :  { %s14316_s10 = scalar_lea.vmem %s15015_s28, 32  ;;  %p14321_p12 = scmp.lt.s32.totalorder %s15015_s28, %s15015_s28 }
  0x8b   :  { %p14317_p11 = scmp.ne.s32.totalorder %s15015_s28, %s14316_s10  ;;  %p14322_p13 = scmp.lt.s32.totalorder %s14316_s10, %s14316_s10 }
  0x8d   :  { %p14323_p0 = por %p14322_p13, %p14321_p12 }
  0x8f   :  { %p14324_p1 = pnand %p14323_p0, %p14317_p11 }
  0x91   :  { %14327 = shalt.err (!%p14324_p1)
}
  0x92   :  { %s14691_s11 = smov 16   ;;  %s14692_s24 = smov 1  }
  0x93   :  { %222 = dma.hbm_to_vmem [thread:$0]  %s14853_s20, 32, %s15015_s28, [#allocation8], %s14691_s11, %s14691_s11, %s14692_s24  }
  0x94   :  { %s14693_s15 = smov [#allocation10]   ;;  %s14694_s18 = smov [#allocation13]  }
  0x95   :  { %s251_s16 = sshll.u32 %s14693_s15, 4  ;;  %s273_s22 = sshll.u32 %s14694_s18, 4  ;;  %s252_s16 = int_to_ptr.vmem [resolvable:$true] %s251_s16  ;;  %s274_s22 = int_to_ptr.vmem [resolvable:$true] %s273_s22 }
  0x96   :  { %s14328_s23 = scalar_lea.hbm %s14888_s30, 16 }
  0x97   :  { %p14329_p2 = scmp.ne.s32.totalorder %s14888_s30, %s14328_s23  ;;  %p14332_p3 = scmp.lt.u32.totalorder %s14328_s23, %s14888_s30 }
  0x99   :  { %p14334_p4 = pnand %p14332_p3, %p14329_p2 }
  0x9b   :  { %14337 = shalt.err (!%p14334_p4)
}
  0x9c   :  { %s14338_s26 = scalar_lea.vmem %s252_s16, 16  ;;  %s14342_s0 = scalar_lea.vmem %s252_s16, 32 }
  0x9d   :  { %p14339_p5 = scmp.ne.s32.totalorder %s252_s16, %s14338_s26  ;;  %p14343_p6 = scmp.lt.s32.totalorder %s252_s16, %s252_s16 }
  0x9e   :  { %p14344_p7 = scmp.lt.s32.totalorder %s14342_s0, %s14338_s26 }
  0xa0   :  { %p14345_p8 = por %p14344_p7, %p14343_p6 }
  0xa2   :  { %p14346_p9 = pnand %p14345_p8, %p14339_p5 }
  0xa4   :  { %14349 = shalt.err (!%p14346_p9)
}
  0xa5   :  { %254 = dma.hbm_to_vmem [thread:$0]  %s14888_s30, 16, %s252_s16, [#allocation11]  }
  0xa6   :  { %s14350_s20 = scalar_lea.hbm %s14903_s8, 16 }
  0xa7   :  { %p14351_p10 = scmp.ne.s32.totalorder %s14903_s8, %s14350_s20  ;;  %p14354_p11 = scmp.lt.u32.totalorder %s14350_s20, %s14903_s8 }
  0xa9   :  { %p14356_p12 = pnand %p14354_p11, %p14351_p10 }
  0xab   :  { %14359 = shalt.err (!%p14356_p12)
}
  0xac   :  { %s14360_s28 = scalar_lea.vmem %s274_s22, 16  ;;  %s14364_s1 = scalar_lea.vmem %s274_s22, 32 }
  0xad   :  { %p14361_p13 = scmp.ne.s32.totalorder %s274_s22, %s14360_s28  ;;  %p14365_p0 = scmp.lt.s32.totalorder %s274_s22, %s274_s22 }
  0xae   :  { %p14366_p1 = scmp.lt.s32.totalorder %s14364_s1, %s14360_s28 }
  0xb0   :  { %p14367_p2 = por %p14366_p1, %p14365_p0 }
  0xb2   :  { %p14368_p3 = pnand %p14367_p2, %p14361_p13 }
  0xb4   :  { %14371 = shalt.err (!%p14368_p3)
}
  0xb5   :  { %276 = dma.hbm_to_vmem [thread:$0]  %s14903_s8, 16, %s274_s22, [#allocation14]  }
  0xb6   :  { %s14695_s2 = smov [#allocation16]   ;;  %s14696_s7 = smov [#allocation19]  }
  0xb7   :  { %s305_s30 = sshll.u32 %s14695_s2, 4  ;;  %s329_s10 = sshll.u32 %s14696_s7, 4  ;;  %s306_s30 = int_to_ptr.vmem [resolvable:$true] %s305_s30  ;;  %s330_s10 = int_to_ptr.vmem [resolvable:$true] %s329_s10 }
  0xb8   :  { %s14372_s15 = scalar_lea.hbm %s14943_s12, 16 }
  0xb9   :  { %p14373_p4 = scmp.ne.s32.totalorder %s14943_s12, %s14372_s15  ;;  %p14376_p5 = scmp.lt.u32.totalorder %s14372_s15, %s14943_s12 }
  0xbb   :  { %p14378_p6 = pnand %p14376_p5, %p14373_p4 }
  0xbd   :  { %14381 = shalt.err (!%p14378_p6)
}
  0xbe   :  { %s14382_s16 = scalar_lea.vmem %s306_s30, 16  ;;  %s14386_s18 = scalar_lea.vmem %s306_s30, 32 }
  0xbf   :  { %p14383_p7 = scmp.ne.s32.totalorder %s306_s30, %s14382_s16  ;;  %p14387_p8 = scmp.lt.s32.totalorder %s306_s30, %s306_s30 }
  0xc0   :  { %p14388_p9 = scmp.lt.s32.totalorder %s14386_s18, %s14382_s16 }
  0xc2   :  { %p14389_p10 = por %p14388_p9, %p14387_p8 }
  0xc4   :  { %p14390_p11 = pnand %p14389_p10, %p14383_p7 }
  0xc6   :  { %14393 = shalt.err (!%p14390_p11)
}
  0xc7   :  { %308 = dma.hbm_to_vmem [thread:$0]  %s14943_s12, 16, %s306_s30, [#allocation17]  }
  0xc8   :  { %s14394_s8 = scalar_lea.hbm %s14963_s3, 16 }
  0xc9   :  { %p14395_p12 = scmp.ne.s32.totalorder %s14963_s3, %s14394_s8  ;;  %p14398_p13 = scmp.lt.u32.totalorder %s14394_s8, %s14963_s3 }
  0xcb   :  { %p14400_p0 = pnand %p14398_p13, %p14395_p12 }
  0xcd   :  { %14403 = shalt.err (!%p14400_p0)
}
  0xce   :  { %s14404_s22 = scalar_lea.vmem %s330_s10, 16  ;;  %s14408_s23 = scalar_lea.vmem %s330_s10, 32 }
  0xcf   :  { %p14405_p1 = scmp.ne.s32.totalorder %s330_s10, %s14404_s22  ;;  %p14409_p2 = scmp.lt.s32.totalorder %s330_s10, %s330_s10 }
  0xd0   :  { %p14410_p3 = scmp.lt.s32.totalorder %s14408_s23, %s14404_s22 }
  0xd2   :  { %p14411_p4 = por %p14410_p3, %p14409_p2 }
  0xd4   :  { %p14412_p5 = pnand %p14411_p4, %p14405_p1 }
  0xd6   :  { %14415 = shalt.err (!%p14412_p5)
}
  0xd7   :  { %332 = dma.hbm_to_vmem [thread:$0]  %s14963_s3, 16, %s330_s10, [#allocation20]  }
  0xd8   :  { %s14697_s26 = smov [#allocation22]   ;;  %s14698_s0 = smov [#allocation2]  }
  0xd9   :  { %s357_s12 = sshll.u32 %s14697_s26, 4  ;;  %s157_s20 = sshll.u32 %s14698_s0, 4  ;;  %s358_s12 = int_to_ptr.vmem [resolvable:$true] %s357_s12  ;;  %s158_s20 = int_to_ptr.vmem [resolvable:$true] %s157_s20 }
  0xda   :  { %s14416_s28 = scalar_lea.hbm %s14993_s17, 16 }
  0xdb   :  { %p14417_p6 = scmp.ne.s32.totalorder %s14993_s17, %s14416_s28  ;;  %p14420_p7 = scmp.lt.u32.totalorder %s14416_s28, %s14993_s17 }
  0xdd   :  { %p14422_p8 = pnand %p14420_p7, %p14417_p6 }
  0xdf   :  { %14425 = shalt.err (!%p14422_p8)
}
  0xe0   :  { %s14426_s1 = scalar_lea.vmem %s358_s12, 16  ;;  %s14430_s2 = scalar_lea.vmem %s358_s12, 32 }
  0xe1   :  { %p14427_p9 = scmp.ne.s32.totalorder %s358_s12, %s14426_s1  ;;  %p14431_p10 = scmp.lt.s32.totalorder %s358_s12, %s358_s12 }
  0xe2   :  { %p14432_p11 = scmp.lt.s32.totalorder %s14430_s2, %s14426_s1 }
  0xe4   :  { %p14433_p12 = por %p14432_p11, %p14431_p10 }
  0xe6   :  { %p14434_p13 = pnand %p14433_p12, %p14427_p9 }
  0xe8   :  { %14437 = shalt.err (!%p14434_p13)
}
  0xe9   :  { %360 = dma.hbm_to_vmem [thread:$0]  %s14993_s17, 16, %s358_s12, [#allocation23]  }
  0xea   :  { %s14438_s3 = scalar_lea.hbm %s14763_s14, 16 }
  0xeb   :  { %p14439_p0 = scmp.ne.s32.totalorder %s14763_s14, %s14438_s3  ;;  %p14442_p1 = scmp.lt.u32.totalorder %s14438_s3, %s14763_s14 }
  0xed   :  { %p14444_p2 = pnand %p14442_p1, %p14439_p0 }
  0xef   :  { %14447 = shalt.err (!%p14444_p2)
}
  0xf0   :  { %s14448_s30 = scalar_lea.vmem %s158_s20, 16  ;;  %s14452_s7 = scalar_lea.vmem %s158_s20, 32 }
  0xf1   :  { %p14449_p3 = scmp.ne.s32.totalorder %s158_s20, %s14448_s30  ;;  %p14453_p4 = scmp.lt.s32.totalorder %s158_s20, %s158_s20 }
  0xf2   :  { %p14454_p5 = scmp.lt.s32.totalorder %s14452_s7, %s14448_s30 }
  0xf4   :  { %p14455_p6 = por %p14454_p5, %p14453_p4 }
  0xf6   :  { %p14456_p7 = pnand %p14455_p6, %p14449_p3 }
  0xf8   :  { %14459 = shalt.err (!%p14456_p7)
}
  0xf9   :  { %160 = dma.hbm_to_vmem [thread:$0]  %s14763_s14, 16, %s158_s20, [#allocation3]  }
  0xfa   :  { %s14699_s10 = smov [#allocation6]   ;;  %s14700_s15 = smov [#allocation9]  }
  0xfb   :  { %s181_s17 = sshll.u32 %s14699_s10, 4  ;;  %s230_s16 = sshll.u32 %s14700_s15, 4  ;;  %s182_s17 = int_to_ptr.vmem [resolvable:$true] %s181_s17  ;;  %s15057_s16 = int_to_ptr.vmem [resolvable:$true] %s230_s16 }
  0xfc   :  { %s14460_s18 = scalar_lea.hbm %s14783_s6, 32 }
  0xfd   :  { %p14461_p8 = scmp.ne.s32.totalorder %s14783_s6, %s14460_s18  ;;  %p14464_p9 = scmp.lt.u32.totalorder %s14460_s18, %s14783_s6 }
  0xff   :  { %p14466_p10 = pnand %p14464_p9, %p14461_p8 }
 0x101   :  { %14469 = shalt.err (!%p14466_p10)
}
 0x102   :  { %s14470_s8 = scalar_lea.vmem %s182_s17, 32  ;;  %p14475_p12 = scmp.lt.s32.totalorder %s182_s17, %s182_s17 }
 0x103   :  { %p14471_p11 = scmp.ne.s32.totalorder %s182_s17, %s14470_s8  ;;  %p14476_p13 = scmp.lt.s32.totalorder %s14470_s8, %s14470_s8 }
 0x105   :  { %p14477_p0 = por %p14476_p13, %p14475_p12 }
 0x107   :  { %p14478_p1 = pnand %p14477_p0, %p14471_p11 }
 0x109   :  { %14481 = shalt.err (!%p14478_p1)
}
 0x10a   :  { %184 = dma.hbm_to_vmem [thread:$0]  %s14783_s6, 32, %s182_s17, [#allocation5]  }
 0x10b   :  { %s14482_s14 = scalar_lea.hbm %s14863_s4, 32 }
 0x10c   :  { %p14483_p2 = scmp.ne.s32.totalorder %s14863_s4, %s14482_s14  ;;  %p14486_p3 = scmp.lt.u32.totalorder %s14482_s14, %s14863_s4 }
 0x10e   :  { %p14488_p4 = pnand %p14486_p3, %p14483_p2 }
 0x110   :  { %14491 = shalt.err (!%p14488_p4)
}
 0x111   :  { %s14492_s22 = scalar_lea.vmem %s15057_s16, 32  ;;  %p14497_p6 = scmp.lt.s32.totalorder %s15057_s16, %s15057_s16 }
 0x112   :  { %p14493_p5 = scmp.ne.s32.totalorder %s15057_s16, %s14492_s22  ;;  %p14498_p7 = scmp.lt.s32.totalorder %s14492_s22, %s14492_s22 }
 0x114   :  { %p14499_p8 = por %p14498_p7, %p14497_p6 }
 0x116   :  { %p14500_p9 = pnand %p14499_p8, %p14493_p5 }
 0x118   :  { %14503 = shalt.err (!%p14500_p9)
}
 0x119   :  { %236 = dma.hbm_to_vmem [thread:$0]  %s14863_s4, 32, %s15057_s16, [#allocation8], %s14691_s11, %s14691_s11, %s14692_s24  }
 0x11a   :  { %s14701_s6 = smov [#allocation12]   ;;  %s14702_s26 = smov [#allocation15]  }
 0x11b   :  { %s263_s23 = sshll.u32 %s14701_s6, 4  ;;  %s285_s12 = sshll.u32 %s14702_s26, 4  ;;  %s264_s23 = int_to_ptr.vmem [resolvable:$true] %s263_s23  ;;  %s286_s12 = int_to_ptr.vmem [resolvable:$true] %s285_s12 }
 0x11c   :  { %s14504_s0 = scalar_lea.hbm %s14898_s27, 16 }
 0x11d   :  { %p14505_p10 = scmp.ne.s32.totalorder %s14898_s27, %s14504_s0  ;;  %p14508_p11 = scmp.lt.u32.totalorder %s14504_s0, %s14898_s27 }
 0x11f   :  { %p14510_p12 = pnand %p14508_p11, %p14505_p10 }
 0x121   :  { %14513 = shalt.err (!%p14510_p12)
}
 0x122   :  { %s14514_s20 = scalar_lea.vmem %s264_s23, 16  ;;  %s14518_s28 = scalar_lea.vmem %s264_s23, 32 }
 0x123   :  { %p14515_p13 = scmp.ne.s32.totalorder %s264_s23, %s14514_s20  ;;  %p14519_p0 = scmp.lt.s32.totalorder %s264_s23, %s264_s23 }
 0x124   :  { %p14520_p1 = scmp.lt.s32.totalorder %s14518_s28, %s14514_s20 }
 0x126   :  { %p14521_p2 = por %p14520_p1, %p14519_p0 }
 0x128   :  { %p14522_p3 = pnand %p14521_p2, %p14515_p13 }
 0x12a   :  { %14525 = shalt.err (!%p14522_p3)
}
 0x12b   :  { %266 = dma.hbm_to_vmem [thread:$0]  %s14898_s27, 16, %s264_s23, [#allocation11]  }
 0x12c   :  { %s14526_s4 = scalar_lea.hbm %s14913_s19, 16 }
 0x12d   :  { %p14527_p4 = scmp.ne.s32.totalorder %s14913_s19, %s14526_s4  ;;  %p14530_p5 = scmp.lt.u32.totalorder %s14526_s4, %s14913_s19 }
 0x12f   :  { %p14532_p6 = pnand %p14530_p5, %p14527_p4 }
 0x131   :  { %14535 = shalt.err (!%p14532_p6)
}
 0x132   :  { %s14536_s11 = scalar_lea.vmem %s286_s12, 16  ;;  %s14540_s24 = scalar_lea.vmem %s286_s12, 32 }
 0x133   :  { %p14537_p7 = scmp.ne.s32.totalorder %s286_s12, %s14536_s11  ;;  %p14541_p8 = scmp.lt.s32.totalorder %s286_s12, %s286_s12 }
 0x134   :  { %p14542_p9 = scmp.lt.s32.totalorder %s14540_s24, %s14536_s11 }
 0x136   :  { %p14543_p10 = por %p14542_p9, %p14541_p8 }
 0x138   :  { %p14544_p11 = pnand %p14543_p10, %p14537_p7 }
 0x13a   :  { %14547 = shalt.err (!%p14544_p11)
}
 0x13b   :  { %288 = dma.hbm_to_vmem [thread:$0]  %s14913_s19, 16, %s286_s12, [#allocation14]  }
 0x13c   :  { %s14703_s1 = smov [#allocation18]   ;;  %s14704_s2 = smov [#allocation21]  }
 0x13d   :  { %s317_s27 = sshll.u32 %s14703_s1, 4  ;;  %s345_s3 = sshll.u32 %s14704_s2, 4  ;;  %s318_s27 = int_to_ptr.vmem [resolvable:$true] %s317_s27  ;;  %s346_s3 = int_to_ptr.vmem [resolvable:$true] %s345_s3 }
 0x13e   :  { %s14548_s30 = scalar_lea.hbm %s14953_s21, 16 }
 0x13f   :  { %p14549_p12 = scmp.ne.s32.totalorder %s14953_s21, %s14548_s30  ;;  %p14552_p13 = scmp.lt.u32.totalorder %s14548_s30, %s14953_s21 }
 0x141   :  { %p14554_p0 = pnand %p14552_p13, %p14549_p12 }
 0x143   :  { %14557 = shalt.err (!%p14554_p0)
}
 0x144   :  { %s14558_s7 = scalar_lea.vmem %s318_s27, 16  ;;  %s14562_s10 = scalar_lea.vmem %s318_s27, 32 }
 0x145   :  { %p14559_p1 = scmp.ne.s32.totalorder %s318_s27, %s14558_s7  ;;  %p14563_p2 = scmp.lt.s32.totalorder %s318_s27, %s318_s27 }
 0x146   :  { %p14564_p3 = scmp.lt.s32.totalorder %s14562_s10, %s14558_s7 }
 0x148   :  { %p14565_p4 = por %p14564_p3, %p14563_p2 }
 0x14a   :  { %p14566_p5 = pnand %p14565_p4, %p14559_p1 }
 0x14c   :  { %14569 = shalt.err (!%p14566_p5)
}
 0x14d   :  { %320 = dma.hbm_to_vmem [thread:$0]  %s14953_s21, 16, %s318_s27, [#allocation17]  }
 0x14e   :  { %s14570_s19 = scalar_lea.hbm %s14983_s13, 16 }
 0x14f   :  { %p14571_p6 = scmp.ne.s32.totalorder %s14983_s13, %s14570_s19  ;;  %p14574_p7 = scmp.lt.u32.totalorder %s14570_s19, %s14983_s13 }
 0x151   :  { %p14576_p8 = pnand %p14574_p7, %p14571_p6 }
 0x153   :  { %14579 = shalt.err (!%p14576_p8)
}
 0x154   :  { %s14580_s17 = scalar_lea.vmem %s346_s3, 16  ;;  %s14584_s15 = scalar_lea.vmem %s346_s3, 32 }
 0x155   :  { %p14581_p9 = scmp.ne.s32.totalorder %s346_s3, %s14580_s17  ;;  %p14585_p10 = scmp.lt.s32.totalorder %s346_s3, %s346_s3 }
 0x156   :  { %p14586_p11 = scmp.lt.s32.totalorder %s14584_s15, %s14580_s17 }
 0x158   :  { %p14587_p12 = por %p14586_p11, %p14585_p10 }
 0x15a   :  { %p14588_p13 = pnand %p14587_p12, %p14581_p9 }
 0x15c   :  { %14591 = shalt.err (!%p14588_p13)
}
 0x15d   :  { %348 = dma.hbm_to_vmem [thread:$0]  %s14983_s13, 16, %s346_s3, [#allocation20]  }
 0x15e   :  { %s14705_s16 = smov [#allocation24]   ;;  %s14592_s18 = scalar_lea.hbm %s15003_s5, 16 }
 0x15f   :  { %s369_s21 = sshll.u32 %s14705_s16, 4  ;;  %p14593_p0 = scmp.ne.s32.totalorder %s15003_s5, %s14592_s18  ;;  %s370_s21 = int_to_ptr.vmem [resolvable:$true] %s369_s21 }
 0x160   :  { %p14596_p1 = scmp.lt.u32.totalorder %s14592_s18, %s15003_s5 }
 0x162   :  { %p14598_p2 = pnand %p14596_p1, %p14593_p0 }
 0x164   :  { %14601 = shalt.err (!%p14598_p2)
}
 0x165   :  { %s14602_s8 = scalar_lea.vmem %s370_s21, 16  ;;  %s14606_s14 = scalar_lea.vmem %s370_s21, 32 }
 0x166   :  { %p14603_p3 = scmp.ne.s32.totalorder %s370_s21, %s14602_s8  ;;  %p14607_p4 = scmp.lt.s32.totalorder %s370_s21, %s370_s21 }
 0x167   :  { %p14608_p5 = scmp.lt.s32.totalorder %s14606_s14, %s14602_s8 }
 0x169   :  { %p14609_p6 = por %p14608_p5, %p14607_p4 }
 0x16b   :  { %p14610_p7 = pnand %p14609_p6, %p14603_p3 }
 0x16d   :  { %14613 = shalt.err (!%p14610_p7)
}
 0x16e   :  { %372 = dma.hbm_to_vmem [thread:$0]  %s15003_s5, 16, %s370_s21, [#allocation23]  }
 0x16f   :  { %14614 = dma.done.wait [#allocation3], 16  }
 0x170   :  { %14615 = vsyncadd [#allocation3], 4294967280 }
 0x171   :  { %14616 = dma.done.wait [#allocation5], 48  }
 0x172   :  { %14617 = vsyncadd [#allocation5], 4294967248 }
 0x173   :  { %14618 = dma.done.wait [#allocation8], 64  }
 0x174   :  { %14619 = vsyncadd [#allocation8], 4294967232 }
 0x175   :  { %14620 = dma.done.wait [#allocation11], 32  }
 0x176   :  { %14621 = vsyncadd [#allocation11], 4294967264 }
 0x177   :  { %14622 = dma.done.wait [#allocation14], 32  }
 0x178   :  { %14623 = vsyncadd [#allocation14], 4294967264 }
 0x179   :  { %14624 = dma.done.wait [#allocation17], 32  }
 0x17a   :  { %14625 = vsyncadd [#allocation17], 4294967264 }
 0x17b   :  { %14626 = dma.done.wait [#allocation20], 32  }
 0x17c   :  { %14627 = vsyncadd [#allocation20], 4294967264 }
 0x17d   :  { %14628 = dma.done.wait [#allocation23], 32  }
 0x17e   :  { %14629 = vsyncadd [#allocation23], 4294967264  ;;  %s16323_s13 = sld [smem:[#allocation34_spill]]  ;;  %v14706_v0 = vmov 0.0|0.0   ;;  %s16324_s5 = sld [smem:[#allocation33_spill]]  ;;  %vm445_vm0 = vcmask 523264  }
 0x17f   :  { %13584 = vmatprep.subr.bf16.mxu0 %v14706_v0  ;;  %13620 = vmatprep.subr.bf16.mxu1 %v14706_v0  ;;  %s16325_s22 = sld [smem:[#allocation35_spill]]  ;;  %s16326_s6 = sld [smem:[#allocation36_spill]]  ;;  %vm522_vm1 = vcmask 261120   ;;  %vm14707_vm2 = vmmov 0   ;;  %v14708_v61 = vmov 0.0   ;;  %vm798_vm3 = vcmask 130048  }
 0x180   :  { %s16327_s23 = sld [smem:[#allocation40_spill]]  ;;  %12701 = vmatprep.mubr.msk.f32.mxu1 %vm14707_vm2, %v14708_v61  ;;  %s16328_s26 = sld [smem:[#allocation37_spill]]  ;;  %vm877_vm4 = vcmask 64512   ;;  %vm2666_vm6 = vcmask 74752   ;;  %vm2662_vm7 = vcmask 80896   ;;  %vm2692_vm8 = vcmask 1041408  }
 0x181   :  { %s16329_s12 = sld [smem:[#allocation44_spill]]  ;;  %s16330_s0 = sld [smem:[#allocation38_spill]]  ;;  %vm15363_vm5 = vmpackc.low %vm877_vm4, %vm877_vm4  ;;  %vm14709_vm9 = vmmov 1   ;;  %vm3404_vm11 = vcmask 123904   ;;  %vm3796_vm12 = vcmask 58368   ;;  %vm10794_vm13 = vcmask 1045504  }
 0x182   :  { %s16331_s20 = sld [smem:[#allocation39_spill]]  ;;  %s16332_s28 = sld [smem:[#allocation41_spill]]  ;;  %vm15395_vm10 = vmpackc.low %vm2692_vm8, %vm14709_vm9  ;;  %vm11671_vm14 = vcmask 25600  }
 0x183   :  { %s16333_s4 = sld [smem:[#allocation42_spill]]  ;;  %s16334_s11 = sld [smem:[#allocation43_spill]] }
 0x184   :  { %v420_v1 = vld [vmem:[%s16323_s13] sm:$0xff]  ;;  %v421_v2 = vld [vmem:[%s16323_s13 + $0x8] sm:$0xff]  ;;  %v422_v3 = vld [vmem:[%s16323_s13 + $0x10] sm:$0xff]  ;;  %s16335_s24 = sld [smem:[#allocation46_spill]]  ;;  %s16336_s1 = sld [smem:[#allocation45_spill]] }
 0x185   :  { %v13585_v4 = vpack.c.bf16 %v421_v2, %v420_v1  ;;  %v423_v5 = vld [vmem:[%s16323_s13 + $0x18] sm:$0xff]  ;;  %v424_v7 = vld [vmem:[%s16323_s13 + $0x20] sm:$0xff]  ;;  %v425_v8 = vld [vmem:[%s16323_s13 + $0x28] sm:$0xff]  ;;  %s16337_s27 = sld [smem:[#allocation47_spill]]  ;;  %s16338_s2 = sld [smem:[#allocation50_spill]] }
 0x186   :  { %v13588_v6 = vpack.c.bf16 %v423_v5, %v422_v3  ;;  %v13591_v9 = vpack.c.bf16 %v425_v8, %v424_v7  ;;  %v426_v10 = vld [vmem:[%s16323_s13 + $0x30] sm:$0xff]  ;;  %v427_v11 = vld [vmem:[%s16323_s13 + $0x38] sm:$0xff]  ;;  %v419_v12 = vld [vmem:[%s16324_s5 + $0x8] sm:$0xff]  ;;  %s16339_s3 = sld [smem:[#allocation48_spill]]  ;;  %s16340_s30 = sld [smem:[#allocation51_spill]] }
 0x187   :  { %13586 = vmatpush1.bf16.msra.mxu0 %v13585_v4  ;;  %11748 = vmatprep.mubr.msk.f32.mxu0 %vm445_vm0, %v419_v12  ;;  %v13594_v13 = vpack.c.bf16 %v427_v11, %v426_v10  ;;  %v428_v14 = vld [vmem:[%s16323_s13 + $0x40] sm:$0xff]  ;;  %v429_v15 = vld [vmem:[%s16323_s13 + $0x48] sm:$0xff]  ;;  %v430_v17 = vld [vmem:[%s16323_s13 + $0x50] sm:$0xff]  ;;  %s16341_s7 = sld [smem:[#allocation58_spill]]  ;;  %s16346_s10 = sld [smem:[#allocation52_spill]] }
 0x188   :  { %13587 = vmatprep.subr.bf16.mxu0 %v14706_v0  ;;  %v13597_v16 = vpack.c.bf16 %v429_v15, %v428_v14  ;;  %v431_v18 = vld [vmem:[%s16323_s13 + $0x58] sm:$0xff]  ;;  %v432_v20 = vld [vmem:[%s16323_s13 + $0x60] sm:$0xff]  ;;  %v433_v21 = vld [vmem:[%s16323_s13 + $0x68] sm:$0xff]  ;;  %s16347_s19 = sld [smem:[#allocation53_spill]]  ;;  %s16348_s17 = sld [smem:[#allocation54_spill]] }
 0x189   :  { %v13600_v19 = vpack.c.bf16 %v431_v18, %v430_v17  ;;  %v13603_v22 = vpack.c.bf16 %v433_v21, %v432_v20  ;;  %v434_v23 = vld [vmem:[%s16323_s13 + $0x70] sm:$0xff]  ;;  %v435_v24 = vld [vmem:[%s16323_s13 + $0x78] sm:$0xff]  ;;  %v436_v26 = vld [vmem:[%s16323_s13 + $0x80] sm:$0xff]  ;;  %s16349_s15 = sld [smem:[#allocation55_spill]]  ;;  %s16350_s16 = sld [smem:[#allocation49_spill]] }
 0x18a   :  { %v13606_v25 = vpack.c.bf16 %v435_v24, %v434_v23  ;;  %v437_v27 = vld [vmem:[%s16323_s13 + $0x88] sm:$0xff]  ;;  %v438_v29 = vld [vmem:[%s16323_s13 + $0x90] sm:$0xff]  ;;  %v439_v30 = vld [vmem:[%s16323_s13 + $0x98] sm:$0xff]  ;;  %s16351_s21 = sld [smem:[#allocation59_spill]]  ;;  %s16352_s18 = sld [smem:[#allocation56_spill]] }
 0x18b   :  { %13589 = vmatpush1.bf16.msra.mxu0 %v13588_v6  ;;  %v13609_v28 = vpack.c.bf16 %v437_v27, %v436_v26  ;;  %v13612_v31 = vpack.c.bf16 %v439_v30, %v438_v29  ;;  %v440_v32 = vld [vmem:[%s16323_s13 + $0xa0] sm:$0xff]  ;;  %v441_v33 = vld [vmem:[%s16323_s13 + $0xa8] sm:$0xff]  ;;  %v442_v35 = vld [vmem:[%s16323_s13 + $0xb0] sm:$0xff]  ;;  %s16353_s8 = sld [smem:[#allocation57_spill]]  ;;  %s16354_s14 = sld [smem:[#allocation60_spill]] }
 0x18c   :  { %13590 = vmatprep.subr.bf16.mxu0 %v14706_v0  ;;  %v13615_v34 = vpack.c.bf16 %v441_v33, %v440_v32  ;;  %v443_v36 = vld [vmem:[%s16323_s13 + $0xb8] sm:$0xff]  ;;  %v418_v38 = vld [vmem:[%s16324_s5] sm:$0xff]  ;;  %v549_v50 = vld [vmem:[%s16326_s6 + $0x8] sm:$0xff]  ;;  %s16355_s13 = sld [smem:[#allocation61_spill]]  ;;  %s16356_s5 = sld [smem:[#allocation62_spill]] }
 0x18d   :  { %v13618_v37 = vpack.c.bf16 %v443_v36, %v442_v35  ;;  %v444_v39 = vld [vmem:[%s16325_s22] sm:$0xff]  ;;  %v11785_v53 = vld [vmem:[%s16326_s6 + $0xa8] sm:$0xff]  ;;  %v550_v55 = vld [vmem:[%s16326_s6 + $0x10] sm:$0xff]  ;;  %s16357_s22 = sld [smem:[#allocation63_spill]] }
 0x18e   :  { %v548_v49 = vld [vmem:[%s16326_s6] sm:$0xff]  ;;  %v551_v56 = vld [vmem:[%s16326_s6 + $0x18] sm:$0xff]  ;;  %v11786_v58 = vld [vmem:[%s16326_s6 + $0xb0] sm:$0xff] }
 0x18f   :  { %13592 = vmatpush1.bf16.msra.mxu0 %v13591_v9  ;;  %v13621_v51 = vpack.c.bf16 %v549_v50, %v548_v49  ;;  %v11784_v52 = vld [vmem:[%s16326_s6 + $0xa0] sm:$0xff]  ;;  %v13624_v57 = vpack.c.bf16 %v551_v56, %v550_v55  ;;  %v11787_v59 = vld [vmem:[%s16326_s6 + $0xb8] sm:$0xff]  ;;  %v11754_v6 = vld [vmem:[%s16326_s6 + $0x48] sm:$0xff] }
 0x190   :  { %13593 = vmatprep.subr.bf16.mxu0 %v14706_v0  ;;  %v13651_v54 = vpack.c.bf16 %v11785_v53, %v11784_v52  ;;  %v13654_v60 = vpack.c.bf16 %v11787_v59, %v11786_v58  ;;  %v11749_v3 = vld [vmem:[%s16327_s23] ss:$0 sm:$0xff]  ;;  %v11750_v7 = vld [vmem:[%s16327_s23 + $0x1] ss:$0 sm:$0xff]  ;;  %v11755_v11 = vld [vmem:[%s16326_s6 + $0x50] sm:$0xff] }
 0x191   :  { %13622 = vmatpush3.bf16.msra.mxu1 %v13621_v51  ;;  %v11753_v5 = vld [vmem:[%s16326_s6 + $0x40] sm:$0xff]  ;;  %v11756_v12 = vld [vmem:[%s16326_s6 + $0x58] sm:$0xff]  ;;  %v11761_v15 = vld [vmem:[%s16326_s6 + $0x88] sm:$0xff] }
 0x192   :  { %13623 = vmatprep.subr.bf16.mxu1 %v14706_v0  ;;  %v13627_v9 = vpack.c.bf16 %v11754_v6, %v11753_v5  ;;  %v11760_v14 = vld [vmem:[%s16326_s6 + $0x80] sm:$0xff]  ;;  %v11762_v17 = vld [vmem:[%s16326_s6 + $0x90] sm:$0xff]  ;;  %v11763_v18 = vld [vmem:[%s16326_s6 + $0x98] sm:$0xff] }
 0x193   :  { %13595 = vmatpush1.bf16.msra.mxu0 %v13594_v13  ;;  %v13630_v13 = vpack.c.bf16 %v11756_v12, %v11755_v11  ;;  %v11758_v24 = vld [vmem:[%s16328_s26 + $0x2] ss:$0 sm:$0xff]  ;;  %v11751_v26 = vld [vmem:[%s16328_s26] ss:$0 sm:$0xff]  ;;  %v11765_v30 = vld [vmem:[%s16328_s26 + $0x4] ss:$0 sm:$0xff] }
 0x194   :  { %13596 = vmatprep.subr.bf16.mxu0 %v14706_v0  ;;  %v15203_v35 = vld [vmem:[%s16329_s12] sm:$0xff]  ;;  %v11772_v52 = vld [vmem:[%s16326_s6 + $0x30] sm:$0xff]  ;;  %v11773_v53 = vld [vmem:[%s16326_s6 + $0x38] sm:$0xff]  ;;  %s16361_s12 = sld [smem:[#allocation64_spill]] }
 0x195   :  { %13625 = vmatpush3.bf16.msra.mxu1 %v13624_v57  ;;  %v11777_v55 = vld [vmem:[%s16326_s6 + $0x60] sm:$0xff]  ;;  %v11778_v56 = vld [vmem:[%s16326_s6 + $0x68] sm:$0xff]  ;;  %v11779_v58 = vld [vmem:[%s16326_s6 + $0x70] sm:$0xff] }
 0x196   :  { %13626 = vmatprep.subr.bf16.mxu1 %v14706_v0  ;;  %v13645_v57 = vpack.c.bf16 %v11778_v56, %v11777_v55  ;;  %v11780_v59 = vld [vmem:[%s16326_s6 + $0x78] sm:$0xff]  ;;  %v11775_v5 = vld [vmem:[%s16328_s26 + $0x1] ss:$0 sm:$0xff]  ;;  %v11799_v56 = vld [vmem:[%s16327_s23 + $0x2] ss:$0 sm:$0xff] }
 0x197   :  { %13598 = vmatpush1.bf16.msra.mxu0 %v13597_v16  ;;  %v13633_v16 = vpack.c.bf16 %v11761_v15, %v11760_v14 }
 0x198   :  { %13599 = vmatprep.subr.bf16.mxu0 %v14706_v0 }
 0x19b   :  { %13601 = vmatpush1.bf16.msra.mxu0 %v13600_v19  ;;  %v13636_v19 = vpack.c.bf16 %v11763_v18, %v11762_v17 }
 0x19c   :  { %13602 = vmatprep.subr.bf16.mxu0 %v14706_v0 }
 0x19f   :  { %13604 = vmatpush1.bf16.msra.mxu0 %v13603_v22 }
 0x1a0   :  { %13605 = vmatprep.subr.bf16.mxu0 %v14706_v0 }
 0x1a3   :  { %13607 = vmatpush1.bf16.msra.mxu0 %v13606_v25 }
 0x1a4   :  { %13608 = vmatprep.subr.bf16.mxu0 %v14706_v0 }
 0x1a7   :  { %13610 = vmatpush1.bf16.msra.mxu0 %v13609_v28 }
 0x1a8   :  { %13611 = vmatprep.subr.bf16.mxu0 %v14706_v0 }
 0x1ab   :  { %13613 = vmatpush1.bf16.msra.mxu0 %v13612_v31 }
 0x1ac   :  { %13614 = vmatprep.subr.bf16.mxu0 %v14706_v0 }
 0x1af   :  { %13616 = vmatpush1.bf16.msra.mxu0 %v13615_v34 }
 0x1b0   :  { %13617 = vmatprep.subr.bf16.mxu0 %v14706_v0 }
 0x1b3   :  { %13619 = vmatpush1.bf16.msra.mxu0 %v13618_v37 }
 0x1b4   :  { %13650 = vmatprep.subr.bf16.mxu0 %v14706_v0 }
 0x1b6   :  { %514 = vmatmul.mubr.f32.vlgmr.msra.gmra.mrb[0].mxu0 %v418_v38 }
 0x1b7   :  { %13652 = vmatpush3.bf16.msra.mxu0 %v13651_v54  ;;  %12766 = vmatprep.mubr.msk.f32.mxu0 %vm14707_vm2, %v14708_v61  ;;  %v13642_v54 = vpack.c.bf16 %v11773_v53, %v11772_v52 }
 0x1b8   :  { %13653 = vmatprep.subr.bf16.mxu0 %v14706_v0 }
 0x1bb   :  { %13655 = vmatpush3.bf16.msra.mxu0 %v13654_v60  ;;  %v13648_v60 = vpack.c.bf16 %v11780_v59, %v11779_v58  ;;  %v11800_v58 = vld [vmem:[%s16327_s23 + $0x3] ss:$0 sm:$0xff]  ;;  %s16359_s23 = sld [smem:[#allocation69_spill]] }
 0x1bc   :  { %13656 = vmatprep.subr.bf16.mxu0 %v14706_v0 }
 0x289   :  { %v515_v40 = vpop.f32.mrb[0].mxu0 }
 0x28a   :  { %v15137_v41 = vadd.f32 %v515_v40, %v444_v39  ;;  %v517_v42 = vpop.f32.mrb[1].mxu0 }
 0x28c   :  { %v523_v43 = vsel %vm522_vm1, %v15137_v41, 0.0 }
 0x28d   :  { %524 = vadd.xlane.f32.xlu0 %v523_v43 }
 0x31a   :  { %v525_v44 = vpop.xlane.xlu0 %524 }
 0x31b   :  { %v527_v45 = vmul.f32 0.03125, %v525_v44 }
 0x31d   :  { %v528_v46 = vsub.f32 %v15137_v41, %v527_v45 }
 0x31f   :  { %v529_v47 = vmul.f32 %v528_v46, %v528_v46 }
 0x321   :  { %v530_v48 = vsel %vm522_vm1, %v529_v47, 0.0  ;;  %v11770_v47 = vld [vmem:[%s16326_s6 + $0x20] sm:$0xff] }
 0x322   :  { %531 = vadd.xlane.f32.xlu0 %v530_v48  ;;  %v11771_v48 = vld [vmem:[%s16326_s6 + $0x28] sm:$0xff]  ;;  %s16358_s6 = sld [smem:[#allocation68_spill]] }
 0x323   :  { %v13639_v50 = vpack.c.bf16 %v11771_v48, %v11770_v47  ;;  %v1557_v47 = vld [vmem:[%s16332_s28] sm:$0xff]  ;;  %v1558_v48 = vld [vmem:[%s16332_s28 + $0x8] sm:$0xff] }
 0x3af   :  { %v532_v62 = vpop.xlane.xlu0 %531 }
 0x3b0   :  { %v533_v63 = vmul.f32 0.03125, %v532_v62 }
 0x3b2   :  { %v534_v1 = vadd.f32 1e-05, %v533_v63 }
 0x3b4   :  { %14116 = vrsqrt.f32 %v534_v1 }
 0x3be   :  { %v14117_v2 = vpop.eup %14116 }
 0x3bf   :  { %v536_v4 = vmul.f32 %v14117_v2, %v528_v46 }
 0x3c1   :  { %v541_v8 = vmul.f32 %v11749_v3, %v536_v4  ;;  %v11782_v3 = vld [vmem:[%s16328_s26 + $0x3] ss:$0 sm:$0xff] }
 0x3c3   :  { %v15163_v10 = vadd.f32 %v11750_v7, %v541_v8  ;;  %v11789_v8 = vld [vmem:[%s16328_s26 + $0x5] ss:$0 sm:$0xff]  ;;  %s16360_s26 = sld [smem:[#allocation70_spill]] }
 0x3c5   :  { %12702 = vmatmul.mubr.msk.f32.vlgmr.msra.gmra.mrb[0].mxu1 %vm522_vm1, %v15163_v10  ;;  %12767 = vmatmul.mubr.msk.f32.vlgmr.msra.gmra.mrb[2].mxu0 %vm522_vm1, %v15163_v10 }
 0x3c6   :  { %13628 = vmatpush3.bf16.msra.mxu1 %v13627_v9  ;;  %12712 = vmatprep.mubr.msk.f32.mxu1 %vm14707_vm2, %v14708_v61 }
 0x3c7   :  { %13629 = vmatprep.subr.bf16.mxu1 %v14706_v0  ;;  %12783 = vmatprep.mubr.msk.f32.mxu0 %vm14707_vm2, %v14708_v61 }
 0x3ca   :  { %13631 = vmatpush3.bf16.msra.mxu1 %v13630_v13 }
 0x3cb   :  { %13632 = vmatprep.subr.bf16.mxu1 %v14706_v0 }
 0x3cd   :  { %12713 = vmatmul.mubr.msk.f32.vlgmr.msra.gmra.mrb[2].mxu1 %vm522_vm1, %v15163_v10 }
 0x3ce   :  { %13634 = vmatpush3.bf16.msra.mxu1 %v13633_v16  ;;  %12723 = vmatprep.mubr.msk.f32.mxu1 %vm14707_vm2, %v14708_v61 }
 0x3cf   :  { %13635 = vmatprep.subr.bf16.mxu1 %v14706_v0 }
 0x3d2   :  { %13637 = vmatpush3.bf16.msra.mxu1 %v13636_v19 }
 0x3d3   :  { %12726 = vmatprep.subr.mxu1 %v14708_v61 }
 0x3d5   :  { %12724 = vmatmul.mubr.msk.f32.vlgmr.msra.gmra.mrb[4].mxu1 %vm522_vm1, %v15163_v10 }
 0x3d6   :  { %12728 = vmatprep.mubr.msk.f32.mxu1 %vm14707_vm2, %v14708_v61 }
 0x498   :  { %v628_v20 = vpop.f32.mrb[0].mxu1  ;;  %v15191_v21 = vpop.f32.mrb[2].mxu0 }
 0x499   :  { %v12703_v22 = vpop.f32.mrb[1].mxu1  ;;  %v12768_v23 = vpop.f32.mrb[3].mxu0  ;;  %v629_v29 = vadd.f32 %v11751_v26, %v628_v20  ;;  %v963_v26 = vld [vmem:[%s16330_s0 + $0x8] sm:$0xff] }
 0x49a   :  { %v11795_v22 = vld [vmem:[%s16330_s0 + $0x18] sm:$0xff] }
 0x4a0   :  { %v711_v25 = vpop.f32.mrb[2].mxu1 }
 0x4a1   :  { %v712_v27 = vadd.f32 %v11758_v24, %v711_v25  ;;  %v12714_v28 = vpop.f32.mrb[3].mxu1  ;;  %v962_v25 = vld [vmem:[%s16330_s0] sm:$0xff] }
 0x4a2   :  { %v13660_v28 = vpack.c.bf16 %v963_v26, %v962_v25 }
 0x4a3   :  { %12727 = vmatpush3.xpose.msk.msra.mxu1 %vm798_vm3, %v712_v27 }
 0x4a4   :  { %12731 = vmatprep.subr.mxu1 %v14708_v61 }
 0x4a6   :  { %12729 = vmatmul.mubr.msk.f32.vlgmr.msra.gmra.mrb[6].mxu1 %vm798_vm3, %v629_v29 }
 0x4a7   :  { %12733 = vmatprep.mubr.msk.f32.mxu1 %vm14707_vm2, %v14708_v61 }
 0x4a8   :  { %v794_v31 = vpop.f32.mrb[4].mxu1 }
 0x4a9   :  { %v795_v32 = vadd.f32 %v11765_v30, %v794_v31  ;;  %v12725_v33 = vpop.f32.mrb[5].mxu1 }
 0x4ab   :  { %12732 = vmatpush3.msra.mxu1 %v795_v32 }
 0x4ac   :  { %13638 = vmatprep.subr.bf16.mxu1 %v14706_v0 }
 0x579   :  { %v871_v34 = vpop.f32.mrb[6].mxu1 }
 0x57a   :  { %v875_v36 = vmul.f32 0.25, %v871_v34  ;;  %v12730_v37 = vpop.f32.mrb[7].mxu1  ;;  %v11798_v34 = vld [vmem:[%s16331_s20] ss:$0 sm:$0xff]  ;;  %s16363_s20 = sld [smem:[#allocation65_spill]] }
 0x57c   :  { %v876_v38 = vadd.f32 %v875_v36, %v15203_v35 }
 0x57e   :  { %v878_v39 = vsel %vm877_vm4, %v876_v38, -inf }
 0x57f   :  { %879 = vmax.xlane.f32.xlu1 %v878_v39 }
 0x60c   :  { %v880_v40 = vpop.xlane.xlu1 %879 }
 0x60d   :  { %v881_v42 = vsub.f32 %v876_v38, %v880_v40 }
 0x60f   :  { %v882_v43 = vmul.f32 1.442695, %v881_v42 }
 0x611   :  { %14118 = vpow2.f32 %v882_v43 }
 0x61b   :  { %v14119_v44 = vpop.eup %14118 }
 0x61c   :  { %v884_v45 = vsel %vm877_vm4, %v14119_v44, 0.0 }
 0x61d   :  { %885 = vadd.xlane.f32.xlu1 %v884_v45 }
 0x6aa   :  { %v886_v46 = vpop.xlane.xlu1 %885 }
 0x6ab   :  { %14120 = vrcp.f32 %v886_v46 }
 0x6b5   :  { %v14121_v49 = vpop.eup %14120 }
 0x6b6   :  { %v888_v51 = vmul.f32 %v14121_v49, %v14119_v44  ;;  %v13663_v49 = vpack.c.bf16 %v1558_v48, %v1557_v47 }
 0x6b8   :  { %12734 = vmatmul.mubr.msk.f32.vlgmr.msra.gmra.mrb[8].mxu1 %vm877_vm4, %v888_v51 }
 0x6b9   :  { %13640 = vmatpush3.bf16.msra.mxu1 %v13639_v50  ;;  %12744 = vmatprep.mubr.msk.f32.mxu1 %vm14707_vm2, %v14708_v61  ;;  %v1560_v50 = vld [vmem:[%s16332_s28 + $0x18] sm:$0xff] }
 0x6ba   :  { %13641 = vmatprep.subr.bf16.mxu1 %v14706_v0 }
 0x6bd   :  { %13643 = vmatpush3.bf16.msra.mxu1 %v13642_v54 }
 0x6be   :  { %13644 = vmatprep.subr.bf16.mxu1 %v14706_v0 }
 0x6c0   :  { %12745 = vmatmul.mubr.msk.f32.vlgmr.msra.gmra.mrb[10].mxu1 %vm522_vm1, %v15163_v10 }
 0x6c1   :  { %13646 = vmatpush3.bf16.msra.mxu1 %v13645_v57  ;;  %12755 = vmatprep.mubr.msk.f32.mxu1 %vm14707_vm2, %v14708_v61 }
 0x6c2   :  { %13647 = vmatprep.subr.bf16.mxu1 %v14706_v0 }
 0x6c5   :  { %13649 = vmatpush3.bf16.msra.mxu1 %v13648_v60 }
 0x6c6   :  { %12769 = vmatprep.subr.mxu1 %v14708_v61 }
 0x6c8   :  { %12756 = vmatmul.mubr.msk.f32.vlgmr.msra.gmra.mrb[12].mxu1 %vm522_vm1, %v15163_v10  ;;  %v1210_v10 = vadd.f32 %v11789_v8, %v15191_v21  ;;  %v11794_v21 = vld [vmem:[%s16330_s0 + $0x10] sm:$0xff]  ;;  %s16362_s0 = sld [smem:[#allocation71_spill]] }
 0x6c9   :  { %12771 = vmatprep.mubr.msk.f32.mxu1 %vm14707_vm2, %v14708_v61  ;;  %v13657_v23 = vpack.c.bf16 %v11795_v22, %v11794_v21  ;;  %v1656_v8 = vld [vmem:[%s16333_s4 + $0x30] sm:$0xff] }
 0x6cb   :  { %13658 = vmatpush3.bf16.msra.mxu0 %v13657_v23 }
 0x6cc   :  { %13662 = vmatprep.subr.bf16.mxu0 %v14706_v0 }
 0x78b   :  { %v958_v62 = vpop.f32.mrb[8].mxu1 }
 0x78c   :  { %v12735_v63 = vpop.f32.mrb[9].mxu1 }
 0x78d   :  { %v1651_v63 = vld [vmem:[%s16333_s4 + $0x8] sm:$0xff] }
 0x793   :  { %v1043_v1 = vpop.f32.mrb[10].mxu1 }
 0x794   :  { %v12746_v2 = vpop.f32.mrb[11].mxu1  ;;  %v1044_v9 = vadd.f32 %v11775_v5, %v1043_v1  ;;  %v1654_v5 = vld [vmem:[%s16333_s4 + $0x20] sm:$0xff] }
 0x795   :  { %v1652_v2 = vld [vmem:[%s16333_s4 + $0x10] sm:$0xff] }
 0x79b   :  { %v1126_v4 = vpop.f32.mrb[12].mxu1 }
 0x79c   :  { %v1127_v6 = vadd.f32 %v11782_v3, %v1126_v4  ;;  %v12757_v7 = vpop.f32.mrb[13].mxu1  ;;  %v1653_v3 = vld [vmem:[%s16333_s4 + $0x18] sm:$0xff] }
 0x79d   :  { %v13672_v4 = vpack.c.bf16 %v1653_v3, %v1652_v2 }
 0x79e   :  { %12770 = vmatpush3.xpose.msk.msra.mxu1 %vm798_vm3, %v1127_v6  ;;  %v1655_v6 = vld [vmem:[%s16333_s4 + $0x28] sm:$0xff] }
 0x79f   :  { %12774 = vmatprep.subr.mxu1 %v14708_v61  ;;  %v13675_v7 = vpack.c.bf16 %v1655_v6, %v1654_v5 }
 0x7a1   :  { %12772 = vmatmul.mubr.msk.f32.vlgmr.msra.gmra.mrb[14].mxu1 %vm798_vm3, %v1044_v9  ;;  %v1657_v9 = vld [vmem:[%s16333_s4 + $0x38] sm:$0xff] }
 0x7a2   :  { %12775 = vmatpush3.msra.mxu1 %v1210_v10  ;;  %12776 = vmatprep.mubr.msk.f32.mxu1 %vm14707_vm2, %v14708_v61  ;;  %v13678_v10 = vpack.c.bf16 %v1657_v9, %v1656_v8 }
 0x7a3   :  { %13659 = vmatprep.subr.bf16.mxu1 %v14706_v0 }
 0x874   :  { %v1285_v11 = vpop.f32.mrb[14].mxu1 }
 0x875   :  { %v1289_v12 = vmul.f32 0.25, %v1285_v11  ;;  %v12773_v13 = vpop.f32.mrb[15].mxu1  ;;  %v1739_v11 = vld [vmem:[%s16334_s11] sm:$0xff] }
 0x877   :  { %v1290_v14 = vadd.f32 %v1289_v12, %v15203_v35  ;;  %v1740_v12 = vld [vmem:[%s16334_s11 + $0x8] sm:$0xff] }
 0x878   :  { %v13681_v13 = vpack.c.bf16 %v1740_v12, %v1739_v11  ;;  %v11818_v11 = vld [vmem:[%s16337_s27 + $0x3] ss:$0 sm:$0xff] }
 0x879   :  { %v1291_v15 = vsel %vm877_vm4, %v1290_v14, -inf }
 0x87a   :  { %1292 = vmax.xlane.f32.xlu0 %v1291_v15 }
 0x907   :  { %v1293_v16 = vpop.xlane.xlu0 %1292 }
 0x908   :  { %v1294_v17 = vsub.f32 %v1290_v14, %v1293_v16  ;;  %v11801_v14 = vld [vmem:[#allocation2] ss:$0 sm:$0xff] }
 0x90a   :  { %v1295_v18 = vmul.f32 1.442695, %v1294_v17 }
 0x90c   :  { %14122 = vpow2.f32 %v1295_v18 }
 0x916   :  { %v14123_v19 = vpop.eup %14122 }
 0x917   :  { %v1297_v20 = vsel %vm877_vm4, %v14123_v19, 0.0 }
 0x918   :  { %1298 = vadd.xlane.f32.xlu1 %v1297_v20 }
 0x9a5   :  { %v1299_v24 = vpop.xlane.xlu1 %1298 }
 0x9a6   :  { %14124 = vrcp.f32 %v1299_v24 }
 0x9b0   :  { %v14125_v27 = vpop.eup %14124 }
 0x9b1   :  { %v1301_v29 = vmul.f32 %v14125_v27, %v14123_v19  ;;  %v1741_v27 = vld [vmem:[%s16334_s11 + $0x10] sm:$0xff] }
 0x9b3   :  { %12777 = vmatmul.mubr.msk.f32.vlgmr.msra.gmra.mrb[16].mxu1 %vm877_vm4, %v1301_v29 }
 0x9b4   :  { %13661 = vmatpush3.bf16.msra.mxu1 %v13660_v28  ;;  %12790 = vmatprep.mubr.msk.f32.mxu1 %vm14707_vm2, %v14708_v61  ;;  %v1742_v28 = vld [vmem:[%s16334_s11 + $0x18] sm:$0xff]  ;;  %s16366_s11 = sld [smem:[#allocation67_spill]] }
 0x9b5   :  { %13668 = vmatprep.subr.bf16.mxu1 %v14706_v0  ;;  %v13684_v29 = vpack.c.bf16 %v1742_v28, %v1741_v27  ;;  %v15336_v27 = vld [vmem:[%s16339_s3] sm:$0xff] }
 0x9b6   :  { %v2309_v28 = vld [vmem:[%s16338_s2] sm:$0xff] }
 0x9b7   :  { %12791 = vmatmul.mubr.msk.f32.vlgmr.msra.gmra.mrb[18].mxu1 %vm798_vm3, %v958_v62  ;;  %v1650_v62 = vld [vmem:[%s16333_s4] sm:$0xff]  ;;  %s16365_s4 = sld [smem:[#allocation66_spill]] }
 0x9b8   :  { %12820 = vmatprep.mubr.msk.f32.mxu1 %vm14707_vm2, %v14708_v61  ;;  %v13669_v1 = vpack.c.bf16 %v1651_v63, %v1650_v62  ;;  %v11815_v62 = vld [vmem:[%s16337_s27 + $0x2] ss:$0 sm:$0xff] }
 0x9ba   :  { %13670 = vmatpush3.bf16.msra.mxu1 %v13669_v1 }
 0x9bb   :  { %13671 = vmatprep.subr.bf16.mxu1 %v14706_v0 }
 0x9be   :  { %13673 = vmatpush3.bf16.msra.mxu1 %v13672_v4 }
 0x9bf   :  { %13674 = vmatprep.subr.bf16.mxu1 %v14706_v0 }
 0x9c2   :  { %13676 = vmatpush3.bf16.msra.mxu1 %v13675_v7 }
 0x9c3   :  { %13677 = vmatprep.subr.bf16.mxu1 %v14706_v0 }
 0x9c6   :  { %13679 = vmatpush3.bf16.msra.mxu1 %v13678_v10 }
 0x9c7   :  { %13689 = vmatprep.subr.bf16.mxu1 %v14706_v0 }
 0xa86   :  { %v1371_v30 = vpop.f32.mrb[16].mxu1 }
 0xa87   :  { %v12778_v31 = vpop.f32.mrb[17].mxu1  ;;  %12784 = vmatmul.mubr.msk.f32.vlgmr.msra.gmra.mrb[4].mxu0 %vm798_vm3, %v1371_v30  ;;  %v11803_v30 = vld [vmem:[#allocation4] ss:$0 sm:$0xff] }
 0xa88   :  { %12801 = vmatprep.mubr.msk.f32.mxu0 %vm14707_vm2, %v14708_v61  ;;  %13664 = vmatpush3.bf16.msra.mxu0 %v13663_v49  ;;  %v1843_v31 = vld [vmem:[%s16335_s24] sm:$0xff] }
 0xa89   :  { %13665 = vmatprep.subr.bf16.mxu0 %v14706_v0 }
 0xa8a   :  { %v1520_v32 = vpop.f32.mrb[18].mxu1 }
 0xa8b   :  { %v12792_v33 = vpop.f32.mrb[19].mxu1 }
 0xb5a   :  { %v1447_v35 = vpop.f32.mrb[4].mxu0 }
 0xb5b   :  { %v1521_v36 = vadd.f32 %v1520_v32, %v1447_v35  ;;  %v12785_v37 = vpop.f32.mrb[5].mxu0  ;;  %v1844_v32 = vld [vmem:[%s16335_s24 + $0x8] sm:$0xff] }
 0xb5d   :  { %v1530_v38 = vadd.f32 %v11798_v34, %v1521_v36  ;;  %v13687_v36 = vpack.c.bf16 %v1844_v32, %v1843_v31  ;;  %v15343_v31 = vld [vmem:[%s16339_s3 + $0x8] sm:$0x3] }
 0xb5f   :  { %v15261_v39 = vadd.f32 %v1530_v38, %v15137_v41  ;;  %v1559_v41 = vld [vmem:[%s16332_s28 + $0x10] sm:$0xff]  ;;  %v1842_v38 = vld [vmem:[%s16336_s1] sm:$0xff]  ;;  %s16364_s28 = sld [smem:[#allocation72_spill]]  ;;  %s16368_s1 = sld [smem:[#allocation74_spill]] }
 0xb60   :  { %v13666_v51 = vpack.c.bf16 %v1560_v50, %v1559_v41 }
 0xb61   :  { %v1534_v40 = vsel %vm522_vm1, %v15261_v39, 0.0 }
 0xb62   :  { %1535 = vadd.xlane.f32.xlu0 %v1534_v40  ;;  %13667 = vmatpush3.bf16.msra.mxu0 %v13666_v51  ;;  %v11810_v40 = vld [vmem:[%s16335_s24 + $0x10] sm:$0xff] }
 0xb63   :  { %13680 = vmatprep.subr.bf16.mxu0 %v14706_v0 }
 0xbef   :  { %v1536_v42 = vpop.xlane.xlu0 %1535 }
 0xbf0   :  { %v1537_v43 = vmul.f32 0.03125, %v1536_v42  ;;  %v11811_v42 = vld [vmem:[%s16335_s24 + $0x18] sm:$0xff] }
 0xbf2   :  { %v1538_v44 = vsub.f32 %v15261_v39, %v1537_v43  ;;  %v13690_v43 = vpack.c.bf16 %v11811_v42, %v11810_v40 }
 0xbf4   :  { %v1539_v45 = vmul.f32 %v1538_v44, %v1538_v44 }
 0xbf6   :  { %v1540_v46 = vsel %vm522_vm1, %v1539_v45, 0.0  ;;  %v11808_v45 = vld [vmem:[%s16337_s27] ss:$0 sm:$0xff] }
 0xbf7   :  { %1541 = vadd.xlane.f32.xlu1 %v1540_v46 }
 0xc84   :  { %v1542_v52 = vpop.xlane.xlu1 %1541 }
 0xc85   :  { %v1543_v53 = vmul.f32 0.03125, %v1542_v52  ;;  %v11816_v52 = vld [vmem:[%s16335_s24 + $0x20] sm:$0xff] }
 0xc87   :  { %v1544_v54 = vadd.f32 1e-05, %v1543_v53  ;;  %v11817_v53 = vld [vmem:[%s16335_s24 + $0x28] sm:$0xff] }
 0xc89   :  { %14126 = vrsqrt.f32 %v1544_v54  ;;  %v13696_v54 = vpack.c.bf16 %v11817_v53, %v11816_v52  ;;  %v11827_v52 = vld [vmem:[%s16340_s30] ss:$0 sm:$0xff] }
 0xc93   :  { %v14127_v55 = vpop.eup %14126 }
 0xc94   :  { %v1546_v57 = vmul.f32 %v14127_v55, %v1538_v44 }
 0xc96   :  { %v1551_v59 = vmul.f32 %v11799_v56, %v1546_v57 }
 0xc98   :  { %v1556_v60 = vadd.f32 %v11800_v58, %v1551_v59  ;;  %v11814_v59 = vld [vmem:[%s16337_s27 + $0x1] ss:$0 sm:$0xff] }
 0xc9a   :  { %12802 = vmatmul.mubr.msk.f32.vlgmr.msra.gmra.mrb[6].mxu0 %vm522_vm1, %v1556_v60 }
 0xc9b   :  { %12831 = vmatprep.mubr.msk.f32.mxu0 %vm14707_vm2, %v14708_v61  ;;  %13682 = vmatpush3.bf16.msra.mxu0 %v13681_v13 }
 0xc9c   :  { %13683 = vmatprep.subr.bf16.mxu0 %v14706_v0 }
 0xc9f   :  { %13685 = vmatpush3.bf16.msra.mxu0 %v13684_v29  ;;  %v2310_v29 = vld [vmem:[%s16338_s2 + $0x8] sm:$0xff] }
 0xca0   :  { %13686 = vmatprep.subr.bf16.mxu0 %v14706_v0 }
 0xd6d   :  { %v1637_v15 = vpop.f32.mrb[6].mxu0 }
 0xd6e   :  { %v1638_v16 = vadd.f32 %v11801_v14, %v1637_v15  ;;  %v12803_v17 = vpop.f32.mrb[7].mxu0 }
 0xd70   :  { %v1641_v18 = vmul.f32 %v1638_v16, %v1638_v16 }
 0xd72   :  { %v1642_v19 = vmul.f32 %v1641_v18, %v1638_v16 }
 0xd74   :  { %v1643_v20 = vmul.f32 0.044715, %v1642_v19 }
 0xd76   :  { %v1644_v21 = vadd.f32 %v1643_v20, %v1638_v16 }
 0xd78   :  { %v1645_v22 = vmul.f32 0.7978846, %v1644_v21  ;;  %v11822_v21 = vld [vmem:[%s16335_s24 + $0x30] sm:$0xff] }
 0xd7a   :  { %14128 = vtanh.f32 %v1645_v22  ;;  %v11823_v22 = vld [vmem:[%s16335_s24 + $0x38] sm:$0xff]  ;;  %s16367_s24 = sld [smem:[#allocation73_spill]] }
 0xd84   :  { %v14129_v23 = vpop.eup %14128 }
 0xd85   :  { %v1647_v24 = vadd.f32 1.0, %v14129_v23  ;;  %v13699_v23 = vpack.c.bf16 %v11823_v22, %v11822_v21 }
 0xd87   :  { %v1648_v25 = vmul.f32 0.5, %v1647_v24  ;;  %v11830_v24 = vld [vmem:[%s16338_s2 + $0x20] sm:$0xff] }
 0xd89   :  { %v1649_v26 = vmul.f32 %v1648_v25, %v1638_v16  ;;  %v11831_v25 = vld [vmem:[%s16338_s2 + $0x28] sm:$0xff] }
 0xd8b   :  { %12821 = vmatmul.mubr.msk.f32.vlgmr.msra.gmra.mrb[20].mxu1 %vm445_vm0, %v1649_v26  ;;  %v13705_v26 = vpack.c.bf16 %v11831_v25, %v11830_v24 }
 0xd8c   :  { %12845 = vmatprep.mubr.msk.f32.mxu1 %vm14707_vm2, %v14708_v61  ;;  %13691 = vmatpush3.bf16.msra.mxu1 %v13690_v43 }
 0xd8d   :  { %13695 = vmatprep.subr.bf16.mxu1 %v14706_v0 }
 0xe5e   :  { %v1734_v33 = vpop.f32.mrb[20].mxu1 }
 0xe5f   :  { %v1735_v34 = vadd.f32 %v11803_v30, %v1734_v33  ;;  %v12822_v35 = vpop.f32.mrb[21].mxu1  ;;  %v13701_v30 = vpack.c.bf16 %v2310_v29, %v2309_v28  ;;  %v11856_v28 = vld [vmem:[%s16338_s2 + $0x38] sm:$0xff] }
 0xe61   :  { %v1738_v37 = vadd.f32 %v1735_v34, %v15261_v39 }
 0xe63   :  { %12832 = vmatmul.mubr.msk.f32.vlgmr.msra.gmra.mrb[8].mxu0 %vm522_vm1, %v1738_v37 }
 0xe64   :  { %13688 = vmatpush3.bf16.msra.mxu0 %v13687_v36  ;;  %12838 = vmatprep.mubr.msk.f32.mxu0 %vm14707_vm2, %v14708_v61  ;;  %v11820_v36 = vld [vmem:[%s16337_s27 + $0x4] ss:$0 sm:$0xff] }
 0xe65   :  { %13692 = vmatprep.subr.bf16.mxu0 %v14706_v0 }
 0xe67   :  { %12839 = vmatmul.mubr.msk.f32.vlgmr.msra.gmra.mrb[10].mxu0 %vm798_vm3, %v1842_v38  ;;  %v11821_v38 = vld [vmem:[%s16337_s27 + $0x5] ss:$0 sm:$0xff] }
 0xe68   :  { %12852 = vmatprep.mubr.msk.f32.mxu0 %vm14707_vm2, %v14708_v61  ;;  %13694 = vmatpush3.bf16.msra.mxu0 %v13690_v43 }
 0xe69   :  { %13698 = vmatprep.subr.bf16.mxu0 %v14706_v0 }
 0xf36   :  { %v15314_v39 = vpop.f32.mrb[8].mxu0 }
 0xf37   :  { %v12833_v44 = vpop.f32.mrb[9].mxu0 }
 0xf3a   :  { %v1919_v46 = vpop.f32.mrb[10].mxu0 }
 0xf3b   :  { %v1920_v47 = vadd.f32 %v11808_v45, %v1919_v46  ;;  %v12840_v48 = vpop.f32.mrb[11].mxu0 }
 0xf3d   :  { %12846 = vmatmul.mubr.msk.f32.vlgmr.msra.gmra.mrb[22].mxu1 %vm798_vm3, %v1920_v47 }
 0xf3e   :  { %12859 = vmatprep.mubr.msk.f32.mxu1 %vm14707_vm2, %v14708_v61  ;;  %13697 = vmatpush3.bf16.msra.mxu1 %v13696_v54 }
 0xf3f   :  { %13702 = vmatprep.subr.bf16.mxu1 %v13701_v30 }
0x1010   :  { %v1997_v49 = vpop.f32.mrb[22].mxu1 }
0x1011   :  { %v2001_v41 = vsub.f32 %v1920_v47, %v1997_v49  ;;  %v12847_v50 = vpop.f32.mrb[23].mxu1 }
0x1013   :  { %v2002_v51 = vmul.f32 %v2001_v41, %v2001_v41 }
0x1015   :  { %12853 = vmatmul.mubr.msk.f32.vlgmr.msra.gmra.mrb[12].mxu0 %vm798_vm3, %v2002_v51 }
0x1016   :  { %12866 = vmatprep.mubr.msk.f32.mxu0 %vm14707_vm2, %v14708_v61  ;;  %13700 = vmatpush3.bf16.msra.mxu0 %v13699_v23 }
0x1017   :  { %13706 = vmatprep.subr.bf16.mxu0 %v13705_v26 }
0x10e8   :  { %v2072_v55 = vpop.f32.mrb[12].mxu0 }
0x10e9   :  { %v2073_v56 = vadd.f32 1e-06, %v2072_v55  ;;  %v12854_v57 = vpop.f32.mrb[13].mxu0 }
0x10eb   :  { %14130 = vrsqrt.f32 %v2073_v56 }
0x10f5   :  { %v14131_v58 = vpop.eup %14130 }
0x10f6   :  { %v2077_v60 = vmul.f32 %v14131_v58, %v2001_v41  ;;  %v11833_v58 = vld [vmem:[%s16340_s30 + $0x2] ss:$0 sm:$0xff] }
0x10f8   :  { %v2082_v63 = vmul.f32 %v11814_v59, %v2077_v60 }
0x10fa   :  { %v2087_v1 = vadd.f32 %v11815_v62, %v2082_v63 }
0x10fc   :  { %v2088_v2 = vmul.f32 %v2087_v1, %v2087_v1 }
0x10fe   :  { %v2089_v3 = vmul.f32 %v2088_v2, %v2087_v1 }
0x1100   :  { %v2090_v4 = vmul.f32 0.044715, %v2089_v3  ;;  %v11836_v3 = vld [vmem:[%s16338_s2 + $0x40] sm:$0xff] }
0x1102   :  { %v2091_v5 = vadd.f32 %v2090_v4, %v2087_v1  ;;  %v11837_v4 = vld [vmem:[%s16338_s2 + $0x48] sm:$0xff] }
0x1104   :  { %v2092_v6 = vmul.f32 0.7978846, %v2091_v5  ;;  %v13709_v5 = vpack.c.bf16 %v11837_v4, %v11836_v3 }
0x1106   :  { %14132 = vtanh.f32 %v2092_v6 }
0x1110   :  { %v14133_v7 = vpop.eup %14132 }
0x1111   :  { %v2094_v8 = vadd.f32 1.0, %v14133_v7  ;;  %v15379_v7 = vld [vmem:[%s16341_s7 + $0x8] sm:$0x3] }
0x1113   :  { %v2095_v9 = vmul.f32 0.5, %v2094_v8 }
0x1115   :  { %v2096_v10 = vmul.f32 %v2095_v9, %v2087_v1 }
0x1117   :  { %12860 = vmatmul.mubr.msk.f32.vlgmr.msra.gmra.mrb[24].mxu1 %vm798_vm3, %v2096_v10  ;;  %v15382_v10 = vld [vmem:[%s16341_s7] sm:$0xff] }
0x1118   :  { %12873 = vmatprep.mubr.msk.f32.mxu1 %vm798_vm3, %v15336_v27  ;;  %13704 = vmatpush3.bf16.msra.mxu1 %v13701_v30 }
0x1119   :  { %13710 = vmatprep.subr.bf16.mxu1 %v13709_v5 }
0x111b   :  { %12874 = vmatmul.mubr.msk.f32.vlgmr.msra.gmra.mrb[26].mxu1 %vm798_vm3, %v15343_v31 }
0x111c   :  { %12887 = vmatprep.mubr.msk.f32.mxu1 %vm798_vm3, %v15336_v27  ;;  %13712 = vmatpush3.bf16.msra.mxu1 %v13709_v5 }
0x111f   :  { %12888 = vmatmul.mubr.msk.f32.vlgmr.msra.gmra.mrb[28].mxu1 %vm798_vm3, %v15343_v31 }
0x11ea   :  { %v2174_v12 = vpop.f32.mrb[24].mxu1 }
0x11eb   :  { %v2175_v13 = vadd.f32 %v11818_v11, %v2174_v12  ;;  %v12861_v14 = vpop.f32.mrb[25].mxu1 }
0x11ed   :  { %v2180_v15 = vsel %vm798_vm3, %v2175_v13, 0.0 }
0x11ee   :  { %2181 = vadd.xlane.f32.xlu0 %v2180_v15  ;;  %v12875_v51 = vpop.f32.mrb[26].mxu1 }
0x11ef   :  { %v2396_v53 = vadd.f32 %v12875_v51, %v11827_v52  ;;  %v2390_v54 = vpop.f32.mrb[27].mxu1 }
0x11f0   :  { %v2391_v55 = vadd.f32 %v11827_v52, %v2390_v54 }
0x11f2   :  { %v12889_v30 = vpop.f32.mrb[28].mxu1 }
0x127b   :  { %v2182_v16 = vpop.xlane.xlu0 %2181 }
0x127c   :  { %v2183_v17 = vmul.f32 0.0625, %v2182_v16 }
0x127e   :  { %v2184_v18 = vsub.f32 %v2175_v13, %v2183_v17 }
0x1280   :  { %v2185_v19 = vmul.f32 %v2184_v18, %v2184_v18 }
0x1282   :  { %v2186_v20 = vsel %vm798_vm3, %v2185_v19, 0.0 }
0x1283   :  { %2187 = vadd.xlane.f32.xlu1 %v2186_v20 }
0x1310   :  { %v2188_v32 = vpop.xlane.xlu1 %2187 }
0x1311   :  { %v2189_v33 = vmul.f32 0.0625, %v2188_v32  ;;  %v11839_v32 = vld [vmem:[%s16340_s30 + $0x4] ss:$0 sm:$0xff] }
0x1313   :  { %v2190_v34 = vadd.f32 1e-06, %v2189_v33  ;;  %v2562_v33 = vpop.f32.mrb[29].mxu1 }
0x1315   :  { %14134 = vrsqrt.f32 %v2190_v34  ;;  %v2568_v34 = vadd.f32 %v12889_v30, %v11839_v32 }
0x131f   :  { %v14135_v35 = vpop.eup %14134 }
0x1320   :  { %v2192_v37 = vmul.f32 %v14135_v35, %v2184_v18  ;;  %v2563_v35 = vadd.f32 %v11839_v32, %v2562_v33 }
0x1322   :  { %v2197_v40 = vmul.f32 %v11820_v36, %v2192_v37  ;;  %v13719_v36 = vpack.c.bf16 %v2568_v34, %v2563_v35 }
0x1324   :  { %v2202_v42 = vadd.f32 %v11821_v38, %v2197_v40  ;;  %13721 = vmatprep.subr.msk.bf16.mxu1 %vm15395_vm10, %v13719_v36  ;;  %v11849_v38 = vld [vmem:[%s16338_s2 + $0x10] sm:$0xff]  ;;  %v11850_v40 = vld [vmem:[%s16338_s2 + $0x18] sm:$0xff] }
0x1325   :  { %13724 = vmatpush3.bf16.msk.msra.mxu1 %vm15395_vm10, %v13719_v36 }
0x1326   :  { %v2203_v43 = vmul.f32 %v2202_v42, %v2202_v42 }
0x1328   :  { %v2204_v44 = vmul.f32 %v2203_v43, %v2202_v42 }
0x132a   :  { %v2205_v45 = vmul.f32 0.044715, %v2204_v44 }
0x132c   :  { %v2206_v46 = vadd.f32 %v2205_v45, %v2202_v42 }
0x132e   :  { %v2207_v47 = vmul.f32 0.7978846, %v2206_v46 }
0x1330   :  { %14136 = vtanh.f32 %v2207_v47 }
0x133a   :  { %v14137_v48 = vpop.eup %14136 }
0x133b   :  { %v2209_v49 = vadd.f32 1.0, %v14137_v48 }
0x133d   :  { %v2210_v41 = vmul.f32 0.5, %v2209_v49  ;;  %v11858_v49 = vld [vmem:[%s16340_s30 + $0x3] ss:$0 sm:$0xff] }
0x133f   :  { %v2211_v50 = vmul.f32 %v2210_v41, %v2202_v42  ;;  %v13725_v42 = vpack.c.bf16 %v11850_v40, %v11849_v38  ;;  %v11874_v38 = vld [vmem:[%s16346_s10 + $0x8] sm:$0xff]  ;;  %v2771_v40 = vld [vmem:[%s16346_s10] sm:$0xff] }
0x1341   :  { %12867 = vmatmul.mubr.msk.f32.vlgmr.msra.gmra.mrb[14].mxu0 %vm798_vm3, %v2211_v50  ;;  %13726 = vmatprep.subr.bf16.mxu1 %v13725_v42 }
0x1342   :  { %13708 = vmatpush3.bf16.msra.mxu0 %v13705_v26  ;;  %12880 = vmatprep.mubr.msk.f32.mxu0 %vm798_vm3, %v15336_v27  ;;  %v11855_v26 = vld [vmem:[%s16338_s2 + $0x30] sm:$0xff] }
0x1343   :  { %v13729_v29 = vpack.c.bf16 %v11856_v28, %v11855_v26 }
0x1345   :  { %12881 = vmatmul.mubr.msk.f32.vlgmr.msra.gmra.mrb[16].mxu0 %vm798_vm3, %v15343_v31 }
0x1346   :  { %12894 = vmatprep.mubr.msk.f32.mxu0 %vm877_vm4, %v2391_v55 }
0x1414   :  { %v15358_v56 = vpop.f32.mrb[14].mxu0 }
0x1415   :  { %v12868_v57 = vpop.f32.mrb[15].mxu0 }
0x1416   :  { %v11852_v57 = vld [vmem:[%s16340_s30 + $0x1] ss:$0 sm:$0xff] }
0x1418   :  { %v12882_v59 = vpop.f32.mrb[16].mxu0 }
0x1419   :  { %v2482_v60 = vadd.f32 %v12882_v59, %v11833_v58  ;;  %v2476_v62 = vpop.f32.mrb[17].mxu0 }
0x141a   :  { %v2477_v63 = vadd.f32 %v11833_v58, %v2476_v62 }
0x141c   :  { %v13713_v2 = vpack.c.bf16 %v2482_v60, %v2477_v63  ;;  %v11861_v63 = vld [vmem:[%s16338_s2 + $0x50] sm:$0xff] }
0x141e   :  { %13715 = vmatprep.subr.msk.bf16.mxu0 %vm15363_vm5, %v13713_v2 }
0x141f   :  { %13718 = vmatpush3.bf16.xpose.msk.msra.mxu0 %vm15363_vm5, %v13713_v2  ;;  %v11862_v2 = vld [vmem:[%s16338_s2 + $0x58] sm:$0xff] }
0x1420   :  { %13730 = vmatprep.subr.bf16.mxu0 %v13729_v29  ;;  %v13733_v3 = vpack.c.bf16 %v11862_v2, %v11861_v63 }
0x1426   :  { %12895 = vmatmul.mubr.msk.f32.vlgmr.msra.gmra.mrb[18].mxu0 %vm877_vm4, %v2396_v53 }
0x1427   :  { %12915 = vmatprep.mubr.msk.f32.mxu0 %vm798_vm3, %v15336_v27  ;;  %13732 = vmatpush3.bf16.msra.mxu0 %v13729_v29 }
0x142a   :  { %12916 = vmatmul.mubr.msk.f32.vlgmr.msra.gmra.mrb[20].mxu0 %vm798_vm3, %v15343_v31 }
0x14f9   :  { %v12896_v6 = vpop.f32.mrb[18].mxu0 }
0x14fa   :  { %v2659_v8 = vmul.f32 0.35355338, %v12896_v6  ;;  %v2649_v9 = vpop.f32.mrb[19].mxu0 }
0x14fb   :  { %v2658_v11 = vmul.f32 0.35355338, %v2649_v9 }
0x14fc   :  { %v2661_v12 = vadd.f32 %v2659_v8, %v15379_v7 }
0x14fd   :  { %v2660_v13 = vadd.f32 %v2658_v11, %v15382_v10  ;;  %v12917_v41 = vpop.f32.mrb[20].mxu0 }
0x14fe   :  { %v2667_v14 = vsel %vm2666_vm6, %v2661_v12, -inf  ;;  %v2941_v50 = vadd.f32 %v12917_v41, %v11858_v49  ;;  %v2935_v51 = vpop.f32.mrb[21].mxu0 }
0x14ff   :  { %2668 = vmax.xlane.f32.xlu1 %v2667_v14  ;;  %v2663_v15 = vsel %vm2662_vm7, %v2660_v13, -inf  ;;  %v2936_v52 = vadd.f32 %v11858_v49, %v2935_v51 }
0x1500   :  { %2664 = vmax.xlane.f32.xlu0 %v2663_v15 }
0x1501   :  { %v13737_v53 = vpack.c.bf16 %v2941_v50, %v2936_v52 }
0x1503   :  { %13739 = vmatprep.subr.msk.bf16.mxu0 %vm15363_vm5, %v13737_v53 }
0x1504   :  { %13742 = vmatpush3.bf16.xpose.msk.msra.mxu0 %vm15363_vm5, %v13737_v53 }
0x158c   :  { %v2669_v16 = vpop.xlane.xlu1 %2668 }
0x158d   :  { %v2671_v17 = vsub.f32 %v2661_v12, %v2669_v16  ;;  %v2665_v18 = vpop.xlane.xlu0 %2664 }
0x158e   :  { %v2670_v19 = vsub.f32 %v2660_v13, %v2665_v18 }
0x158f   :  { %v2674_v20 = vmul.f32 1.442695, %v2671_v17 }
0x1590   :  { %v2672_v21 = vmul.f32 1.442695, %v2670_v19 }
0x1591   :  { %14138 = vpow2.f32 %v2674_v20 }
0x1592   :  { %14140 = vpow2.f32 %v2672_v21 }
0x159b   :  { %v14139_v22 = vpop.eup %14138 }
0x159c   :  { %v14141_v23 = vpop.eup %14140  ;;  %v2679_v24 = vsel %vm2666_vm6, %v14139_v22, 0.0 }
0x159d   :  { %2680 = vadd.xlane.f32.xlu1 %v2679_v24  ;;  %v2676_v25 = vsel %vm2662_vm7, %v14141_v23, 0.0  ;;  %v11864_v24 = vld [vmem:[%s16340_s30 + $0x5] ss:$0 sm:$0xff] }
0x159e   :  { %2677 = vadd.xlane.f32.xlu0 %v2676_v25 }
0x162a   :  { %v2681_v43 = vpop.xlane.xlu1 %2680 }
0x162b   :  { %14142 = vrcp.f32 %v2681_v43  ;;  %v2678_v44 = vpop.xlane.xlu0 %2677 }
0x162c   :  { %14144 = vrcp.f32 %v2678_v44 }
0x1635   :  { %v14143_v45 = vpop.eup %14142 }
0x1636   :  { %v14145_v46 = vpop.eup %14144  ;;  %v2685_v48 = vmul.f32 %v14143_v45, %v14139_v22  ;;  %v1818_v22 = vsel %vm798_vm3, %v15314_v39, 0.0  ;;  %v11879_v45 = vld [vmem:[%s16347_s19] ss:$0 sm:$0xff] }
0x1637   :  { %v2683_v47 = vmul.f32 %v14145_v46, %v14141_v23 }
0x1639   :  { %12901 = vmatprep.mubr.msk.f32.mxu1 %vm2662_vm7, %v2683_v47 }
0x163a   :  { %12902 = vmatmul.mubr.msk.f32.vlgmr.msra.gmra.mrb[30].mxu1 %vm2662_vm7, %v2685_v48 }
0x163b   :  { %13728 = vmatpush3.bf16.msra.mxu1 %v13725_v42  ;;  %12908 = vmatprep.mubr.msk.f32.mxu1 %vm798_vm3, %v15336_v27 }
0x163c   :  { %13734 = vmatprep.subr.bf16.mxu1 %v13733_v3 }
0x163e   :  { %12909 = vmatmul.mubr.msk.f32.vlgmr.msra.gmra.mrb[32].mxu1 %vm798_vm3, %v15343_v31 }
0x163f   :  { %12922 = vmatprep.mubr.msk.f32.mxu1 %vm798_vm3, %v15336_v27  ;;  %13736 = vmatpush3.bf16.msra.mxu1 %v13733_v3 }
0x1642   :  { %12923 = vmatmul.mubr.msk.f32.vlgmr.msra.gmra.mrb[34].mxu1 %vm798_vm3, %v15343_v31 }
0x170d   :  { %v15418_v54 = vpop.f32.mrb[30].mxu1 }
0x170e   :  { %v15420_v55 = vpop.f32.mrb[31].mxu1 }
0x1711   :  { %v12910_v58 = vpop.f32.mrb[32].mxu1 }
0x1712   :  { %v2849_v59 = vpop.f32.mrb[33].mxu1  ;;  %v2855_v62 = vadd.f32 %v12910_v58, %v11852_v57 }
0x1713   :  { %v2850_v60 = vadd.f32 %v11852_v57, %v2849_v59  ;;  %v11895_v57 = vld [vmem:[%s16338_s2 + $0xa8] sm:$0xff] }
0x1715   :  { %12929 = vmatprep.mubr.msk.f32.mxu0 %vm877_vm4, %v2850_v60  ;;  %v12924_v23 = vpop.f32.mrb[34].mxu1 }
0x1716   :  { %12930 = vmatmul.mubr.msk.f32.vlgmr.msra.gmra.mrb[22].mxu0 %vm877_vm4, %v2855_v62  ;;  %v3021_v25 = vpop.f32.mrb[35].mxu1  ;;  %v3027_v26 = vadd.f32 %v12924_v23, %v11864_v24 }
0x1717   :  { %v3022_v28 = vadd.f32 %v11864_v24, %v3021_v25 }
0x1719   :  { %v13743_v29 = vpack.c.bf16 %v3027_v26, %v3022_v28 }
0x171b   :  { %13745 = vmatprep.subr.msk.bf16.mxu1 %vm15395_vm10, %v13743_v29 }
0x171c   :  { %13748 = vmatpush3.bf16.msk.msra.mxu1 %vm15395_vm10, %v13743_v29 }
0x171d   :  { %12939 = vmatprep.subr.mxu1 %v11874_v38 }
0x17e9   :  { %v12931_v4 = vpop.f32.mrb[22].mxu0 }
0x17ea   :  { %v3118_v5 = vmul.f32 0.35355338, %v12931_v4  ;;  %v3108_v6 = vpop.f32.mrb[23].mxu0 }
0x17eb   :  { %v3117_v8 = vmul.f32 0.35355338, %v3108_v6 }
0x17ec   :  { %v3120_v9 = vadd.f32 %v3118_v5, %v15379_v7 }
0x17ed   :  { %v3119_v11 = vadd.f32 %v3117_v8, %v15382_v10 }
0x17ee   :  { %v3124_v12 = vsel %vm2666_vm6, %v3120_v9, -inf }
0x17ef   :  { %3125 = vmax.xlane.f32.xlu1 %v3124_v12  ;;  %v3121_v13 = vsel %vm2662_vm7, %v3119_v11, -inf }
0x17f0   :  { %3122 = vmax.xlane.f32.xlu0 %v3121_v13  ;;  %v11806_v13 = vld [vmem:[#allocation6] ss:$0 sm:$0xff] }
0x187c   :  { %v3126_v14 = vpop.xlane.xlu1 %3125 }
0x187d   :  { %v3128_v15 = vsub.f32 %v3120_v9, %v3126_v14  ;;  %v3123_v16 = vpop.xlane.xlu0 %3122 }
0x187e   :  { %v3127_v17 = vsub.f32 %v3119_v11, %v3123_v16  ;;  %v11807_v16 = vld [vmem:[#allocation6 + $0x1] ss:$0 sm:$0xff] }
0x187f   :  { %v3131_v18 = vmul.f32 1.442695, %v3128_v15  ;;  %v11824_v15 = vld [vmem:[%s16337_s27 + $0x6] ss:$0 sm:$0xff] }
0x1880   :  { %v3129_v19 = vmul.f32 1.442695, %v3127_v17 }
0x1881   :  { %14146 = vpow2.f32 %v3131_v18  ;;  %v2290_v18 = vadd.f32 %v11824_v15, %v15358_v56 }
0x1882   :  { %14148 = vpow2.f32 %v3129_v19 }
0x188b   :  { %v14147_v20 = vpop.eup %14146 }
0x188c   :  { %v14149_v21 = vpop.eup %14148  ;;  %v3136_v7 = vsel %vm2666_vm6, %v14147_v20, 0.0 }
0x188d   :  { %3137 = vadd.xlane.f32.xlu1 %v3136_v7  ;;  %v3133_v10 = vsel %vm2662_vm7, %v14149_v21, 0.0 }
0x188e   :  { %3134 = vadd.xlane.f32.xlu0 %v3133_v10  ;;  %v11883_v10 = vld [vmem:[%s16338_s2 + $0x60] sm:$0xff] }
0x1891   :  { %1819 = vadd.xlane.f32.xlu1 %v1818_v22  ;;  %v11884_v22 = vld [vmem:[%s16338_s2 + $0x68] sm:$0xff] }
0x1892   :  { %v13749_v23 = vpack.c.bf16 %v11884_v22, %v11883_v10  ;;  %v11919_v10 = vld [vmem:[%s16340_s30 + $0xb] ss:$0 sm:$0xff] }
0x1894   :  { %13750 = vmatprep.subr.bf16.mxu0 %v13749_v23 }
0x1895   :  { %13752 = vmatpush3.bf16.msra.mxu0 %v13749_v23 }
0x1896   :  { %13753 = vmatprep.subr.bf16.mxu0 %v14706_v0 }
0x191a   :  { %v3138_v30 = vpop.xlane.xlu1 %3137 }
0x191b   :  { %14150 = vrcp.f32 %v3138_v30  ;;  %v3135_v32 = vpop.xlane.xlu0 %3134 }
0x191c   :  { %14152 = vrcp.f32 %v3135_v32  ;;  %v11880_v32 = vld [vmem:[%s16348_s17] ss:$0 sm:$0xff] }
0x191e   :  { %v1820_v44 = vpop.xlane.xlu1 %1819 }
0x191f   :  { %v1822_v46 = vmul.f32 0.0625, %v1820_v44  ;;  %v11889_v44 = vld [vmem:[%s16338_s2 + $0x80] sm:$0xff] }
0x1921   :  { %v1823_v41 = vsub.f32 %v15314_v39, %v1822_v46 }
0x1923   :  { %v1824_v53 = vmul.f32 %v1823_v41, %v1823_v41 }
0x1925   :  { %v14151_v33 = vpop.eup %14150 }
0x1926   :  { %v14153_v34 = vpop.eup %14152  ;;  %v3142_v36 = vmul.f32 %v14151_v33, %v14147_v20  ;;  %v11826_v20 = vld [vmem:[%s16337_s27 + $0x7] ss:$0 sm:$0xff] }
0x1927   :  { %v3140_v35 = vmul.f32 %v14153_v34, %v14149_v21  ;;  %v11881_v34 = vld [vmem:[%s16349_s15] ss:$0 sm:$0xff] }
0x1929   :  { %12936 = vmatprep.mubr.msk.f32.mxu1 %vm2662_vm7, %v3140_v35 }
0x192a   :  { %12937 = vmatmul.mubr.msk.f32.vlgmr.msra.gmra.mrb[36].mxu1 %vm2662_vm7, %v3142_v36 }
0x192b   :  { %12940 = vmatpush3.msra.mxu1 %v11874_v38 }
0x192c   :  { %12944 = vmatprep.subr.mxu1 %v2771_v40 }
0x19fd   :  { %v12938_v42 = vpop.f32.mrb[36].mxu1 }
0x19fe   :  { %v3218_v43 = vpop.f32.mrb[37].mxu1 }
0x19ff   :  { %12941 = vmatprep.mubr.msk.f32.mxu1 %vm877_vm4, %v3218_v43 }
0x1a00   :  { %12942 = vmatmul.mubr.msk.f32.vlgmr.msra.gmra.mrb[38].mxu1 %vm877_vm4, %v12938_v42 }
0x1a01   :  { %12946 = vmatprep.mubr.msk.f32.mxu1 %vm877_vm4, %v15420_v55  ;;  %12945 = vmatpush3.msra.mxu1 %v2771_v40  ;;  %v11894_v55 = vld [vmem:[%s16338_s2 + $0xa0] sm:$0xff] }
0x1a02   :  { %13756 = vmatprep.subr.bf16.mxu1 %v14706_v0  ;;  %v13757_v58 = vpack.c.bf16 %v11895_v57, %v11894_v55  ;;  %v11892_v57 = vld [vmem:[%s16340_s30 + $0x8] ss:$0 sm:$0xff] }
0x1a08   :  { %12947 = vmatmul.mubr.msk.f32.vlgmr.msra.gmra.mrb[38].mxu1 %vm877_vm4, %v15418_v54  ;;  %v1825_v54 = vsel %vm798_vm3, %v1824_v53, 0.0 }
0x1a09   :  { %12967 = vmatprep.mubr.msk.f32.mxu1 %vm14707_vm2, %v14708_v61  ;;  %13758 = vmatpush3.bf16.msra.mxu1 %v13757_v58  ;;  %v11905_v58 = vld [vmem:[%s16338_s2 + $0x70] sm:$0xff] }
0x1adb   :  { %v12948_v47 = vpop.f32.mrb[38].mxu1 }
0x1adc   :  { %v3382_v48 = vpop.f32.mrb[39].mxu1  ;;  %v3398_v50 = vadd.f32 %v12948_v47, %v11879_v45 }
0x1add   :  { %v3397_v49 = vadd.f32 %v11879_v45, %v3382_v48  ;;  %v11890_v45 = vld [vmem:[%s16338_s2 + $0x88] sm:$0xff] }
0x1ade   :  { %v3405_v52 = vsel %vm3404_vm11, %v3398_v50, 0.0  ;;  %v13754_v47 = vpack.c.bf16 %v11890_v45, %v11889_v44 }
0x1adf   :  { %v3401_v51 = vsel %vm798_vm3, %v3397_v49, 0.0 }
0x1ae0   :  { %3402 = vadd.xlane.f32.xlu0 %v3401_v51 }
0x1ae4   :  { %3406 = vadd.xlane.f32.xlu0 %v3405_v52  ;;  %v11886_v52 = vld [vmem:[%s16340_s30 + $0x6] ss:$0 sm:$0xff] }
0x1ae8   :  { %1826 = vadd.xlane.f32.xlu0 %v1825_v54 }
0x1b6d   :  { %v3403_v59 = vpop.xlane.xlu0 %3402 }
0x1b6e   :  { %v3408_v60 = vmul.f32 0.0625, %v3403_v59  ;;  %v11906_v59 = vld [vmem:[%s16338_s2 + $0x78] sm:$0xff] }
0x1b70   :  { %v3410_v62 = vsub.f32 %v3397_v49, %v3408_v60  ;;  %v2302_v49 = vld [vmem:[%s16350_s16] sm:$0xff] }
0x1b71   :  { %v3407_v39 = vpop.xlane.xlu0 %3406 }
0x1b72   :  { %v3409_v63 = vmul.f32 0.0625, %v3407_v39  ;;  %v3412_v2 = vmul.f32 %v3410_v62, %v3410_v62 }
0x1b74   :  { %v3411_v3 = vsub.f32 %v3398_v50, %v3409_v63  ;;  %v3414_v4 = vsel %vm798_vm3, %v3412_v2, 0.0  ;;  %v13759_v63 = vpack.c.bf16 %v11906_v59, %v11905_v58 }
0x1b75   :  { %3415 = vadd.xlane.f32.xlu1 %v3414_v4  ;;  %v1827_v5 = vpop.xlane.xlu0 %1826  ;;  %v11917_v4 = vld [vmem:[%s16338_s2 + $0xb8] sm:$0xff] }
0x1b76   :  { %v1828_v6 = vmul.f32 0.0625, %v1827_v5  ;;  %v3413_v8 = vmul.f32 %v3411_v3, %v3411_v3 }
0x1b78   :  { %v1829_v9 = vadd.f32 1e-06, %v1828_v6  ;;  %v3417_v11 = vsel %vm3404_vm11, %v3413_v8, 0.0  ;;  %v15516_v8 = vld [vmem:[%s16351_s21 + $0x8] sm:$0x3] }
0x1b79   :  { %3418 = vadd.xlane.f32.xlu1 %v3417_v11 }
0x1b7a   :  { %14154 = vrsqrt.f32 %v1829_v9 }
0x1b84   :  { %v14155_v12 = vpop.eup %14154 }
0x1b85   :  { %v1831_v14 = vmul.f32 %v14155_v12, %v1823_v41  ;;  %v11897_v41 = vld [vmem:[%s16340_s30 + $0xa] ss:$0 sm:$0xff]  ;;  %v15519_v12 = vld [vmem:[%s16351_s21] sm:$0xff] }
0x1b87   :  { %v1836_v17 = vmul.f32 %v11806_v13, %v1831_v14  ;;  %v11908_v14 = vld [vmem:[%s16340_s30 + $0x7] ss:$0 sm:$0xff] }
0x1b89   :  { %v1841_v19 = vadd.f32 %v11807_v16, %v1836_v17 }
0x1b8b   :  { %v2293_v21 = vadd.f32 %v2290_v18, %v1841_v19 }
0x1b8d   :  { %v15467_v7 = vadd.f32 %v11826_v20, %v2293_v21 }
0x1b8f   :  { %12968 = vmatmul.mubr.msk.f32.vlgmr.msra.gmra.mrb[40].mxu1 %vm798_vm3, %v15467_v7 }
0x1c02   :  { %v3416_v24 = vpop.xlane.xlu1 %3415 }
0x1c03   :  { %v3420_v25 = vmul.f32 0.0625, %v3416_v24 }
0x1c05   :  { %v3422_v56 = vadd.f32 1e-05, %v3420_v25 }
0x1c06   :  { %v3419_v26 = vpop.xlane.xlu1 %3418 }
0x1c07   :  { %14156 = vrsqrt.f32 %v3422_v56  ;;  %v3421_v28 = vmul.f32 0.0625, %v3419_v26 }
0x1c09   :  { %v3423_v29 = vadd.f32 1e-05, %v3421_v28 }
0x1c0b   :  { %14158 = vrsqrt.f32 %v3423_v29 }
0x1c11   :  { %v14157_v30 = vpop.eup %14156 }
0x1c12   :  { %v3426_v33 = vmul.f32 %v14157_v30, %v3410_v62 }
0x1c14   :  { %v3432_v35 = vmul.f32 %v11880_v32, %v3426_v33 }
0x1c15   :  { %v14159_v36 = vpop.eup %14158 }
0x1c16   :  { %v3427_v38 = vmul.f32 %v14159_v36, %v3411_v3  ;;  %v15476_v40 = vadd.f32 %v11881_v34, %v3432_v35  ;;  %v11916_v3 = vld [vmem:[%s16338_s2 + $0xb0] sm:$0xff] }
0x1c17   :  { %v13767_v5 = vpack.c.bf16 %v11917_v4, %v11916_v3 }
0x1c18   :  { %v3433_v42 = vmul.f32 %v11880_v32, %v3427_v38  ;;  %v3440_v43 = vadd.f32 %v15476_v40, %v15336_v27  ;;  %v15492_v27 = vadd.f32 %v2302_v49, %v15467_v7 }
0x1c1a   :  { %v15482_v46 = vadd.f32 %v11881_v34, %v3433_v42  ;;  %12953 = vmatprep.mubr.msk.f32.mxu0 %vm798_vm3, %v3440_v43  ;;  %v11911_v42 = vld [vmem:[%s16338_s2 + $0x90] sm:$0xff] }
0x1c1c   :  { %v3441_v48 = vadd.f32 %v15482_v46, %v15343_v31 }
0x1c1e   :  { %12954 = vmatmul.mubr.msk.f32.vlgmr.msra.gmra.mrb[24].mxu0 %vm798_vm3, %v3441_v48 }
0x1c1f   :  { %13755 = vmatpush3.bf16.msra.mxu0 %v13754_v47  ;;  %12960 = vmatprep.mubr.msk.f32.mxu0 %vm14707_vm2, %v14708_v61 }
0x1c22   :  { %12961 = vmatmul.mubr.msk.f32.vlgmr.msra.gmra.mrb[26].mxu0 %vm798_vm3, %v15492_v27 }
0x1c62   :  { %v3701_v50 = vpop.f32.mrb[40].mxu1 }
0x1c63   :  { %v3702_v51 = vadd.f32 %v11897_v41, %v3701_v50  ;;  %v12969_v31 = vpop.f32.mrb[41].mxu1 }
0x1c64   :  { %v11914_v31 = vld [vmem:[%s16340_s30 + $0x9] ss:$0 sm:$0xff] }
0x1c65   :  { %12975 = vmatprep.subr.mxu1 %v3702_v51 }
0x1c66   :  { %12976 = vmatpush3.msra.mxu1 %v3702_v51 }
0x1c67   :  { %13763 = vmatprep.subr.bf16.mxu1 %v14706_v0 }
0x1cf1   :  { %v12955_v53 = vpop.f32.mrb[24].mxu0 }
0x1cf2   :  { %v3528_v54 = vpop.f32.mrb[25].mxu0  ;;  %v3534_v2 = vadd.f32 %v12955_v53, %v11886_v52 }
0x1cf3   :  { %v3529_v55 = vadd.f32 %v11886_v52, %v3528_v54 }
0x1cf5   :  { %v3617_v60 = vpop.f32.mrb[26].mxu0  ;;  %12972 = vmatprep.mubr.msk.f32.mxu0 %vm877_vm4, %v3529_v55 }
0x1cf6   :  { %v3618_v62 = vadd.f32 %v11892_v57, %v3617_v60  ;;  %v12962_v39 = vpop.f32.mrb[27].mxu0 }
0x1cf8   :  { %12970 = vmatprep.subr.msk.mxu0 %vm877_vm4, %v3618_v62 }
0x1cf9   :  { %12971 = vmatpush3.xpose.msk.msra.mxu0 %vm877_vm4, %v3618_v62 }
0x1cfa   :  { %13760 = vmatprep.subr.bf16.mxu0 %v13759_v63 }
0x1cfc   :  { %12973 = vmatmul.mubr.msk.f32.vlgmr.msra.gmra.mrb[28].mxu0 %vm877_vm4, %v3534_v2 }
0x1cfd   :  { %13762 = vmatpush3.bf16.msra.mxu0 %v13759_v63  ;;  %12984 = vmatprep.mubr.msk.f32.mxu0 %vm798_vm3, %v3440_v43  ;;  %v11912_v43 = vld [vmem:[%s16338_s2 + $0x98] sm:$0xff] }
0x1cfe   :  { %13766 = vmatprep.subr.bf16.mxu0 %v14706_v0 }
0x1d00   :  { %12985 = vmatmul.mubr.msk.f32.vlgmr.msra.gmra.mrb[30].mxu0 %vm798_vm3, %v3441_v48  ;;  %v13764_v48 = vpack.c.bf16 %v11912_v43, %v11911_v42 }
0x1d01   :  { %13768 = vmatpush3.bf16.msra.mxu0 %v13767_v5  ;;  %12998 = vmatprep.mubr.msk.f32.mxu0 %vm14707_vm2, %v14708_v61 }
0x1d04   :  { %12999 = vmatmul.mubr.msk.f32.vlgmr.msra.gmra.mrb[32].mxu0 %vm798_vm3, %v15467_v7 }
0x1dcf   :  { %v12974_v6 = vpop.f32.mrb[28].mxu0 }
0x1dd0   :  { %v3790_v9 = vmul.f32 0.35355338, %v12974_v6  ;;  %v3780_v11 = vpop.f32.mrb[29].mxu0 }
0x1dd1   :  { %v3789_v13 = vmul.f32 0.35355338, %v3780_v11 }
0x1dd2   :  { %v3792_v15 = vadd.f32 %v3790_v9, %v15516_v8 }
0x1dd3   :  { %v12986_v16 = vpop.f32.mrb[30].mxu0  ;;  %v3791_v17 = vadd.f32 %v3789_v13, %v15519_v12 }
0x1dd4   :  { %v3982_v18 = vadd.f32 %v12986_v16, %v11908_v14  ;;  %v3976_v19 = vpop.f32.mrb[31].mxu0  ;;  %v3797_v20 = vsel %vm3796_vm12, %v3792_v15, -inf }
0x1dd5   :  { %3798 = vmax.xlane.f32.xlu1 %v3797_v20  ;;  %v3793_v21 = vsel %vm877_vm4, %v3791_v17, -inf  ;;  %v3977_v41 = vadd.f32 %v11908_v14, %v3976_v19  ;;  %v11926_v20 = vld [vmem:[%s16346_s10 + $0x18] sm:$0xff] }
0x1dd6   :  { %3794 = vmax.xlane.f32.xlu0 %v3793_v21  ;;  %v11904_v21 = vld [vmem:[%s16346_s10 + $0x10] sm:$0xff] }
0x1dd7   :  { %v4143_v22 = vpop.f32.mrb[32].mxu0 }
0x1dd8   :  { %v4144_v23 = vadd.f32 %v11919_v10, %v4143_v22  ;;  %v13000_v24 = vpop.f32.mrb[33].mxu0 }
0x1dd9   :  { %v11944_v24 = vld [vmem:[%s16338_s2 + $0xc8] sm:$0xff] }
0x1dda   :  { %13006 = vmatprep.subr.mxu0 %v4144_v23 }
0x1ddb   :  { %13007 = vmatpush3.msra.mxu0 %v4144_v23  ;;  %v11943_v23 = vld [vmem:[%s16338_s2 + $0xc0] sm:$0xff] }
0x1e62   :  { %v3799_v25 = vpop.xlane.xlu1 %3798 }
0x1e63   :  { %v3801_v56 = vsub.f32 %v3792_v15, %v3799_v25  ;;  %v3795_v26 = vpop.xlane.xlu0 %3794  ;;  %v13782_v25 = vpack.c.bf16 %v11944_v24, %v11943_v23 }
0x1e64   :  { %v3800_v28 = vsub.f32 %v3791_v17, %v3795_v26 }
0x1e65   :  { %v3804_v29 = vmul.f32 1.442695, %v3801_v56  ;;  %v11931_v56 = vld [vmem:[%s16347_s19 + $0x1] ss:$0 sm:$0xff] }
0x1e66   :  { %v3802_v30 = vmul.f32 1.442695, %v3800_v28 }
0x1e67   :  { %14160 = vpow2.f32 %v3804_v29 }
0x1e68   :  { %14162 = vpow2.f32 %v3802_v30 }
0x1e71   :  { %v14161_v32 = vpop.eup %14160 }
0x1e72   :  { %v14163_v33 = vpop.eup %14162  ;;  %v3809_v34 = vsel %vm3796_vm12, %v14161_v32, 0.0 }
0x1e73   :  { %3810 = vadd.xlane.f32.xlu1 %v3809_v34  ;;  %v3806_v35 = vsel %vm877_vm4, %v14163_v33, 0.0 }
0x1e74   :  { %3807 = vadd.xlane.f32.xlu0 %v3806_v35 }
0x1f00   :  { %v3811_v36 = vpop.xlane.xlu1 %3810 }
0x1f01   :  { %14164 = vrcp.f32 %v3811_v36  ;;  %v3808_v38 = vpop.xlane.xlu0 %3807 }
0x1f02   :  { %14166 = vrcp.f32 %v3808_v38 }
0x1f0b   :  { %v14165_v44 = vpop.eup %14164 }
0x1f0c   :  { %v14167_v45 = vpop.eup %14166  ;;  %v3815_v49 = vmul.f32 %v14165_v44, %v14161_v32 }
0x1f0d   :  { %v3813_v47 = vmul.f32 %v14167_v45, %v14163_v33 }
0x1f0f   :  { %12977 = vmatprep.mubr.msk.f32.mxu1 %vm877_vm4, %v3813_v47 }
0x1f10   :  { %12978 = vmatmul.mubr.msk.f32.vlgmr.msra.gmra.mrb[42].mxu1 %vm877_vm4, %v3815_v49 }
0x1f11   :  { %13765 = vmatpush3.bf16.msra.mxu1 %v13764_v48  ;;  %12991 = vmatprep.mubr.msk.f32.mxu1 %vm14707_vm2, %v14708_v61 }
0x1f14   :  { %12992 = vmatmul.mubr.msk.f32.vlgmr.msra.gmra.mrb[44].mxu1 %vm798_vm3, %v15492_v27 }
0x1f15   :  { %13003 = vmatprep.mubr.msk.f32.mxu1 %vm877_vm4, %v3977_v41 }
0x1fe3   :  { %v12979_v50 = vpop.f32.mrb[42].mxu1 }
0x1fe4   :  { %v3888_v51 = vpop.f32.mrb[43].mxu1 }
0x1fe7   :  { %v4062_v52 = vpop.f32.mrb[44].mxu1 }
0x1fe8   :  { %v4063_v53 = vadd.f32 %v11914_v31, %v4062_v52  ;;  %v12993_v54 = vpop.f32.mrb[45].mxu1  ;;  %v4644_v52 = vld [vmem:[%s16353_s8] sm:$0xff] }
0x1fea   :  { %13001 = vmatprep.subr.msk.mxu1 %vm877_vm4, %v4063_v53 }
0x1feb   :  { %13002 = vmatpush3.xpose.msk.msra.mxu1 %vm877_vm4, %v4063_v53  ;;  %v4645_v53 = vld [vmem:[%s16353_s8 + $0x8] sm:$0xff] }
0x1fec   :  { %13011 = vmatprep.subr.mxu1 %v11926_v20  ;;  %v13773_v54 = vpack.c.bf16 %v4645_v53, %v4644_v52 }
0x1fee   :  { %13004 = vmatmul.mubr.msk.f32.vlgmr.msra.gmra.mrb[46].mxu1 %vm877_vm4, %v3982_v18 }
0x1fef   :  { %13012 = vmatpush3.msra.mxu1 %v11926_v20 }
0x1ff0   :  { %13016 = vmatprep.subr.mxu1 %v11904_v21 }
0x20c1   :  { %v13005_v55 = vpop.f32.mrb[46].mxu1 }
0x20c2   :  { %v4232_v57 = vmul.f32 0.35355338, %v13005_v55  ;;  %v4222_v58 = vpop.f32.mrb[47].mxu1 }
0x20c3   :  { %v4231_v59 = vmul.f32 0.35355338, %v4222_v58 }
0x20c4   :  { %v4234_v60 = vadd.f32 %v4232_v57, %v15516_v8 }
0x20c5   :  { %v4233_v62 = vadd.f32 %v4231_v59, %v15519_v12 }
0x20c6   :  { %v4238_v39 = vsel %vm3796_vm12, %v4234_v60, -inf }
0x20c7   :  { %4239 = vmax.xlane.f32.xlu1 %v4238_v39  ;;  %v4235_v63 = vsel %vm877_vm4, %v4233_v62, -inf }
0x20c8   :  { %4236 = vmax.xlane.f32.xlu0 %v4235_v63  ;;  %v11932_v63 = vld [vmem:[%s16348_s17 + $0x1] ss:$0 sm:$0xff] }
0x2154   :  { %v4240_v2 = vpop.xlane.xlu1 %4239 }
0x2155   :  { %v4242_v3 = vsub.f32 %v4234_v60, %v4240_v2  ;;  %v4237_v4 = vpop.xlane.xlu0 %4236 }
0x2156   :  { %v4241_v5 = vsub.f32 %v4233_v62, %v4237_v4 }
0x2157   :  { %v4245_v6 = vmul.f32 1.442695, %v4242_v3 }
0x2158   :  { %v4243_v9 = vmul.f32 1.442695, %v4241_v5  ;;  %v11933_v5 = vld [vmem:[%s16349_s15 + $0x1] ss:$0 sm:$0xff] }
0x2159   :  { %14168 = vpow2.f32 %v4245_v6 }
0x215a   :  { %14170 = vpow2.f32 %v4243_v9 }
0x2163   :  { %v14169_v11 = vpop.eup %14168 }
0x2164   :  { %v14171_v13 = vpop.eup %14170  ;;  %v4250_v8 = vsel %vm3796_vm12, %v14169_v11, 0.0 }
0x2165   :  { %4251 = vadd.xlane.f32.xlu1 %v4250_v8  ;;  %v4247_v12 = vsel %vm877_vm4, %v14171_v13, 0.0  ;;  %v4646_v8 = vld [vmem:[%s16353_s8 + $0x10] sm:$0xff] }
0x2166   :  { %4248 = vadd.xlane.f32.xlu0 %v4247_v12  ;;  %v4647_v12 = vld [vmem:[%s16353_s8 + $0x18] sm:$0xff] }
0x21f2   :  { %v4252_v14 = vpop.xlane.xlu1 %4251 }
0x21f3   :  { %14172 = vrcp.f32 %v4252_v14  ;;  %v4249_v15 = vpop.xlane.xlu0 %4248  ;;  %v13777_v14 = vpack.c.bf16 %v4647_v12, %v4646_v8  ;;  %v11951_v8 = vld [vmem:[%s16340_s30 + $0xe] ss:$0 sm:$0xff] }
0x21f4   :  { %14174 = vrcp.f32 %v4249_v15  ;;  %v11934_v15 = vld [vmem:[#allocation7] ss:$0 sm:$0xff] }
0x21fd   :  { %v14173_v16 = vpop.eup %14172 }
0x21fe   :  { %v14175_v17 = vpop.eup %14174  ;;  %v4256_v19 = vmul.f32 %v14173_v16, %v14169_v11 }
0x21ff   :  { %v4254_v18 = vmul.f32 %v14175_v17, %v14171_v13 }
0x2201   :  { %13008 = vmatprep.mubr.msk.f32.mxu0 %vm877_vm4, %v4254_v18 }
0x2202   :  { %13009 = vmatmul.mubr.msk.f32.vlgmr.msra.gmra.mrb[34].mxu0 %vm877_vm4, %v4256_v19 }
0x22d5   :  { %v13010_v10 = vpop.f32.mrb[34].mxu0 }
0x22d6   :  { %v4329_v22 = vpop.f32.mrb[35].mxu0 }
0x22d7   :  { %13013 = vmatprep.mubr.msk.f32.mxu1 %vm877_vm4, %v4329_v22 }
0x22d8   :  { %13014 = vmatmul.mubr.msk.f32.vlgmr.msra.gmra.mrb[48].mxu1 %vm877_vm4, %v13010_v10  ;;  %v11937_v10 = vld [vmem:[#allocation9] ss:$0 sm:$0xff] }
0x22d9   :  { %13018 = vmatprep.mubr.msk.f32.mxu1 %vm877_vm4, %v3888_v51  ;;  %13017 = vmatpush3.msra.mxu1 %v11904_v21  ;;  %v4553_v51 = vld [vmem:[%s16352_s18 + $0x8] sm:$0xff] }
0x22da   :  { %13781 = vmatprep.subr.bf16.mxu1 %v14706_v0 }
0x22e0   :  { %13019 = vmatmul.mubr.msk.f32.vlgmr.msra.gmra.mrb[48].mxu1 %vm877_vm4, %v12979_v50  ;;  %v4552_v50 = vld [vmem:[%s16352_s18] sm:$0xff] }
0x22e1   :  { %13783 = vmatpush3.bf16.msra.mxu1 %v13782_v25  ;;  %13043 = vmatprep.mubr.msk.f32.mxu1 %vm14707_vm2, %v14708_v61  ;;  %v13769_v31 = vpack.c.bf16 %v4553_v51, %v4552_v50 }
0x22e3   :  { %13770 = vmatprep.subr.bf16.mxu0 %v13769_v31 }
0x22e4   :  { %13044 = vmatmul.mubr.msk.f32.vlgmr.msra.gmra.mrb[50].mxu1 %vm798_vm3, %v15492_v27  ;;  %13772 = vmatpush3.bf16.msra.mxu0 %v13769_v31 }
0x22e5   :  { %13774 = vmatprep.subr.bf16.mxu0 %v13773_v54 }
0x23b3   :  { %v13020_v26 = vpop.f32.mrb[48].mxu1 }
0x23b4   :  { %v4509_v28 = vadd.f32 %v13020_v26, %v11931_v56  ;;  %v4493_v29 = vpop.f32.mrb[49].mxu1 }
0x23b5   :  { %v4508_v30 = vadd.f32 %v11931_v56, %v4493_v29 }
0x23b6   :  { %v4511_v32 = vadd.f32 %v4509_v28, %v15482_v46 }
0x23b7   :  { %v15565_v33 = vpop.f32.mrb[50].mxu1  ;;  %v4510_v34 = vadd.f32 %v4508_v30, %v15476_v40 }
0x23b8   :  { %v13045_v35 = vpop.f32.mrb[51].mxu1  ;;  %v4517_v36 = vsel %vm3404_vm11, %v4511_v32, 0.0 }
0x23b9   :  { %4518 = vadd.xlane.f32.xlu1 %v4517_v36  ;;  %v4514_v38 = vsel %vm798_vm3, %v4510_v34, 0.0 }
0x23ba   :  { %4515 = vadd.xlane.f32.xlu0 %v4514_v38 }
0x2446   :  { %v4519_v42 = vpop.xlane.xlu1 %4518 }
0x2447   :  { %v4521_v43 = vmul.f32 0.0625, %v4519_v42  ;;  %v4516_v44 = vpop.xlane.xlu0 %4515 }
0x2448   :  { %v4520_v45 = vmul.f32 0.0625, %v4516_v44 }
0x2449   :  { %v4523_v46 = vsub.f32 %v4511_v32, %v4521_v43 }
0x244a   :  { %v4522_v47 = vsub.f32 %v4510_v34, %v4520_v45 }
0x244b   :  { %v4525_v48 = vmul.f32 %v4523_v46, %v4523_v46 }
0x244c   :  { %v4524_v49 = vmul.f32 %v4522_v47, %v4522_v47 }
0x244d   :  { %v4529_v40 = vsel %vm3404_vm11, %v4525_v48, 0.0 }
0x244e   :  { %4530 = vadd.xlane.f32.xlu1 %v4529_v40  ;;  %v4526_v41 = vsel %vm798_vm3, %v4524_v49, 0.0  ;;  %v11948_v49 = vld [vmem:[%s16338_s2 + $0xe0] sm:$0xff]  ;;  %v11949_v40 = vld [vmem:[%s16338_s2 + $0xe8] sm:$0xff] }
0x244f   :  { %4527 = vadd.xlane.f32.xlu0 %v4526_v41  ;;  %v13784_v41 = vpack.c.bf16 %v11949_v40, %v11948_v49  ;;  %v11966_v49 = vld [vmem:[%s16338_s2 + $0xd0] sm:$0xff]  ;;  %v11967_v40 = vld [vmem:[%s16338_s2 + $0xd8] sm:$0xff] }
0x2451   :  { %13785 = vmatprep.subr.bf16.mxu1 %v13784_v41 }
0x2452   :  { %13787 = vmatpush3.bf16.msra.mxu1 %v13784_v41  ;;  %v11977_v41 = vld [vmem:[%s16338_s2 + $0x110] sm:$0xff] }
0x2453   :  { %13792 = vmatprep.subr.bf16.mxu1 %v14706_v0 }
0x24db   :  { %v4531_v55 = vpop.xlane.xlu1 %4530 }
0x24dc   :  { %v4533_v57 = vmul.f32 0.0625, %v4531_v55  ;;  %v4528_v58 = vpop.xlane.xlu0 %4527 }
0x24dd   :  { %v4532_v59 = vmul.f32 0.0625, %v4528_v58 }
0x24de   :  { %v4535_v60 = vadd.f32 1e-05, %v4533_v57  ;;  %v11940_v57 = vld [vmem:[%s16348_s17 + $0x2] ss:$0 sm:$0xff] }
0x24df   :  { %v4534_v62 = vadd.f32 1e-05, %v4532_v59 }
0x24e0   :  { %14176 = vrsqrt.f32 %v4535_v60  ;;  %v11941_v60 = vld [vmem:[%s16349_s15 + $0x2] ss:$0 sm:$0xff] }
0x24e1   :  { %14178 = vrsqrt.f32 %v4534_v62 }
0x24ea   :  { %v14177_v39 = vpop.eup %14176 }
0x24eb   :  { %v14179_v2 = vpop.eup %14178  ;;  %v4539_v3 = vmul.f32 %v14177_v39, %v4523_v46  ;;  %v11954_v46 = vld [vmem:[%s16338_s2 + $0x100] sm:$0xff] }
0x24ec   :  { %v4538_v4 = vmul.f32 %v14179_v2, %v4522_v47  ;;  %v11955_v47 = vld [vmem:[%s16338_s2 + $0x108] sm:$0xff] }
0x24ed   :  { %v4545_v6 = vmul.f32 %v11932_v63, %v4539_v3  ;;  %v13788_v48 = vpack.c.bf16 %v11955_v47, %v11954_v46 }
0x24ee   :  { %v4544_v9 = vmul.f32 %v11932_v63, %v4538_v4  ;;  %v15603_v4 = vld [vmem:[%s16339_s3] sm:$0xff] }
0x24ef   :  { %v4551_v13 = vadd.f32 %v11933_v5, %v4545_v6  ;;  %v15612_v6 = vld [vmem:[%s16339_s3 + $0x8] sm:$0x3] }
0x24f0   :  { %v4550_v11 = vadd.f32 %v11933_v5, %v4544_v9 }
0x24f2   :  { %13025 = vmatprep.mubr.msk.f32.mxu0 %vm798_vm3, %v4550_v11 }
0x24f3   :  { %13026 = vmatmul.mubr.msk.f32.vlgmr.msra.gmra.mrb[36].mxu0 %vm798_vm3, %v4551_v13 }
0x24f4   :  { %13776 = vmatpush3.bf16.msra.mxu0 %v13773_v54 }
0x24f5   :  { %13778 = vmatprep.subr.bf16.mxu0 %v13777_v14 }
0x24f8   :  { %13780 = vmatpush3.bf16.msra.mxu0 %v13777_v14 }
0x24f9   :  { %13789 = vmatprep.subr.bf16.mxu0 %v13788_v48 }
0x25c6   :  { %v13027_v16 = vpop.f32.mrb[36].mxu0 }
0x25c7   :  { %v4639_v17 = vadd.f32 %v13027_v16, %v11934_v15  ;;  %v4633_v18 = vpop.f32.mrb[37].mxu0 }
0x25c8   :  { %v4634_v19 = vadd.f32 %v11934_v15, %v4633_v18  ;;  %v11972_v18 = vld [vmem:[%s16338_s2 + $0xf8] sm:$0xff] }
0x25c9   :  { %v4643_v21 = vmax.f32 %v4639_v17, 0.0  ;;  %v11971_v17 = vld [vmem:[%s16338_s2 + $0xf0] sm:$0xff] }
0x25ca   :  { %v4642_v20 = vmax.f32 %v4634_v19, 0.0 }
0x25cc   :  { %13036 = vmatprep.mubr.msk.f32.mxu0 %vm522_vm1, %v4642_v20 }
0x25cd   :  { %13037 = vmatmul.mubr.msk.f32.vlgmr.msra.gmra.mrb[38].mxu0 %vm522_vm1, %v4643_v21 }
0x25ce   :  { %13791 = vmatpush3.bf16.msra.mxu0 %v13788_v48 }
0x25cf   :  { %13796 = vmatprep.subr.bf16.mxu0 %v14706_v0 }
0x26a0   :  { %v13038_v22 = vpop.f32.mrb[38].mxu0 }
0x26a1   :  { %v4733_v23 = vadd.f32 %v13038_v22, %v11937_v10  ;;  %v4727_v24 = vpop.f32.mrb[39].mxu0  ;;  %v13803_v22 = vpack.c.bf16 %v11972_v18, %v11971_v17 }
0x26a2   :  { %v4728_v25 = vadd.f32 %v11937_v10, %v4727_v24  ;;  %v11946_v24 = vld [vmem:[%s16340_s30 + $0xc] ss:$0 sm:$0xff] }
0x26a3   :  { %v4737_v56 = vadd.f32 %v4733_v23, %v4551_v13 }
0x26a4   :  { %v4736_v26 = vadd.f32 %v4728_v25, %v4550_v11  ;;  %v11957_v11 = vld [vmem:[%s16340_s30 + $0x10] ss:$0 sm:$0xff]  ;;  %v4860_v25 = vadd.f32 %v11946_v24, %v15565_v33  ;;  %v11974_v33 = vld [vmem:[%s16340_s30 + $0xf] ss:$0 sm:$0xff] }
0x26a5   :  { %v4743_v28 = vsel %vm3404_vm11, %v4737_v56, 0.0 }
0x26a6   :  { %4744 = vadd.xlane.f32.xlu1 %v4743_v28  ;;  %v4740_v29 = vsel %vm798_vm3, %v4736_v26, 0.0 }
0x26a7   :  { %4741 = vadd.xlane.f32.xlu0 %v4740_v29 }
0x2733   :  { %v4745_v30 = vpop.xlane.xlu1 %4744 }
0x2734   :  { %v4747_v32 = vmul.f32 0.0625, %v4745_v30  ;;  %v4742_v34 = vpop.xlane.xlu0 %4741 }
0x2735   :  { %v4746_v35 = vmul.f32 0.0625, %v4742_v34 }
0x2736   :  { %v4749_v36 = vsub.f32 %v4737_v56, %v4747_v32 }
0x2737   :  { %v4748_v38 = vsub.f32 %v4736_v26, %v4746_v35  ;;  %v15646_v26 = vld [vmem:[%s16354_s14] sm:$0xff] }
0x2738   :  { %v4751_v42 = vmul.f32 %v4749_v36, %v4749_v36 }
0x2739   :  { %v4750_v43 = vmul.f32 %v4748_v38, %v4748_v38 }
0x273a   :  { %v4755_v44 = vsel %vm3404_vm11, %v4751_v42, 0.0 }
0x273b   :  { %4756 = vadd.xlane.f32.xlu1 %v4755_v44  ;;  %v4752_v45 = vsel %vm798_vm3, %v4750_v43, 0.0 }
0x273c   :  { %4753 = vadd.xlane.f32.xlu0 %v4752_v45 }
0x27c8   :  { %v4757_v50 = vpop.xlane.xlu1 %4756 }
0x27c9   :  { %v4759_v51 = vmul.f32 0.0625, %v4757_v50  ;;  %v4754_v31 = vpop.xlane.xlu0 %4753  ;;  %v11978_v50 = vld [vmem:[%s16338_s2 + $0x118] sm:$0xff] }
0x27ca   :  { %v4758_v52 = vmul.f32 0.0625, %v4754_v31  ;;  %v13801_v31 = vpack.c.bf16 %v11967_v40, %v11966_v49  ;;  %v12027_v40 = vld [vmem:[%s16338_s2 + $0x150] sm:$0xff] }
0x27cb   :  { %v4761_v53 = vadd.f32 1e-05, %v4759_v51 }
0x27cc   :  { %v4760_v54 = vadd.f32 1e-05, %v4758_v52 }
0x27cd   :  { %14180 = vrsqrt.f32 %v4761_v53  ;;  %v13807_v53 = vpack.c.bf16 %v11978_v50, %v11977_v41  ;;  %v12028_v41 = vld [vmem:[%s16338_s2 + $0x158] sm:$0xff] }
0x27ce   :  { %14182 = vrsqrt.f32 %v4760_v54  ;;  %v13847_v50 = vpack.c.bf16 %v12028_v41, %v12027_v40 }
0x27d7   :  { %v14181_v55 = vpop.eup %14180 }
0x27d8   :  { %v14183_v58 = vpop.eup %14182  ;;  %v4765_v59 = vmul.f32 %v14181_v55, %v4749_v36 }
0x27d9   :  { %v4764_v62 = vmul.f32 %v14183_v58, %v4748_v38  ;;  %v12001_v58 = vld [vmem:[%s16338_s2 + $0x140] sm:$0xff] }
0x27da   :  { %v4771_v39 = vmul.f32 %v11940_v57, %v4765_v59  ;;  %v12002_v59 = vld [vmem:[%s16338_s2 + $0x148] sm:$0xff] }
0x27db   :  { %v4770_v63 = vmul.f32 %v11940_v57, %v4764_v62  ;;  %v11969_v57 = vld [vmem:[%s16340_s30 + $0xd] ss:$0 sm:$0xff] }
0x27dc   :  { %v15596_v2 = vadd.f32 %v11941_v60, %v4771_v39  ;;  %v11965_v39 = vld [vmem:[%s16346_s10 + $0x20] sm:$0xff] }
0x27dd   :  { %v15598_v3 = vadd.f32 %v11941_v60, %v4770_v63  ;;  %v13823_v63 = vpack.c.bf16 %v12002_v59, %v12001_v58  ;;  %v12010_v58 = vld [vmem:[%s16340_s30 + $0x16] ss:$0 sm:$0xff] }
0x27de   :  { %v15616_v9 = vadd.f32 %v15612_v6, %v15596_v2 }
0x27df   :  { %13057 = vmatprep.mubr.msk.f32.mxu0 %vm798_vm3, %v15598_v3  ;;  %v15607_v5 = vadd.f32 %v15603_v4, %v15598_v3 }
0x27e0   :  { %13058 = vmatmul.mubr.msk.f32.vlgmr.msra.gmra.mrb[40].mxu0 %vm798_vm3, %v15596_v2 }
0x27e1   :  { %13050 = vmatprep.mubr.msk.f32.mxu1 %vm798_vm3, %v15607_v5  ;;  %13071 = vmatprep.mubr.msk.f32.mxu0 %vm14707_vm2, %v14708_v61 }
0x27e2   :  { %13051 = vmatmul.mubr.msk.f32.vlgmr.msra.gmra.mrb[52].mxu1 %vm798_vm3, %v15616_v9 }
0x27e3   :  { %13064 = vmatprep.mubr.msk.f32.mxu1 %vm14707_vm2, %v14708_v61 }
0x28b3   :  { %v13059_v13 = vpop.f32.mrb[40].mxu0 }
0x28b4   :  { %v5044_v12 = vadd.f32 %v13059_v13, %v11957_v11  ;;  %v5038_v14 = vpop.f32.mrb[41].mxu0 }
0x28b5   :  { %v5039_v15 = vadd.f32 %v11957_v11, %v5038_v14  ;;  %v13052_v16 = vpop.f32.mrb[52].mxu1  ;;  %v11980_v11 = vld [vmem:[%s16340_s30 + $0x11] ss:$0 sm:$0xff] }
0x28b6   :  { %v4952_v19 = vadd.f32 %v13052_v16, %v11951_v8  ;;  %v4946_v20 = vpop.f32.mrb[53].mxu1 }
0x28b7   :  { %v13797_v21 = vpack.c.bf16 %v5044_v12, %v5039_v15  ;;  %v4947_v10 = vadd.f32 %v11951_v8, %v4946_v20 }
0x28b9   :  { %v13793_v23 = vpack.c.bf16 %v4952_v19, %v4947_v10  ;;  %13799 = vmatpush3.bf16.msk.msra.mxu0 %vm15395_vm10, %v13797_v21 }
0x28ba   :  { %13800 = vmatprep.subr.bf16.mxu0 %v14706_v0 }
0x28bb   :  { %13795 = vmatpush3.bf16.xpose.msk.msra.mxu1 %vm15363_vm5, %v13793_v23 }
0x28bc   :  { %13804 = vmatprep.subr.bf16.mxu1 %v13803_v22 }
0x28c2   :  { %13065 = vmatmul.mubr.msk.f32.vlgmr.msra.gmra.mrb[54].mxu1 %vm877_vm4, %v4860_v25 }
0x28c3   :  { %13806 = vmatpush3.bf16.msra.mxu1 %v13803_v22  ;;  %13085 = vmatprep.mubr.msk.f32.mxu1 %vm798_vm3, %v15607_v5  ;;  %v12004_v22 = vld [vmem:[%s16340_s30 + $0x14] ss:$0 sm:$0xff] }
0x28c4   :  { %13811 = vmatprep.subr.bf16.mxu1 %v14706_v0 }
0x28c6   :  { %13086 = vmatmul.mubr.msk.f32.vlgmr.msra.gmra.mrb[56].mxu1 %vm798_vm3, %v15616_v9 }
0x28c7   :  { %13099 = vmatprep.mubr.msk.f32.mxu1 %vm14707_vm2, %v14708_v61 }
0x2995   :  { %v5122_v56 = vpop.f32.mrb[54].mxu1 }
0x2996   :  { %v5126_v28 = vmul.f32 0.35355338, %v5122_v56  ;;  %v13066_v29 = vpop.f32.mrb[55].mxu1 }
0x2998   :  { %v5127_v30 = vadd.f32 %v5126_v28, %v15646_v26 }
0x2999   :  { %v13087_v32 = vpop.f32.mrb[56].mxu1 }
0x299a   :  { %v5381_v34 = vadd.f32 %v13087_v32, %v11974_v33  ;;  %v5375_v35 = vpop.f32.mrb[57].mxu1  ;;  %v5128_v36 = vsel %vm2662_vm7, %v5127_v30, -inf }
0x299b   :  { %v5376_v38 = vadd.f32 %v11974_v33, %v5375_v35  ;;  %5129 = vmax.xlane.f32.xlu0 %v5128_v36 }
0x299d   :  { %v13812_v42 = vpack.c.bf16 %v5381_v34, %v5376_v38  ;;  %v11995_v38 = vld [vmem:[%s16338_s2 + $0x120] sm:$0xff] }
0x299f   :  { %13814 = vmatpush3.bf16.xpose.msk.msra.mxu1 %vm15363_vm5, %v13812_v42  ;;  %v11996_v42 = vld [vmem:[%s16338_s2 + $0x128] sm:$0xff] }
0x29a0   :  { %13114 = vmatprep.subr.mxu1 %v14708_v61 }
0x2a28   :  { %v5130_v43 = vpop.xlane.xlu0 %5129 }
0x2a29   :  { %v5131_v44 = vsub.f32 %v5127_v30, %v5130_v43  ;;  %v11988_v43 = vld [vmem:[%s16346_s10 + $0x28] sm:$0xff] }
0x2a2b   :  { %v5132_v45 = vmul.f32 1.442695, %v5131_v44  ;;  %v13819_v44 = vpack.c.bf16 %v11996_v42, %v11995_v38  ;;  %v12022_v38 = vld [vmem:[%s16338_s2 + $0x138] sm:$0xff] }
0x2a2d   :  { %14184 = vpow2.f32 %v5132_v45  ;;  %v12007_v45 = vld [vmem:[%s16338_s2 + $0x160] sm:$0xff] }
0x2a37   :  { %v14185_v46 = vpop.eup %14184 }
0x2a38   :  { %v5134_v47 = vsel %vm2662_vm7, %v14185_v46, 0.0 }
0x2a39   :  { %5135 = vadd.xlane.f32.xlu1 %v5134_v47 }
0x2ac6   :  { %v5136_v48 = vpop.xlane.xlu1 %5135 }
0x2ac7   :  { %14186 = vrcp.f32 %v5136_v48 }
0x2ad1   :  { %v14187_v51 = vpop.eup %14186 }
0x2ad2   :  { %v5138_v52 = vmul.f32 %v14187_v51, %v14185_v46  ;;  %v12008_v46 = vld [vmem:[%s16338_s2 + $0x168] sm:$0xff] }
0x2ad3   :  { %v13827_v47 = vpack.c.bf16 %v12008_v46, %v12007_v45  ;;  %v12033_v46 = vld [vmem:[%s16338_s2 + $0x170] sm:$0xff] }
0x2ad4   :  { %13072 = vmatmul.mubr.msk.f32.vlgmr.msra.gmra.mrb[42].mxu0 %vm2662_vm7, %v5138_v52 }
0x2ad5   :  { %13802 = vmatpush3.bf16.msra.mxu0 %v13801_v31  ;;  %13078 = vmatprep.mubr.msk.f32.mxu0 %vm14707_vm2, %v14708_v61 }
0x2ad6   :  { %13808 = vmatprep.subr.bf16.mxu0 %v13807_v53 }
0x2ad8   :  { %13079 = vmatmul.mubr.msk.f32.vlgmr.msra.gmra.mrb[44].mxu0 %vm798_vm3, %v15492_v27 }
0x2ad9   :  { %13810 = vmatpush3.bf16.msra.mxu0 %v13807_v53  ;;  %13092 = vmatprep.mubr.msk.f32.mxu0 %vm798_vm3, %v15598_v3  ;;  %v11998_v53 = vld [vmem:[%s16340_s30 + $0x12] ss:$0 sm:$0xff] }
0x2ada   :  { %13815 = vmatprep.subr.bf16.mxu0 %v14706_v0 }
0x2adc   :  { %13093 = vmatmul.mubr.msk.f32.vlgmr.msra.gmra.mrb[46].mxu0 %vm798_vm3, %v15596_v2 }
0x2add   :  { %13106 = vmatprep.mubr.msk.f32.mxu0 %vm14707_vm2, %v14708_v61 }
0x2ba7   :  { %v5211_v54 = vpop.f32.mrb[42].mxu0 }
0x2ba8   :  { %v13073_v55 = vpop.f32.mrb[43].mxu0 }
0x2bab   :  { %v5294_v60 = vpop.f32.mrb[44].mxu0 }
0x2bac   :  { %v5295_v27 = vadd.f32 %v11969_v57, %v5294_v60  ;;  %v13080_v62 = vpop.f32.mrb[45].mxu0 }
0x2bae   :  { %13100 = vmatmul.mubr.msk.f32.vlgmr.msra.gmra.mrb[58].mxu1 %vm877_vm4, %v5295_v27 }
0x2baf   :  { %v13094_v13 = vpop.f32.mrb[46].mxu0  ;;  %13115 = vmatpush3.msra.mxu1 %v11965_v39  ;;  %13116 = vmatprep.mubr.msk.f32.mxu1 %vm14707_vm2, %v14708_v61 }
0x2bb0   :  { %v5467_v8 = vadd.f32 %v13094_v13, %v11980_v11  ;;  %v5461_v12 = vpop.f32.mrb[47].mxu0  ;;  %13824 = vmatprep.subr.bf16.mxu1 %v13823_v63 }
0x2bb1   :  { %v5462_v14 = vadd.f32 %v11980_v11, %v5461_v12 }
0x2bb2   :  { %13117 = vmatmul.mubr.msk.f32.vlgmr.msra.gmra.mrb[60].mxu1 %vm877_vm4, %v5211_v54 }
0x2bb3   :  { %v13816_v15 = vpack.c.bf16 %v5467_v8, %v5462_v14  ;;  %13826 = vmatpush3.bf16.msra.mxu1 %v13823_v63  ;;  %13130 = vmatprep.mubr.msk.f32.mxu1 %vm798_vm3, %v15607_v5  ;;  %v12030_v14 = vld [vmem:[%s16340_s30 + $0x15] ss:$0 sm:$0xff] }
0x2bb5   :  { %13818 = vmatpush3.bf16.msk.msra.mxu0 %vm15395_vm10, %v13816_v15  ;;  %v15730_v15 = vld [vmem:[%s16341_s7 + $0x8] sm:$0x3] }
0x2bb6   :  { %13131 = vmatmul.mubr.msk.f32.vlgmr.msra.gmra.mrb[62].mxu1 %vm798_vm3, %v15616_v9  ;;  %13109 = vmatprep.subr.mxu0 %v14708_v61 }
0x2c81   :  { %v5545_v16 = vpop.f32.mrb[58].mxu1 }
0x2c82   :  { %v5549_v17 = vmul.f32 0.35355338, %v5545_v16  ;;  %v13101_v18 = vpop.f32.mrb[59].mxu1 }
0x2c83   :  { %v15734_v18 = vld [vmem:[%s16341_s7] sm:$0xff] }
0x2c84   :  { %v5550_v19 = vadd.f32 %v5549_v17, %v15646_v26 }
0x2c85   :  { %v5782_v20 = vpop.f32.mrb[60].mxu1 }
0x2c86   :  { %v13118_v21 = vpop.f32.mrb[61].mxu1  ;;  %v5551_v10 = vsel %vm2662_vm7, %v5550_v19, -inf }
0x2c87   :  { %5552 = vmax.xlane.f32.xlu0 %v5551_v10 }
0x2c89   :  { %v13132_v23 = vpop.f32.mrb[62].mxu1 }
0x2c8a   :  { %v5990_v24 = vadd.f32 %v13132_v23, %v12004_v22  ;;  %v5984_v25 = vpop.f32.mrb[63].mxu1 }
0x2c8b   :  { %v5985_v56 = vadd.f32 %v12004_v22, %v5984_v25 }
0x2c8d   :  { %v13831_v28 = vpack.c.bf16 %v5990_v24, %v5985_v56 }
0x2c8f   :  { %13833 = vmatprep.subr.msk.bf16.mxu1 %vm15363_vm5, %v13831_v28 }
0x2c90   :  { %13836 = vmatpush3.bf16.xpose.msk.msra.mxu1 %vm15363_vm5, %v13831_v28 }
0x2c91   :  { %13848 = vmatprep.subr.bf16.mxu1 %v13847_v50 }
0x2d14   :  { %v5553_v26 = vpop.xlane.xlu0 %5552 }
0x2d15   :  { %v5554_v29 = vsub.f32 %v5550_v19, %v5553_v26 }
0x2d17   :  { %v5555_v33 = vmul.f32 1.442695, %v5554_v29 }
0x2d19   :  { %14188 = vpow2.f32 %v5555_v33 }
0x2d23   :  { %v14189_v30 = vpop.eup %14188 }
0x2d24   :  { %v5557_v32 = vsel %vm2662_vm7, %v14189_v30, 0.0 }
0x2d25   :  { %5558 = vadd.xlane.f32.xlu1 %v5557_v32 }
0x2db2   :  { %v5559_v34 = vpop.xlane.xlu1 %5558 }
0x2db3   :  { %14190 = vrcp.f32 %v5559_v34 }
0x2dbd   :  { %v14191_v35 = vpop.eup %14190 }
0x2dbe   :  { %v5561_v36 = vmul.f32 %v14191_v35, %v14189_v30 }
0x2dc0   :  { %13107 = vmatmul.mubr.msk.f32.vlgmr.msra.gmra.mrb[48].mxu0 %vm2662_vm7, %v5561_v36  ;;  %v12021_v36 = vld [vmem:[%s16338_s2 + $0x130] sm:$0xff] }
0x2dc1   :  { %13111 = vmatprep.mubr.msk.f32.mxu0 %vm14707_vm2, %v14708_v61  ;;  %13110 = vmatpush3.msra.mxu0 %v11988_v43  ;;  %v13843_v42 = vpack.c.bf16 %v12022_v38, %v12021_v36  ;;  %v11991_v36 = vld [vmem:[%s16347_s19 + $0x2] ss:$0 sm:$0xff] }
0x2dc2   :  { %13820 = vmatprep.subr.bf16.mxu0 %v13819_v44 }
0x2e93   :  { %v5634_v48 = vpop.f32.mrb[48].mxu0 }
0x2e94   :  { %v13108_v49 = vpop.f32.mrb[49].mxu0  ;;  %13112 = vmatmul.mubr.msk.f32.vlgmr.msra.gmra.mrb[50].mxu0 %vm877_vm4, %v5634_v48 }
0x2e95   :  { %13822 = vmatpush3.bf16.msra.mxu0 %v13819_v44  ;;  %13123 = vmatprep.mubr.msk.f32.mxu0 %vm798_vm3, %v15607_v5 }
0x2e96   :  { %13828 = vmatprep.subr.bf16.mxu0 %v13827_v47 }
0x2e98   :  { %13124 = vmatmul.mubr.msk.f32.vlgmr.msra.gmra.mrb[52].mxu0 %vm798_vm3, %v15616_v9 }
0x2e99   :  { %13830 = vmatpush3.bf16.msra.mxu0 %v13827_v47  ;;  %13137 = vmatprep.mubr.msk.f32.mxu0 %vm798_vm3, %v15598_v3  ;;  %v12034_v47 = vld [vmem:[%s16338_s2 + $0x178] sm:$0xff] }
0x2e9a   :  { %v13851_v41 = vpack.c.bf16 %v12034_v47, %v12033_v46 }
0x2e9c   :  { %13138 = vmatmul.mubr.msk.f32.vlgmr.msra.gmra.mrb[54].mxu0 %vm798_vm3, %v15596_v2 }
0x2f67   :  { %v5709_v51 = vpop.f32.mrb[50].mxu0 }
0x2f68   :  { %v15714_v31 = vadd.f32 %v5782_v20, %v5709_v51  ;;  %v13113_v52 = vpop.f32.mrb[51].mxu0 }
0x2f69   :  { %v12024_v52 = vld [vmem:[%s16340_s30 + $0x13] ss:$0 sm:$0xff] }
0x2f6b   :  { %v13125_v54 = vpop.f32.mrb[52].mxu0 }
0x2f6c   :  { %v5898_v55 = vpop.f32.mrb[53].mxu0  ;;  %v5904_v59 = vadd.f32 %v13125_v54, %v11998_v53 }
0x2f6d   :  { %v5899_v57 = vadd.f32 %v11998_v53, %v5898_v55 }
0x2f6f   :  { %v13139_v60 = vpop.f32.mrb[54].mxu0  ;;  %13144 = vmatprep.mubr.msk.f32.mxu1 %vm877_vm4, %v5899_v57  ;;  %v12036_v57 = vld [vmem:[%s16340_s30 + $0x17] ss:$0 sm:$0xff] }
0x2f70   :  { %v6076_v27 = vadd.f32 %v13139_v60, %v12010_v58  ;;  %v6070_v62 = vpop.f32.mrb[55].mxu0  ;;  %13145 = vmatmul.mubr.msk.f32.vlgmr.msra.gmra.mrb[64].mxu1 %vm877_vm4, %v5904_v59 }
0x2f71   :  { %v6071_v39 = vadd.f32 %v12010_v58, %v6070_v62  ;;  %13850 = vmatpush3.bf16.msra.mxu1 %v13847_v50  ;;  %13165 = vmatprep.mubr.msk.f32.mxu1 %vm798_vm3, %v15607_v5 }
0x2f73   :  { %v13837_v63 = vpack.c.bf16 %v6076_v27, %v6071_v39 }
0x2f74   :  { %13166 = vmatmul.mubr.msk.f32.vlgmr.msra.gmra.mrb[66].mxu1 %vm798_vm3, %v15616_v9 }
0x2f75   :  { %13839 = vmatprep.subr.msk.bf16.mxu0 %vm15395_vm10, %v13837_v63 }
0x2f76   :  { %13842 = vmatpush3.bf16.msk.msra.mxu0 %vm15395_vm10, %v13837_v63 }
0x2f77   :  { %13844 = vmatprep.subr.bf16.mxu0 %v13843_v42 }
0x3043   :  { %v13146_v11 = vpop.f32.mrb[64].mxu1 }
0x3044   :  { %v6167_v13 = vmul.f32 0.35355338, %v13146_v11  ;;  %v6157_v8 = vpop.f32.mrb[65].mxu1 }
0x3045   :  { %v6166_v12 = vmul.f32 0.35355338, %v6157_v8 }
0x3046   :  { %v6169_v16 = vadd.f32 %v15730_v15, %v6167_v13 }
0x3047   :  { %v13167_v17 = vpop.f32.mrb[66].mxu1  ;;  %v6168_v19 = vadd.f32 %v15734_v18, %v6166_v12 }
0x3048   :  { %v6447_v20 = vadd.f32 %v13167_v17, %v12030_v14  ;;  %v6441_v21 = vpop.f32.mrb[67].mxu1  ;;  %v6173_v10 = vsel %vm2666_vm6, %v6169_v16, -inf }
0x3049   :  { %v6442_v22 = vadd.f32 %v12030_v14, %v6441_v21  ;;  %6174 = vmax.xlane.f32.xlu1 %v6173_v10  ;;  %v6170_v23 = vsel %vm2662_vm7, %v6168_v19, -inf }
0x304a   :  { %6171 = vmax.xlane.f32.xlu0 %v6170_v23 }
0x304b   :  { %v13855_v24 = vpack.c.bf16 %v6447_v20, %v6442_v22 }
0x304d   :  { %13857 = vmatprep.subr.msk.bf16.mxu1 %vm15363_vm5, %v13855_v24 }
0x304e   :  { %13860 = vmatpush3.bf16.xpose.msk.msra.mxu1 %vm15363_vm5, %v13855_v24 }
0x30d6   :  { %v6175_v25 = vpop.xlane.xlu1 %6174 }
0x30d7   :  { %v6177_v56 = vsub.f32 %v6169_v16, %v6175_v25  ;;  %v6172_v28 = vpop.xlane.xlu0 %6171 }
0x30d8   :  { %v6176_v26 = vsub.f32 %v6168_v19, %v6172_v28 }
0x30d9   :  { %v6180_v29 = vmul.f32 1.442695, %v6177_v56 }
0x30da   :  { %v6178_v33 = vmul.f32 1.442695, %v6176_v26 }
0x30db   :  { %14192 = vpow2.f32 %v6180_v29 }
0x30dc   :  { %14194 = vpow2.f32 %v6178_v33  ;;  %v12046_v33 = vld [vmem:[%s16346_s10 + $0x38] sm:$0xff] }
0x30e5   :  { %v14193_v30 = vpop.eup %14192 }
0x30e6   :  { %v14195_v32 = vpop.eup %14194  ;;  %v6185_v34 = vsel %vm2666_vm6, %v14193_v30, 0.0 }
0x30e7   :  { %6186 = vadd.xlane.f32.xlu1 %v6185_v34  ;;  %v6182_v35 = vsel %vm2662_vm7, %v14195_v32, 0.0 }
0x30e8   :  { %6183 = vadd.xlane.f32.xlu0 %v6182_v35  ;;  %v12051_v35 = vld [vmem:[%s16347_s19 + $0x3] ss:$0 sm:$0xff] }
0x3174   :  { %v6187_v43 = vpop.xlane.xlu1 %6186 }
0x3175   :  { %14196 = vrcp.f32 %v6187_v43  ;;  %v6184_v44 = vpop.xlane.xlu0 %6183 }
0x3176   :  { %14198 = vrcp.f32 %v6184_v44  ;;  %v5792_v44 = vadd.f32 %v11991_v36, %v15714_v31 }
0x317f   :  { %v14197_v45 = vpop.eup %14196 }
0x3180   :  { %v14199_v48 = vpop.eup %14198  ;;  %v6191_v40 = vmul.f32 %v14197_v45, %v14193_v30  ;;  %v12020_v30 = vld [vmem:[%s16346_s10 + $0x30] sm:$0xff] }
0x3181   :  { %v6189_v49 = vmul.f32 %v14199_v48, %v14195_v32 }
0x3183   :  { %13151 = vmatprep.mubr.msk.f32.mxu0 %vm2662_vm7, %v6189_v49 }
0x3184   :  { %13152 = vmatmul.mubr.msk.f32.vlgmr.msra.gmra.mrb[56].mxu0 %vm2662_vm7, %v6191_v40  ;;  %v5793_v40 = vadd.f32 %v5792_v44, %v15467_v7 }
0x3185   :  { %13846 = vmatpush3.bf16.msra.mxu0 %v13843_v42  ;;  %13158 = vmatprep.mubr.msk.f32.mxu0 %vm798_vm3, %v15607_v5 }
0x3186   :  { %13852 = vmatprep.subr.bf16.mxu0 %v13851_v41 }
0x3188   :  { %13159 = vmatmul.mubr.msk.f32.vlgmr.msra.gmra.mrb[58].mxu0 %vm798_vm3, %v15616_v9 }
0x3189   :  { %13854 = vmatpush3.bf16.msra.mxu0 %v13851_v41  ;;  %13172 = vmatprep.mubr.msk.f32.mxu0 %vm798_vm3, %v15598_v3  ;;  %v5796_v41 = vsel %vm798_vm3, %v5793_v40, 0.0 }
0x318c   :  { %13173 = vmatmul.mubr.msk.f32.vlgmr.msra.gmra.mrb[60].mxu0 %vm798_vm3, %v15596_v2 }
0x3257   :  { %v15759_v50 = vpop.f32.mrb[56].mxu0 }
0x3258   :  { %v6267_v51 = vpop.f32.mrb[57].mxu0 }
0x325b   :  { %v13160_v53 = vpop.f32.mrb[58].mxu0 }
0x325c   :  { %v6355_v54 = vpop.f32.mrb[59].mxu0  ;;  %v6361_v5 = vadd.f32 %v13160_v53, %v12024_v52 }
0x325d   :  { %v6356_v55 = vadd.f32 %v12024_v52, %v6355_v54 }
0x325f   :  { %v13174_v58 = vpop.f32.mrb[60].mxu0  ;;  %13179 = vmatprep.mubr.msk.f32.mxu1 %vm877_vm4, %v6356_v55 }
0x3260   :  { %v6533_v9 = vadd.f32 %v13174_v58, %v12036_v57  ;;  %v6527_v59 = vpop.f32.mrb[61].mxu0  ;;  %13180 = vmatmul.mubr.msk.f32.vlgmr.msra.gmra.mrb[68].mxu1 %vm877_vm4, %v6361_v5 }
0x3261   :  { %v6528_v60 = vadd.f32 %v12036_v57, %v6527_v59 }
0x3263   :  { %v13861_v27 = vpack.c.bf16 %v6533_v9, %v6528_v60  ;;  %v12055_v60 = vld [vmem:[%s16338_s2 + $0x180] sm:$0xff] }
0x3265   :  { %13863 = vmatprep.subr.msk.bf16.mxu0 %vm15395_vm10, %v13861_v27 }
0x3266   :  { %13866 = vmatpush3.bf16.msk.msra.mxu0 %vm15395_vm10, %v13861_v27  ;;  %v12056_v27 = vld [vmem:[%s16338_s2 + $0x188] sm:$0xff] }
0x3267   :  { %13189 = vmatprep.subr.mxu0 %v12046_v33 }
0x3333   :  { %v13181_v62 = vpop.f32.mrb[68].mxu1 }
0x3334   :  { %v6624_v39 = vmul.f32 0.35355338, %v13181_v62  ;;  %v6614_v63 = vpop.f32.mrb[69].mxu1  ;;  %v13867_v62 = vpack.c.bf16 %v12056_v27, %v12055_v60  ;;  %v12080_v27 = vld [vmem:[%s16340_s30 + $0x19] ss:$0 sm:$0xff] }
0x3335   :  { %v6623_v11 = vmul.f32 0.35355338, %v6614_v63  ;;  %v12067_v63 = vld [vmem:[%s16338_s2 + $0x1c8] sm:$0xff] }
0x3336   :  { %v6626_v13 = vadd.f32 %v15730_v15, %v6624_v39  ;;  %v12066_v39 = vld [vmem:[%s16338_s2 + $0x1c0] sm:$0xff]  ;;  %13868 = vmatprep.subr.bf16.mxu1 %v13867_v62 }
0x3337   :  { %v6625_v8 = vadd.f32 %v15734_v18, %v6623_v11  ;;  %v13875_v11 = vpack.c.bf16 %v12067_v63, %v12066_v39  ;;  %13870 = vmatpush3.bf16.msra.mxu1 %v13867_v62  ;;  %v15856_v62 = vld [vmem:[%s16351_s21 + $0x8] sm:$0x3] }
0x3338   :  { %v6630_v12 = vsel %vm2666_vm6, %v6626_v13, -inf  ;;  %13871 = vmatprep.subr.bf16.mxu1 %v14706_v0 }
0x3339   :  { %6631 = vmax.xlane.f32.xlu1 %v6630_v12  ;;  %v6627_v14 = vsel %vm2662_vm7, %v6625_v8, -inf }
0x333a   :  { %6628 = vmax.xlane.f32.xlu0 %v6627_v14 }
0x33c6   :  { %v6632_v16 = vpop.xlane.xlu1 %6631 }
0x33c7   :  { %v6634_v17 = vsub.f32 %v6626_v13, %v6632_v16  ;;  %v6629_v19 = vpop.xlane.xlu0 %6628 }
0x33c8   :  { %v6633_v20 = vsub.f32 %v6625_v8, %v6629_v19 }
0x33c9   :  { %v6637_v21 = vmul.f32 1.442695, %v6634_v17 }
0x33ca   :  { %v6635_v10 = vmul.f32 1.442695, %v6633_v20 }
0x33cb   :  { %14200 = vpow2.f32 %v6637_v21 }
0x33cc   :  { %14202 = vpow2.f32 %v6635_v10 }
0x33d5   :  { %v14201_v22 = vpop.eup %14200 }
0x33d6   :  { %v14203_v23 = vpop.eup %14202  ;;  %v6642_v15 = vsel %vm2666_vm6, %v14201_v22, 0.0 }
0x33d7   :  { %6643 = vadd.xlane.f32.xlu1 %v6642_v15  ;;  %v6639_v18 = vsel %vm2662_vm7, %v14203_v23, 0.0 }
0x33d8   :  { %6640 = vadd.xlane.f32.xlu0 %v6639_v18 }
0x3464   :  { %v6644_v24 = vpop.xlane.xlu1 %6643 }
0x3465   :  { %14204 = vrcp.f32 %v6644_v24  ;;  %v6641_v25 = vpop.xlane.xlu0 %6640  ;;  %v12053_v24 = vld [vmem:[%s16349_s15 + $0x4] ss:$0 sm:$0xff] }
0x3466   :  { %14206 = vrcp.f32 %v6641_v25 }
0x346f   :  { %v14205_v56 = vpop.eup %14204 }
0x3470   :  { %v14207_v28 = vpop.eup %14206  ;;  %v6648_v29 = vmul.f32 %v14205_v56, %v14201_v22  ;;  %v12052_v22 = vld [vmem:[%s16348_s17 + $0x4] ss:$0 sm:$0xff] }
0x3471   :  { %v6646_v26 = vmul.f32 %v14207_v28, %v14203_v23 }
0x3473   :  { %13186 = vmatprep.mubr.msk.f32.mxu0 %vm2662_vm7, %v6646_v26 }
0x3474   :  { %13187 = vmatmul.mubr.msk.f32.vlgmr.msra.gmra.mrb[62].mxu0 %vm2662_vm7, %v6648_v29  ;;  %v12061_v29 = vld [vmem:[%s16338_s2 + $0x1a0] sm:$0xff] }
0x3475   :  { %13190 = vmatpush3.msra.mxu0 %v12046_v33  ;;  %v12062_v33 = vld [vmem:[%s16338_s2 + $0x1a8] sm:$0xff] }
0x3476   :  { %13194 = vmatprep.subr.mxu0 %v12020_v30 }
0x3547   :  { %v13188_v32 = vpop.f32.mrb[62].mxu0 }
0x3548   :  { %v6724_v34 = vpop.f32.mrb[63].mxu0 }
0x3549   :  { %13191 = vmatprep.mubr.msk.f32.mxu0 %vm877_vm4, %v6724_v34 }
0x354a   :  { %13192 = vmatmul.mubr.msk.f32.vlgmr.msra.gmra.mrb[64].mxu0 %vm877_vm4, %v13188_v32 }
0x354b   :  { %13196 = vmatprep.mubr.msk.f32.mxu0 %vm877_vm4, %v6267_v51  ;;  %13195 = vmatpush3.msra.mxu0 %v12020_v30  ;;  %v11992_v30 = vld [vmem:[%s16348_s17 + $0x3] ss:$0 sm:$0xff] }
0x354c   :  { %13874 = vmatprep.subr.bf16.mxu0 %v14706_v0 }
0x3552   :  { %13197 = vmatmul.mubr.msk.f32.vlgmr.msra.gmra.mrb[64].mxu0 %vm877_vm4, %v15759_v50 }
0x3553   :  { %13217 = vmatprep.mubr.msk.f32.mxu0 %vm14707_vm2, %v14708_v61  ;;  %13876 = vmatpush3.bf16.msra.mxu0 %v13875_v11  ;;  %v15860_v11 = vld [vmem:[%s16351_s21] sm:$0xff] }
0x3625   :  { %v13198_v38 = vpop.f32.mrb[64].mxu0 }
0x3626   :  { %v6904_v42 = vadd.f32 %v13198_v38, %v12051_v35  ;;  %v6888_v43 = vpop.f32.mrb[65].mxu0  ;;  %v13872_v38 = vpack.c.bf16 %v12062_v33, %v12061_v29 }
0x3627   :  { %v6903_v45 = vadd.f32 %v12051_v35, %v6888_v43  ;;  %v11993_v35 = vld [vmem:[%s16349_s15 + $0x3] ss:$0 sm:$0xff] }
0x3628   :  { %v6906_v46 = vadd.f32 %v6904_v42, %v15596_v2 }
0x3629   :  { %v6905_v47 = vadd.f32 %v6903_v45, %v15598_v3  ;;  %v15825_v45 = vld [vmem:[%s16350_s16] sm:$0xff] }
0x362a   :  { %v6912_v48 = vsel %vm3404_vm11, %v6906_v46, 0.0 }
0x362b   :  { %6913 = vadd.xlane.f32.xlu1 %v6912_v48  ;;  %v6909_v49 = vsel %vm798_vm3, %v6905_v47, 0.0 }
0x362c   :  { %6910 = vadd.xlane.f32.xlu0 %v6909_v49 }
0x3630   :  { %5797 = vadd.xlane.f32.xlu0 %v5796_v41 }
0x36b8   :  { %v6914_v50 = vpop.xlane.xlu1 %6913 }
0x36b9   :  { %v6916_v51 = vmul.f32 0.0625, %v6914_v50  ;;  %v6911_v52 = vpop.xlane.xlu0 %6910 }
0x36ba   :  { %v6915_v31 = vmul.f32 0.0625, %v6911_v52  ;;  %v12077_v52 = vld [vmem:[%s16338_s2 + $0x190] sm:$0xff] }
0x36bb   :  { %v6918_v2 = vsub.f32 %v6906_v46, %v6916_v51  ;;  %v12069_v46 = vld [vmem:[%s16340_s30 + $0x1c] ss:$0 sm:$0xff]  ;;  %v12064_v51 = vld [vmem:[%s16340_s30 + $0x1a] ss:$0 sm:$0xff] }
0x36bc   :  { %v6917_v53 = vsub.f32 %v6905_v47, %v6915_v31  ;;  %v12078_v31 = vld [vmem:[%s16338_s2 + $0x198] sm:$0xff] }
0x36bd   :  { %v5798_v3 = vpop.xlane.xlu0 %5797  ;;  %v6920_v54 = vmul.f32 %v6918_v2, %v6918_v2 }
0x36be   :  { %v5799_v55 = vmul.f32 0.0625, %v5798_v3  ;;  %v6919_v57 = vmul.f32 %v6917_v53, %v6917_v53 }
0x36bf   :  { %v6924_v7 = vsel %vm3404_vm11, %v6920_v54, 0.0  ;;  %v13877_v54 = vpack.c.bf16 %v12078_v31, %v12077_v52 }
0x36c0   :  { %v5800_v5 = vsub.f32 %v5793_v40, %v5799_v55  ;;  %6925 = vadd.xlane.f32.xlu0 %v6924_v7  ;;  %v6921_v58 = vsel %vm798_vm3, %v6919_v57, 0.0  ;;  %v12088_v57 = vld [vmem:[%s16338_s2 + $0x1d0] sm:$0xff]  ;;  %v12089_v7 = vld [vmem:[%s16338_s2 + $0x1d8] sm:$0xff] }
0x36c1   :  { %6922 = vadd.xlane.f32.xlu1 %v6921_v58 }
0x36c2   :  { %v5801_v9 = vmul.f32 %v5800_v5, %v5800_v5 }
0x36c4   :  { %v5802_v59 = vsel %vm798_vm3, %v5801_v9, 0.0 }
0x36c5   :  { %5803 = vadd.xlane.f32.xlu1 %v5802_v59 }
0x374d   :  { %v6926_v13 = vpop.xlane.xlu0 %6925 }
0x374e   :  { %v6928_v8 = vmul.f32 0.0625, %v6926_v13  ;;  %v6923_v12 = vpop.xlane.xlu1 %6922 }
0x374f   :  { %v6927_v14 = vmul.f32 0.0625, %v6923_v12 }
0x3750   :  { %v6930_v16 = vadd.f32 1e-05, %v6928_v8 }
0x3751   :  { %v6929_v17 = vadd.f32 1e-05, %v6927_v14 }
0x3752   :  { %14208 = vrsqrt.f32 %v6930_v16  ;;  %v5804_v19 = vpop.xlane.xlu1 %5803 }
0x3753   :  { %14210 = vrsqrt.f32 %v6929_v17  ;;  %v5805_v20 = vmul.f32 0.0625, %v5804_v19  ;;  %v12091_v17 = vld [vmem:[%s16340_s30 + $0x1d] ss:$0 sm:$0xff] }
0x3755   :  { %v5806_v21 = vadd.f32 1e-05, %v5805_v20 }
0x3757   :  { %14212 = vrsqrt.f32 %v5806_v21 }
0x375c   :  { %v14209_v10 = vpop.eup %14208 }
0x375d   :  { %v14211_v23 = vpop.eup %14210  ;;  %v6934_v15 = vmul.f32 %v14209_v10, %v6918_v2 }
0x375e   :  { %v6933_v18 = vmul.f32 %v14211_v23, %v6917_v53 }
0x375f   :  { %v6940_v25 = vmul.f32 %v12052_v22, %v6934_v15 }
0x3760   :  { %v6939_v56 = vmul.f32 %v12052_v22, %v6933_v18 }
0x3761   :  { %v14213_v28 = vpop.eup %14212  ;;  %v15806_v26 = vadd.f32 %v12053_v24, %v6940_v25 }
0x3762   :  { %v5808_v32 = vmul.f32 %v14213_v28, %v5800_v5  ;;  %v15811_v34 = vadd.f32 %v12053_v24, %v6939_v56  ;;  %v13885_v5 = vpack.c.bf16 %v12089_v7, %v12088_v57 }
0x3763   :  { %v6948_v43 = vadd.f32 %v15612_v6, %v15806_v26  ;;  %v12058_v6 = vld [vmem:[%s16340_s30 + $0x18] ss:$0 sm:$0xff] }
0x3764   :  { %v6947_v36 = vadd.f32 %v15603_v4, %v15811_v34  ;;  %v5813_v42 = vmul.f32 %v11992_v30, %v5808_v32  ;;  %v12083_v32 = vld [vmem:[%s16338_s2 + $0x1b0] sm:$0xff] }
0x3766   :  { %13203 = vmatprep.mubr.msk.f32.mxu1 %vm798_vm3, %v6947_v36  ;;  %v15819_v44 = vadd.f32 %v11993_v35, %v5813_v42  ;;  %v12084_v35 = vld [vmem:[%s16338_s2 + $0x1b8] sm:$0xff] }
0x3767   :  { %13204 = vmatmul.mubr.msk.f32.vlgmr.msra.gmra.mrb[70].mxu1 %vm798_vm3, %v6948_v43 }
0x3768   :  { %13873 = vmatpush3.bf16.msra.mxu1 %v13872_v38  ;;  %13218 = vmatmul.mubr.msk.f32.vlgmr.msra.gmra.mrb[66].mxu0 %vm798_vm3, %v15819_v44  ;;  %v15829_v4 = vadd.f32 %v15825_v45, %v15819_v44 }
0x3769   :  { %13210 = vmatprep.mubr.msk.f32.mxu1 %vm14707_vm2, %v14708_v61 }
0x376b   :  { %13211 = vmatmul.mubr.msk.f32.vlgmr.msra.gmra.mrb[72].mxu1 %vm798_vm3, %v15829_v4 }
0x383a   :  { %v13205_v47 = vpop.f32.mrb[70].mxu1 }
0x383b   :  { %v7035_v48 = vpop.f32.mrb[71].mxu1  ;;  %v7208_v49 = vpop.f32.mrb[66].mxu0  ;;  %v7041_v55 = vadd.f32 %v13205_v47, %v12058_v6 }
0x383c   :  { %v7036_v40 = vadd.f32 %v12058_v6, %v7035_v48  ;;  %v7209_v41 = vadd.f32 %v12069_v46, %v7208_v49  ;;  %v13219_v50 = vpop.f32.mrb[67].mxu0  ;;  %v12086_v49 = vld [vmem:[%s16340_s30 + $0x1b] ss:$0 sm:$0xff] }
0x383e   :  { %v7124_v2 = vpop.f32.mrb[72].mxu1  ;;  %13222 = vmatprep.mubr.msk.f32.mxu1 %vm877_vm4, %v7036_v40  ;;  %13225 = vmatprep.subr.mxu0 %v7209_v41 }
0x383f   :  { %v7125_v53 = vadd.f32 %v12064_v51, %v7124_v2  ;;  %v13212_v3 = vpop.f32.mrb[73].mxu1  ;;  %13226 = vmatpush3.msra.mxu0 %v7209_v41 }
0x3840   :  { %13881 = vmatprep.subr.bf16.mxu0 %v14706_v0 }
0x3841   :  { %13220 = vmatprep.subr.msk.mxu1 %vm877_vm4, %v7125_v53 }
0x3842   :  { %13221 = vmatpush3.xpose.msk.msra.mxu1 %vm877_vm4, %v7125_v53 }
0x3843   :  { %13878 = vmatprep.subr.bf16.mxu1 %v13877_v54 }
0x3845   :  { %13223 = vmatmul.mubr.msk.f32.vlgmr.msra.gmra.mrb[74].mxu1 %vm877_vm4, %v7041_v55 }
0x3846   :  { %13880 = vmatpush3.bf16.msra.mxu1 %v13877_v54  ;;  %13234 = vmatprep.mubr.msk.f32.mxu1 %vm798_vm3, %v6947_v36 }
0x3847   :  { %13884 = vmatprep.subr.bf16.mxu1 %v14706_v0 }
0x3849   :  { %13235 = vmatmul.mubr.msk.f32.vlgmr.msra.gmra.mrb[76].mxu1 %vm798_vm3, %v6948_v43  ;;  %v13882_v43 = vpack.c.bf16 %v12084_v35, %v12083_v32 }
0x384a   :  { %13886 = vmatpush3.bf16.msra.mxu1 %v13885_v5  ;;  %13248 = vmatprep.mubr.msk.f32.mxu1 %vm14707_vm2, %v14708_v61 }
0x384d   :  { %13249 = vmatmul.mubr.msk.f32.vlgmr.msra.gmra.mrb[78].mxu1 %vm798_vm3, %v15819_v44 }
0x3918   :  { %v13224_v58 = vpop.f32.mrb[74].mxu1 }
0x3919   :  { %v7297_v9 = vmul.f32 0.35355338, %v13224_v58  ;;  %v7287_v59 = vpop.f32.mrb[75].mxu1 }
0x391a   :  { %v7296_v60 = vmul.f32 0.35355338, %v7287_v59 }
0x391b   :  { %v7299_v39 = vadd.f32 %v15856_v62, %v7297_v9 }
0x391c   :  { %v13236_v63 = vpop.f32.mrb[76].mxu1  ;;  %v7298_v13 = vadd.f32 %v15860_v11, %v7296_v60 }
0x391d   :  { %v7488_v8 = vadd.f32 %v13236_v63, %v12080_v27  ;;  %v7482_v12 = vpop.f32.mrb[77].mxu1  ;;  %v7303_v14 = vsel %vm3796_vm12, %v7299_v39, -inf }
0x391e   :  { %7304 = vmax.xlane.f32.xlu1 %v7303_v14  ;;  %v7300_v16 = vsel %vm877_vm4, %v7298_v13, -inf  ;;  %v7483_v46 = vadd.f32 %v12080_v27, %v7482_v12 }
0x391f   :  { %7301 = vmax.xlane.f32.xlu0 %v7300_v16 }
0x3920   :  { %v7649_v19 = vpop.f32.mrb[78].mxu1 }
0x3921   :  { %v7650_v20 = vadd.f32 %v12091_v17, %v7649_v19  ;;  %v13250_v21 = vpop.f32.mrb[79].mxu1  ;;  %v12098_v19 = vld [vmem:[%s16346_s10 + $0x48] sm:$0xff] }
0x3923   :  { %13256 = vmatprep.subr.mxu1 %v7650_v20 }
0x3924   :  { %13257 = vmatpush3.msra.mxu1 %v7650_v20  ;;  %v12076_v20 = vld [vmem:[%s16346_s10 + $0x40] sm:$0xff] }
0x39ab   :  { %v7305_v10 = vpop.xlane.xlu1 %7304 }
0x39ac   :  { %v7307_v22 = vsub.f32 %v7299_v39, %v7305_v10  ;;  %v7302_v23 = vpop.xlane.xlu0 %7301 }
0x39ad   :  { %v7306_v15 = vsub.f32 %v7298_v13, %v7302_v23  ;;  %v12122_v23 = vld [vmem:[%s16338_s2 + $0x1e8] sm:$0xff] }
0x39ae   :  { %v7310_v18 = vmul.f32 1.442695, %v7307_v22  ;;  %v12121_v22 = vld [vmem:[%s16338_s2 + $0x1e0] sm:$0xff] }
0x39af   :  { %v7308_v24 = vmul.f32 1.442695, %v7306_v15  ;;  %v13900_v15 = vpack.c.bf16 %v12122_v23, %v12121_v22  ;;  %v12115_v23 = vld [vmem:[#allocation9 + $0x1] ss:$0 sm:$0xff] }
0x39b0   :  { %14214 = vpow2.f32 %v7310_v18  ;;  %v12103_v18 = vld [vmem:[%s16347_s19 + $0x4] ss:$0 sm:$0xff] }
0x39b1   :  { %14216 = vpow2.f32 %v7308_v24 }
0x39ba   :  { %v14215_v25 = vpop.eup %14214 }
0x39bb   :  { %v14217_v56 = vpop.eup %14216  ;;  %v7315_v28 = vsel %vm3796_vm12, %v14215_v25, 0.0 }
0x39bc   :  { %7316 = vadd.xlane.f32.xlu1 %v7315_v28  ;;  %v7312_v29 = vsel %vm877_vm4, %v14217_v56, 0.0 }
0x39bd   :  { %7313 = vadd.xlane.f32.xlu0 %v7312_v29 }
0x3a49   :  { %v7317_v33 = vpop.xlane.xlu1 %7316 }
0x3a4a   :  { %14218 = vrcp.f32 %v7317_v33  ;;  %v7314_v30 = vpop.xlane.xlu0 %7313 }
0x3a4b   :  { %14220 = vrcp.f32 %v7314_v30 }
0x3a54   :  { %v14219_v36 = vpop.eup %14218 }
0x3a55   :  { %v14221_v38 = vpop.eup %14220  ;;  %v7321_v6 = vmul.f32 %v14219_v36, %v14215_v25 }
0x3a56   :  { %v7319_v42 = vmul.f32 %v14221_v38, %v14217_v56 }
0x3a58   :  { %13227 = vmatprep.mubr.msk.f32.mxu0 %vm877_vm4, %v7319_v42 }
0x3a59   :  { %13228 = vmatmul.mubr.msk.f32.vlgmr.msra.gmra.mrb[68].mxu0 %vm877_vm4, %v7321_v6 }
0x3a5a   :  { %13883 = vmatpush3.bf16.msra.mxu0 %v13882_v43  ;;  %13241 = vmatprep.mubr.msk.f32.mxu0 %vm14707_vm2, %v14708_v61 }
0x3a5d   :  { %13242 = vmatmul.mubr.msk.f32.vlgmr.msra.gmra.mrb[70].mxu0 %vm798_vm3, %v15829_v4 }
0x3a5e   :  { %13253 = vmatprep.mubr.msk.f32.mxu0 %vm877_vm4, %v7483_v46 }
0x3b2c   :  { %v13229_v47 = vpop.f32.mrb[68].mxu0 }
0x3b2d   :  { %v7394_v48 = vpop.f32.mrb[69].mxu0 }
0x3b30   :  { %v7568_v40 = vpop.f32.mrb[70].mxu0 }
0x3b31   :  { %v7569_v41 = vadd.f32 %v12086_v49, %v7568_v40  ;;  %v13243_v50 = vpop.f32.mrb[71].mxu0  ;;  %v12106_v40 = vld [vmem:[%s16352_s18 + $0x10] sm:$0xff] }
0x3b33   :  { %13251 = vmatprep.subr.msk.mxu0 %vm877_vm4, %v7569_v41 }
0x3b34   :  { %13252 = vmatpush3.xpose.msk.msra.mxu0 %vm877_vm4, %v7569_v41  ;;  %v12107_v41 = vld [vmem:[%s16352_s18 + $0x18] sm:$0xff] }
0x3b35   :  { %13261 = vmatprep.subr.mxu0 %v12098_v19  ;;  %v13887_v50 = vpack.c.bf16 %v12107_v41, %v12106_v40  ;;  %v12127_v41 = vld [vmem:[%s16338_s2 + $0x208] sm:$0xff] }
0x3b37   :  { %13254 = vmatmul.mubr.msk.f32.vlgmr.msra.gmra.mrb[72].mxu0 %vm877_vm4, %v7488_v8  ;;  %13888 = vmatprep.subr.bf16.mxu1 %v13887_v50 }
0x3b38   :  { %13262 = vmatpush3.msra.mxu0 %v12098_v19 }
0x3b39   :  { %13266 = vmatprep.subr.mxu0 %v12076_v20 }
0x3c0a   :  { %v13255_v51 = vpop.f32.mrb[72].mxu0 }
0x3c0b   :  { %v7738_v52 = vmul.f32 0.35355338, %v13255_v51  ;;  %v7728_v31 = vpop.f32.mrb[73].mxu0  ;;  %v12111_v51 = vld [vmem:[%s16353_s8 + $0x20] sm:$0xff] }
0x3c0c   :  { %v7737_v2 = vmul.f32 0.35355338, %v7728_v31 }
0x3c0d   :  { %v7740_v53 = vadd.f32 %v15856_v62, %v7738_v52  ;;  %v12112_v52 = vld [vmem:[%s16353_s8 + $0x28] sm:$0xff] }
0x3c0e   :  { %v7739_v3 = vadd.f32 %v15860_v11, %v7737_v2  ;;  %v13891_v31 = vpack.c.bf16 %v12112_v52, %v12111_v51 }
0x3c0f   :  { %v7744_v54 = vsel %vm3796_vm12, %v7740_v53, -inf }
0x3c10   :  { %7745 = vmax.xlane.f32.xlu1 %v7744_v54  ;;  %v7741_v55 = vsel %vm877_vm4, %v7739_v3, -inf }
0x3c11   :  { %7742 = vmax.xlane.f32.xlu0 %v7741_v55 }
0x3c9d   :  { %v7746_v57 = vpop.xlane.xlu1 %7745 }
0x3c9e   :  { %v7748_v7 = vsub.f32 %v7740_v53, %v7746_v57  ;;  %v7743_v5 = vpop.xlane.xlu0 %7742 }
0x3c9f   :  { %v7747_v58 = vsub.f32 %v7739_v3, %v7743_v5  ;;  %v12104_v5 = vld [vmem:[%s16348_s17 + $0x5] ss:$0 sm:$0xff] }
0x3ca0   :  { %v7751_v9 = vmul.f32 1.442695, %v7748_v7 }
0x3ca1   :  { %v7749_v59 = vmul.f32 1.442695, %v7747_v58 }
0x3ca2   :  { %14222 = vpow2.f32 %v7751_v9 }
0x3ca3   :  { %14224 = vpow2.f32 %v7749_v59 }
0x3cac   :  { %v14223_v60 = vpop.eup %14222 }
0x3cad   :  { %v14225_v27 = vpop.eup %14224  ;;  %v7756_v39 = vsel %vm3796_vm12, %v14223_v60, 0.0 }
0x3cae   :  { %7757 = vadd.xlane.f32.xlu1 %v7756_v39  ;;  %v7753_v63 = vsel %vm877_vm4, %v14225_v27, 0.0 }
0x3caf   :  { %7754 = vadd.xlane.f32.xlu0 %v7753_v63 }
0x3d3b   :  { %v7758_v13 = vpop.xlane.xlu1 %7757 }
0x3d3c   :  { %14226 = vrcp.f32 %v7758_v13  ;;  %v7755_v8 = vpop.xlane.xlu0 %7754 }
0x3d3d   :  { %14228 = vrcp.f32 %v7755_v8  ;;  %v12113_v8 = vld [vmem:[%s16353_s8 + $0x30] sm:$0xff] }
0x3d46   :  { %v14227_v12 = vpop.eup %14226 }
0x3d47   :  { %v14229_v14 = vpop.eup %14228  ;;  %v7762_v17 = vmul.f32 %v14227_v12, %v14223_v60  ;;  %v12105_v60 = vld [vmem:[%s16349_s15 + $0x5] ss:$0 sm:$0xff]  ;;  %v12114_v12 = vld [vmem:[%s16353_s8 + $0x38] sm:$0xff] }
0x3d48   :  { %v7760_v16 = vmul.f32 %v14229_v14, %v14225_v27  ;;  %v13895_v14 = vpack.c.bf16 %v12114_v12, %v12113_v8  ;;  %v12135_v12 = vld [vmem:[%s16340_s30 + $0x22] ss:$0 sm:$0xff] }
0x3d4a   :  { %13258 = vmatprep.mubr.msk.f32.mxu1 %vm877_vm4, %v7760_v16  ;;  %v12108_v16 = vld [vmem:[#allocation7 + $0x1] ss:$0 sm:$0xff] }
0x3d4b   :  { %13259 = vmatmul.mubr.msk.f32.vlgmr.msra.gmra.mrb[80].mxu1 %vm877_vm4, %v7762_v17 }
0x3d4c   :  { %13890 = vmatpush3.bf16.msra.mxu1 %v13887_v50 }
0x3d4d   :  { %13892 = vmatprep.subr.bf16.mxu1 %v13891_v31 }
0x3e1e   :  { %v13260_v21 = vpop.f32.mrb[80].mxu1 }
0x3e1f   :  { %v7835_v10 = vpop.f32.mrb[81].mxu1 }
0x3e20   :  { %13263 = vmatprep.mubr.msk.f32.mxu0 %vm877_vm4, %v7835_v10 }
0x3e21   :  { %13264 = vmatmul.mubr.msk.f32.vlgmr.msra.gmra.mrb[74].mxu0 %vm877_vm4, %v13260_v21 }
0x3e22   :  { %13268 = vmatprep.mubr.msk.f32.mxu0 %vm877_vm4, %v7394_v48  ;;  %13267 = vmatpush3.msra.mxu0 %v12076_v20 }
0x3e23   :  { %13899 = vmatprep.subr.bf16.mxu0 %v14706_v0 }
0x3e29   :  { %13269 = vmatmul.mubr.msk.f32.vlgmr.msra.gmra.mrb[74].mxu0 %vm877_vm4, %v13229_v47 }
0x3e2a   :  { %13901 = vmatpush3.bf16.msra.mxu0 %v13900_v15  ;;  %13293 = vmatprep.mubr.msk.f32.mxu0 %vm14707_vm2, %v14708_v61 }
0x3e2d   :  { %13294 = vmatmul.mubr.msk.f32.vlgmr.msra.gmra.mrb[76].mxu0 %vm798_vm3, %v15829_v4 }
0x3efc   :  { %v13270_v24 = vpop.f32.mrb[74].mxu0 }
0x3efd   :  { %v8015_v25 = vadd.f32 %v13270_v24, %v12103_v18  ;;  %v7999_v56 = vpop.f32.mrb[75].mxu0 }
0x3efe   :  { %v8014_v28 = vadd.f32 %v12103_v18, %v7999_v56 }
0x3eff   :  { %v8017_v29 = vadd.f32 %v8015_v25, %v15806_v26 }
0x3f00   :  { %v15904_v33 = vpop.f32.mrb[76].mxu0  ;;  %v8016_v30 = vadd.f32 %v8014_v28, %v15811_v34 }
0x3f01   :  { %v13295_v32 = vpop.f32.mrb[77].mxu0  ;;  %v8023_v35 = vsel %vm3404_vm11, %v8017_v29, 0.0 }
0x3f02   :  { %8024 = vadd.xlane.f32.xlu1 %v8023_v35  ;;  %v8020_v36 = vsel %vm798_vm3, %v8016_v30, 0.0 }
0x3f03   :  { %8021 = vadd.xlane.f32.xlu0 %v8020_v36 }
0x3f8f   :  { %v8025_v38 = vpop.xlane.xlu1 %8024 }
0x3f90   :  { %v8027_v42 = vmul.f32 0.0625, %v8025_v38  ;;  %v8022_v43 = vpop.xlane.xlu0 %8021 }
0x3f91   :  { %v8026_v6 = vmul.f32 0.0625, %v8022_v43 }
0x3f92   :  { %v8029_v26 = vsub.f32 %v8017_v29, %v8027_v42 }
0x3f93   :  { %v8028_v46 = vsub.f32 %v8016_v30, %v8026_v6 }
0x3f94   :  { %v8031_v47 = vmul.f32 %v8029_v26, %v8029_v26 }
0x3f95   :  { %v8030_v48 = vmul.f32 %v8028_v46, %v8028_v46 }
0x3f96   :  { %v8035_v34 = vsel %vm3404_vm11, %v8031_v47, 0.0 }
0x3f97   :  { %8036 = vadd.xlane.f32.xlu1 %v8035_v34  ;;  %v8032_v49 = vsel %vm798_vm3, %v8030_v48, 0.0  ;;  %v12132_v48 = vld [vmem:[%s16338_s2 + $0x220] sm:$0xff]  ;;  %v12133_v34 = vld [vmem:[%s16338_s2 + $0x228] sm:$0xff] }
0x3f98   :  { %8033 = vadd.xlane.f32.xlu0 %v8032_v49  ;;  %v12126_v49 = vld [vmem:[%s16338_s2 + $0x200] sm:$0xff]  ;;  %v13906_v40 = vpack.c.bf16 %v12133_v34, %v12132_v48 }
0x3f99   :  { %v13902_v50 = vpack.c.bf16 %v12127_v41, %v12126_v49 }
0x3f9b   :  { %13903 = vmatprep.subr.bf16.mxu0 %v13902_v50 }
0x3f9c   :  { %13905 = vmatpush3.bf16.msra.mxu0 %v13902_v50 }
0x3f9d   :  { %13910 = vmatprep.subr.bf16.mxu0 %v14706_v0 }
0x4024   :  { %v8037_v2 = vpop.xlane.xlu1 %8036 }
0x4025   :  { %v8039_v53 = vmul.f32 0.0625, %v8037_v2  ;;  %v8034_v3 = vpop.xlane.xlu0 %8033 }
0x4026   :  { %v8038_v54 = vmul.f32 0.0625, %v8034_v3 }
0x4027   :  { %v8041_v55 = vadd.f32 1e-05, %v8039_v53 }
0x4028   :  { %v8040_v57 = vadd.f32 1e-05, %v8038_v54 }
0x4029   :  { %14230 = vrsqrt.f32 %v8041_v55  ;;  %v12118_v55 = vld [vmem:[%s16348_s17 + $0x6] ss:$0 sm:$0xff] }
0x402a   :  { %14232 = vrsqrt.f32 %v8040_v57 }
0x4033   :  { %v14231_v7 = vpop.eup %14230 }
0x4034   :  { %v14233_v58 = vpop.eup %14232  ;;  %v8045_v9 = vmul.f32 %v14231_v7, %v8029_v26 }
0x4035   :  { %v8044_v59 = vmul.f32 %v14233_v58, %v8028_v46 }
0x4036   :  { %v8051_v27 = vmul.f32 %v12104_v5, %v8045_v9 }
0x4037   :  { %v8050_v39 = vmul.f32 %v12104_v5, %v8044_v59  ;;  %v12119_v5 = vld [vmem:[%s16349_s15 + $0x6] ss:$0 sm:$0xff] }
0x4038   :  { %v8057_v13 = vadd.f32 %v12105_v60, %v8051_v27 }
0x4039   :  { %v8056_v63 = vadd.f32 %v12105_v60, %v8050_v39  ;;  %v14281_v39 = vld [vmem:[%s16339_s3] sm:$0xff] }
0x403b   :  { %13275 = vmatprep.mubr.msk.f32.mxu1 %vm798_vm3, %v8056_v63 }
0x403c   :  { %13276 = vmatmul.mubr.msk.f32.vlgmr.msra.gmra.mrb[82].mxu1 %vm798_vm3, %v8057_v13 }
0x403d   :  { %13894 = vmatpush3.bf16.msra.mxu1 %v13891_v31 }
0x403e   :  { %13896 = vmatprep.subr.bf16.mxu1 %v13895_v14 }
0x4041   :  { %13898 = vmatpush3.bf16.msra.mxu1 %v13895_v14 }
0x4042   :  { %13907 = vmatprep.subr.bf16.mxu1 %v13906_v40 }
0x410f   :  { %v13277_v17 = vpop.f32.mrb[82].mxu1 }
0x4110   :  { %v8147_v19 = vadd.f32 %v13277_v17, %v12108_v16  ;;  %v8141_v20 = vpop.f32.mrb[83].mxu1 }
0x4111   :  { %v8142_v21 = vadd.f32 %v12108_v16, %v8141_v20  ;;  %v12129_v16 = vld [vmem:[%s16340_s30 + $0x20] ss:$0 sm:$0xff] }
0x4112   :  { %v8151_v22 = vmax.f32 %v8147_v19, 0.0 }
0x4113   :  { %v8150_v10 = vmax.f32 %v8142_v21, 0.0 }
0x4115   :  { %13286 = vmatprep.mubr.msk.f32.mxu1 %vm522_vm1, %v8150_v10  ;;  %v12149_v10 = vld [vmem:[%s16338_s2 + $0x210] sm:$0xff] }
0x4116   :  { %13287 = vmatmul.mubr.msk.f32.vlgmr.msra.gmra.mrb[84].mxu1 %vm522_vm1, %v8151_v22  ;;  %v12150_v22 = vld [vmem:[%s16338_s2 + $0x218] sm:$0xff] }
0x4117   :  { %13909 = vmatpush3.bf16.msra.mxu1 %v13906_v40 }
0x4118   :  { %13914 = vmatprep.subr.bf16.mxu1 %v14706_v0 }
0x41e9   :  { %v13288_v15 = vpop.f32.mrb[84].mxu1 }
0x41ea   :  { %v8243_v18 = vadd.f32 %v13288_v15, %v12115_v23  ;;  %v8237_v24 = vpop.f32.mrb[85].mxu1 }
0x41eb   :  { %v8238_v25 = vadd.f32 %v12115_v23, %v8237_v24 }
0x41ec   :  { %v8247_v56 = vadd.f32 %v8243_v18, %v8057_v13  ;;  %v14282_v13 = vld [vmem:[%s16339_s3 + $0x8] sm:$0x3] }
0x41ed   :  { %v8246_v28 = vadd.f32 %v8238_v25, %v8056_v63  ;;  %v13921_v25 = vpack.c.bf16 %v12150_v22, %v12149_v10 }
0x41ee   :  { %v8253_v29 = vsel %vm3404_vm11, %v8247_v56, 0.0 }
0x41ef   :  { %8254 = vadd.xlane.f32.xlu1 %v8253_v29  ;;  %v8250_v30 = vsel %vm798_vm3, %v8246_v28, 0.0 }
0x41f0   :  { %8251 = vadd.xlane.f32.xlu0 %v8250_v30 }
0x427c   :  { %v8255_v32 = vpop.xlane.xlu1 %8254 }
0x427d   :  { %v8257_v35 = vmul.f32 0.0625, %v8255_v32  ;;  %v8252_v36 = vpop.xlane.xlu0 %8251 }
0x427e   :  { %v8256_v38 = vmul.f32 0.0625, %v8252_v36  ;;  %v12152_v36 = vld [vmem:[%s16340_s30 + $0x21] ss:$0 sm:$0xff] }
0x427f   :  { %v8259_v42 = vsub.f32 %v8247_v56, %v8257_v35 }
0x4280   :  { %v8258_v43 = vsub.f32 %v8246_v28, %v8256_v38  ;;  %v12124_v28 = vld [vmem:[%s16340_s30 + $0x1e] ss:$0 sm:$0xff]  ;;  %v14283_v38 = vld [vmem:[%s16354_s14] sm:$0xff] }
0x4281   :  { %v8261_v6 = vmul.f32 %v8259_v42, %v8259_v42  ;;  %v8370_v29 = vadd.f32 %v12124_v28, %v15904_v33 }
0x4282   :  { %v8260_v26 = vmul.f32 %v8258_v43, %v8258_v43 }
0x4283   :  { %v8265_v46 = vsel %vm3404_vm11, %v8261_v6, 0.0 }
0x4284   :  { %8266 = vadd.xlane.f32.xlu1 %v8265_v46  ;;  %v8262_v47 = vsel %vm798_vm3, %v8260_v26, 0.0 }
0x4285   :  { %8263 = vadd.xlane.f32.xlu0 %v8262_v47 }
0x4311   :  { %v8267_v51 = vpop.xlane.xlu1 %8266 }
0x4312   :  { %v8269_v52 = vmul.f32 0.0625, %v8267_v51  ;;  %v8264_v31 = vpop.xlane.xlu0 %8263  ;;  %v12144_v51 = vld [vmem:[%s16338_s2 + $0x1f0] sm:$0xff] }
0x4313   :  { %v8268_v2 = vmul.f32 0.0625, %v8264_v31  ;;  %v12155_v31 = vld [vmem:[%s16338_s2 + $0x230] sm:$0xff] }
0x4314   :  { %v8271_v53 = vadd.f32 1e-05, %v8269_v52  ;;  %v12145_v52 = vld [vmem:[%s16338_s2 + $0x1f8] sm:$0xff] }
0x4315   :  { %v8270_v3 = vadd.f32 1e-05, %v8268_v2  ;;  %v12156_v2 = vld [vmem:[%s16338_s2 + $0x238] sm:$0xff]  ;;  %v13919_v1 = vpack.c.bf16 %v12145_v52, %v12144_v51 }
0x4316   :  { %14234 = vrsqrt.f32 %v8271_v53 }
0x4317   :  { %14236 = vrsqrt.f32 %v8270_v3 }
0x4320   :  { %v14235_v54 = vpop.eup %14234 }
0x4321   :  { %v14237_v57 = vpop.eup %14236  ;;  %v8275_v7 = vmul.f32 %v14235_v54, %v8259_v42  ;;  %v13925_v54 = vpack.c.bf16 %v12156_v2, %v12155_v31 }
0x4322   :  { %v8274_v58 = vmul.f32 %v14237_v57, %v8258_v43 }
0x4323   :  { %v8281_v9 = vmul.f32 %v12118_v55, %v8275_v7  ;;  %v12147_v7 = vld [vmem:[%s16340_s30 + $0x1f] ss:$0 sm:$0xff] }
0x4324   :  { %v8280_v59 = vmul.f32 %v12118_v55, %v8274_v58 }
0x4325   :  { %v15935_v60 = vadd.f32 %v12119_v5, %v8281_v9 }
0x4326   :  { %v15937_v27 = vadd.f32 %v12119_v5, %v8280_v59  ;;  %v12143_v59 = vld [vmem:[%s16346_s10 + $0x50] sm:$0xff] }
0x4327   :  { %v15949_v8 = vadd.f32 %v14282_v13, %v15935_v60 }
0x4328   :  { %13307 = vmatprep.mubr.msk.f32.mxu1 %vm798_vm3, %v15937_v27  ;;  %v15943_v63 = vadd.f32 %v14281_v39, %v15937_v27 }
0x4329   :  { %13308 = vmatmul.mubr.msk.f32.vlgmr.msra.gmra.mrb[86].mxu1 %vm798_vm3, %v15935_v60 }
0x432a   :  { %13300 = vmatprep.mubr.msk.f32.mxu0 %vm798_vm3, %v15943_v63  ;;  %13321 = vmatprep.mubr.msk.f32.mxu1 %vm14707_vm2, %v14708_v61 }
0x432b   :  { %13301 = vmatmul.mubr.msk.f32.vlgmr.msra.gmra.mrb[78].mxu0 %vm798_vm3, %v15949_v8 }
0x432c   :  { %13314 = vmatprep.mubr.msk.f32.mxu0 %vm14707_vm2, %v14708_v61 }
0x43fc   :  { %v13309_v14 = vpop.f32.mrb[86].mxu1 }
0x43fd   :  { %v8554_v17 = vadd.f32 %v13309_v14, %v12135_v12  ;;  %v8548_v19 = vpop.f32.mrb[87].mxu1 }
0x43fe   :  { %v8549_v20 = vadd.f32 %v12135_v12, %v8548_v19  ;;  %v13302_v21 = vpop.f32.mrb[78].mxu0 }
0x43ff   :  { %v8462_v23 = vadd.f32 %v13302_v21, %v12129_v16  ;;  %v8456_v15 = vpop.f32.mrb[79].mxu0 }
0x4400   :  { %v13915_v18 = vpack.c.bf16 %v8554_v17, %v8549_v20  ;;  %v8457_v24 = vadd.f32 %v12129_v16, %v8456_v15 }
0x4402   :  { %v13911_v56 = vpack.c.bf16 %v8462_v23, %v8457_v24  ;;  %13917 = vmatpush3.bf16.msk.msra.mxu1 %vm15395_vm10, %v13915_v18 }
0x4403   :  { %13918 = vmatprep.subr.bf16.mxu1 %v14706_v0 }
0x4404   :  { %13913 = vmatpush3.bf16.xpose.msk.msra.mxu0 %vm15363_vm5, %v13911_v56 }
0x4405   :  { %13922 = vmatprep.subr.bf16.mxu0 %v13921_v25 }
0x440b   :  { %13315 = vmatmul.mubr.msk.f32.vlgmr.msra.gmra.mrb[80].mxu0 %vm877_vm4, %v8370_v29 }
0x440c   :  { %13924 = vmatpush3.bf16.msra.mxu0 %v13921_v25  ;;  %13335 = vmatprep.mubr.msk.f32.mxu0 %vm798_vm3, %v15943_v63 }
0x440d   :  { %13929 = vmatprep.subr.bf16.mxu0 %v14706_v0 }
0x440f   :  { %13336 = vmatmul.mubr.msk.f32.vlgmr.msra.gmra.mrb[82].mxu0 %vm798_vm3, %v15949_v8 }
0x4410   :  { %13349 = vmatprep.mubr.msk.f32.mxu0 %vm14707_vm2, %v14708_v61 }
0x44de   :  { %v8632_v30 = vpop.f32.mrb[80].mxu0 }
0x44df   :  { %v8636_v32 = vmul.f32 0.35355338, %v8632_v30  ;;  %v13316_v35 = vpop.f32.mrb[81].mxu0  ;;  %v12173_v30 = vld [vmem:[%s16338_s2 + $0x240] sm:$0xff] }
0x44e0   :  { %v12166_v35 = vld [vmem:[%s16346_s10 + $0x58] sm:$0xff] }
0x44e1   :  { %v8637_v33 = vadd.f32 %v14283_v38, %v8636_v32  ;;  %v12174_v32 = vld [vmem:[%s16338_s2 + $0x248] sm:$0xff] }
0x44e2   :  { %v13337_v42 = vpop.f32.mrb[82].mxu0 }
0x44e3   :  { %v8891_v43 = vadd.f32 %v13337_v42, %v12152_v36  ;;  %v8885_v6 = vpop.f32.mrb[83].mxu0  ;;  %v8638_v26 = vsel %vm2662_vm7, %v8637_v33, -inf  ;;  %v12169_v42 = vld [vmem:[%s16347_s19 + $0x5] ss:$0 sm:$0xff] }
0x44e4   :  { %v8886_v46 = vadd.f32 %v12152_v36, %v8885_v6  ;;  %8639 = vmax.xlane.f32.xlu0 %v8638_v26  ;;  %v13937_v36 = vpack.c.bf16 %v12174_v32, %v12173_v30  ;;  %v12198_v32 = vld [vmem:[%s16340_s30 + $0x25] ss:$0 sm:$0xff] }
0x44e6   :  { %v13930_v47 = vpack.c.bf16 %v8891_v43, %v8886_v46  ;;  %v12176_v46 = vld [vmem:[%s16340_s30 + $0x24] ss:$0 sm:$0xff] }
0x44e8   :  { %13932 = vmatpush3.bf16.xpose.msk.msra.mxu0 %vm15363_vm5, %v13930_v47 }
0x44e9   :  { %13364 = vmatprep.subr.mxu0 %v14708_v61 }
0x4571   :  { %v8640_v48 = vpop.xlane.xlu0 %8639 }
0x4572   :  { %v8641_v34 = vsub.f32 %v8637_v33, %v8640_v48 }
0x4574   :  { %v8642_v49 = vmul.f32 1.442695, %v8641_v34 }
0x4576   :  { %14238 = vpow2.f32 %v8642_v49 }
0x4580   :  { %v14239_v40 = vpop.eup %14238 }
0x4581   :  { %v8644_v41 = vsel %vm2662_vm7, %v14239_v40, 0.0 }
0x4582   :  { %8645 = vadd.xlane.f32.xlu1 %v8644_v41 }
0x460f   :  { %v8646_v50 = vpop.xlane.xlu1 %8645 }
0x4610   :  { %14240 = vrcp.f32 %v8646_v50 }
0x461a   :  { %v14241_v53 = vpop.eup %14240 }
0x461b   :  { %v8648_v3 = vmul.f32 %v14241_v53, %v14239_v40  ;;  %v12184_v53 = vld [vmem:[%s16338_s2 + $0x280] sm:$0xff] }
0x461d   :  { %13322 = vmatmul.mubr.msk.f32.vlgmr.msra.gmra.mrb[88].mxu1 %vm2662_vm7, %v8648_v3  ;;  %v12179_v3 = vld [vmem:[%s16338_s2 + $0x260] sm:$0xff] }
0x461e   :  { %13920 = vmatpush3.bf16.msra.mxu1 %v13919_v1  ;;  %13328 = vmatprep.mubr.msk.f32.mxu1 %vm14707_vm2, %v14708_v61  ;;  %v12185_v1 = vld [vmem:[%s16338_s2 + $0x288] sm:$0xff] }
0x461f   :  { %13926 = vmatprep.subr.bf16.mxu1 %v13925_v54 }
0x4621   :  { %13329 = vmatmul.mubr.msk.f32.vlgmr.msra.gmra.mrb[90].mxu1 %vm798_vm3, %v15829_v4  ;;  %v12158_v4 = vld [vmem:[%s16340_s30 + $0x23] ss:$0 sm:$0xff] }
0x4622   :  { %13928 = vmatpush3.bf16.msra.mxu1 %v13925_v54  ;;  %13342 = vmatprep.mubr.msk.f32.mxu1 %vm798_vm3, %v15937_v27  ;;  %v13945_v54 = vpack.c.bf16 %v12185_v1, %v12184_v53  ;;  %v12201_v1 = vld [vmem:[%s16338_s2 + $0x270] sm:$0xff] }
0x4623   :  { %13933 = vmatprep.subr.bf16.mxu1 %v14706_v0 }
0x4625   :  { %13343 = vmatmul.mubr.msk.f32.vlgmr.msra.gmra.mrb[92].mxu1 %vm798_vm3, %v15935_v60 }
0x4626   :  { %13356 = vmatprep.mubr.msk.f32.mxu1 %vm14707_vm2, %v14708_v61 }
0x46f0   :  { %v8721_v55 = vpop.f32.mrb[88].mxu1 }
0x46f1   :  { %v13323_v57 = vpop.f32.mrb[89].mxu1 }
0x46f4   :  { %v8804_v5 = vpop.f32.mrb[90].mxu1 }
0x46f5   :  { %v8805_v58 = vadd.f32 %v12147_v7, %v8804_v5  ;;  %v13330_v9 = vpop.f32.mrb[91].mxu1 }
0x46f6   :  { %v12170_v9 = vld [vmem:[%s16348_s17 + $0x7] ss:$0 sm:$0xff] }
0x46f7   :  { %13350 = vmatmul.mubr.msk.f32.vlgmr.msra.gmra.mrb[84].mxu0 %vm877_vm4, %v8805_v58 }
0x46f8   :  { %v13344_v39 = vpop.f32.mrb[92].mxu1  ;;  %13365 = vmatpush3.msra.mxu0 %v12143_v59  ;;  %13366 = vmatprep.mubr.msk.f32.mxu0 %vm14707_vm2, %v14708_v61 }
0x46f9   :  { %v8977_v13 = vadd.f32 %v13344_v39, %v12158_v4  ;;  %v8971_v12 = vpop.f32.mrb[93].mxu1  ;;  %13941 = vmatprep.subr.bf16.mxu0 %v14706_v0 }
0x46fa   :  { %v8972_v14 = vadd.f32 %v12158_v4, %v8971_v12  ;;  %v12171_v4 = vld [vmem:[%s16349_s15 + $0x7] ss:$0 sm:$0xff] }
0x46fb   :  { %13367 = vmatmul.mubr.msk.f32.vlgmr.msra.gmra.mrb[86].mxu0 %vm877_vm4, %v8721_v55  ;;  %v12180_v55 = vld [vmem:[%s16338_s2 + $0x268] sm:$0xff] }
0x46fc   :  { %v13934_v16 = vpack.c.bf16 %v8977_v13, %v8972_v14  ;;  %13380 = vmatprep.mubr.msk.f32.mxu0 %vm14707_vm2, %v14708_v61  ;;  %v13942_v57 = vpack.c.bf16 %v12180_v55, %v12179_v3  ;;  %v12202_v3 = vld [vmem:[%s16338_s2 + $0x278] sm:$0xff] }
0x46fe   :  { %13936 = vmatpush3.bf16.msk.msra.mxu1 %vm15395_vm10, %v13934_v16  ;;  %13943 = vmatpush3.bf16.msra.mxu0 %v13942_v57  ;;  %v12187_v16 = vld [vmem:[%s16340_s30 + $0x28] ss:$0 sm:$0xff] }
0x46ff   :  { %13359 = vmatprep.subr.mxu1 %v14708_v61 }
0x47ca   :  { %v9055_v17 = vpop.f32.mrb[84].mxu0 }
0x47cb   :  { %v9059_v19 = vmul.f32 0.35355338, %v9055_v17  ;;  %v13351_v20 = vpop.f32.mrb[85].mxu0 }
0x47cc   :  { %v12195_v20 = vld [vmem:[%s16338_s2 + $0x250] sm:$0xff] }
0x47cd   :  { %v9060_v21 = vadd.f32 %v14283_v38, %v9059_v19  ;;  %v12182_v19 = vld [vmem:[%s16340_s30 + $0x26] ss:$0 sm:$0xff] }
0x47ce   :  { %v9292_v10 = vpop.f32.mrb[86].mxu0 }
0x47cf   :  { %v13368_v22 = vpop.f32.mrb[87].mxu0  ;;  %v9061_v23 = vsel %vm2662_vm7, %v9060_v21, -inf }
0x47d0   :  { %9062 = vmax.xlane.f32.xlu0 %v9061_v23 }
0x485d   :  { %v9063_v15 = vpop.xlane.xlu0 %9062 }
0x485e   :  { %v9064_v18 = vsub.f32 %v9060_v21, %v9063_v15  ;;  %v12196_v21 = vld [vmem:[%s16338_s2 + $0x258] sm:$0xff] }
0x4860   :  { %v9065_v24 = vmul.f32 1.442695, %v9064_v18 }
0x4862   :  { %14242 = vpow2.f32 %v9065_v24  ;;  %v12206_v24 = vld [vmem:[%s16338_s2 + $0x290] sm:$0xff] }
0x486c   :  { %v14243_v37 = vpop.eup %14242 }
0x486d   :  { %v9067_v25 = vsel %vm2662_vm7, %v14243_v37, 0.0 }
0x486e   :  { %9068 = vadd.xlane.f32.xlu1 %v9067_v25 }
0x48fb   :  { %v9069_v56 = vpop.xlane.xlu1 %9068 }
0x48fc   :  { %14244 = vrcp.f32 %v9069_v56 }
0x4906   :  { %v14245_v28 = vpop.eup %14244 }
0x4907   :  { %v9071_v29 = vmul.f32 %v14245_v28, %v14243_v37  ;;  %v12207_v37 = vld [vmem:[%s16338_s2 + $0x298] sm:$0xff] }
0x4908   :  { %v13955_v25 = vpack.c.bf16 %v12207_v37, %v12206_v24 }
0x4909   :  { %13357 = vmatmul.mubr.msk.f32.vlgmr.msra.gmra.mrb[94].mxu1 %vm2662_vm7, %v9071_v29 }
0x490a   :  { %13361 = vmatprep.mubr.msk.f32.mxu1 %vm14707_vm2, %v14708_v61  ;;  %13360 = vmatpush3.msra.mxu1 %v12166_v35 }
0x490b   :  { %13938 = vmatprep.subr.bf16.mxu1 %v13937_v36 }
0x49dc   :  { %v9144_v38 = vpop.f32.mrb[94].mxu1 }
0x49dd   :  { %v13358_v33 = vpop.f32.mrb[95].mxu1  ;;  %13362 = vmatmul.mubr.msk.f32.vlgmr.msra.gmra.mrb[96].mxu1 %vm877_vm4, %v9144_v38 }
0x49de   :  { %13940 = vmatpush3.bf16.msra.mxu1 %v13937_v36  ;;  %13373 = vmatprep.mubr.msk.f32.mxu1 %vm798_vm3, %v15943_v63 }
0x49df   :  { %13944 = vmatprep.subr.bf16.mxu1 %v14706_v0 }
0x49e1   :  { %13374 = vmatmul.mubr.msk.f32.vlgmr.msra.gmra.mrb[98].mxu1 %vm798_vm3, %v15949_v8 }
0x49e2   :  { %13387 = vmatprep.mubr.msk.f32.mxu1 %vm14707_vm2, %v14708_v61  ;;  %13946 = vmatpush3.bf16.msra.mxu1 %v13945_v54 }
0x4ab0   :  { %v9219_v43 = vpop.f32.mrb[96].mxu1 }
0x4ab1   :  { %v9293_v6 = vadd.f32 %v9292_v10, %v9219_v43  ;;  %v13363_v26 = vpop.f32.mrb[97].mxu1  ;;  %v12209_v43 = vld [vmem:[%s16340_s30 + $0x29] ss:$0 sm:$0xff] }
0x4ab3   :  { %v9302_v47 = vadd.f32 %v12169_v42, %v9293_v6 }
0x4ab4   :  { %v13375_v48 = vpop.f32.mrb[98].mxu1 }
0x4ab5   :  { %v9415_v34 = vadd.f32 %v13375_v48, %v12176_v46  ;;  %v9409_v49 = vpop.f32.mrb[99].mxu1  ;;  %v9303_v40 = vadd.f32 %v9302_v47, %v15819_v44 }
0x4ab6   :  { %v9410_v14 = vadd.f32 %v12176_v46, %v9409_v49 }
0x4ab7   :  { %v9306_v41 = vsel %vm798_vm3, %v9303_v40, 0.0 }
0x4ab8   :  { %9307 = vadd.xlane.f32.xlu0 %v9306_v41 }
0x4b45   :  { %v9308_v50 = vpop.xlane.xlu0 %9307 }
0x4b46   :  { %v9309_v51 = vmul.f32 0.0625, %v9308_v50 }
0x4b48   :  { %v9310_v52 = vsub.f32 %v9303_v40, %v9309_v51 }
0x4b4a   :  { %v9311_v31 = vmul.f32 %v9310_v52, %v9310_v52 }
0x4b4c   :  { %v9312_v2 = vsel %vm798_vm3, %v9311_v31, 0.0 }
0x4b4d   :  { %9313 = vadd.xlane.f32.xlu1 %v9312_v2 }
0x4bda   :  { %v9314_v44 = vpop.xlane.xlu1 %9313 }
0x4bdb   :  { %v9315_v7 = vmul.f32 0.0625, %v9314_v44  ;;  %v13952_v44 = vpack.c.bf16 %v12202_v3, %v12201_v1 }
0x4bdd   :  { %v9316_v5 = vadd.f32 1e-05, %v9315_v7 }
0x4bdf   :  { %14246 = vrsqrt.f32 %v9316_v5 }
0x4be9   :  { %v14247_v58 = vpop.eup %14246 }
0x4bea   :  { %v9318_v59 = vmul.f32 %v14247_v58, %v9310_v52 }
0x4bec   :  { %v9323_v39 = vmul.f32 %v12170_v9, %v9318_v59  ;;  %v12204_v59 = vld [vmem:[%s16340_s30 + $0x27] ss:$0 sm:$0xff] }
0x4bee   :  { %v16041_v13 = vadd.f32 %v12171_v4, %v9323_v39 }
0x4bf0   :  { %13388 = vmatmul.mubr.msk.f32.vlgmr.msra.gmra.mrb[100].mxu1 %vm798_vm3, %v16041_v13  ;;  %v16047_v12 = vadd.f32 %v15825_v45, %v16041_v13  ;;  %v13947_v45 = vpack.c.bf16 %v12196_v21, %v12195_v20 }
0x4bf2   :  { %13381 = vmatmul.mubr.msk.f32.vlgmr.msra.gmra.mrb[88].mxu0 %vm798_vm3, %v16047_v12 }
0x4bf3   :  { %13392 = vmatprep.mubr.msk.f32.mxu0 %vm877_vm4, %v9410_v14 }
0x4cc3   :  { %v9582_v17 = vpop.f32.mrb[100].mxu1 }
0x4cc4   :  { %v9583_v10 = vadd.f32 %v12187_v16, %v9582_v17  ;;  %v13389_v22 = vpop.f32.mrb[101].mxu1 }
0x4cc5   :  { %v9498_v23 = vpop.f32.mrb[88].mxu0 }
0x4cc6   :  { %v9499_v15 = vadd.f32 %v12182_v19, %v9498_v23  ;;  %v13382_v18 = vpop.f32.mrb[89].mxu0  ;;  %13395 = vmatprep.subr.mxu1 %v9583_v10 }
0x4cc7   :  { %13396 = vmatpush3.msra.mxu1 %v9583_v10 }
0x4cc8   :  { %13390 = vmatprep.subr.msk.mxu0 %vm877_vm4, %v9499_v15  ;;  %13951 = vmatprep.subr.bf16.mxu1 %v14706_v0 }
0x4cc9   :  { %13391 = vmatpush3.xpose.msk.msra.mxu0 %vm877_vm4, %v9499_v15 }
0x4cca   :  { %13948 = vmatprep.subr.bf16.mxu0 %v13947_v45 }
0x4ccc   :  { %13393 = vmatmul.mubr.msk.f32.vlgmr.msra.gmra.mrb[90].mxu0 %vm877_vm4, %v9415_v34 }
0x4ccd   :  { %13950 = vmatpush3.bf16.msra.mxu0 %v13947_v45  ;;  %13404 = vmatprep.mubr.msk.f32.mxu0 %vm798_vm3, %v15943_v63 }
0x4cce   :  { %13954 = vmatprep.subr.bf16.mxu0 %v14706_v0 }
0x4cd0   :  { %13405 = vmatmul.mubr.msk.f32.vlgmr.msra.gmra.mrb[92].mxu0 %vm798_vm3, %v15949_v8 }
0x4cd1   :  { %13956 = vmatpush3.bf16.msra.mxu0 %v13955_v25  ;;  %13418 = vmatprep.mubr.msk.f32.mxu0 %vm14707_vm2, %v14708_v61 }
0x4cd4   :  { %13419 = vmatmul.mubr.msk.f32.vlgmr.msra.gmra.mrb[94].mxu0 %vm798_vm3, %v16041_v13 }
0x4d9f   :  { %v13394_v56 = vpop.f32.mrb[90].mxu0 }
0x4da0   :  { %v9671_v28 = vmul.f32 0.35355338, %v13394_v56  ;;  %v9661_v29 = vpop.f32.mrb[91].mxu0 }
0x4da1   :  { %v9670_v30 = vmul.f32 0.35355338, %v9661_v29 }
0x4da2   :  { %v9673_v63 = vadd.f32 %v15856_v62, %v9671_v28 }
0x4da3   :  { %v13406_v35 = vpop.f32.mrb[92].mxu0  ;;  %v9672_v36 = vadd.f32 %v15860_v11, %v9670_v30  ;;  %v10432_v30 = vld [vmem:[%s16355_s13] sm:$0xff] }
0x4da4   :  { %v9862_v38 = vadd.f32 %v13406_v35, %v12198_v32  ;;  %v9856_v8 = vpop.f32.mrb[93].mxu0  ;;  %v9677_v33 = vsel %vm3796_vm12, %v9673_v63, -inf }
0x4da5   :  { %9678 = vmax.xlane.f32.xlu1 %v9677_v33  ;;  %v9674_v42 = vsel %vm877_vm4, %v9672_v36, -inf  ;;  %v9857_v5 = vadd.f32 %v12198_v32, %v9856_v8  ;;  %v10433_v32 = vld [vmem:[%s16355_s13 + $0x8] sm:$0xff]  ;;  %v10511_v33 = vld [vmem:[%s16356_s5] sm:$0xff] }
0x4da6   :  { %9675 = vmax.xlane.f32.xlu0 %v9674_v42  ;;  %v10512_v42 = vld [vmem:[%s16356_s5 + $0x8] sm:$0xff] }
0x4da7   :  { %v10023_v6 = vpop.f32.mrb[94].mxu0 }
0x4da8   :  { %v10024_v26 = vadd.f32 %v12209_v43, %v10023_v6  ;;  %v13420_v46 = vpop.f32.mrb[95].mxu0  ;;  %v13961_v43 = vpack.c.bf16 %v10512_v42, %v10511_v33  ;;  %v12216_v6 = vld [vmem:[%s16346_s10 + $0x68] sm:$0xff] }
0x4da9   :  { %v10514_v46 = vld [vmem:[%s16356_s5 + $0x18] sm:$0xff] }
0x4daa   :  { %13426 = vmatprep.subr.mxu0 %v10024_v26 }
0x4dab   :  { %13427 = vmatpush3.msra.mxu0 %v10024_v26  ;;  %v10513_v26 = vld [vmem:[%s16356_s5 + $0x10] sm:$0xff] }
0x4dac   :  { %13957 = vmatprep.subr.bf16.mxu0 %v14706_v0 }
0x4e32   :  { %v9679_v47 = vpop.xlane.xlu1 %9678 }
0x4e33   :  { %v9681_v48 = vsub.f32 %v9673_v63, %v9679_v47  ;;  %v9676_v34 = vpop.xlane.xlu0 %9675  ;;  %v13964_v47 = vpack.c.bf16 %v10514_v46, %v10513_v26 }
0x4e34   :  { %v9680_v49 = vsub.f32 %v9672_v36, %v9676_v34 }
0x4e35   :  { %v9684_v40 = vmul.f32 1.442695, %v9681_v48  ;;  %v12194_v48 = vld [vmem:[%s16346_s10 + $0x60] sm:$0xff] }
0x4e36   :  { %v9682_v41 = vmul.f32 1.442695, %v9680_v49  ;;  %v12224_v49 = vld [vmem:[#allocation10] ss:$0 sm:$0xff] }
0x4e37   :  { %14248 = vpow2.f32 %v9684_v40 }
0x4e38   :  { %14250 = vpow2.f32 %v9682_v41 }
0x4e41   :  { %v14249_v50 = vpop.eup %14248 }
0x4e42   :  { %v14251_v51 = vpop.eup %14250  ;;  %v9689_v52 = vsel %vm3796_vm12, %v14249_v50, 0.0 }
0x4e43   :  { %9690 = vadd.xlane.f32.xlu1 %v9689_v52  ;;  %v9686_v31 = vsel %vm877_vm4, %v14251_v51, 0.0 }
0x4e44   :  { %9687 = vadd.xlane.f32.xlu0 %v9686_v31 }
0x4ed0   :  { %v9691_v2 = vpop.xlane.xlu1 %9690 }
0x4ed1   :  { %14252 = vrcp.f32 %v9691_v2  ;;  %v9688_v53 = vpop.xlane.xlu0 %9687  ;;  %v12221_v2 = vld [vmem:[%s16347_s19 + $0x6] ss:$0 sm:$0xff] }
0x4ed2   :  { %14254 = vrcp.f32 %v9688_v53 }
0x4edb   :  { %v14253_v54 = vpop.eup %14252 }
0x4edc   :  { %v14255_v55 = vpop.eup %14254  ;;  %v9695_v7 = vmul.f32 %v14253_v54, %v14249_v50 }
0x4edd   :  { %v9693_v57 = vmul.f32 %v14255_v55, %v14251_v51 }
0x4edf   :  { %13397 = vmatprep.mubr.msk.f32.mxu1 %vm877_vm4, %v9693_v57 }
0x4ee0   :  { %13398 = vmatmul.mubr.msk.f32.vlgmr.msra.gmra.mrb[102].mxu1 %vm877_vm4, %v9695_v7 }
0x4ee1   :  { %13953 = vmatpush3.bf16.msra.mxu1 %v13952_v44  ;;  %13411 = vmatprep.mubr.msk.f32.mxu1 %vm14707_vm2, %v14708_v61 }
0x4ee4   :  { %13412 = vmatmul.mubr.msk.f32.vlgmr.msra.gmra.mrb[104].mxu1 %vm798_vm3, %v16047_v12 }
0x4ee5   :  { %13423 = vmatprep.mubr.msk.f32.mxu1 %vm877_vm4, %v9857_v5 }
0x4fb3   :  { %v16089_v58 = vpop.f32.mrb[102].mxu1 }
0x4fb4   :  { %v16091_v9 = vpop.f32.mrb[103].mxu1 }
0x4fb7   :  { %v9942_v4 = vpop.f32.mrb[104].mxu1 }
0x4fb8   :  { %v9943_v39 = vadd.f32 %v12204_v59, %v9942_v4  ;;  %v13413_v14 = vpop.f32.mrb[105].mxu1  ;;  %v10692_v59 = vld [vmem:[%s16357_s22 + $0x10] sm:$0xff] }
0x4fba   :  { %13421 = vmatprep.subr.msk.mxu1 %vm877_vm4, %v9943_v39 }
0x4fbb   :  { %13422 = vmatpush3.xpose.msk.msra.mxu1 %vm877_vm4, %v9943_v39  ;;  %v10693_v39 = vld [vmem:[%s16357_s22 + $0x18] sm:$0xff] }
0x4fbc   :  { %13431 = vmatprep.subr.mxu1 %v12216_v6  ;;  %v13976_v14 = vpack.c.bf16 %v10693_v39, %v10692_v59  ;;  %v10878_v39 = vld [vmem:[%s16359_s23 + $0x38] sm:$0xff] }
0x4fbe   :  { %13424 = vmatmul.mubr.msk.f32.vlgmr.msra.gmra.mrb[106].mxu1 %vm877_vm4, %v9862_v38  ;;  %v13958_v38 = vpack.c.bf16 %v10433_v32, %v10432_v30 }
0x4fbf   :  { %13432 = vmatpush3.msra.mxu1 %v12216_v6 }
0x4fc0   :  { %13436 = vmatprep.subr.mxu1 %v12194_v48 }
0x5091   :  { %v13425_v16 = vpop.f32.mrb[106].mxu1 }
0x5092   :  { %v10112_v17 = vmul.f32 0.35355338, %v13425_v16  ;;  %v10102_v19 = vpop.f32.mrb[107].mxu1 }
0x5093   :  { %v10111_v12 = vmul.f32 0.35355338, %v10102_v19 }
0x5094   :  { %v10114_v20 = vadd.f32 %v15856_v62, %v10112_v17 }
0x5095   :  { %v10113_v21 = vadd.f32 %v15860_v11, %v10111_v12 }
0x5096   :  { %v10118_v10 = vsel %vm3796_vm12, %v10114_v20, -inf }
0x5097   :  { %10119 = vmax.xlane.f32.xlu1 %v10118_v10  ;;  %v10115_v22 = vsel %vm877_vm4, %v10113_v21, -inf }
0x5098   :  { %10116 = vmax.xlane.f32.xlu0 %v10115_v22 }
0x5124   :  { %v10120_v23 = vpop.xlane.xlu1 %10119 }
0x5125   :  { %v10122_v15 = vsub.f32 %v10114_v20, %v10120_v23  ;;  %v10117_v18 = vpop.xlane.xlu0 %10116  ;;  %v10783_v23 = vld [vmem:[%s16358_s6] sm:$0xff] }
0x5126   :  { %v10121_v45 = vsub.f32 %v10113_v21, %v10117_v18 }
0x5127   :  { %v10125_v24 = vmul.f32 1.442695, %v10122_v15  ;;  %v10784_v15 = vld [vmem:[%s16358_s6 + $0x8] sm:$0xff] }
0x5128   :  { %v10123_v37 = vmul.f32 1.442695, %v10121_v45  ;;  %v13979_v18 = vpack.c.bf16 %v10784_v15, %v10783_v23  ;;  %v12232_v15 = vld [vmem:[#allocation16] ss:$0 sm:$0xff] }
0x5129   :  { %14256 = vpow2.f32 %v10125_v24 }
0x512a   :  { %14258 = vpow2.f32 %v10123_v37 }
0x5133   :  { %v14257_v25 = vpop.eup %14256 }
0x5134   :  { %v14259_v62 = vpop.eup %14258  ;;  %v10130_v11 = vsel %vm3796_vm12, %v14257_v25, 0.0 }
0x5135   :  { %10131 = vadd.xlane.f32.xlu1 %v10130_v11  ;;  %v10127_v56 = vsel %vm877_vm4, %v14259_v62, 0.0 }
0x5136   :  { %10128 = vadd.xlane.f32.xlu0 %v10127_v56  ;;  %v12229_v56 = vld [vmem:[#allocation13] ss:$0 sm:$0xff] }
0x51c2   :  { %v10132_v28 = vpop.xlane.xlu1 %10131 }
0x51c3   :  { %14260 = vrcp.f32 %v10132_v28  ;;  %v10129_v29 = vpop.xlane.xlu0 %10128 }
0x51c4   :  { %14262 = vrcp.f32 %v10129_v29 }
0x51cd   :  { %v14261_v63 = vpop.eup %14260 }
0x51ce   :  { %v14263_v35 = vpop.eup %14262  ;;  %v10136_v8 = vmul.f32 %v14261_v63, %v14257_v25 }
0x51cf   :  { %v10134_v36 = vmul.f32 %v14263_v35, %v14259_v62  ;;  %v12228_v62 = vld [vmem:[#allocation12] ss:$0 sm:$0xff] }
0x51d1   :  { %13428 = vmatprep.mubr.msk.f32.mxu0 %vm877_vm4, %v10134_v36 }
0x51d2   :  { %13429 = vmatmul.mubr.msk.f32.vlgmr.msra.gmra.mrb[96].mxu0 %vm877_vm4, %v10136_v8 }
0x51d3   :  { %13959 = vmatpush3.bf16.msra.mxu0 %v13958_v38  ;;  %13445 = vmatprep.mubr.msk.f32.mxu0 %vm14707_vm2, %v14708_v61 }
0x51d4   :  { %13960 = vmatprep.subr.bf16.mxu0 %v14706_v0 }
0x51d6   :  { %13446 = vmatmul.mubr.msk.f32.vlgmr.msra.gmra.mrb[98].mxu0 %vm798_vm3, %v16041_v13 }
0x51d7   :  { %13456 = vmatprep.mubr.msk.f32.mxu0 %vm14707_vm2, %v14708_v61  ;;  %13962 = vmatpush3.bf16.msra.mxu0 %v13961_v43 }
0x51d8   :  { %13963 = vmatprep.subr.bf16.mxu0 %v14706_v0 }
0x51db   :  { %13965 = vmatpush3.bf16.msra.mxu0 %v13964_v47 }
0x51dc   :  { %13972 = vmatprep.subr.bf16.mxu0 %v14706_v0 }
0x52a5   :  { %v13430_v13 = vpop.f32.mrb[96].mxu0 }
0x52a6   :  { %v10209_v34 = vpop.f32.mrb[97].mxu0 }
0x52a7   :  { %13433 = vmatprep.mubr.msk.f32.mxu1 %vm877_vm4, %v10209_v34  ;;  %v12222_v34 = vld [vmem:[%s16348_s17 + $0x8] ss:$0 sm:$0xff] }
0x52a8   :  { %13434 = vmatmul.mubr.msk.f32.vlgmr.msra.gmra.mrb[108].mxu1 %vm877_vm4, %v13430_v13 }
0x52a9   :  { %13438 = vmatprep.mubr.msk.f32.mxu1 %vm877_vm4, %v16091_v9  ;;  %v10507_v40 = vpop.f32.mrb[98].mxu0  ;;  %13437 = vmatpush3.msra.mxu1 %v12194_v48  ;;  %v10691_v9 = vld [vmem:[%s16357_s22 + $0x8] sm:$0xff] }
0x52aa   :  { %v10508_v41 = vadd.f32 %v12224_v49, %v10507_v40  ;;  %v13447_v50 = vpop.f32.mrb[99].mxu0  ;;  %13966 = vmatprep.subr.bf16.mxu1 %v14706_v0 }
0x52ab   :  { %v12223_v50 = vld [vmem:[%s16349_s15 + $0x8] ss:$0 sm:$0xff] }
0x52ac   :  { %13457 = vmatmul.mubr.msk.f32.vlgmr.msra.gmra.mrb[100].mxu0 %vm522_vm1, %v10508_v41 }
0x52ad   :  { %13478 = vmatprep.mubr.msk.f32.mxu0 %vm14707_vm2, %v14708_v61 }
0x52b0   :  { %13439 = vmatmul.mubr.msk.f32.vlgmr.msra.gmra.mrb[108].mxu1 %vm877_vm4, %v16089_v58  ;;  %v10690_v58 = vld [vmem:[%s16357_s22] sm:$0xff] }
0x52b1   :  { %13968 = vmatpush3.bf16.msra.mxu1 %v13961_v43  ;;  %13467 = vmatprep.mubr.msk.f32.mxu1 %vm14707_vm2, %v14708_v61  ;;  %v13973_v4 = vpack.c.bf16 %v10691_v9, %v10690_v58  ;;  %v10875_v58 = vld [vmem:[%s16359_s23 + $0x20] sm:$0xff]  ;;  %v10876_v9 = vld [vmem:[%s16359_s23 + $0x28] sm:$0xff] }
0x52b2   :  { %13969 = vmatprep.subr.bf16.mxu1 %v14706_v0  ;;  %v13988_v59 = vpack.c.bf16 %v10876_v9, %v10875_v58  ;;  %v11275_v9 = vld [vmem:[%s16365_s4] sm:$0xff] }
0x52b3   :  { %13974 = vmatpush3.bf16.msra.mxu0 %v13973_v4  ;;  %v10877_v4 = vld [vmem:[%s16359_s23 + $0x30] sm:$0xff] }
0x52b4   :  { %13975 = vmatprep.subr.bf16.mxu0 %v14706_v0 }
0x52b5   :  { %13971 = vmatpush3.bf16.msra.mxu1 %v13964_v47 }
0x52b6   :  { %13978 = vmatprep.subr.bf16.mxu1 %v14706_v0 }
0x52b7   :  { %13977 = vmatpush3.bf16.msra.mxu0 %v13976_v14  ;;  %v13991_v14 = vpack.c.bf16 %v10878_v39, %v10877_v4  ;;  %v11424_v4 = vld [vmem:[%s16367_s24] sm:$0xff]  ;;  %v11425_v39 = vld [vmem:[%s16367_s24 + $0x8] sm:$0xff] }
0x52b8   :  { %13993 = vmatprep.subr.bf16.mxu0 %v14706_v0 }
0x537f   :  { %v10586_v51 = vpop.f32.mrb[100].mxu0 }
0x5380   :  { %v10590_v52 = vsub.f32 %v10508_v41, %v10586_v51  ;;  %v13458_v31 = vpop.f32.mrb[101].mxu0 }
0x5382   :  { %v10591_v53 = vmul.f32 %v10590_v52, %v10590_v52 }
0x5383   :  { %v13440_v1 = vpop.f32.mrb[108].mxu1 }
0x5384   :  { %v10389_v3 = vadd.f32 %v13440_v1, %v12221_v2  ;;  %v10373_v54 = vpop.f32.mrb[109].mxu1  ;;  %13468 = vmatmul.mubr.msk.f32.vlgmr.msra.gmra.mrb[110].mxu1 %vm522_vm1, %v10591_v53 }
0x5385   :  { %v10388_v55 = vadd.f32 %v12221_v2, %v10373_v54  ;;  %13485 = vmatprep.mubr.msk.f32.mxu1 %vm14707_vm2, %v14708_v61  ;;  %13980 = vmatpush3.bf16.msra.mxu1 %v13979_v18  ;;  %v10871_v54 = vld [vmem:[%s16359_s23] sm:$0xff] }
0x5386   :  { %v10391_v57 = vadd.f32 %v10389_v3, %v15935_v60  ;;  %13981 = vmatprep.subr.bf16.mxu1 %v14706_v0 }
0x5387   :  { %v10390_v44 = vadd.f32 %v10388_v55, %v15937_v27  ;;  %v10872_v55 = vld [vmem:[%s16359_s23 + $0x8] sm:$0xff] }
0x5388   :  { %v10397_v7 = vsel %vm3404_vm11, %v10391_v57, 0.0 }
0x5389   :  { %10398 = vadd.xlane.f32.xlu1 %v10397_v7  ;;  %v10394_v5 = vsel %vm798_vm3, %v10390_v44, 0.0  ;;  %v10874_v7 = vld [vmem:[%s16359_s23 + $0x18] sm:$0xff] }
0x538a   :  { %10395 = vadd.xlane.f32.xlu0 %v10394_v5 }
0x5416   :  { %v10399_v60 = vpop.xlane.xlu1 %10398 }
0x5417   :  { %v10401_v27 = vmul.f32 0.0625, %v10399_v60  ;;  %v10396_v16 = vpop.xlane.xlu0 %10395  ;;  %v10960_v60 = vld [vmem:[%s16360_s26] sm:$0xff] }
0x5418   :  { %v10400_v17 = vmul.f32 0.0625, %v10396_v16  ;;  %v10962_v16 = vld [vmem:[%s16360_s26 + $0x10] sm:$0xff] }
0x5419   :  { %v10403_v19 = vsub.f32 %v10391_v57, %v10401_v27  ;;  %v10873_v57 = vld [vmem:[%s16359_s23 + $0x10] sm:$0xff]  ;;  %v10961_v27 = vld [vmem:[%s16360_s26 + $0x8] sm:$0xff] }
0x541a   :  { %v10402_v12 = vsub.f32 %v10390_v44, %v10400_v17  ;;  %v13982_v44 = vpack.c.bf16 %v10872_v55, %v10871_v54  ;;  %v13985_v5 = vpack.c.bf16 %v10874_v7, %v10873_v57  ;;  %v13994_v17 = vpack.c.bf16 %v10961_v27, %v10960_v60  ;;  %v11050_v54 = vld [vmem:[%s16364_s28] sm:$0xff]  ;;  %v11203_v57 = vld [vmem:[%s16363_s20 + $0x10] sm:$0xff] }
0x541b   :  { %v10405_v20 = vmul.f32 %v10403_v19, %v10403_v19 }
0x541c   :  { %v10404_v21 = vmul.f32 %v10402_v12, %v10402_v12 }
0x541d   :  { %v10409_v10 = vsel %vm3404_vm11, %v10405_v20, 0.0  ;;  %v10964_v20 = vld [vmem:[%s16360_s26 + $0x20] sm:$0xff] }
0x541e   :  { %10410 = vadd.xlane.f32.xlu1 %v10409_v10  ;;  %v10406_v22 = vsel %vm798_vm3, %v10404_v21, 0.0  ;;  %v10965_v21 = vld [vmem:[%s16360_s26 + $0x28] sm:$0xff] }
0x541f   :  { %10407 = vadd.xlane.f32.xlu0 %v10406_v22  ;;  %v14000_v10 = vpack.c.bf16 %v10965_v21, %v10964_v20 }
0x5457   :  { %v10661_v45 = vpop.f32.mrb[110].mxu1 }
0x5458   :  { %v10662_v24 = vadd.f32 1e-06, %v10661_v45  ;;  %v13469_v37 = vpop.f32.mrb[111].mxu1 }
0x545a   :  { %14264 = vrsqrt.f32 %v10662_v24 }
0x5464   :  { %v14265_v25 = vpop.eup %14264 }
0x5465   :  { %v10666_v11 = vmul.f32 %v14265_v25, %v10590_v52  ;;  %v10966_v25 = vld [vmem:[%s16360_s26 + $0x30] sm:$0xff] }
0x5467   :  { %v10673_v28 = vmul.f32 %v12228_v62, %v10666_v11  ;;  %v10967_v62 = vld [vmem:[%s16360_s26 + $0x38] sm:$0xff] }
0x5468   :  { %v14003_v11 = vpack.c.bf16 %v10967_v62, %v10966_v25  ;;  %v11589_v25 = vld [vmem:[%s14998_s25] sm:$0xff]  ;;  %v11590_v62 = vld [vmem:[%s14998_s25 + $0x8] sm:$0xff] }
0x5469   :  { %v10680_v29 = vadd.f32 %v12229_v56, %v10673_v28  ;;  %v12230_v56 = vld [vmem:[#allocation15] ss:$0 sm:$0xff] }
0x546b   :  { %v10681_v30 = vmul.f32 %v10680_v29, %v10680_v29 }
0x546d   :  { %v10682_v32 = vmul.f32 %v10681_v30, %v10680_v29 }
0x546f   :  { %v10683_v63 = vmul.f32 0.044715, %v10682_v32 }
0x5471   :  { %v10684_v35 = vadd.f32 %v10683_v63, %v10680_v29 }
0x5473   :  { %v10685_v36 = vmul.f32 0.7978846, %v10684_v35 }
0x5475   :  { %14266 = vtanh.f32 %v10685_v36  ;;  %v12234_v36 = vld [vmem:[#allocation18] ss:$0 sm:$0xff] }
0x547f   :  { %v14267_v38 = vpop.eup %14266 }
0x5480   :  { %v10687_v8 = vadd.f32 1.0, %v14267_v38  ;;  %v11124_v38 = vld [vmem:[%s16361_s12] sm:$0xff] }
0x5482   :  { %v10688_v33 = vmul.f32 0.5, %v10687_v8  ;;  %v11125_v8 = vld [vmem:[%s16361_s12 + $0x8] sm:$0xff] }
0x5484   :  { %v10689_v42 = vmul.f32 %v10688_v33, %v10680_v29 }
0x5486   :  { %13479 = vmatmul.mubr.msk.f32.vlgmr.msra.gmra.mrb[102].mxu0 %vm522_vm1, %v10689_v42 }
0x5487   :  { %13523 = vmatprep.mubr.msk.f32.mxu0 %vm14707_vm2, %v14708_v61  ;;  %13995 = vmatpush3.bf16.msra.mxu0 %v13994_v17 }
0x5488   :  { %13996 = vmatprep.subr.bf16.mxu0 %v14706_v0 }
0x54ab   :  { %v10411_v43 = vpop.xlane.xlu1 %10410 }
0x54ac   :  { %v10413_v6 = vmul.f32 0.0625, %v10411_v43  ;;  %v10408_v26 = vpop.xlane.xlu0 %10407 }
0x54ad   :  { %v10412_v46 = vmul.f32 0.0625, %v10408_v26  ;;  %v14006_v26 = vpack.c.bf16 %v11125_v8, %v11124_v38 }
0x54ae   :  { %v10415_v47 = vadd.f32 1e-05, %v10413_v6 }
0x54af   :  { %v10414_v48 = vadd.f32 1e-05, %v10412_v46 }
0x54b0   :  { %14268 = vrsqrt.f32 %v10415_v47 }
0x54b1   :  { %14270 = vrsqrt.f32 %v10414_v48  ;;  %v11126_v48 = vld [vmem:[%s16361_s12 + $0x10] sm:$0xff] }
0x54ba   :  { %v14269_v13 = vpop.eup %14268 }
0x54bb   :  { %v14271_v49 = vpop.eup %14270  ;;  %v10419_v40 = vmul.f32 %v14269_v13, %v10403_v19  ;;  %v10963_v19 = vld [vmem:[%s16360_s26 + $0x18] sm:$0xff] }
0x54bc   :  { %v10418_v41 = vmul.f32 %v14271_v49, %v10402_v12  ;;  %v13997_v12 = vpack.c.bf16 %v10963_v19, %v10962_v16  ;;  %v11127_v13 = vld [vmem:[%s16361_s12 + $0x18] sm:$0xff]  ;;  %v11506_v19 = vld [vmem:[%s16368_s1] sm:$0xff] }
0x54bd   :  { %v10425_v51 = vmul.f32 %v12222_v34, %v10419_v40 }
0x54be   :  { %v10424_v52 = vmul.f32 %v12222_v34, %v10418_v41  ;;  %13998 = vmatpush3.bf16.msra.mxu0 %v13997_v12  ;;  %v14009_v34 = vpack.c.bf16 %v11127_v13, %v11126_v48  ;;  %v12236_v41 = vld [vmem:[#allocation19] ss:$0 sm:$0xff]  ;;  %v11507_v12 = vld [vmem:[%s16368_s1 + $0x8] sm:$0xff] }
0x54bf   :  { %v10431_v31 = vadd.f32 %v12223_v50, %v10425_v51  ;;  %13999 = vmatprep.subr.bf16.mxu0 %v14706_v0  ;;  %v11048_v51 = vld [vmem:[%s16362_s0] sm:$0xff]  ;;  %v14021_v20 = vpack.c.bf16 %v11507_v12, %v11506_v19 }
0x54c0   :  { %v16160_v2 = vadd.f32 %v12223_v50, %v10424_v52  ;;  %v11201_v52 = vld [vmem:[%s16363_s20] sm:$0xff] }
0x54c1   :  { %v10796_v53 = vrot.slane %v10431_v31, 2  ;;  %v11202_v31 = vld [vmem:[%s16363_s20 + $0x8] sm:$0xff] }
0x54c2   :  { %v10795_v1 = vrot.slane %v16160_v2, 2  ;;  %14001 = vmatpush3.bf16.msra.mxu0 %v14000_v10  ;;  %v14012_v55 = vpack.c.bf16 %v11202_v31, %v11201_v52 }
0x54c3   :  { %14002 = vmatprep.subr.bf16.mxu0 %v14706_v0 }
0x54c4   :  { %v10797_v3 = vsel %vm10794_vm13, %v10795_v1, %v10796_v53 }
0x54c5   :  { %13486 = vmatmul.mubr.msk.f32.vlgmr.msra.gmra.mrb[112].mxu1 %vm798_vm3, %v10797_v3 }
0x54c6   :  { %13504 = vmatprep.mubr.msk.f32.mxu1 %vm14707_vm2, %v14708_v61  ;;  %13983 = vmatpush3.bf16.msra.mxu1 %v13982_v44  ;;  %v11204_v44 = vld [vmem:[%s16363_s20 + $0x18] sm:$0xff] }
0x54c7   :  { %13984 = vmatprep.subr.bf16.mxu1 %v14706_v0  ;;  %14004 = vmatpush3.bf16.msra.mxu0 %v14003_v11  ;;  %v14015_v7 = vpack.c.bf16 %v11204_v44, %v11203_v57  ;;  %v14024_v11 = vpack.c.bf16 %v11590_v62, %v11589_v25 }
0x54c8   :  { %14005 = vmatprep.subr.bf16.mxu0 %v14706_v0 }
0x54ca   :  { %13986 = vmatpush3.bf16.msra.mxu1 %v13985_v5 }
0x54cb   :  { %13987 = vmatprep.subr.bf16.mxu1 %v14706_v0 }
0x54ce   :  { %13989 = vmatpush3.bf16.msra.mxu1 %v13988_v59  ;;  %v11349_v59 = vld [vmem:[%s16366_s11] sm:$0xff] }
0x54cf   :  { %13990 = vmatprep.subr.bf16.mxu1 %v14706_v0 }
0x54d2   :  { %13992 = vmatpush3.bf16.msra.mxu1 %v13991_v14  ;;  %v14018_v14 = vpack.c.bf16 %v11425_v39, %v11424_v4 }
0x54d3   :  { %13526 = vmatprep.subr.mxu1 %v14708_v61 }
0x5559   :  { %v10770_v22 = vpop.f32.mrb[102].mxu0 }
0x555a   :  { %v13480_v23 = vpop.f32.mrb[103].mxu0  ;;  %v10771_v28 = vadd.f32 %v12230_v56, %v10770_v22  ;;  %v12245_v56 = vld [vmem:[#allocation22] ss:$0 sm:$0xff] }
0x555c   :  { %v10774_v29 = vmul.f32 %v10771_v28, %v10771_v28 }
0x555e   :  { %v10775_v30 = vmul.f32 %v10774_v29, %v10771_v28 }
0x5560   :  { %v10776_v32 = vmul.f32 0.044715, %v10775_v30 }
0x5562   :  { %v10777_v63 = vadd.f32 %v10776_v32, %v10771_v28 }
0x5564   :  { %v10778_v35 = vmul.f32 0.7978846, %v10777_v63  ;;  %v12247_v63 = vld [vmem:[#allocation24] ss:$0 sm:$0xff] }
0x5566   :  { %14272 = vtanh.f32 %v10778_v35 }
0x5570   :  { %v14273_v33 = vpop.eup %14272 }
0x5571   :  { %v10780_v46 = vadd.f32 1.0, %v14273_v33 }
0x5573   :  { %v10781_v49 = vmul.f32 0.5, %v10780_v46 }
0x5575   :  { %v10782_v40 = vmul.f32 %v10781_v49, %v10771_v28 }
0x5598   :  { %v10866_v18 = vpop.f32.mrb[112].mxu1 }
0x5599   :  { %v10867_v45 = vadd.f32 %v12232_v15, %v10866_v18  ;;  %v13487_v24 = vpop.f32.mrb[113].mxu1  ;;  %v12243_v18 = vld [vmem:[#allocation21] ss:$0 sm:$0xff] }
0x559b   :  { %v10870_v37 = vmax.f32 %v10867_v45, 0.0 }
0x559d   :  { %13505 = vmatmul.mubr.msk.f32.vlgmr.msra.gmra.mrb[114].mxu1 %vm445_vm0, %v10870_v37 }
0x559e   :  { %13528 = vmatprep.mubr.msk.f32.mxu1 %vm14707_vm2, %v14708_v61 }
0x5670   :  { %v10955_v42 = vpop.f32.mrb[114].mxu1 }
0x5671   :  { %v10956_v43 = vadd.f32 %v12234_v36, %v10955_v42  ;;  %v13506_v6 = vpop.f32.mrb[115].mxu1 }
0x5673   :  { %v10959_v47 = vmax.f32 %v10956_v43, 0.0 }
0x5675   :  { %13524 = vmatmul.mubr.msk.f32.vlgmr.msra.gmra.mrb[104].mxu0 %vm445_vm0, %v10959_v47 }
0x5676   :  { %14007 = vmatpush3.bf16.msra.mxu0 %v14006_v26  ;;  %13539 = vmatprep.mubr.msk.f32.mxu0 %vm14707_vm2, %v14708_v61 }
0x5677   :  { %14008 = vmatprep.subr.bf16.mxu0 %v14706_v0 }
0x567a   :  { %14010 = vmatpush3.bf16.msra.mxu0 %v14009_v34 }
0x567b   :  { %13553 = vmatprep.subr.mxu0 %v14708_v61 }
0x567d   :  { %13540 = vmatmul.mubr.msk.f32.vlgmr.msra.gmra.mrb[106].mxu0 %vm522_vm1, %v10782_v40 }
0x567e   :  { %13555 = vmatprep.mubr.msk.f32.mxu0 %vm14707_vm2, %v14708_v61  ;;  %13554 = vmatpush3.msra.mxu0 %v11275_v9 }
0x567f   :  { %14017 = vmatprep.subr.bf16.mxu0 %v14706_v0 }
0x5748   :  { %v11044_v50 = vpop.f32.mrb[104].mxu0 }
0x5749   :  { %v11045_v53 = vadd.f32 %v12236_v41, %v11044_v50  ;;  %v13525_v1 = vpop.f32.mrb[105].mxu0 }
0x574b   :  { %v11049_v3 = vmul.f32 %v11048_v51, %v11045_v53 }
0x574d   :  { %13527 = vmatpush3.msra.mxu1 %v11049_v3 }
0x574e   :  { %13529 = vmatmul.mubr.msk.f32.vlgmr.msra.gmra.mrb[116].mxu1 %vm877_vm4, %v11050_v54  ;;  %14011 = vmatprep.subr.bf16.mxu1 %v14706_v0 }
0x574f   :  { %14013 = vmatpush3.bf16.msra.mxu1 %v14012_v55  ;;  %13550 = vmatprep.mubr.msk.f32.mxu1 %vm14707_vm2, %v14708_v61 }
0x5750   :  { %v11197_v5 = vpop.f32.mrb[106].mxu0  ;;  %14014 = vmatprep.subr.bf16.mxu1 %v14706_v0 }
0x5751   :  { %v13541_v58 = vpop.f32.mrb[107].mxu0 }
0x5753   :  { %14016 = vmatpush3.bf16.msra.mxu1 %v14015_v7 }
0x5754   :  { %13558 = vmatprep.subr.mxu1 %v14708_v61 }
0x5756   :  { %13551 = vmatmul.mubr.msk.f32.vlgmr.msra.gmra.mrb[118].mxu1 %vm522_vm1, %v10782_v40 }
0x5757   :  { %13560 = vmatprep.mubr.msk.f32.mxu1 %vm14707_vm2, %v14708_v61  ;;  %13559 = vmatpush3.msra.mxu1 %v11349_v59 }
0x5758   :  { %14020 = vmatprep.subr.bf16.mxu1 %v14706_v0 }
0x5821   :  { %v11120_v60 = vpop.f32.mrb[116].mxu1 }
0x5822   :  { %13556 = vmatmul.mubr.msk.f32.vlgmr.msra.gmra.mrb[108].mxu0 %vm877_vm4, %v11120_v60  ;;  %13561 = vmatmul.mubr.msk.f32.vlgmr.msra.gmra.mrb[120].mxu1 %vm877_vm4, %v11120_v60  ;;  %v13530_v27 = vpop.f32.mrb[117].mxu1 }
0x5823   :  { %14019 = vmatpush3.bf16.msra.mxu0 %v14018_v14  ;;  %13567 = vmatprep.mubr.msk.f32.mxu0 %vm14707_vm2, %v14708_v61 }
0x5824   :  { %13574 = vmatprep.mubr.msk.f32.mxu1 %vm14707_vm2, %v14708_v61  ;;  %14023 = vmatprep.subr.bf16.mxu0 %v14706_v0 }
0x5825   :  { %14022 = vmatpush3.bf16.msra.mxu1 %v14021_v20 }
0x5826   :  { %13568 = vmatmul.mubr.msk.f32.vlgmr.msra.gmra.mrb[110].mxu0 %vm798_vm3, %v16160_v2 }
0x5827   :  { %13581 = vmatprep.mubr.msk.f32.mxu0 %vm14707_vm2, %v14708_v61  ;;  %14025 = vmatpush3.bf16.msra.mxu0 %v14024_v11 }
0x5829   :  { %v11271_v16 = vpop.f32.mrb[118].mxu1 }
0x582a   :  { %v13552_v17 = vpop.f32.mrb[119].mxu1 }
0x58f5   :  { %v11345_v21 = vpop.f32.mrb[108].mxu0  ;;  %v11416_v10 = vpop.f32.mrb[120].mxu1 }
0x58f6   :  { %v11420_v22 = vmul.f32 %v11345_v21, %v11197_v5  ;;  %v11421_v23 = vmul.f32 %v11416_v10, %v11271_v16  ;;  %v13557_v0 = vpop.f32.mrb[109].mxu0  ;;  %v13562_v15 = vpop.f32.mrb[121].mxu1 }
0x58f8   :  { %v11422_v2 = vadd.f32 %v11421_v23, %v11420_v22 }
0x58f9   :  { %v11501_v45 = vpop.f32.mrb[110].mxu0 }
0x58fa   :  { %11423 = vst.msk [vmem:[%s15008_s29] sm:$0xff] %vm445_vm0, %v11422_v2  ;;  %v11502_v61 = vadd.f32 %v12243_v18, %v11501_v45  ;;  %v13569_v24 = vpop.f32.mrb[111].mxu0 }
0x58fc   :  { %v11505_v37 = vmax.f32 %v11502_v61, 0.0 }
0x58fe   :  { %13575 = vmatmul.mubr.msk.f32.vlgmr.msra.gmra.mrb[122].mxu1 %vm798_vm3, %v11505_v37 }
0x59d1   :  { %v11584_v28 = vpop.f32.mrb[122].mxu1 }
0x59d2   :  { %v11585_v29 = vadd.f32 %v12245_v56, %v11584_v28  ;;  %v13576_v30 = vpop.f32.mrb[123].mxu1 }
0x59d4   :  { %v11588_v32 = vmax.f32 %v11585_v29, 0.0 }
0x59d6   :  { %13582 = vmatmul.mubr.msk.f32.vlgmr.msra.gmra.mrb[112].mxu0 %vm798_vm3, %v11588_v32 }
0x5aa9   :  { %v11667_v35 = vpop.f32.mrb[112].mxu0 }
0x5aaa   :  { %v11668_v36 = vadd.f32 %v12247_v63, %v11667_v35  ;;  %v13583_v38 = vpop.f32.mrb[113].mxu0 }
0x5aac   :  { %11672 = vst.msk [vmem:[%s15013_s9] sm:$0x3] %vm11671_vm14, %v11668_v36 }
0x5aad   :  { %11681 = vsyncpa [#allocation3], 1 }
0x5aae   :  { %11682 = vsyncpa [#allocation5], 1 }
0x5aaf   :  { %11683 = vsyncpa [#allocation8], 1 }
0x5ab0   :  { %11684 = vsyncpa [#allocation11], 1 }
0x5ab1   :  { %11685 = vsyncpa [#allocation14], 1 }
0x5ab2   :  { %11686 = vsyncpa [#allocation17], 1 }
0x5ab3   :  { %11687 = vsyncpa [#allocation20], 1 }
0x5ab4   :  { %11688 = vsyncpa [#allocation23], 1 }

</bundles_post_ra>
